<compile_context>
chip_gen: v7x
topology: tpu7x:2x2x1
jax: 0.10.0
libtpu: 0.0.40
codegen_flags: <defaults>
</compile_context>

<pallas_src>
import functools

import jax
import jax.numpy as jnp
from jax.experimental import pallas as pl
from jax.experimental.pallas import tpu as pltpu

# ----------------------------- model config (small, synthetic) -----------------
BATCH = 2
SEQ = 16
HIDDEN = 128          # lane-aligned
N_HEADS = 4
HEAD_DIM = HIDDEN // N_HEADS
FFN = 256
N_LAYERS = 2
N_WEIGHTS = N_LAYERS + 1   # hidden_states = embeddings + per-layer outputs
VOCAB = 100
TYPE_VOCAB = 2
MAX_POS = 64
N_OUT = 30                 # Head output dim (QUEST-style 30 targets)
LN_EPS = 1e-12
DTYPE = jnp.float32
MXU_DTYPE = jnp.bfloat16   # matmul operand dtype (f32 accumulation)

_VMEM = pl.BlockSpec(memory_space=pltpu.MemorySpace.VMEM)


# ----------------------------- fused Pallas kernel ------------------------------
def _double_berts_kernel(
    # inputs
    emb_ref, bias_ref, pool_cls_ref, pool_avg_ref,
    eln_g_ref, eln_b_ref,
    wqkv_ref, bqkv_ref, wo_ref, bo_ref, ln1_g_ref, ln1_b_ref,
    w1_ref, b1_ref, w2_ref, b2_ref, ln2_g_ref, ln2_b_ref,
    head_w_ref, head_b_ref,
    # output
    out_ref,
    # scratch
    qkv_s, ctx_s,
    *, n_layers, n_heads, head_dim, batch, batch2, seq, hidden, eps):
    """Full DoubleBerts forward (post-embedding) on a VMEM-resident (B2*L, H) slab."""
    H = hidden

    def layernorm(y, g, b):
        mu = jnp.mean(y, axis=-1, keepdims=True)
        var = jnp.mean((y - mu) ** 2, axis=-1, keepdims=True)
        return (y - mu) * jax.lax.rsqrt(var + eps) * g + b

    def mm_bf16(x, w):  # bf16 operands, f32 accumulation (vector math stays f32)
        return jnp.dot(x.astype(MXU_DTYPE), w, preferred_element_type=jnp.float32)

    bias_all = bias_ref[...]                                        # (B2, L) f32

    # ---- embedding LayerNorm (no residual) ----
    h = layernorm(emb_ref[...], eln_g_ref[...], eln_b_ref[...])     # (M, H) f32

    # ---- layer-weighted CLS pooling: layer 0 = embedding output ----
    # pool_cls[l] is a (B2, M) block-diagonal selector with softmax(layer_weights)
    # already folded in, so weighted pooling is a single small MXU matmul.
    cls_acc = jnp.dot(pool_cls_ref[0], h, preferred_element_type=jnp.float32)  # (B2, H)

    for l in range(n_layers):
        # fused QKV projection (1/sqrt(head_dim) folded into the Q weight)
        qkv_s[...] = mm_bf16(h, wqkv_ref[l]) + bqkv_ref[l]          # (M, 3H)

        # per (batch, head) attention; context written back lane-contiguous
        for b in range(batch2):
            r0 = b * seq
            bias_b = bias_all[b:b + 1, :]                           # (1, L)
            for hd in range(n_heads):
                c0 = hd * head_dim
                q = qkv_s[pl.ds(r0, seq), pl.ds(c0, head_dim)]          # (L, dh)
                k = qkv_s[pl.ds(r0, seq), pl.ds(H + c0, head_dim)]      # (L, dh)
                v = qkv_s[pl.ds(r0, seq), pl.ds(2 * H + c0, head_dim)]  # (L, dh)
                s = jax.lax.dot_general(q, k, (((1,), (1,)), ((), ())),
                                        preferred_element_type=jnp.float32)
                p = jax.nn.softmax(s + bias_b, axis=-1)             # (L, L) f32
                o = jnp.dot(p, v, preferred_element_type=jnp.float32)
                ctx_s[pl.ds(r0, seq), pl.ds(c0, head_dim)] = o

        # output projection + residual + LayerNorm (fused)
        attn_out = mm_bf16(ctx_s[...], wo_ref[l]) + bo_ref[l]
        h1 = layernorm(attn_out + h, ln1_g_ref[l], ln1_b_ref[l])

        # FFN + residual + LayerNorm (fused)
        ff = jax.nn.gelu(mm_bf16(h1, w1_ref[l]) + b1_ref[l])
        ff = mm_bf16(ff, w2_ref[l]) + b2_ref[l]
        h = layernorm(ff + h1, ln2_g_ref[l], ln2_b_ref[l])

        cls_acc = cls_acc + jnp.dot(pool_cls_ref[l + 1], h,
                                    preferred_element_type=jnp.float32)

    # ---- masked mean pooling of the final hidden state (mask / len folded into
    #      a block-diagonal pooling matrix -> one small MXU matmul) ----
    avg = jnp.dot(pool_avg_ref[...], h, preferred_element_type=jnp.float32)   # (B2, H)

    # ---- split Q/A halves and apply the head as one K = 4H matmul ----
    q_cls = cls_acc[0:batch, :]
    a_cls = cls_acc[batch:batch2, :]
    q_avg = avg[0:batch, :]
    a_avg = avg[batch:batch2, :]
    feats = jnp.concatenate([q_cls, q_avg, a_cls, a_avg], axis=1)   # (B, 4H)
    out = (jnp.dot(feats, head_w_ref[...], preferred_element_type=jnp.float32)
           + head_b_ref[...])
    out_ref[...] = out.astype(out_ref.dtype)


# ----------------------------- parameters ---------------------------------------
def init_params(key):
    def nrm(k, shape):
        return jax.random.normal(k, shape, dtype=DTYPE) * 0.02

    n_keys = 3 + 6 * N_LAYERS + 1
    keys = jax.random.split(key, n_keys)
    it = iter(keys)
    scale = 1.0 / (HEAD_DIM ** 0.5)

    p = {
        "word_emb": nrm(next(it), (VOCAB, HIDDEN)),
        "pos_emb": nrm(next(it), (MAX_POS, HIDDEN)),
        "type_emb": nrm(next(it), (TYPE_VOCAB, HIDDEN)),
        "emb_ln_g": jnp.ones((1, HIDDEN), DTYPE),
        "emb_ln_b": jnp.zeros((1, HIDDEN), DTYPE),
    }

    wqkv, bqkv, wo, bo = [], [], [], []
    ln1g, ln1b, ln2g, ln2b = [], [], [], []
    w1, b1, w2, b2 = [], [], [], []
    for _ in range(N_LAYERS):
        wq = nrm(next(it), (HIDDEN, HIDDEN)) * scale   # fold attention scale into Q
        wk = nrm(next(it), (HIDDEN, HIDDEN))
        wv = nrm(next(it), (HIDDEN, HIDDEN))
        wqkv.append(jnp.concatenate([wq, wk, wv], axis=1))          # (H, 3H)
        bqkv.append(jnp.zeros((1, 3 * HIDDEN), DTYPE))              # (scaled bq would go here)
        wo.append(nrm(next(it), (HIDDEN, HIDDEN)))
        bo.append(jnp.zeros((1, HIDDEN), DTYPE))
        ln1g.append(jnp.ones((1, HIDDEN), DTYPE))
        ln1b.append(jnp.zeros((1, HIDDEN), DTYPE))
        w1.append(nrm(next(it), (HIDDEN, FFN)))
        b1.append(jnp.zeros((1, FFN), DTYPE))
        w2.append(nrm(next(it), (FFN, HIDDEN)))
        b2.append(jnp.zeros((1, HIDDEN), DTYPE))
        ln2g.append(jnp.ones((1, HIDDEN), DTYPE))
        ln2b.append(jnp.zeros((1, HIDDEN), DTYPE))

    p.update({
        "wqkv": jnp.stack(wqkv).astype(MXU_DTYPE),   # (nL, H, 3H) bf16
        "bqkv": jnp.stack(bqkv),                     # (nL, 1, 3H) f32
        "wo": jnp.stack(wo).astype(MXU_DTYPE),
        "bo": jnp.stack(bo),
        "ln1_g": jnp.stack(ln1g), "ln1_b": jnp.stack(ln1b),
        "w1": jnp.stack(w1).astype(MXU_DTYPE), "b1": jnp.stack(b1),
        "w2": jnp.stack(w2).astype(MXU_DTYPE), "b2": jnp.stack(b2),
        "ln2_g": jnp.stack(ln2g), "ln2_b": jnp.stack(ln2b),
    })

    # DoubleBerts.__init__: weights_init = zeros(n_weights); weights_init[:-1] = -3
    layer_w = jnp.zeros((N_WEIGHTS,), DTYPE).at[:-1].set(-3.0)
    p["q_layer_weights"] = layer_w
    p["a_layer_weights"] = layer_w
    p["head_w"] = nrm(next(it), (4 * HIDDEN, N_OUT))   # concat([q_cls,q_avg,a_cls,a_avg])
    p["head_b"] = jnp.zeros((1, N_OUT), DTYPE)
    return p


# ----------------------------- forward (one fused pallas_call) -------------------
@jax.jit
def double_berts_forward(p, q_input_ids, q_attention_mask, q_input_segments,
                         a_input_ids, a_attention_mask, a_input_segments):
    B, L = q_input_ids.shape
    B2 = 2 * B
    M = B2 * L

    # siamese=True: batch Q and A through the shared encoder in one pass.
    ids = jnp.concatenate([q_input_ids, a_input_ids], axis=0)            # (B2, L)
    seg = jnp.concatenate([q_input_segments, a_input_segments], axis=0)  # (B2, L)
    mask = jnp.concatenate([q_attention_mask, a_attention_mask],
                           axis=0).astype(DTYPE)                         # (B2, L)

    # TODO(synk): embedding-table gathers stay in plain JAX (no clean Pallas gather here).
    emb = (p["word_emb"][ids]
           + p["pos_emb"][:L][None, :, :]
           + p["type_emb"][seg])                                         # (B2, L, H)
    emb2 = emb.reshape(M, HIDDEN)

    # additive attention-mask bias, precomputed once (tiny glue)
    att_bias = (1.0 - mask) * (-1e9)                                     # (B2, L)

    # block-diagonal pooling matrices so pooling runs as small MXU matmuls in-kernel
    eye = jnp.eye(B2, dtype=DTYPE)
    den = jnp.maximum(jnp.sum(mask, axis=1, keepdims=True), 1.0)
    norm_mask = mask / den                                               # (B2, L)
    pool_avg = (eye[:, :, None] * norm_mask[None, :, :]).reshape(B2, M)  # (B2, M)

    cls_onehot = (jnp.arange(L) == 0).astype(DTYPE)                      # (L,)
    cls_sel = (eye[:, :, None] * cls_onehot[None, None, :]).reshape(B2, M)
    q_w = jax.nn.softmax(p["q_layer_weights"])                           # (nW,)
    a_w = jax.nn.softmax(p["a_layer_weights"])
    w_rows = jnp.concatenate([jnp.tile(q_w[:, None], (1, B)),
                              jnp.tile(a_w[:, None], (1, B))], axis=1)   # (nW, B2)
    pool_cls = w_rows[:, :, None] * cls_sel[None, :, :]                  # (nW, B2, M)

    kernel = functools.partial(
        _double_berts_kernel,
        n_layers=N_LAYERS, n_heads=N_HEADS, head_dim=HEAD_DIM,
        batch=B, batch2=B2, seq=L, hidden=HIDDEN, eps=LN_EPS)

    return pl.pallas_call(
        kernel,
        out_shape=jax.ShapeDtypeStruct((B, N_OUT), jnp.float32),
        in_specs=[_VMEM] * 20,
        out_specs=_VMEM,
        scratch_shapes=[
            pltpu.VMEM((M, 3 * HIDDEN), jnp.float32),   # fused QKV activations
            pltpu.VMEM((M, HIDDEN), jnp.float32),       # attention context
        ],
    )(emb2, att_bias, pool_cls, pool_avg,
      p["emb_ln_g"], p["emb_ln_b"],
      p["wqkv"], p["bqkv"], p["wo"], p["bo"], p["ln1_g"], p["ln1_b"],
      p["w1"], p["b1"], p["w2"], p["b2"], p["ln2_g"], p["ln2_b"],
      p["head_w"], p["head_b"])


# ----------------------------- driver --------------------------------------------
if __name__ == "__main__":
    key = jax.random.PRNGKey(0)
    k_param, k_qid, k_aid = jax.random.split(key, 3)

    params = init_params(k_param)

    q_input_ids = jax.random.randint(k_qid, (BATCH, SEQ), 0, VOCAB, dtype=jnp.int32)
    a_input_ids = jax.random.randint(k_aid, (BATCH, SEQ), 0, VOCAB, dtype=jnp.int32)
    q_input_segments = jnp.zeros((BATCH, SEQ), jnp.int32)
    a_input_segments = jnp.ones((BATCH, SEQ), jnp.int32)

    q_lens = jnp.array([SEQ, 10], jnp.int32)
    a_lens = jnp.array([12, SEQ], jnp.int32)
    pos = jnp.arange(SEQ, dtype=jnp.int32)[None, :]
    q_attention_mask = (pos < q_lens[:, None]).astype(jnp.int32)
    a_attention_mask = (pos < a_lens[:, None]).astype(jnp.int32)

    out = double_berts_forward(params,
                               q_input_ids, q_attention_mask, q_input_segments,
                               a_input_ids, a_attention_mask, a_input_segments)
    out = jax.block_until_ready(out)
    assert out.shape == (BATCH, N_OUT)
    assert bool(jnp.all(jnp.isfinite(out)))
    print("KERNEL_OK")
</pallas_src>

<mosaic_0001>
module attributes {stable_mosaic.version = 11 : i64} {
  func.func @_double_berts_kernel(%arg0: memref<64x128xf32, #tpu.memory_space<vmem>>, %arg1: memref<4x16xf32, #tpu.memory_space<vmem>>, %arg2: memref<3x4x64xf32, #tpu.memory_space<vmem>>, %arg3: memref<4x64xf32, #tpu.memory_space<vmem>>, %arg4: memref<1x128xf32, #tpu.memory_space<vmem>>, %arg5: memref<1x128xf32, #tpu.memory_space<vmem>>, %arg6: memref<2x128x384xbf16, #tpu.memory_space<vmem>>, %arg7: memref<2x1x384xf32, #tpu.memory_space<vmem>>, %arg8: memref<2x128x128xbf16, #tpu.memory_space<vmem>>, %arg9: memref<2x1x128xf32, #tpu.memory_space<vmem>>, %arg10: memref<2x1x128xf32, #tpu.memory_space<vmem>>, %arg11: memref<2x1x128xf32, #tpu.memory_space<vmem>>, %arg12: memref<2x128x256xbf16, #tpu.memory_space<vmem>>, %arg13: memref<2x1x256xf32, #tpu.memory_space<vmem>>, %arg14: memref<2x256x128xbf16, #tpu.memory_space<vmem>>, %arg15: memref<2x1x128xf32, #tpu.memory_space<vmem>>, %arg16: memref<2x1x128xf32, #tpu.memory_space<vmem>>, %arg17: memref<2x1x128xf32, #tpu.memory_space<vmem>>, %arg18: memref<512x30xf32, #tpu.memory_space<vmem>>, %arg19: memref<1x30xf32, #tpu.memory_space<vmem>>, %arg20: memref<2x30xf32, #tpu.memory_space<vmem>>, %arg21: memref<64x384xf32, #tpu.memory_space<vmem>>, %arg22: memref<64x128xf32, #tpu.memory_space<vmem>>) attributes {dimension_semantics = [], scalar_prefetch = 0 : i64, scratch_operands = 2 : i64, tpu.core_type = #tpu.core_type<tc>} {
    %c0 = arith.constant 0 : index
    %c0_0 = arith.constant 0 : index
    %0 = vector.load %arg1[%c0, %c0_0] : memref<4x16xf32, #tpu.memory_space<vmem>>, vector<4x16xf32>
    %c0_1 = arith.constant 0 : index
    %c0_2 = arith.constant 0 : index
    %1 = vector.load %arg0[%c0_1, %c0_2] : memref<64x128xf32, #tpu.memory_space<vmem>>, vector<64x128xf32>
    %c0_3 = arith.constant 0 : index
    %c0_4 = arith.constant 0 : index
    %2 = vector.load %arg4[%c0_3, %c0_4] : memref<1x128xf32, #tpu.memory_space<vmem>>, vector<1x128xf32>
    %c0_5 = arith.constant 0 : index
    %c0_6 = arith.constant 0 : index
    %3 = vector.load %arg5[%c0_5, %c0_6] : memref<1x128xf32, #tpu.memory_space<vmem>>, vector<1x128xf32>
    %cst = arith.constant dense<0.000000e+00> : vector<64xf32>
    %4 = vector.multi_reduction <add>, %1, %cst [1] : vector<64x128xf32> to vector<64xf32>
    %5 = vector.shape_cast %4 : vector<64xf32> to vector<64x1xf32>
    %cst_7 = arith.constant 1.280000e+02 : f32
    %6 = vector.broadcast %cst_7 : f32 to vector<64x1xf32>
    %7 = arith.divf %5, %6 : vector<64x1xf32>
    %8 = vector.broadcast %7 : vector<64x1xf32> to vector<64x128xf32>
    %9 = arith.subf %1, %8 : vector<64x128xf32>
    %10 = arith.mulf %9, %9 : vector<64x128xf32>
    %cst_8 = arith.constant dense<0.000000e+00> : vector<64xf32>
    %11 = vector.multi_reduction <add>, %10, %cst_8 [1] : vector<64x128xf32> to vector<64xf32>
    %12 = vector.shape_cast %11 : vector<64xf32> to vector<64x1xf32>
    %cst_9 = arith.constant 1.280000e+02 : f32
    %13 = vector.broadcast %cst_9 : f32 to vector<64x1xf32>
    %14 = arith.divf %12, %13 : vector<64x1xf32>
    %15 = vector.broadcast %7 : vector<64x1xf32> to vector<64x128xf32>
    %16 = arith.subf %1, %15 : vector<64x128xf32>
    %cst_10 = arith.constant 9.99999996E-13 : f32
    %17 = vector.broadcast %cst_10 : f32 to vector<64x1xf32>
    %18 = arith.addf %14, %17 : vector<64x1xf32>
    %19 = math.rsqrt %18 : vector<64x1xf32>
    %20 = vector.broadcast %19 : vector<64x1xf32> to vector<64x128xf32>
    %21 = arith.mulf %16, %20 : vector<64x128xf32>
    %22 = vector.broadcast %2 : vector<1x128xf32> to vector<64x128xf32>
    %23 = arith.mulf %21, %22 : vector<64x128xf32>
    %24 = vector.broadcast %3 : vector<1x128xf32> to vector<64x128xf32>
    %25 = arith.addf %23, %24 : vector<64x128xf32>
    %c0_11 = arith.constant 0 : index
    %c0_12 = arith.constant 0 : index
    %c0_13 = arith.constant 0 : index
    %26 = vector.load %arg2[%c0_11, %c0_12, %c0_13] : memref<3x4x64xf32, #tpu.memory_space<vmem>>, vector<1x4x64xf32>
    %27 = vector.shape_cast %26 : vector<1x4x64xf32> to vector<4x64xf32>
    %cst_14 = arith.constant dense<0.000000e+00> : vector<4x128xf32>
    %28 = tpu.matmul %27, %25, %cst_14 {dimension_numbers = #tpu.dot_dimension_numbers<[1], [0], [0], [1], [0, 0, 1, 1], [], []>} : vector<4x64xf32>, vector<64x128xf32>, vector<4x128xf32> -> vector<4x128xf32>
    %c0_15 = arith.constant 0 : index
    %c0_16 = arith.constant 0 : index
    %c0_17 = arith.constant 0 : index
    %29 = vector.load %arg6[%c0_15, %c0_16, %c0_17] : memref<2x128x384xbf16, #tpu.memory_space<vmem>>, vector<1x128x384xbf16>
    %30 = vector.shape_cast %29 : vector<1x128x384xbf16> to vector<128x384xbf16>
    %31 = arith.truncf %25 : vector<64x128xf32> to vector<64x128xbf16>
    %cst_18 = arith.constant dense<0.000000e+00> : vector<64x384xf32>
    %32 = tpu.matmul %31, %30, %cst_18 {dimension_numbers = #tpu.dot_dimension_numbers<[1], [0], [0], [1], [0, 0, 1, 1], [], []>} : vector<64x128xbf16>, vector<128x384xbf16>, vector<64x384xf32> -> vector<64x384xf32>
    %c0_19 = arith.constant 0 : index
    %c0_20 = arith.constant 0 : index
    %c0_21 = arith.constant 0 : index
    %33 = vector.load %arg7[%c0_19, %c0_20, %c0_21] : memref<2x1x384xf32, #tpu.memory_space<vmem>>, vector<1x1x384xf32>
    %34 = vector.shape_cast %33 : vector<1x1x384xf32> to vector<1x384xf32>
    %35 = vector.broadcast %34 : vector<1x384xf32> to vector<64x384xf32>
    %36 = arith.addf %32, %35 : vector<64x384xf32>
    %c0_22 = arith.constant 0 : index
    %c0_23 = arith.constant 0 : index
    %37 = vector.load %arg21[%c0_22, %c0_23] : memref<64x384xf32, #tpu.memory_space<vmem>>, vector<64x384xf32>
    tpu.vector_store %arg21[%c0_22, %c0_23], %36 {strides = array<i32>} : memref<64x384xf32, #tpu.memory_space<vmem>>, vector<64x384xf32>,
    %38 = vector.extract_strided_slice %0 {offsets = [0, 0], sizes = [1, 16], strides = [1, 1]} : vector<4x16xf32> to vector<1x16xf32>
    %c0_24 = arith.constant 0 : index
    %c0_25 = arith.constant 0 : index
    %39 = vector.load %arg21[%c0_24, %c0_25] : memref<64x384xf32, #tpu.memory_space<vmem>>, vector<16x32xf32>
    %c0_26 = arith.constant 0 : index
    %c128 = arith.constant 128 : index
    %40 = vector.load %arg21[%c0_26, %c128] : memref<64x384xf32, #tpu.memory_space<vmem>>, vector<16x32xf32>
    %c0_27 = arith.constant 0 : index
    %c256 = arith.constant 256 : index
    %41 = vector.load %arg21[%c0_27, %c256] : memref<64x384xf32, #tpu.memory_space<vmem>>, vector<16x32xf32>
    %cst_28 = arith.constant dense<0.000000e+00> : vector<16x16xf32>
    %42 = tpu.matmul %39, %40, %cst_28 {dimension_numbers = #tpu.dot_dimension_numbers<[1], [1], [0], [0], [0, 0, 1, 0], [], []>} : vector<16x32xf32>, vector<16x32xf32>, vector<16x16xf32> -> vector<16x16xf32>
    %43 = vector.broadcast %38 : vector<1x16xf32> to vector<16x16xf32>
    %44 = arith.addf %42, %43 : vector<16x16xf32>
    %cst_29 = arith.constant dense<0xFF800000> : vector<16xf32>
    %45 = vector.multi_reduction <maximumf>, %44, %cst_29 [1] : vector<16x16xf32> to vector<16xf32>
    %cst_30 = arith.constant 0xFF800000 : f32
    %46 = vector.broadcast %cst_30 : f32 to vector<16xf32>
    %47 = arith.maximumf %46, %45 : vector<16xf32>
    %48 = vector.shape_cast %47 : vector<16xf32> to vector<16x1xf32>
    %49 = vector.broadcast %48 : vector<16x1xf32> to vector<16x16xf32>
    %50 = arith.subf %44, %49 : vector<16x16xf32>
    %51 = math.exp %50 : vector<16x16xf32>
    %cst_31 = arith.constant dense<0.000000e+00> : vector<16xf32>
    %52 = vector.multi_reduction <add>, %51, %cst_31 [1] : vector<16x16xf32> to vector<16xf32>
    %53 = vector.shape_cast %52 : vector<16xf32> to vector<16x1xf32>
    %54 = vector.broadcast %53 : vector<16x1xf32> to vector<16x16xf32>
    %55 = arith.divf %51, %54 : vector<16x16xf32>
    %cst_32 = arith.constant dense<0.000000e+00> : vector<16x32xf32>
    %56 = tpu.matmul %55, %41, %cst_32 {dimension_numbers = #tpu.dot_dimension_numbers<[1], [0], [0], [1], [0, 0, 1, 1], [], []>} : vector<16x16xf32>, vector<16x32xf32>, vector<16x32xf32> -> vector<16x32xf32>
    %c0_33 = arith.constant 0 : index
    %c0_34 = arith.constant 0 : index
    %57 = vector.load %arg22[%c0_33, %c0_34] : memref<64x128xf32, #tpu.memory_space<vmem>>, vector<16x32xf32>
    tpu.vector_store %arg22[%c0_33, %c0_34], %56 {strides = array<i32>} : memref<64x128xf32, #tpu.memory_space<vmem>>, vector<16x32xf32>,
    %c0_35 = arith.constant 0 : index
    %c32 = arith.constant 32 : index
    %58 = vector.load %arg21[%c0_35, %c32] : memref<64x384xf32, #tpu.memory_space<vmem>>, vector<16x32xf32>
    %c0_36 = arith.constant 0 : index
    %c160 = arith.constant 160 : index
    %59 = vector.load %arg21[%c0_36, %c160] : memref<64x384xf32, #tpu.memory_space<vmem>>, vector<16x32xf32>
    %c0_37 = arith.constant 0 : index
    %c288 = arith.constant 288 : index
    %60 = vector.load %arg21[%c0_37, %c288] : memref<64x384xf32, #tpu.memory_space<vmem>>, vector<16x32xf32>
    %cst_38 = arith.constant dense<0.000000e+00> : vector<16x16xf32>
    %61 = tpu.matmul %58, %59, %cst_38 {dimension_numbers = #tpu.dot_dimension_numbers<[1], [1], [0], [0], [0, 0, 1, 0], [], []>} : vector<16x32xf32>, vector<16x32xf32>, vector<16x16xf32> -> vector<16x16xf32>
    %62 = vector.broadcast %38 : vector<1x16xf32> to vector<16x16xf32>
    %63 = arith.addf %61, %62 : vector<16x16xf32>
    %cst_39 = arith.constant dense<0xFF800000> : vector<16xf32>
    %64 = vector.multi_reduction <maximumf>, %63, %cst_39 [1] : vector<16x16xf32> to vector<16xf32>
    %cst_40 = arith.constant 0xFF800000 : f32
    %65 = vector.broadcast %cst_40 : f32 to vector<16xf32>
    %66 = arith.maximumf %65, %64 : vector<16xf32>
    %67 = vector.shape_cast %66 : vector<16xf32> to vector<16x1xf32>
    %68 = vector.broadcast %67 : vector<16x1xf32> to vector<16x16xf32>
    %69 = arith.subf %63, %68 : vector<16x16xf32>
    %70 = math.exp %69 : vector<16x16xf32>
    %cst_41 = arith.constant dense<0.000000e+00> : vector<16xf32>
    %71 = vector.multi_reduction <add>, %70, %cst_41 [1] : vector<16x16xf32> to vector<16xf32>
    %72 = vector.shape_cast %71 : vector<16xf32> to vector<16x1xf32>
    %73 = vector.broadcast %72 : vector<16x1xf32> to vector<16x16xf32>
    %74 = arith.divf %70, %73 : vector<16x16xf32>
    %cst_42 = arith.constant dense<0.000000e+00> : vector<16x32xf32>
    %75 = tpu.matmul %74, %60, %cst_42 {dimension_numbers = #tpu.dot_dimension_numbers<[1], [0], [0], [1], [0, 0, 1, 1], [], []>} : vector<16x16xf32>, vector<16x32xf32>, vector<16x32xf32> -> vector<16x32xf32>
    %c0_43 = arith.constant 0 : index
    %c32_44 = arith.constant 32 : index
    %76 = vector.load %arg22[%c0_43, %c32_44] : memref<64x128xf32, #tpu.memory_space<vmem>>, vector<16x32xf32>
    tpu.vector_store %arg22[%c0_43, %c32_44], %75 {strides = array<i32>} : memref<64x128xf32, #tpu.memory_space<vmem>>, vector<16x32xf32>,
    %c0_45 = arith.constant 0 : index
    %c64 = arith.constant 64 : index
    %77 = vector.load %arg21[%c0_45, %c64] : memref<64x384xf32, #tpu.memory_space<vmem>>, vector<16x32xf32>
    %c0_46 = arith.constant 0 : index
    %c192 = arith.constant 192 : index
    %78 = vector.load %arg21[%c0_46, %c192] : memref<64x384xf32, #tpu.memory_space<vmem>>, vector<16x32xf32>
    %c0_47 = arith.constant 0 : index
    %c320 = arith.constant 320 : index
    %79 = vector.load %arg21[%c0_47, %c320] : memref<64x384xf32, #tpu.memory_space<vmem>>, vector<16x32xf32>
    %cst_48 = arith.constant dense<0.000000e+00> : vector<16x16xf32>
    %80 = tpu.matmul %77, %78, %cst_48 {dimension_numbers = #tpu.dot_dimension_numbers<[1], [1], [0], [0], [0, 0, 1, 0], [], []>} : vector<16x32xf32>, vector<16x32xf32>, vector<16x16xf32> -> vector<16x16xf32>
    %81 = vector.broadcast %38 : vector<1x16xf32> to vector<16x16xf32>
    %82 = arith.addf %80, %81 : vector<16x16xf32>
    %cst_49 = arith.constant dense<0xFF800000> : vector<16xf32>
    %83 = vector.multi_reduction <maximumf>, %82, %cst_49 [1] : vector<16x16xf32> to vector<16xf32>
    %cst_50 = arith.constant 0xFF800000 : f32
    %84 = vector.broadcast %cst_50 : f32 to vector<16xf32>
    %85 = arith.maximumf %84, %83 : vector<16xf32>
    %86 = vector.shape_cast %85 : vector<16xf32> to vector<16x1xf32>
    %87 = vector.broadcast %86 : vector<16x1xf32> to vector<16x16xf32>
    %88 = arith.subf %82, %87 : vector<16x16xf32>
    %89 = math.exp %88 : vector<16x16xf32>
    %cst_51 = arith.constant dense<0.000000e+00> : vector<16xf32>
    %90 = vector.multi_reduction <add>, %89, %cst_51 [1] : vector<16x16xf32> to vector<16xf32>
    %91 = vector.shape_cast %90 : vector<16xf32> to vector<16x1xf32>
    %92 = vector.broadcast %91 : vector<16x1xf32> to vector<16x16xf32>
    %93 = arith.divf %89, %92 : vector<16x16xf32>
    %cst_52 = arith.constant dense<0.000000e+00> : vector<16x32xf32>
    %94 = tpu.matmul %93, %79, %cst_52 {dimension_numbers = #tpu.dot_dimension_numbers<[1], [0], [0], [1], [0, 0, 1, 1], [], []>} : vector<16x16xf32>, vector<16x32xf32>, vector<16x32xf32> -> vector<16x32xf32>
    %c0_53 = arith.constant 0 : index
    %c64_54 = arith.constant 64 : index
    %95 = vector.load %arg22[%c0_53, %c64_54] : memref<64x128xf32, #tpu.memory_space<vmem>>, vector<16x32xf32>
    tpu.vector_store %arg22[%c0_53, %c64_54], %94 {strides = array<i32>} : memref<64x128xf32, #tpu.memory_space<vmem>>, vector<16x32xf32>,
    %c0_55 = arith.constant 0 : index
    %c96 = arith.constant 96 : index
    %96 = vector.load %arg21[%c0_55, %c96] : memref<64x384xf32, #tpu.memory_space<vmem>>, vector<16x32xf32>
    %c0_56 = arith.constant 0 : index
    %c224 = arith.constant 224 : index
    %97 = vector.load %arg21[%c0_56, %c224] : memref<64x384xf32, #tpu.memory_space<vmem>>, vector<16x32xf32>
    %c0_57 = arith.constant 0 : index
    %c352 = arith.constant 352 : index
    %98 = vector.load %arg21[%c0_57, %c352] : memref<64x384xf32, #tpu.memory_space<vmem>>, vector<16x32xf32>
    %cst_58 = arith.constant dense<0.000000e+00> : vector<16x16xf32>
    %99 = tpu.matmul %96, %97, %cst_58 {dimension_numbers = #tpu.dot_dimension_numbers<[1], [1], [0], [0], [0, 0, 1, 0], [], []>} : vector<16x32xf32>, vector<16x32xf32>, vector<16x16xf32> -> vector<16x16xf32>
    %100 = vector.broadcast %38 : vector<1x16xf32> to vector<16x16xf32>
    %101 = arith.addf %99, %100 : vector<16x16xf32>
    %cst_59 = arith.constant dense<0xFF800000> : vector<16xf32>
    %102 = vector.multi_reduction <maximumf>, %101, %cst_59 [1] : vector<16x16xf32> to vector<16xf32>
    %cst_60 = arith.constant 0xFF800000 : f32
    %103 = vector.broadcast %cst_60 : f32 to vector<16xf32>
    %104 = arith.maximumf %103, %102 : vector<16xf32>
    %105 = vector.shape_cast %104 : vector<16xf32> to vector<16x1xf32>
    %106 = vector.broadcast %105 : vector<16x1xf32> to vector<16x16xf32>
    %107 = arith.subf %101, %106 : vector<16x16xf32>
    %108 = math.exp %107 : vector<16x16xf32>
    %cst_61 = arith.constant dense<0.000000e+00> : vector<16xf32>
    %109 = vector.multi_reduction <add>, %108, %cst_61 [1] : vector<16x16xf32> to vector<16xf32>
    %110 = vector.shape_cast %109 : vector<16xf32> to vector<16x1xf32>
    %111 = vector.broadcast %110 : vector<16x1xf32> to vector<16x16xf32>
    %112 = arith.divf %108, %111 : vector<16x16xf32>
    %cst_62 = arith.constant dense<0.000000e+00> : vector<16x32xf32>
    %113 = tpu.matmul %112, %98, %cst_62 {dimension_numbers = #tpu.dot_dimension_numbers<[1], [0], [0], [1], [0, 0, 1, 1], [], []>} : vector<16x16xf32>, vector<16x32xf32>, vector<16x32xf32> -> vector<16x32xf32>
    %c0_63 = arith.constant 0 : index
    %c96_64 = arith.constant 96 : index
    %114 = vector.load %arg22[%c0_63, %c96_64] : memref<64x128xf32, #tpu.memory_space<vmem>>, vector<16x32xf32>
    tpu.vector_store %arg22[%c0_63, %c96_64], %113 {strides = array<i32>} : memref<64x128xf32, #tpu.memory_space<vmem>>, vector<16x32xf32>,
    %115 = vector.extract_strided_slice %0 {offsets = [1, 0], sizes = [1, 16], strides = [1, 1]} : vector<4x16xf32> to vector<1x16xf32>
    %c16 = arith.constant 16 : index
    %c0_65 = arith.constant 0 : index
    %116 = vector.load %arg21[%c16, %c0_65] : memref<64x384xf32, #tpu.memory_space<vmem>>, vector<16x32xf32>
    %c16_66 = arith.constant 16 : index
    %c128_67 = arith.constant 128 : index
    %117 = vector.load %arg21[%c16_66, %c128_67] : memref<64x384xf32, #tpu.memory_space<vmem>>, vector<16x32xf32>
    %c16_68 = arith.constant 16 : index
    %c256_69 = arith.constant 256 : index
    %118 = vector.load %arg21[%c16_68, %c256_69] : memref<64x384xf32, #tpu.memory_space<vmem>>, vector<16x32xf32>
    %cst_70 = arith.constant dense<0.000000e+00> : vector<16x16xf32>
    %119 = tpu.matmul %116, %117, %cst_70 {dimension_numbers = #tpu.dot_dimension_numbers<[1], [1], [0], [0], [0, 0, 1, 0], [], []>} : vector<16x32xf32>, vector<16x32xf32>, vector<16x16xf32> -> vector<16x16xf32>
    %120 = vector.broadcast %115 : vector<1x16xf32> to vector<16x16xf32>
    %121 = arith.addf %119, %120 : vector<16x16xf32>
    %cst_71 = arith.constant dense<0xFF800000> : vector<16xf32>
    %122 = vector.multi_reduction <maximumf>, %121, %cst_71 [1] : vector<16x16xf32> to vector<16xf32>
    %cst_72 = arith.constant 0xFF800000 : f32
    %123 = vector.broadcast %cst_72 : f32 to vector<16xf32>
    %124 = arith.maximumf %123, %122 : vector<16xf32>
    %125 = vector.shape_cast %124 : vector<16xf32> to vector<16x1xf32>
    %126 = vector.broadcast %125 : vector<16x1xf32> to vector<16x16xf32>
    %127 = arith.subf %121, %126 : vector<16x16xf32>
    %128 = math.exp %127 : vector<16x16xf32>
    %cst_73 = arith.constant dense<0.000000e+00> : vector<16xf32>
    %129 = vector.multi_reduction <add>, %128, %cst_73 [1] : vector<16x16xf32> to vector<16xf32>
    %130 = vector.shape_cast %129 : vector<16xf32> to vector<16x1xf32>
    %131 = vector.broadcast %130 : vector<16x1xf32> to vector<16x16xf32>
    %132 = arith.divf %128, %131 : vector<16x16xf32>
    %cst_74 = arith.constant dense<0.000000e+00> : vector<16x32xf32>
    %133 = tpu.matmul %132, %118, %cst_74 {dimension_numbers = #tpu.dot_dimension_numbers<[1], [0], [0], [1], [0, 0, 1, 1], [], []>} : vector<16x16xf32>, vector<16x32xf32>, vector<16x32xf32> -> vector<16x32xf32>
    %c16_75 = arith.constant 16 : index
    %c0_76 = arith.constant 0 : index
    %134 = vector.load %arg22[%c16_75, %c0_76] : memref<64x128xf32, #tpu.memory_space<vmem>>, vector<16x32xf32>
    tpu.vector_store %arg22[%c16_75, %c0_76], %133 {strides = array<i32>} : memref<64x128xf32, #tpu.memory_space<vmem>>, vector<16x32xf32>,
    %c16_77 = arith.constant 16 : index
    %c32_78 = arith.constant 32 : index
    %135 = vector.load %arg21[%c16_77, %c32_78] : memref<64x384xf32, #tpu.memory_space<vmem>>, vector<16x32xf32>
    %c16_79 = arith.constant 16 : index
    %c160_80 = arith.constant 160 : index
    %136 = vector.load %arg21[%c16_79, %c160_80] : memref<64x384xf32, #tpu.memory_space<vmem>>, vector<16x32xf32>
    %c16_81 = arith.constant 16 : index
    %c288_82 = arith.constant 288 : index
    %137 = vector.load %arg21[%c16_81, %c288_82] : memref<64x384xf32, #tpu.memory_space<vmem>>, vector<16x32xf32>
    %cst_83 = arith.constant dense<0.000000e+00> : vector<16x16xf32>
    %138 = tpu.matmul %135, %136, %cst_83 {dimension_numbers = #tpu.dot_dimension_numbers<[1], [1], [0], [0], [0, 0, 1, 0], [], []>} : vector<16x32xf32>, vector<16x32xf32>, vector<16x16xf32> -> vector<16x16xf32>
    %139 = vector.broadcast %115 : vector<1x16xf32> to vector<16x16xf32>
    %140 = arith.addf %138, %139 : vector<16x16xf32>
    %cst_84 = arith.constant dense<0xFF800000> : vector<16xf32>
    %141 = vector.multi_reduction <maximumf>, %140, %cst_84 [1] : vector<16x16xf32> to vector<16xf32>
    %cst_85 = arith.constant 0xFF800000 : f32
    %142 = vector.broadcast %cst_85 : f32 to vector<16xf32>
    %143 = arith.maximumf %142, %141 : vector<16xf32>
    %144 = vector.shape_cast %143 : vector<16xf32> to vector<16x1xf32>
    %145 = vector.broadcast %144 : vector<16x1xf32> to vector<16x16xf32>
    %146 = arith.subf %140, %145 : vector<16x16xf32>
    %147 = math.exp %146 : vector<16x16xf32>
    %cst_86 = arith.constant dense<0.000000e+00> : vector<16xf32>
    %148 = vector.multi_reduction <add>, %147, %cst_86 [1] : vector<16x16xf32> to vector<16xf32>
    %149 = vector.shape_cast %148 : vector<16xf32> to vector<16x1xf32>
    %150 = vector.broadcast %149 : vector<16x1xf32> to vector<16x16xf32>
    %151 = arith.divf %147, %150 : vector<16x16xf32>
    %cst_87 = arith.constant dense<0.000000e+00> : vector<16x32xf32>
    %152 = tpu.matmul %151, %137, %cst_87 {dimension_numbers = #tpu.dot_dimension_numbers<[1], [0], [0], [1], [0, 0, 1, 1], [], []>} : vector<16x16xf32>, vector<16x32xf32>, vector<16x32xf32> -> vector<16x32xf32>
    %c16_88 = arith.constant 16 : index
    %c32_89 = arith.constant 32 : index
    %153 = vector.load %arg22[%c16_88, %c32_89] : memref<64x128xf32, #tpu.memory_space<vmem>>, vector<16x32xf32>
    tpu.vector_store %arg22[%c16_88, %c32_89], %152 {strides = array<i32>} : memref<64x128xf32, #tpu.memory_space<vmem>>, vector<16x32xf32>,
    %c16_90 = arith.constant 16 : index
    %c64_91 = arith.constant 64 : index
    %154 = vector.load %arg21[%c16_90, %c64_91] : memref<64x384xf32, #tpu.memory_space<vmem>>, vector<16x32xf32>
    %c16_92 = arith.constant 16 : index
    %c192_93 = arith.constant 192 : index
    %155 = vector.load %arg21[%c16_92, %c192_93] : memref<64x384xf32, #tpu.memory_space<vmem>>, vector<16x32xf32>
    %c16_94 = arith.constant 16 : index
    %c320_95 = arith.constant 320 : index
    %156 = vector.load %arg21[%c16_94, %c320_95] : memref<64x384xf32, #tpu.memory_space<vmem>>, vector<16x32xf32>
    %cst_96 = arith.constant dense<0.000000e+00> : vector<16x16xf32>
    %157 = tpu.matmul %154, %155, %cst_96 {dimension_numbers = #tpu.dot_dimension_numbers<[1], [1], [0], [0], [0, 0, 1, 0], [], []>} : vector<16x32xf32>, vector<16x32xf32>, vector<16x16xf32> -> vector<16x16xf32>
    %158 = vector.broadcast %115 : vector<1x16xf32> to vector<16x16xf32>
    %159 = arith.addf %157, %158 : vector<16x16xf32>
    %cst_97 = arith.constant dense<0xFF800000> : vector<16xf32>
    %160 = vector.multi_reduction <maximumf>, %159, %cst_97 [1] : vector<16x16xf32> to vector<16xf32>
    %cst_98 = arith.constant 0xFF800000 : f32
    %161 = vector.broadcast %cst_98 : f32 to vector<16xf32>
    %162 = arith.maximumf %161, %160 : vector<16xf32>
    %163 = vector.shape_cast %162 : vector<16xf32> to vector<16x1xf32>
    %164 = vector.broadcast %163 : vector<16x1xf32> to vector<16x16xf32>
    %165 = arith.subf %159, %164 : vector<16x16xf32>
    %166 = math.exp %165 : vector<16x16xf32>
    %cst_99 = arith.constant dense<0.000000e+00> : vector<16xf32>
    %167 = vector.multi_reduction <add>, %166, %cst_99 [1] : vector<16x16xf32> to vector<16xf32>
    %168 = vector.shape_cast %167 : vector<16xf32> to vector<16x1xf32>
    %169 = vector.broadcast %168 : vector<16x1xf32> to vector<16x16xf32>
    %170 = arith.divf %166, %169 : vector<16x16xf32>
    %cst_100 = arith.constant dense<0.000000e+00> : vector<16x32xf32>
    %171 = tpu.matmul %170, %156, %cst_100 {dimension_numbers = #tpu.dot_dimension_numbers<[1], [0], [0], [1], [0, 0, 1, 1], [], []>} : vector<16x16xf32>, vector<16x32xf32>, vector<16x32xf32> -> vector<16x32xf32>
    %c16_101 = arith.constant 16 : index
    %c64_102 = arith.constant 64 : index
    %172 = vector.load %arg22[%c16_101, %c64_102] : memref<64x128xf32, #tpu.memory_space<vmem>>, vector<16x32xf32>
    tpu.vector_store %arg22[%c16_101, %c64_102], %171 {strides = array<i32>} : memref<64x128xf32, #tpu.memory_space<vmem>>, vector<16x32xf32>,
    %c16_103 = arith.constant 16 : index
    %c96_104 = arith.constant 96 : index
    %173 = vector.load %arg21[%c16_103, %c96_104] : memref<64x384xf32, #tpu.memory_space<vmem>>, vector<16x32xf32>
    %c16_105 = arith.constant 16 : index
    %c224_106 = arith.constant 224 : index
    %174 = vector.load %arg21[%c16_105, %c224_106] : memref<64x384xf32, #tpu.memory_space<vmem>>, vector<16x32xf32>
    %c16_107 = arith.constant 16 : index
    %c352_108 = arith.constant 352 : index
    %175 = vector.load %arg21[%c16_107, %c352_108] : memref<64x384xf32, #tpu.memory_space<vmem>>, vector<16x32xf32>
    %cst_109 = arith.constant dense<0.000000e+00> : vector<16x16xf32>
    %176 = tpu.matmul %173, %174, %cst_109 {dimension_numbers = #tpu.dot_dimension_numbers<[1], [1], [0], [0], [0, 0, 1, 0], [], []>} : vector<16x32xf32>, vector<16x32xf32>, vector<16x16xf32> -> vector<16x16xf32>
    %177 = vector.broadcast %115 : vector<1x16xf32> to vector<16x16xf32>
    %178 = arith.addf %176, %177 : vector<16x16xf32>
    %cst_110 = arith.constant dense<0xFF800000> : vector<16xf32>
    %179 = vector.multi_reduction <maximumf>, %178, %cst_110 [1] : vector<16x16xf32> to vector<16xf32>
    %cst_111 = arith.constant 0xFF800000 : f32
    %180 = vector.broadcast %cst_111 : f32 to vector<16xf32>
    %181 = arith.maximumf %180, %179 : vector<16xf32>
    %182 = vector.shape_cast %181 : vector<16xf32> to vector<16x1xf32>
    %183 = vector.broadcast %182 : vector<16x1xf32> to vector<16x16xf32>
    %184 = arith.subf %178, %183 : vector<16x16xf32>
    %185 = math.exp %184 : vector<16x16xf32>
    %cst_112 = arith.constant dense<0.000000e+00> : vector<16xf32>
    %186 = vector.multi_reduction <add>, %185, %cst_112 [1] : vector<16x16xf32> to vector<16xf32>
    %187 = vector.shape_cast %186 : vector<16xf32> to vector<16x1xf32>
    %188 = vector.broadcast %187 : vector<16x1xf32> to vector<16x16xf32>
    %189 = arith.divf %185, %188 : vector<16x16xf32>
    %cst_113 = arith.constant dense<0.000000e+00> : vector<16x32xf32>
    %190 = tpu.matmul %189, %175, %cst_113 {dimension_numbers = #tpu.dot_dimension_numbers<[1], [0], [0], [1], [0, 0, 1, 1], [], []>} : vector<16x16xf32>, vector<16x32xf32>, vector<16x32xf32> -> vector<16x32xf32>
    %c16_114 = arith.constant 16 : index
    %c96_115 = arith.constant 96 : index
    %191 = vector.load %arg22[%c16_114, %c96_115] : memref<64x128xf32, #tpu.memory_space<vmem>>, vector<16x32xf32>
    tpu.vector_store %arg22[%c16_114, %c96_115], %190 {strides = array<i32>} : memref<64x128xf32, #tpu.memory_space<vmem>>, vector<16x32xf32>,
    %192 = vector.extract_strided_slice %0 {offsets = [2, 0], sizes = [1, 16], strides = [1, 1]} : vector<4x16xf32> to vector<1x16xf32>
    %c32_116 = arith.constant 32 : index
    %c0_117 = arith.constant 0 : index
    %193 = vector.load %arg21[%c32_116, %c0_117] : memref<64x384xf32, #tpu.memory_space<vmem>>, vector<16x32xf32>
    %c32_118 = arith.constant 32 : index
    %c128_119 = arith.constant 128 : index
    %194 = vector.load %arg21[%c32_118, %c128_119] : memref<64x384xf32, #tpu.memory_space<vmem>>, vector<16x32xf32>
    %c32_120 = arith.constant 32 : index
    %c256_121 = arith.constant 256 : index
    %195 = vector.load %arg21[%c32_120, %c256_121] : memref<64x384xf32, #tpu.memory_space<vmem>>, vector<16x32xf32>
    %cst_122 = arith.constant dense<0.000000e+00> : vector<16x16xf32>
    %196 = tpu.matmul %193, %194, %cst_122 {dimension_numbers = #tpu.dot_dimension_numbers<[1], [1], [0], [0], [0, 0, 1, 0], [], []>} : vector<16x32xf32>, vector<16x32xf32>, vector<16x16xf32> -> vector<16x16xf32>
    %197 = vector.broadcast %192 : vector<1x16xf32> to vector<16x16xf32>
    %198 = arith.addf %196, %197 : vector<16x16xf32>
    %cst_123 = arith.constant dense<0xFF800000> : vector<16xf32>
    %199 = vector.multi_reduction <maximumf>, %198, %cst_123 [1] : vector<16x16xf32> to vector<16xf32>
    %cst_124 = arith.constant 0xFF800000 : f32
    %200 = vector.broadcast %cst_124 : f32 to vector<16xf32>
    %201 = arith.maximumf %200, %199 : vector<16xf32>
    %202 = vector.shape_cast %201 : vector<16xf32> to vector<16x1xf32>
    %203 = vector.broadcast %202 : vector<16x1xf32> to vector<16x16xf32>
    %204 = arith.subf %198, %203 : vector<16x16xf32>
    %205 = math.exp %204 : vector<16x16xf32>
    %cst_125 = arith.constant dense<0.000000e+00> : vector<16xf32>
    %206 = vector.multi_reduction <add>, %205, %cst_125 [1] : vector<16x16xf32> to vector<16xf32>
    %207 = vector.shape_cast %206 : vector<16xf32> to vector<16x1xf32>
    %208 = vector.broadcast %207 : vector<16x1xf32> to vector<16x16xf32>
    %209 = arith.divf %205, %208 : vector<16x16xf32>
    %cst_126 = arith.constant dense<0.000000e+00> : vector<16x32xf32>
    %210 = tpu.matmul %209, %195, %cst_126 {dimension_numbers = #tpu.dot_dimension_numbers<[1], [0], [0], [1], [0, 0, 1, 1], [], []>} : vector<16x16xf32>, vector<16x32xf32>, vector<16x32xf32> -> vector<16x32xf32>
    %c32_127 = arith.constant 32 : index
    %c0_128 = arith.constant 0 : index
    %211 = vector.load %arg22[%c32_127, %c0_128] : memref<64x128xf32, #tpu.memory_space<vmem>>, vector<16x32xf32>
    tpu.vector_store %arg22[%c32_127, %c0_128], %210 {strides = array<i32>} : memref<64x128xf32, #tpu.memory_space<vmem>>, vector<16x32xf32>,
    %c32_129 = arith.constant 32 : index
    %c32_130 = arith.constant 32 : index
    %212 = vector.load %arg21[%c32_129, %c32_130] : memref<64x384xf32, #tpu.memory_space<vmem>>, vector<16x32xf32>
    %c32_131 = arith.constant 32 : index
    %c160_132 = arith.constant 160 : index
    %213 = vector.load %arg21[%c32_131, %c160_132] : memref<64x384xf32, #tpu.memory_space<vmem>>, vector<16x32xf32>
    %c32_133 = arith.constant 32 : index
    %c288_134 = arith.constant 288 : index
    %214 = vector.load %arg21[%c32_133, %c288_134] : memref<64x384xf32, #tpu.memory_space<vmem>>, vector<16x32xf32>
    %cst_135 = arith.constant dense<0.000000e+00> : vector<16x16xf32>
    %215 = tpu.matmul %212, %213, %cst_135 {dimension_numbers = #tpu.dot_dimension_numbers<[1], [1], [0], [0], [0, 0, 1, 0], [], []>} : vector<16x32xf32>, vector<16x32xf32>, vector<16x16xf32> -> vector<16x16xf32>
    %216 = vector.broadcast %192 : vector<1x16xf32> to vector<16x16xf32>
    %217 = arith.addf %215, %216 : vector<16x16xf32>
    %cst_136 = arith.constant dense<0xFF800000> : vector<16xf32>
    %218 = vector.multi_reduction <maximumf>, %217, %cst_136 [1] : vector<16x16xf32> to vector<16xf32>
    %cst_137 = arith.constant 0xFF800000 : f32
    %219 = vector.broadcast %cst_137 : f32 to vector<16xf32>
    %220 = arith.maximumf %219, %218 : vector<16xf32>
    %221 = vector.shape_cast %220 : vector<16xf32> to vector<16x1xf32>
    %222 = vector.broadcast %221 : vector<16x1xf32> to vector<16x16xf32>
    %223 = arith.subf %217, %222 : vector<16x16xf32>
    %224 = math.exp %223 : vector<16x16xf32>
    %cst_138 = arith.constant dense<0.000000e+00> : vector<16xf32>
    %225 = vector.multi_reduction <add>, %224, %cst_138 [1] : vector<16x16xf32> to vector<16xf32>
    %226 = vector.shape_cast %225 : vector<16xf32> to vector<16x1xf32>
    %227 = vector.broadcast %226 : vector<16x1xf32> to vector<16x16xf32>
    %228 = arith.divf %224, %227 : vector<16x16xf32>
    %cst_139 = arith.constant dense<0.000000e+00> : vector<16x32xf32>
    %229 = tpu.matmul %228, %214, %cst_139 {dimension_numbers = #tpu.dot_dimension_numbers<[1], [0], [0], [1], [0, 0, 1, 1], [], []>} : vector<16x16xf32>, vector<16x32xf32>, vector<16x32xf32> -> vector<16x32xf32>
    %c32_140 = arith.constant 32 : index
    %c32_141 = arith.constant 32 : index
    %230 = vector.load %arg22[%c32_140, %c32_141] : memref<64x128xf32, #tpu.memory_space<vmem>>, vector<16x32xf32>
    tpu.vector_store %arg22[%c32_140, %c32_141], %229 {strides = array<i32>} : memref<64x128xf32, #tpu.memory_space<vmem>>, vector<16x32xf32>,
    %c32_142 = arith.constant 32 : index
    %c64_143 = arith.constant 64 : index
    %231 = vector.load %arg21[%c32_142, %c64_143] : memref<64x384xf32, #tpu.memory_space<vmem>>, vector<16x32xf32>
    %c32_144 = arith.constant 32 : index
    %c192_145 = arith.constant 192 : index
    %232 = vector.load %arg21[%c32_144, %c192_145] : memref<64x384xf32, #tpu.memory_space<vmem>>, vector<16x32xf32>
    %c32_146 = arith.constant 32 : index
    %c320_147 = arith.constant 320 : index
    %233 = vector.load %arg21[%c32_146, %c320_147] : memref<64x384xf32, #tpu.memory_space<vmem>>, vector<16x32xf32>
    %cst_148 = arith.constant dense<0.000000e+00> : vector<16x16xf32>
    %234 = tpu.matmul %231, %232, %cst_148 {dimension_numbers = #tpu.dot_dimension_numbers<[1], [1], [0], [0], [0, 0, 1, 0], [], []>} : vector<16x32xf32>, vector<16x32xf32>, vector<16x16xf32> -> vector<16x16xf32>
    %235 = vector.broadcast %192 : vector<1x16xf32> to vector<16x16xf32>
    %236 = arith.addf %234, %235 : vector<16x16xf32>
    %cst_149 = arith.constant dense<0xFF800000> : vector<16xf32>
    %237 = vector.multi_reduction <maximumf>, %236, %cst_149 [1] : vector<16x16xf32> to vector<16xf32>
    %cst_150 = arith.constant 0xFF800000 : f32
    %238 = vector.broadcast %cst_150 : f32 to vector<16xf32>
    %239 = arith.maximumf %238, %237 : vector<16xf32>
    %240 = vector.shape_cast %239 : vector<16xf32> to vector<16x1xf32>
    %241 = vector.broadcast %240 : vector<16x1xf32> to vector<16x16xf32>
    %242 = arith.subf %236, %241 : vector<16x16xf32>
    %243 = math.exp %242 : vector<16x16xf32>
    %cst_151 = arith.constant dense<0.000000e+00> : vector<16xf32>
    %244 = vector.multi_reduction <add>, %243, %cst_151 [1] : vector<16x16xf32> to vector<16xf32>
    %245 = vector.shape_cast %244 : vector<16xf32> to vector<16x1xf32>
    %246 = vector.broadcast %245 : vector<16x1xf32> to vector<16x16xf32>
    %247 = arith.divf %243, %246 : vector<16x16xf32>
    %cst_152 = arith.constant dense<0.000000e+00> : vector<16x32xf32>
    %248 = tpu.matmul %247, %233, %cst_152 {dimension_numbers = #tpu.dot_dimension_numbers<[1], [0], [0], [1], [0, 0, 1, 1], [], []>} : vector<16x16xf32>, vector<16x32xf32>, vector<16x32xf32> -> vector<16x32xf32>
    %c32_153 = arith.constant 32 : index
    %c64_154 = arith.constant 64 : index
    %249 = vector.load %arg22[%c32_153, %c64_154] : memref<64x128xf32, #tpu.memory_space<vmem>>, vector<16x32xf32>
    tpu.vector_store %arg22[%c32_153, %c64_154], %248 {strides = array<i32>} : memref<64x128xf32, #tpu.memory_space<vmem>>, vector<16x32xf32>,
    %c32_155 = arith.constant 32 : index
    %c96_156 = arith.constant 96 : index
    %250 = vector.load %arg21[%c32_155, %c96_156] : memref<64x384xf32, #tpu.memory_space<vmem>>, vector<16x32xf32>
    %c32_157 = arith.constant 32 : index
    %c224_158 = arith.constant 224 : index
    %251 = vector.load %arg21[%c32_157, %c224_158] : memref<64x384xf32, #tpu.memory_space<vmem>>, vector<16x32xf32>
    %c32_159 = arith.constant 32 : index
    %c352_160 = arith.constant 352 : index
    %252 = vector.load %arg21[%c32_159, %c352_160] : memref<64x384xf32, #tpu.memory_space<vmem>>, vector<16x32xf32>
    %cst_161 = arith.constant dense<0.000000e+00> : vector<16x16xf32>
    %253 = tpu.matmul %250, %251, %cst_161 {dimension_numbers = #tpu.dot_dimension_numbers<[1], [1], [0], [0], [0, 0, 1, 0], [], []>} : vector<16x32xf32>, vector<16x32xf32>, vector<16x16xf32> -> vector<16x16xf32>
    %254 = vector.broadcast %192 : vector<1x16xf32> to vector<16x16xf32>
    %255 = arith.addf %253, %254 : vector<16x16xf32>
    %cst_162 = arith.constant dense<0xFF800000> : vector<16xf32>
    %256 = vector.multi_reduction <maximumf>, %255, %cst_162 [1] : vector<16x16xf32> to vector<16xf32>
    %cst_163 = arith.constant 0xFF800000 : f32
    %257 = vector.broadcast %cst_163 : f32 to vector<16xf32>
    %258 = arith.maximumf %257, %256 : vector<16xf32>
    %259 = vector.shape_cast %258 : vector<16xf32> to vector<16x1xf32>
    %260 = vector.broadcast %259 : vector<16x1xf32> to vector<16x16xf32>
    %261 = arith.subf %255, %260 : vector<16x16xf32>
    %262 = math.exp %261 : vector<16x16xf32>
    %cst_164 = arith.constant dense<0.000000e+00> : vector<16xf32>
    %263 = vector.multi_reduction <add>, %262, %cst_164 [1] : vector<16x16xf32> to vector<16xf32>
    %264 = vector.shape_cast %263 : vector<16xf32> to vector<16x1xf32>
    %265 = vector.broadcast %264 : vector<16x1xf32> to vector<16x16xf32>
    %266 = arith.divf %262, %265 : vector<16x16xf32>
    %cst_165 = arith.constant dense<0.000000e+00> : vector<16x32xf32>
    %267 = tpu.matmul %266, %252, %cst_165 {dimension_numbers = #tpu.dot_dimension_numbers<[1], [0], [0], [1], [0, 0, 1, 1], [], []>} : vector<16x16xf32>, vector<16x32xf32>, vector<16x32xf32> -> vector<16x32xf32>
    %c32_166 = arith.constant 32 : index
    %c96_167 = arith.constant 96 : index
    %268 = vector.load %arg22[%c32_166, %c96_167] : memref<64x128xf32, #tpu.memory_space<vmem>>, vector<16x32xf32>
    tpu.vector_store %arg22[%c32_166, %c96_167], %267 {strides = array<i32>} : memref<64x128xf32, #tpu.memory_space<vmem>>, vector<16x32xf32>,
    %269 = vector.extract_strided_slice %0 {offsets = [3, 0], sizes = [1, 16], strides = [1, 1]} : vector<4x16xf32> to vector<1x16xf32>
    %c48 = arith.constant 48 : index
    %c0_168 = arith.constant 0 : index
    %270 = vector.load %arg21[%c48, %c0_168] : memref<64x384xf32, #tpu.memory_space<vmem>>, vector<16x32xf32>
    %c48_169 = arith.constant 48 : index
    %c128_170 = arith.constant 128 : index
    %271 = vector.load %arg21[%c48_169, %c128_170] : memref<64x384xf32, #tpu.memory_space<vmem>>, vector<16x32xf32>
    %c48_171 = arith.constant 48 : index
    %c256_172 = arith.constant 256 : index
    %272 = vector.load %arg21[%c48_171, %c256_172] : memref<64x384xf32, #tpu.memory_space<vmem>>, vector<16x32xf32>
    %cst_173 = arith.constant dense<0.000000e+00> : vector<16x16xf32>
    %273 = tpu.matmul %270, %271, %cst_173 {dimension_numbers = #tpu.dot_dimension_numbers<[1], [1], [0], [0], [0, 0, 1, 0], [], []>} : vector<16x32xf32>, vector<16x32xf32>, vector<16x16xf32> -> vector<16x16xf32>
    %274 = vector.broadcast %269 : vector<1x16xf32> to vector<16x16xf32>
    %275 = arith.addf %273, %274 : vector<16x16xf32>
    %cst_174 = arith.constant dense<0xFF800000> : vector<16xf32>
    %276 = vector.multi_reduction <maximumf>, %275, %cst_174 [1] : vector<16x16xf32> to vector<16xf32>
    %cst_175 = arith.constant 0xFF800000 : f32
    %277 = vector.broadcast %cst_175 : f32 to vector<16xf32>
    %278 = arith.maximumf %277, %276 : vector<16xf32>
    %279 = vector.shape_cast %278 : vector<16xf32> to vector<16x1xf32>
    %280 = vector.broadcast %279 : vector<16x1xf32> to vector<16x16xf32>
    %281 = arith.subf %275, %280 : vector<16x16xf32>
    %282 = math.exp %281 : vector<16x16xf32>
    %cst_176 = arith.constant dense<0.000000e+00> : vector<16xf32>
    %283 = vector.multi_reduction <add>, %282, %cst_176 [1] : vector<16x16xf32> to vector<16xf32>
    %284 = vector.shape_cast %283 : vector<16xf32> to vector<16x1xf32>
    %285 = vector.broadcast %284 : vector<16x1xf32> to vector<16x16xf32>
    %286 = arith.divf %282, %285 : vector<16x16xf32>
    %cst_177 = arith.constant dense<0.000000e+00> : vector<16x32xf32>
    %287 = tpu.matmul %286, %272, %cst_177 {dimension_numbers = #tpu.dot_dimension_numbers<[1], [0], [0], [1], [0, 0, 1, 1], [], []>} : vector<16x16xf32>, vector<16x32xf32>, vector<16x32xf32> -> vector<16x32xf32>
    %c48_178 = arith.constant 48 : index
    %c0_179 = arith.constant 0 : index
    %288 = vector.load %arg22[%c48_178, %c0_179] : memref<64x128xf32, #tpu.memory_space<vmem>>, vector<16x32xf32>
    tpu.vector_store %arg22[%c48_178, %c0_179], %287 {strides = array<i32>} : memref<64x128xf32, #tpu.memory_space<vmem>>, vector<16x32xf32>,
    %c48_180 = arith.constant 48 : index
    %c32_181 = arith.constant 32 : index
    %289 = vector.load %arg21[%c48_180, %c32_181] : memref<64x384xf32, #tpu.memory_space<vmem>>, vector<16x32xf32>
    %c48_182 = arith.constant 48 : index
    %c160_183 = arith.constant 160 : index
    %290 = vector.load %arg21[%c48_182, %c160_183] : memref<64x384xf32, #tpu.memory_space<vmem>>, vector<16x32xf32>
    %c48_184 = arith.constant 48 : index
    %c288_185 = arith.constant 288 : index
    %291 = vector.load %arg21[%c48_184, %c288_185] : memref<64x384xf32, #tpu.memory_space<vmem>>, vector<16x32xf32>
    %cst_186 = arith.constant dense<0.000000e+00> : vector<16x16xf32>
    %292 = tpu.matmul %289, %290, %cst_186 {dimension_numbers = #tpu.dot_dimension_numbers<[1], [1], [0], [0], [0, 0, 1, 0], [], []>} : vector<16x32xf32>, vector<16x32xf32>, vector<16x16xf32> -> vector<16x16xf32>
    %293 = vector.broadcast %269 : vector<1x16xf32> to vector<16x16xf32>
    %294 = arith.addf %292, %293 : vector<16x16xf32>
    %cst_187 = arith.constant dense<0xFF800000> : vector<16xf32>
    %295 = vector.multi_reduction <maximumf>, %294, %cst_187 [1] : vector<16x16xf32> to vector<16xf32>
    %cst_188 = arith.constant 0xFF800000 : f32
    %296 = vector.broadcast %cst_188 : f32 to vector<16xf32>
    %297 = arith.maximumf %296, %295 : vector<16xf32>
    %298 = vector.shape_cast %297 : vector<16xf32> to vector<16x1xf32>
    %299 = vector.broadcast %298 : vector<16x1xf32> to vector<16x16xf32>
    %300 = arith.subf %294, %299 : vector<16x16xf32>
    %301 = math.exp %300 : vector<16x16xf32>
    %cst_189 = arith.constant dense<0.000000e+00> : vector<16xf32>
    %302 = vector.multi_reduction <add>, %301, %cst_189 [1] : vector<16x16xf32> to vector<16xf32>
    %303 = vector.shape_cast %302 : vector<16xf32> to vector<16x1xf32>
    %304 = vector.broadcast %303 : vector<16x1xf32> to vector<16x16xf32>
    %305 = arith.divf %301, %304 : vector<16x16xf32>
    %cst_190 = arith.constant dense<0.000000e+00> : vector<16x32xf32>
    %306 = tpu.matmul %305, %291, %cst_190 {dimension_numbers = #tpu.dot_dimension_numbers<[1], [0], [0], [1], [0, 0, 1, 1], [], []>} : vector<16x16xf32>, vector<16x32xf32>, vector<16x32xf32> -> vector<16x32xf32>
    %c48_191 = arith.constant 48 : index
    %c32_192 = arith.constant 32 : index
    %307 = vector.load %arg22[%c48_191, %c32_192] : memref<64x128xf32, #tpu.memory_space<vmem>>, vector<16x32xf32>
    tpu.vector_store %arg22[%c48_191, %c32_192], %306 {strides = array<i32>} : memref<64x128xf32, #tpu.memory_space<vmem>>, vector<16x32xf32>,
    %c48_193 = arith.constant 48 : index
    %c64_194 = arith.constant 64 : index
    %308 = vector.load %arg21[%c48_193, %c64_194] : memref<64x384xf32, #tpu.memory_space<vmem>>, vector<16x32xf32>
    %c48_195 = arith.constant 48 : index
    %c192_196 = arith.constant 192 : index
    %309 = vector.load %arg21[%c48_195, %c192_196] : memref<64x384xf32, #tpu.memory_space<vmem>>, vector<16x32xf32>
    %c48_197 = arith.constant 48 : index
    %c320_198 = arith.constant 320 : index
    %310 = vector.load %arg21[%c48_197, %c320_198] : memref<64x384xf32, #tpu.memory_space<vmem>>, vector<16x32xf32>
    %cst_199 = arith.constant dense<0.000000e+00> : vector<16x16xf32>
    %311 = tpu.matmul %308, %309, %cst_199 {dimension_numbers = #tpu.dot_dimension_numbers<[1], [1], [0], [0], [0, 0, 1, 0], [], []>} : vector<16x32xf32>, vector<16x32xf32>, vector<16x16xf32> -> vector<16x16xf32>
    %312 = vector.broadcast %269 : vector<1x16xf32> to vector<16x16xf32>
    %313 = arith.addf %311, %312 : vector<16x16xf32>
    %cst_200 = arith.constant dense<0xFF800000> : vector<16xf32>
    %314 = vector.multi_reduction <maximumf>, %313, %cst_200 [1] : vector<16x16xf32> to vector<16xf32>
    %cst_201 = arith.constant 0xFF800000 : f32
    %315 = vector.broadcast %cst_201 : f32 to vector<16xf32>
    %316 = arith.maximumf %315, %314 : vector<16xf32>
    %317 = vector.shape_cast %316 : vector<16xf32> to vector<16x1xf32>
    %318 = vector.broadcast %317 : vector<16x1xf32> to vector<16x16xf32>
    %319 = arith.subf %313, %318 : vector<16x16xf32>
    %320 = math.exp %319 : vector<16x16xf32>
    %cst_202 = arith.constant dense<0.000000e+00> : vector<16xf32>
    %321 = vector.multi_reduction <add>, %320, %cst_202 [1] : vector<16x16xf32> to vector<16xf32>
    %322 = vector.shape_cast %321 : vector<16xf32> to vector<16x1xf32>
    %323 = vector.broadcast %322 : vector<16x1xf32> to vector<16x16xf32>
    %324 = arith.divf %320, %323 : vector<16x16xf32>
    %cst_203 = arith.constant dense<0.000000e+00> : vector<16x32xf32>
    %325 = tpu.matmul %324, %310, %cst_203 {dimension_numbers = #tpu.dot_dimension_numbers<[1], [0], [0], [1], [0, 0, 1, 1], [], []>} : vector<16x16xf32>, vector<16x32xf32>, vector<16x32xf32> -> vector<16x32xf32>
    %c48_204 = arith.constant 48 : index
    %c64_205 = arith.constant 64 : index
    %326 = vector.load %arg22[%c48_204, %c64_205] : memref<64x128xf32, #tpu.memory_space<vmem>>, vector<16x32xf32>
    tpu.vector_store %arg22[%c48_204, %c64_205], %325 {strides = array<i32>} : memref<64x128xf32, #tpu.memory_space<vmem>>, vector<16x32xf32>,
    %c48_206 = arith.constant 48 : index
    %c96_207 = arith.constant 96 : index
    %327 = vector.load %arg21[%c48_206, %c96_207] : memref<64x384xf32, #tpu.memory_space<vmem>>, vector<16x32xf32>
    %c48_208 = arith.constant 48 : index
    %c224_209 = arith.constant 224 : index
    %328 = vector.load %arg21[%c48_208, %c224_209] : memref<64x384xf32, #tpu.memory_space<vmem>>, vector<16x32xf32>
    %c48_210 = arith.constant 48 : index
    %c352_211 = arith.constant 352 : index
    %329 = vector.load %arg21[%c48_210, %c352_211] : memref<64x384xf32, #tpu.memory_space<vmem>>, vector<16x32xf32>
    %cst_212 = arith.constant dense<0.000000e+00> : vector<16x16xf32>
    %330 = tpu.matmul %327, %328, %cst_212 {dimension_numbers = #tpu.dot_dimension_numbers<[1], [1], [0], [0], [0, 0, 1, 0], [], []>} : vector<16x32xf32>, vector<16x32xf32>, vector<16x16xf32> -> vector<16x16xf32>
    %331 = vector.broadcast %269 : vector<1x16xf32> to vector<16x16xf32>
    %332 = arith.addf %330, %331 : vector<16x16xf32>
    %cst_213 = arith.constant dense<0xFF800000> : vector<16xf32>
    %333 = vector.multi_reduction <maximumf>, %332, %cst_213 [1] : vector<16x16xf32> to vector<16xf32>
    %cst_214 = arith.constant 0xFF800000 : f32
    %334 = vector.broadcast %cst_214 : f32 to vector<16xf32>
    %335 = arith.maximumf %334, %333 : vector<16xf32>
    %336 = vector.shape_cast %335 : vector<16xf32> to vector<16x1xf32>
    %337 = vector.broadcast %336 : vector<16x1xf32> to vector<16x16xf32>
    %338 = arith.subf %332, %337 : vector<16x16xf32>
    %339 = math.exp %338 : vector<16x16xf32>
    %cst_215 = arith.constant dense<0.000000e+00> : vector<16xf32>
    %340 = vector.multi_reduction <add>, %339, %cst_215 [1] : vector<16x16xf32> to vector<16xf32>
    %341 = vector.shape_cast %340 : vector<16xf32> to vector<16x1xf32>
    %342 = vector.broadcast %341 : vector<16x1xf32> to vector<16x16xf32>
    %343 = arith.divf %339, %342 : vector<16x16xf32>
    %cst_216 = arith.constant dense<0.000000e+00> : vector<16x32xf32>
    %344 = tpu.matmul %343, %329, %cst_216 {dimension_numbers = #tpu.dot_dimension_numbers<[1], [0], [0], [1], [0, 0, 1, 1], [], []>} : vector<16x16xf32>, vector<16x32xf32>, vector<16x32xf32> -> vector<16x32xf32>
    %c48_217 = arith.constant 48 : index
    %c96_218 = arith.constant 96 : index
    %345 = vector.load %arg22[%c48_217, %c96_218] : memref<64x128xf32, #tpu.memory_space<vmem>>, vector<16x32xf32>
    tpu.vector_store %arg22[%c48_217, %c96_218], %344 {strides = array<i32>} : memref<64x128xf32, #tpu.memory_space<vmem>>, vector<16x32xf32>,
    %c0_219 = arith.constant 0 : index
    %c0_220 = arith.constant 0 : index
    %346 = vector.load %arg22[%c0_219, %c0_220] : memref<64x128xf32, #tpu.memory_space<vmem>>, vector<64x128xf32>
    %c0_221 = arith.constant 0 : index
    %c0_222 = arith.constant 0 : index
    %c0_223 = arith.constant 0 : index
    %347 = vector.load %arg8[%c0_221, %c0_222, %c0_223] : memref<2x128x128xbf16, #tpu.memory_space<vmem>>, vector<1x128x128xbf16>
    %348 = vector.shape_cast %347 : vector<1x128x128xbf16> to vector<128x128xbf16>
    %349 = arith.truncf %346 : vector<64x128xf32> to vector<64x128xbf16>
    %cst_224 = arith.constant dense<0.000000e+00> : vector<64x128xf32>
    %350 = tpu.matmul %349, %348, %cst_224 {dimension_numbers = #tpu.dot_dimension_numbers<[1], [0], [0], [1], [0, 0, 1, 1], [], []>} : vector<64x128xbf16>, vector<128x128xbf16>, vector<64x128xf32> -> vector<64x128xf32>
    %c0_225 = arith.constant 0 : index
    %c0_226 = arith.constant 0 : index
    %c0_227 = arith.constant 0 : index
    %351 = vector.load %arg9[%c0_225, %c0_226, %c0_227] : memref<2x1x128xf32, #tpu.memory_space<vmem>>, vector<1x1x128xf32>
    %352 = vector.shape_cast %351 : vector<1x1x128xf32> to vector<1x128xf32>
    %353 = vector.broadcast %352 : vector<1x128xf32> to vector<64x128xf32>
    %354 = arith.addf %350, %353 : vector<64x128xf32>
    %355 = arith.addf %354, %25 : vector<64x128xf32>
    %c0_228 = arith.constant 0 : index
    %c0_229 = arith.constant 0 : index
    %c0_230 = arith.constant 0 : index
    %356 = vector.load %arg10[%c0_228, %c0_229, %c0_230] : memref<2x1x128xf32, #tpu.memory_space<vmem>>, vector<1x1x128xf32>
    %357 = vector.shape_cast %356 : vector<1x1x128xf32> to vector<1x128xf32>
    %c0_231 = arith.constant 0 : index
    %c0_232 = arith.constant 0 : index
    %c0_233 = arith.constant 0 : index
    %358 = vector.load %arg11[%c0_231, %c0_232, %c0_233] : memref<2x1x128xf32, #tpu.memory_space<vmem>>, vector<1x1x128xf32>
    %359 = vector.shape_cast %358 : vector<1x1x128xf32> to vector<1x128xf32>
    %cst_234 = arith.constant dense<0.000000e+00> : vector<64xf32>
    %360 = vector.multi_reduction <add>, %355, %cst_234 [1] : vector<64x128xf32> to vector<64xf32>
    %361 = vector.shape_cast %360 : vector<64xf32> to vector<64x1xf32>
    %cst_235 = arith.constant 1.280000e+02 : f32
    %362 = vector.broadcast %cst_235 : f32 to vector<64x1xf32>
    %363 = arith.divf %361, %362 : vector<64x1xf32>
    %364 = vector.broadcast %363 : vector<64x1xf32> to vector<64x128xf32>
    %365 = arith.subf %355, %364 : vector<64x128xf32>
    %366 = arith.mulf %365, %365 : vector<64x128xf32>
    %cst_236 = arith.constant dense<0.000000e+00> : vector<64xf32>
    %367 = vector.multi_reduction <add>, %366, %cst_236 [1] : vector<64x128xf32> to vector<64xf32>
    %368 = vector.shape_cast %367 : vector<64xf32> to vector<64x1xf32>
    %cst_237 = arith.constant 1.280000e+02 : f32
    %369 = vector.broadcast %cst_237 : f32 to vector<64x1xf32>
    %370 = arith.divf %368, %369 : vector<64x1xf32>
    %371 = vector.broadcast %363 : vector<64x1xf32> to vector<64x128xf32>
    %372 = arith.subf %355, %371 : vector<64x128xf32>
    %cst_238 = arith.constant 9.99999996E-13 : f32
    %373 = vector.broadcast %cst_238 : f32 to vector<64x1xf32>
    %374 = arith.addf %370, %373 : vector<64x1xf32>
    %375 = math.rsqrt %374 : vector<64x1xf32>
    %376 = vector.broadcast %375 : vector<64x1xf32> to vector<64x128xf32>
    %377 = arith.mulf %372, %376 : vector<64x128xf32>
    %378 = vector.broadcast %357 : vector<1x128xf32> to vector<64x128xf32>
    %379 = arith.mulf %377, %378 : vector<64x128xf32>
    %380 = vector.broadcast %359 : vector<1x128xf32> to vector<64x128xf32>
    %381 = arith.addf %379, %380 : vector<64x128xf32>
    %c0_239 = arith.constant 0 : index
    %c0_240 = arith.constant 0 : index
    %c0_241 = arith.constant 0 : index
    %382 = vector.load %arg12[%c0_239, %c0_240, %c0_241] : memref<2x128x256xbf16, #tpu.memory_space<vmem>>, vector<1x128x256xbf16>
    %383 = vector.shape_cast %382 : vector<1x128x256xbf16> to vector<128x256xbf16>
    %384 = arith.truncf %381 : vector<64x128xf32> to vector<64x128xbf16>
    %cst_242 = arith.constant dense<0.000000e+00> : vector<64x256xf32>
    %385 = tpu.matmul %384, %383, %cst_242 {dimension_numbers = #tpu.dot_dimension_numbers<[1], [0], [0], [1], [0, 0, 1, 1], [], []>} : vector<64x128xbf16>, vector<128x256xbf16>, vector<64x256xf32> -> vector<64x256xf32>
    %c0_243 = arith.constant 0 : index
    %c0_244 = arith.constant 0 : index
    %c0_245 = arith.constant 0 : index
    %386 = vector.load %arg13[%c0_243, %c0_244, %c0_245] : memref<2x1x256xf32, #tpu.memory_space<vmem>>, vector<1x1x256xf32>
    %387 = vector.shape_cast %386 : vector<1x1x256xf32> to vector<1x256xf32>
    %388 = vector.broadcast %387 : vector<1x256xf32> to vector<64x256xf32>
    %389 = arith.addf %385, %388 : vector<64x256xf32>
    %390 = arith.mulf %389, %389 : vector<64x256xf32>
    %391 = arith.mulf %389, %390 : vector<64x256xf32>
    %cst_246 = arith.constant 4.471500e-02 : f32
    %392 = vector.broadcast %cst_246 : f32 to vector<64x256xf32>
    %393 = arith.mulf %392, %391 : vector<64x256xf32>
    %394 = arith.addf %389, %393 : vector<64x256xf32>
    %cst_247 = arith.constant 0.797884583 : f32
    %395 = vector.broadcast %cst_247 : f32 to vector<64x256xf32>
    %396 = arith.mulf %395, %394 : vector<64x256xf32>
    %397 = math.tanh %396 : vector<64x256xf32>
    %cst_248 = arith.constant 1.000000e+00 : f32
    %398 = vector.broadcast %cst_248 : f32 to vector<64x256xf32>
    %399 = arith.addf %398, %397 : vector<64x256xf32>
    %cst_249 = arith.constant 5.000000e-01 : f32
    %400 = vector.broadcast %cst_249 : f32 to vector<64x256xf32>
    %401 = arith.mulf %400, %399 : vector<64x256xf32>
    %402 = arith.mulf %389, %401 : vector<64x256xf32>
    %c0_250 = arith.constant 0 : index
    %c0_251 = arith.constant 0 : index
    %c0_252 = arith.constant 0 : index
    %403 = vector.load %arg14[%c0_250, %c0_251, %c0_252] : memref<2x256x128xbf16, #tpu.memory_space<vmem>>, vector<1x256x128xbf16>
    %404 = vector.shape_cast %403 : vector<1x256x128xbf16> to vector<256x128xbf16>
    %405 = arith.truncf %402 : vector<64x256xf32> to vector<64x256xbf16>
    %cst_253 = arith.constant dense<0.000000e+00> : vector<64x128xf32>
    %406 = tpu.matmul %405, %404, %cst_253 {dimension_numbers = #tpu.dot_dimension_numbers<[1], [0], [0], [1], [0, 0, 1, 1], [], []>} : vector<64x256xbf16>, vector<256x128xbf16>, vector<64x128xf32> -> vector<64x128xf32>
    %c0_254 = arith.constant 0 : index
    %c0_255 = arith.constant 0 : index
    %c0_256 = arith.constant 0 : index
    %407 = vector.load %arg15[%c0_254, %c0_255, %c0_256] : memref<2x1x128xf32, #tpu.memory_space<vmem>>, vector<1x1x128xf32>
    %408 = vector.shape_cast %407 : vector<1x1x128xf32> to vector<1x128xf32>
    %409 = vector.broadcast %408 : vector<1x128xf32> to vector<64x128xf32>
    %410 = arith.addf %406, %409 : vector<64x128xf32>
    %411 = arith.addf %410, %381 : vector<64x128xf32>
    %c0_257 = arith.constant 0 : index
    %c0_258 = arith.constant 0 : index
    %c0_259 = arith.constant 0 : index
    %412 = vector.load %arg16[%c0_257, %c0_258, %c0_259] : memref<2x1x128xf32, #tpu.memory_space<vmem>>, vector<1x1x128xf32>
    %413 = vector.shape_cast %412 : vector<1x1x128xf32> to vector<1x128xf32>
    %c0_260 = arith.constant 0 : index
    %c0_261 = arith.constant 0 : index
    %c0_262 = arith.constant 0 : index
    %414 = vector.load %arg17[%c0_260, %c0_261, %c0_262] : memref<2x1x128xf32, #tpu.memory_space<vmem>>, vector<1x1x128xf32>
    %415 = vector.shape_cast %414 : vector<1x1x128xf32> to vector<1x128xf32>
    %cst_263 = arith.constant dense<0.000000e+00> : vector<64xf32>
    %416 = vector.multi_reduction <add>, %411, %cst_263 [1] : vector<64x128xf32> to vector<64xf32>
    %417 = vector.shape_cast %416 : vector<64xf32> to vector<64x1xf32>
    %cst_264 = arith.constant 1.280000e+02 : f32
    %418 = vector.broadcast %cst_264 : f32 to vector<64x1xf32>
    %419 = arith.divf %417, %418 : vector<64x1xf32>
    %420 = vector.broadcast %419 : vector<64x1xf32> to vector<64x128xf32>
    %421 = arith.subf %411, %420 : vector<64x128xf32>
    %422 = arith.mulf %421, %421 : vector<64x128xf32>
    %cst_265 = arith.constant dense<0.000000e+00> : vector<64xf32>
    %423 = vector.multi_reduction <add>, %422, %cst_265 [1] : vector<64x128xf32> to vector<64xf32>
    %424 = vector.shape_cast %423 : vector<64xf32> to vector<64x1xf32>
    %cst_266 = arith.constant 1.280000e+02 : f32
    %425 = vector.broadcast %cst_266 : f32 to vector<64x1xf32>
    %426 = arith.divf %424, %425 : vector<64x1xf32>
    %427 = vector.broadcast %419 : vector<64x1xf32> to vector<64x128xf32>
    %428 = arith.subf %411, %427 : vector<64x128xf32>
    %cst_267 = arith.constant 9.99999996E-13 : f32
    %429 = vector.broadcast %cst_267 : f32 to vector<64x1xf32>
    %430 = arith.addf %426, %429 : vector<64x1xf32>
    %431 = math.rsqrt %430 : vector<64x1xf32>
    %432 = vector.broadcast %431 : vector<64x1xf32> to vector<64x128xf32>
    %433 = arith.mulf %428, %432 : vector<64x128xf32>
    %434 = vector.broadcast %413 : vector<1x128xf32> to vector<64x128xf32>
    %435 = arith.mulf %433, %434 : vector<64x128xf32>
    %436 = vector.broadcast %415 : vector<1x128xf32> to vector<64x128xf32>
    %437 = arith.addf %435, %436 : vector<64x128xf32>
    %c1 = arith.constant 1 : index
    %c0_268 = arith.constant 0 : index
    %c0_269 = arith.constant 0 : index
    %438 = vector.load %arg2[%c1, %c0_268, %c0_269] : memref<3x4x64xf32, #tpu.memory_space<vmem>>, vector<1x4x64xf32>
    %439 = vector.shape_cast %438 : vector<1x4x64xf32> to vector<4x64xf32>
    %cst_270 = arith.constant dense<0.000000e+00> : vector<4x128xf32>
    %440 = tpu.matmul %439, %437, %cst_270 {dimension_numbers = #tpu.dot_dimension_numbers<[1], [0], [0], [1], [0, 0, 1, 1], [], []>} : vector<4x64xf32>, vector<64x128xf32>, vector<4x128xf32> -> vector<4x128xf32>
    %441 = arith.addf %28, %440 : vector<4x128xf32>
    %c1_271 = arith.constant 1 : index
    %c0_272 = arith.constant 0 : index
    %c0_273 = arith.constant 0 : index
    %442 = vector.load %arg6[%c1_271, %c0_272, %c0_273] : memref<2x128x384xbf16, #tpu.memory_space<vmem>>, vector<1x128x384xbf16>
    %443 = vector.shape_cast %442 : vector<1x128x384xbf16> to vector<128x384xbf16>
    %444 = arith.truncf %437 : vector<64x128xf32> to vector<64x128xbf16>
    %cst_274 = arith.constant dense<0.000000e+00> : vector<64x384xf32>
    %445 = tpu.matmul %444, %443, %cst_274 {dimension_numbers = #tpu.dot_dimension_numbers<[1], [0], [0], [1], [0, 0, 1, 1], [], []>} : vector<64x128xbf16>, vector<128x384xbf16>, vector<64x384xf32> -> vector<64x384xf32>
    %c1_275 = arith.constant 1 : index
    %c0_276 = arith.constant 0 : index
    %c0_277 = arith.constant 0 : index
    %446 = vector.load %arg7[%c1_275, %c0_276, %c0_277] : memref<2x1x384xf32, #tpu.memory_space<vmem>>, vector<1x1x384xf32>
    %447 = vector.shape_cast %446 : vector<1x1x384xf32> to vector<1x384xf32>
    %448 = vector.broadcast %447 : vector<1x384xf32> to vector<64x384xf32>
    %449 = arith.addf %445, %448 : vector<64x384xf32>
    %c0_278 = arith.constant 0 : index
    %c0_279 = arith.constant 0 : index
    %450 = vector.load %arg21[%c0_278, %c0_279] : memref<64x384xf32, #tpu.memory_space<vmem>>, vector<64x384xf32>
    tpu.vector_store %arg21[%c0_278, %c0_279], %449 {strides = array<i32>} : memref<64x384xf32, #tpu.memory_space<vmem>>, vector<64x384xf32>,
    %451 = vector.extract_strided_slice %0 {offsets = [0, 0], sizes = [1, 16], strides = [1, 1]} : vector<4x16xf32> to vector<1x16xf32>
    %c0_280 = arith.constant 0 : index
    %c0_281 = arith.constant 0 : index
    %452 = vector.load %arg21[%c0_280, %c0_281] : memref<64x384xf32, #tpu.memory_space<vmem>>, vector<16x32xf32>
    %c0_282 = arith.constant 0 : index
    %c128_283 = arith.constant 128 : index
    %453 = vector.load %arg21[%c0_282, %c128_283] : memref<64x384xf32, #tpu.memory_space<vmem>>, vector<16x32xf32>
    %c0_284 = arith.constant 0 : index
    %c256_285 = arith.constant 256 : index
    %454 = vector.load %arg21[%c0_284, %c256_285] : memref<64x384xf32, #tpu.memory_space<vmem>>, vector<16x32xf32>
    %cst_286 = arith.constant dense<0.000000e+00> : vector<16x16xf32>
    %455 = tpu.matmul %452, %453, %cst_286 {dimension_numbers = #tpu.dot_dimension_numbers<[1], [1], [0], [0], [0, 0, 1, 0], [], []>} : vector<16x32xf32>, vector<16x32xf32>, vector<16x16xf32> -> vector<16x16xf32>
    %456 = vector.broadcast %451 : vector<1x16xf32> to vector<16x16xf32>
    %457 = arith.addf %455, %456 : vector<16x16xf32>
    %cst_287 = arith.constant dense<0xFF800000> : vector<16xf32>
    %458 = vector.multi_reduction <maximumf>, %457, %cst_287 [1] : vector<16x16xf32> to vector<16xf32>
    %cst_288 = arith.constant 0xFF800000 : f32
    %459 = vector.broadcast %cst_288 : f32 to vector<16xf32>
    %460 = arith.maximumf %459, %458 : vector<16xf32>
    %461 = vector.shape_cast %460 : vector<16xf32> to vector<16x1xf32>
    %462 = vector.broadcast %461 : vector<16x1xf32> to vector<16x16xf32>
    %463 = arith.subf %457, %462 : vector<16x16xf32>
    %464 = math.exp %463 : vector<16x16xf32>
    %cst_289 = arith.constant dense<0.000000e+00> : vector<16xf32>
    %465 = vector.multi_reduction <add>, %464, %cst_289 [1] : vector<16x16xf32> to vector<16xf32>
    %466 = vector.shape_cast %465 : vector<16xf32> to vector<16x1xf32>
    %467 = vector.broadcast %466 : vector<16x1xf32> to vector<16x16xf32>
    %468 = arith.divf %464, %467 : vector<16x16xf32>
    %cst_290 = arith.constant dense<0.000000e+00> : vector<16x32xf32>
    %469 = tpu.matmul %468, %454, %cst_290 {dimension_numbers = #tpu.dot_dimension_numbers<[1], [0], [0], [1], [0, 0, 1, 1], [], []>} : vector<16x16xf32>, vector<16x32xf32>, vector<16x32xf32> -> vector<16x32xf32>
    %c0_291 = arith.constant 0 : index
    %c0_292 = arith.constant 0 : index
    %470 = vector.load %arg22[%c0_291, %c0_292] : memref<64x128xf32, #tpu.memory_space<vmem>>, vector<16x32xf32>
    tpu.vector_store %arg22[%c0_291, %c0_292], %469 {strides = array<i32>} : memref<64x128xf32, #tpu.memory_space<vmem>>, vector<16x32xf32>,
    %c0_293 = arith.constant 0 : index
    %c32_294 = arith.constant 32 : index
    %471 = vector.load %arg21[%c0_293, %c32_294] : memref<64x384xf32, #tpu.memory_space<vmem>>, vector<16x32xf32>
    %c0_295 = arith.constant 0 : index
    %c160_296 = arith.constant 160 : index
    %472 = vector.load %arg21[%c0_295, %c160_296] : memref<64x384xf32, #tpu.memory_space<vmem>>, vector<16x32xf32>
    %c0_297 = arith.constant 0 : index
    %c288_298 = arith.constant 288 : index
    %473 = vector.load %arg21[%c0_297, %c288_298] : memref<64x384xf32, #tpu.memory_space<vmem>>, vector<16x32xf32>
    %cst_299 = arith.constant dense<0.000000e+00> : vector<16x16xf32>
    %474 = tpu.matmul %471, %472, %cst_299 {dimension_numbers = #tpu.dot_dimension_numbers<[1], [1], [0], [0], [0, 0, 1, 0], [], []>} : vector<16x32xf32>, vector<16x32xf32>, vector<16x16xf32> -> vector<16x16xf32>
    %475 = vector.broadcast %451 : vector<1x16xf32> to vector<16x16xf32>
    %476 = arith.addf %474, %475 : vector<16x16xf32>
    %cst_300 = arith.constant dense<0xFF800000> : vector<16xf32>
    %477 = vector.multi_reduction <maximumf>, %476, %cst_300 [1] : vector<16x16xf32> to vector<16xf32>
    %cst_301 = arith.constant 0xFF800000 : f32
    %478 = vector.broadcast %cst_301 : f32 to vector<16xf32>
    %479 = arith.maximumf %478, %477 : vector<16xf32>
    %480 = vector.shape_cast %479 : vector<16xf32> to vector<16x1xf32>
    %481 = vector.broadcast %480 : vector<16x1xf32> to vector<16x16xf32>
    %482 = arith.subf %476, %481 : vector<16x16xf32>
    %483 = math.exp %482 : vector<16x16xf32>
    %cst_302 = arith.constant dense<0.000000e+00> : vector<16xf32>
    %484 = vector.multi_reduction <add>, %483, %cst_302 [1] : vector<16x16xf32> to vector<16xf32>
    %485 = vector.shape_cast %484 : vector<16xf32> to vector<16x1xf32>
    %486 = vector.broadcast %485 : vector<16x1xf32> to vector<16x16xf32>
    %487 = arith.divf %483, %486 : vector<16x16xf32>
    %cst_303 = arith.constant dense<0.000000e+00> : vector<16x32xf32>
    %488 = tpu.matmul %487, %473, %cst_303 {dimension_numbers = #tpu.dot_dimension_numbers<[1], [0], [0], [1], [0, 0, 1, 1], [], []>} : vector<16x16xf32>, vector<16x32xf32>, vector<16x32xf32> -> vector<16x32xf32>
    %c0_304 = arith.constant 0 : index
    %c32_305 = arith.constant 32 : index
    %489 = vector.load %arg22[%c0_304, %c32_305] : memref<64x128xf32, #tpu.memory_space<vmem>>, vector<16x32xf32>
    tpu.vector_store %arg22[%c0_304, %c32_305], %488 {strides = array<i32>} : memref<64x128xf32, #tpu.memory_space<vmem>>, vector<16x32xf32>,
    %c0_306 = arith.constant 0 : index
    %c64_307 = arith.constant 64 : index
    %490 = vector.load %arg21[%c0_306, %c64_307] : memref<64x384xf32, #tpu.memory_space<vmem>>, vector<16x32xf32>
    %c0_308 = arith.constant 0 : index
    %c192_309 = arith.constant 192 : index
    %491 = vector.load %arg21[%c0_308, %c192_309] : memref<64x384xf32, #tpu.memory_space<vmem>>, vector<16x32xf32>
    %c0_310 = arith.constant 0 : index
    %c320_311 = arith.constant 320 : index
    %492 = vector.load %arg21[%c0_310, %c320_311] : memref<64x384xf32, #tpu.memory_space<vmem>>, vector<16x32xf32>
    %cst_312 = arith.constant dense<0.000000e+00> : vector<16x16xf32>
    %493 = tpu.matmul %490, %491, %cst_312 {dimension_numbers = #tpu.dot_dimension_numbers<[1], [1], [0], [0], [0, 0, 1, 0], [], []>} : vector<16x32xf32>, vector<16x32xf32>, vector<16x16xf32> -> vector<16x16xf32>
    %494 = vector.broadcast %451 : vector<1x16xf32> to vector<16x16xf32>
    %495 = arith.addf %493, %494 : vector<16x16xf32>
    %cst_313 = arith.constant dense<0xFF800000> : vector<16xf32>
    %496 = vector.multi_reduction <maximumf>, %495, %cst_313 [1] : vector<16x16xf32> to vector<16xf32>
    %cst_314 = arith.constant 0xFF800000 : f32
    %497 = vector.broadcast %cst_314 : f32 to vector<16xf32>
    %498 = arith.maximumf %497, %496 : vector<16xf32>
    %499 = vector.shape_cast %498 : vector<16xf32> to vector<16x1xf32>
    %500 = vector.broadcast %499 : vector<16x1xf32> to vector<16x16xf32>
    %501 = arith.subf %495, %500 : vector<16x16xf32>
    %502 = math.exp %501 : vector<16x16xf32>
    %cst_315 = arith.constant dense<0.000000e+00> : vector<16xf32>
    %503 = vector.multi_reduction <add>, %502, %cst_315 [1] : vector<16x16xf32> to vector<16xf32>
    %504 = vector.shape_cast %503 : vector<16xf32> to vector<16x1xf32>
    %505 = vector.broadcast %504 : vector<16x1xf32> to vector<16x16xf32>
    %506 = arith.divf %502, %505 : vector<16x16xf32>
    %cst_316 = arith.constant dense<0.000000e+00> : vector<16x32xf32>
    %507 = tpu.matmul %506, %492, %cst_316 {dimension_numbers = #tpu.dot_dimension_numbers<[1], [0], [0], [1], [0, 0, 1, 1], [], []>} : vector<16x16xf32>, vector<16x32xf32>, vector<16x32xf32> -> vector<16x32xf32>
    %c0_317 = arith.constant 0 : index
    %c64_318 = arith.constant 64 : index
    %508 = vector.load %arg22[%c0_317, %c64_318] : memref<64x128xf32, #tpu.memory_space<vmem>>, vector<16x32xf32>
    tpu.vector_store %arg22[%c0_317, %c64_318], %507 {strides = array<i32>} : memref<64x128xf32, #tpu.memory_space<vmem>>, vector<16x32xf32>,
    %c0_319 = arith.constant 0 : index
    %c96_320 = arith.constant 96 : index
    %509 = vector.load %arg21[%c0_319, %c96_320] : memref<64x384xf32, #tpu.memory_space<vmem>>, vector<16x32xf32>
    %c0_321 = arith.constant 0 : index
    %c224_322 = arith.constant 224 : index
    %510 = vector.load %arg21[%c0_321, %c224_322] : memref<64x384xf32, #tpu.memory_space<vmem>>, vector<16x32xf32>
    %c0_323 = arith.constant 0 : index
    %c352_324 = arith.constant 352 : index
    %511 = vector.load %arg21[%c0_323, %c352_324] : memref<64x384xf32, #tpu.memory_space<vmem>>, vector<16x32xf32>
    %cst_325 = arith.constant dense<0.000000e+00> : vector<16x16xf32>
    %512 = tpu.matmul %509, %510, %cst_325 {dimension_numbers = #tpu.dot_dimension_numbers<[1], [1], [0], [0], [0, 0, 1, 0], [], []>} : vector<16x32xf32>, vector<16x32xf32>, vector<16x16xf32> -> vector<16x16xf32>
    %513 = vector.broadcast %451 : vector<1x16xf32> to vector<16x16xf32>
    %514 = arith.addf %512, %513 : vector<16x16xf32>
    %cst_326 = arith.constant dense<0xFF800000> : vector<16xf32>
    %515 = vector.multi_reduction <maximumf>, %514, %cst_326 [1] : vector<16x16xf32> to vector<16xf32>
    %cst_327 = arith.constant 0xFF800000 : f32
    %516 = vector.broadcast %cst_327 : f32 to vector<16xf32>
    %517 = arith.maximumf %516, %515 : vector<16xf32>
    %518 = vector.shape_cast %517 : vector<16xf32> to vector<16x1xf32>
    %519 = vector.broadcast %518 : vector<16x1xf32> to vector<16x16xf32>
    %520 = arith.subf %514, %519 : vector<16x16xf32>
    %521 = math.exp %520 : vector<16x16xf32>
    %cst_328 = arith.constant dense<0.000000e+00> : vector<16xf32>
    %522 = vector.multi_reduction <add>, %521, %cst_328 [1] : vector<16x16xf32> to vector<16xf32>
    %523 = vector.shape_cast %522 : vector<16xf32> to vector<16x1xf32>
    %524 = vector.broadcast %523 : vector<16x1xf32> to vector<16x16xf32>
    %525 = arith.divf %521, %524 : vector<16x16xf32>
    %cst_329 = arith.constant dense<0.000000e+00> : vector<16x32xf32>
    %526 = tpu.matmul %525, %511, %cst_329 {dimension_numbers = #tpu.dot_dimension_numbers<[1], [0], [0], [1], [0, 0, 1, 1], [], []>} : vector<16x16xf32>, vector<16x32xf32>, vector<16x32xf32> -> vector<16x32xf32>
    %c0_330 = arith.constant 0 : index
    %c96_331 = arith.constant 96 : index
    %527 = vector.load %arg22[%c0_330, %c96_331] : memref<64x128xf32, #tpu.memory_space<vmem>>, vector<16x32xf32>
    tpu.vector_store %arg22[%c0_330, %c96_331], %526 {strides = array<i32>} : memref<64x128xf32, #tpu.memory_space<vmem>>, vector<16x32xf32>,
    %528 = vector.extract_strided_slice %0 {offsets = [1, 0], sizes = [1, 16], strides = [1, 1]} : vector<4x16xf32> to vector<1x16xf32>
    %c16_332 = arith.constant 16 : index
    %c0_333 = arith.constant 0 : index
    %529 = vector.load %arg21[%c16_332, %c0_333] : memref<64x384xf32, #tpu.memory_space<vmem>>, vector<16x32xf32>
    %c16_334 = arith.constant 16 : index
    %c128_335 = arith.constant 128 : index
    %530 = vector.load %arg21[%c16_334, %c128_335] : memref<64x384xf32, #tpu.memory_space<vmem>>, vector<16x32xf32>
    %c16_336 = arith.constant 16 : index
    %c256_337 = arith.constant 256 : index
    %531 = vector.load %arg21[%c16_336, %c256_337] : memref<64x384xf32, #tpu.memory_space<vmem>>, vector<16x32xf32>
    %cst_338 = arith.constant dense<0.000000e+00> : vector<16x16xf32>
    %532 = tpu.matmul %529, %530, %cst_338 {dimension_numbers = #tpu.dot_dimension_numbers<[1], [1], [0], [0], [0, 0, 1, 0], [], []>} : vector<16x32xf32>, vector<16x32xf32>, vector<16x16xf32> -> vector<16x16xf32>
    %533 = vector.broadcast %528 : vector<1x16xf32> to vector<16x16xf32>
    %534 = arith.addf %532, %533 : vector<16x16xf32>
    %cst_339 = arith.constant dense<0xFF800000> : vector<16xf32>
    %535 = vector.multi_reduction <maximumf>, %534, %cst_339 [1] : vector<16x16xf32> to vector<16xf32>
    %cst_340 = arith.constant 0xFF800000 : f32
    %536 = vector.broadcast %cst_340 : f32 to vector<16xf32>
    %537 = arith.maximumf %536, %535 : vector<16xf32>
    %538 = vector.shape_cast %537 : vector<16xf32> to vector<16x1xf32>
    %539 = vector.broadcast %538 : vector<16x1xf32> to vector<16x16xf32>
    %540 = arith.subf %534, %539 : vector<16x16xf32>
    %541 = math.exp %540 : vector<16x16xf32>
    %cst_341 = arith.constant dense<0.000000e+00> : vector<16xf32>
    %542 = vector.multi_reduction <add>, %541, %cst_341 [1] : vector<16x16xf32> to vector<16xf32>
    %543 = vector.shape_cast %542 : vector<16xf32> to vector<16x1xf32>
    %544 = vector.broadcast %543 : vector<16x1xf32> to vector<16x16xf32>
    %545 = arith.divf %541, %544 : vector<16x16xf32>
    %cst_342 = arith.constant dense<0.000000e+00> : vector<16x32xf32>
    %546 = tpu.matmul %545, %531, %cst_342 {dimension_numbers = #tpu.dot_dimension_numbers<[1], [0], [0], [1], [0, 0, 1, 1], [], []>} : vector<16x16xf32>, vector<16x32xf32>, vector<16x32xf32> -> vector<16x32xf32>
    %c16_343 = arith.constant 16 : index
    %c0_344 = arith.constant 0 : index
    %547 = vector.load %arg22[%c16_343, %c0_344] : memref<64x128xf32, #tpu.memory_space<vmem>>, vector<16x32xf32>
    tpu.vector_store %arg22[%c16_343, %c0_344], %546 {strides = array<i32>} : memref<64x128xf32, #tpu.memory_space<vmem>>, vector<16x32xf32>,
    %c16_345 = arith.constant 16 : index
    %c32_346 = arith.constant 32 : index
    %548 = vector.load %arg21[%c16_345, %c32_346] : memref<64x384xf32, #tpu.memory_space<vmem>>, vector<16x32xf32>
    %c16_347 = arith.constant 16 : index
    %c160_348 = arith.constant 160 : index
    %549 = vector.load %arg21[%c16_347, %c160_348] : memref<64x384xf32, #tpu.memory_space<vmem>>, vector<16x32xf32>
    %c16_349 = arith.constant 16 : index
    %c288_350 = arith.constant 288 : index
    %550 = vector.load %arg21[%c16_349, %c288_350] : memref<64x384xf32, #tpu.memory_space<vmem>>, vector<16x32xf32>
    %cst_351 = arith.constant dense<0.000000e+00> : vector<16x16xf32>
    %551 = tpu.matmul %548, %549, %cst_351 {dimension_numbers = #tpu.dot_dimension_numbers<[1], [1], [0], [0], [0, 0, 1, 0], [], []>} : vector<16x32xf32>, vector<16x32xf32>, vector<16x16xf32> -> vector<16x16xf32>
    %552 = vector.broadcast %528 : vector<1x16xf32> to vector<16x16xf32>
    %553 = arith.addf %551, %552 : vector<16x16xf32>
    %cst_352 = arith.constant dense<0xFF800000> : vector<16xf32>
    %554 = vector.multi_reduction <maximumf>, %553, %cst_352 [1] : vector<16x16xf32> to vector<16xf32>
    %cst_353 = arith.constant 0xFF800000 : f32
    %555 = vector.broadcast %cst_353 : f32 to vector<16xf32>
    %556 = arith.maximumf %555, %554 : vector<16xf32>
    %557 = vector.shape_cast %556 : vector<16xf32> to vector<16x1xf32>
    %558 = vector.broadcast %557 : vector<16x1xf32> to vector<16x16xf32>
    %559 = arith.subf %553, %558 : vector<16x16xf32>
    %560 = math.exp %559 : vector<16x16xf32>
    %cst_354 = arith.constant dense<0.000000e+00> : vector<16xf32>
    %561 = vector.multi_reduction <add>, %560, %cst_354 [1] : vector<16x16xf32> to vector<16xf32>
    %562 = vector.shape_cast %561 : vector<16xf32> to vector<16x1xf32>
    %563 = vector.broadcast %562 : vector<16x1xf32> to vector<16x16xf32>
    %564 = arith.divf %560, %563 : vector<16x16xf32>
    %cst_355 = arith.constant dense<0.000000e+00> : vector<16x32xf32>
    %565 = tpu.matmul %564, %550, %cst_355 {dimension_numbers = #tpu.dot_dimension_numbers<[1], [0], [0], [1], [0, 0, 1, 1], [], []>} : vector<16x16xf32>, vector<16x32xf32>, vector<16x32xf32> -> vector<16x32xf32>
    %c16_356 = arith.constant 16 : index
    %c32_357 = arith.constant 32 : index
    %566 = vector.load %arg22[%c16_356, %c32_357] : memref<64x128xf32, #tpu.memory_space<vmem>>, vector<16x32xf32>
    tpu.vector_store %arg22[%c16_356, %c32_357], %565 {strides = array<i32>} : memref<64x128xf32, #tpu.memory_space<vmem>>, vector<16x32xf32>,
    %c16_358 = arith.constant 16 : index
    %c64_359 = arith.constant 64 : index
    %567 = vector.load %arg21[%c16_358, %c64_359] : memref<64x384xf32, #tpu.memory_space<vmem>>, vector<16x32xf32>
    %c16_360 = arith.constant 16 : index
    %c192_361 = arith.constant 192 : index
    %568 = vector.load %arg21[%c16_360, %c192_361] : memref<64x384xf32, #tpu.memory_space<vmem>>, vector<16x32xf32>
    %c16_362 = arith.constant 16 : index
    %c320_363 = arith.constant 320 : index
    %569 = vector.load %arg21[%c16_362, %c320_363] : memref<64x384xf32, #tpu.memory_space<vmem>>, vector<16x32xf32>
    %cst_364 = arith.constant dense<0.000000e+00> : vector<16x16xf32>
    %570 = tpu.matmul %567, %568, %cst_364 {dimension_numbers = #tpu.dot_dimension_numbers<[1], [1], [0], [0], [0, 0, 1, 0], [], []>} : vector<16x32xf32>, vector<16x32xf32>, vector<16x16xf32> -> vector<16x16xf32>
    %571 = vector.broadcast %528 : vector<1x16xf32> to vector<16x16xf32>
    %572 = arith.addf %570, %571 : vector<16x16xf32>
    %cst_365 = arith.constant dense<0xFF800000> : vector<16xf32>
    %573 = vector.multi_reduction <maximumf>, %572, %cst_365 [1] : vector<16x16xf32> to vector<16xf32>
    %cst_366 = arith.constant 0xFF800000 : f32
    %574 = vector.broadcast %cst_366 : f32 to vector<16xf32>
    %575 = arith.maximumf %574, %573 : vector<16xf32>
    %576 = vector.shape_cast %575 : vector<16xf32> to vector<16x1xf32>
    %577 = vector.broadcast %576 : vector<16x1xf32> to vector<16x16xf32>
    %578 = arith.subf %572, %577 : vector<16x16xf32>
    %579 = math.exp %578 : vector<16x16xf32>
    %cst_367 = arith.constant dense<0.000000e+00> : vector<16xf32>
    %580 = vector.multi_reduction <add>, %579, %cst_367 [1] : vector<16x16xf32> to vector<16xf32>
    %581 = vector.shape_cast %580 : vector<16xf32> to vector<16x1xf32>
    %582 = vector.broadcast %581 : vector<16x1xf32> to vector<16x16xf32>
    %583 = arith.divf %579, %582 : vector<16x16xf32>
    %cst_368 = arith.constant dense<0.000000e+00> : vector<16x32xf32>
    %584 = tpu.matmul %583, %569, %cst_368 {dimension_numbers = #tpu.dot_dimension_numbers<[1], [0], [0], [1], [0, 0, 1, 1], [], []>} : vector<16x16xf32>, vector<16x32xf32>, vector<16x32xf32> -> vector<16x32xf32>
    %c16_369 = arith.constant 16 : index
    %c64_370 = arith.constant 64 : index
    %585 = vector.load %arg22[%c16_369, %c64_370] : memref<64x128xf32, #tpu.memory_space<vmem>>, vector<16x32xf32>
    tpu.vector_store %arg22[%c16_369, %c64_370], %584 {strides = array<i32>} : memref<64x128xf32, #tpu.memory_space<vmem>>, vector<16x32xf32>,
    %c16_371 = arith.constant 16 : index
    %c96_372 = arith.constant 96 : index
    %586 = vector.load %arg21[%c16_371, %c96_372] : memref<64x384xf32, #tpu.memory_space<vmem>>, vector<16x32xf32>
    %c16_373 = arith.constant 16 : index
    %c224_374 = arith.constant 224 : index
    %587 = vector.load %arg21[%c16_373, %c224_374] : memref<64x384xf32, #tpu.memory_space<vmem>>, vector<16x32xf32>
    %c16_375 = arith.constant 16 : index
    %c352_376 = arith.constant 352 : index
    %588 = vector.load %arg21[%c16_375, %c352_376] : memref<64x384xf32, #tpu.memory_space<vmem>>, vector<16x32xf32>
    %cst_377 = arith.constant dense<0.000000e+00> : vector<16x16xf32>
    %589 = tpu.matmul %586, %587, %cst_377 {dimension_numbers = #tpu.dot_dimension_numbers<[1], [1], [0], [0], [0, 0, 1, 0], [], []>} : vector<16x32xf32>, vector<16x32xf32>, vector<16x16xf32> -> vector<16x16xf32>
    %590 = vector.broadcast %528 : vector<1x16xf32> to vector<16x16xf32>
    %591 = arith.addf %589, %590 : vector<16x16xf32>
    %cst_378 = arith.constant dense<0xFF800000> : vector<16xf32>
    %592 = vector.multi_reduction <maximumf>, %591, %cst_378 [1] : vector<16x16xf32> to vector<16xf32>
    %cst_379 = arith.constant 0xFF800000 : f32
    %593 = vector.broadcast %cst_379 : f32 to vector<16xf32>
    %594 = arith.maximumf %593, %592 : vector<16xf32>
    %595 = vector.shape_cast %594 : vector<16xf32> to vector<16x1xf32>
    %596 = vector.broadcast %595 : vector<16x1xf32> to vector<16x16xf32>
    %597 = arith.subf %591, %596 : vector<16x16xf32>
    %598 = math.exp %597 : vector<16x16xf32>
    %cst_380 = arith.constant dense<0.000000e+00> : vector<16xf32>
    %599 = vector.multi_reduction <add>, %598, %cst_380 [1] : vector<16x16xf32> to vector<16xf32>
    %600 = vector.shape_cast %599 : vector<16xf32> to vector<16x1xf32>
    %601 = vector.broadcast %600 : vector<16x1xf32> to vector<16x16xf32>
    %602 = arith.divf %598, %601 : vector<16x16xf32>
    %cst_381 = arith.constant dense<0.000000e+00> : vector<16x32xf32>
    %603 = tpu.matmul %602, %588, %cst_381 {dimension_numbers = #tpu.dot_dimension_numbers<[1], [0], [0], [1], [0, 0, 1, 1], [], []>} : vector<16x16xf32>, vector<16x32xf32>, vector<16x32xf32> -> vector<16x32xf32>
    %c16_382 = arith.constant 16 : index
    %c96_383 = arith.constant 96 : index
    %604 = vector.load %arg22[%c16_382, %c96_383] : memref<64x128xf32, #tpu.memory_space<vmem>>, vector<16x32xf32>
    tpu.vector_store %arg22[%c16_382, %c96_383], %603 {strides = array<i32>} : memref<64x128xf32, #tpu.memory_space<vmem>>, vector<16x32xf32>,
    %605 = vector.extract_strided_slice %0 {offsets = [2, 0], sizes = [1, 16], strides = [1, 1]} : vector<4x16xf32> to vector<1x16xf32>
    %c32_384 = arith.constant 32 : index
    %c0_385 = arith.constant 0 : index
    %606 = vector.load %arg21[%c32_384, %c0_385] : memref<64x384xf32, #tpu.memory_space<vmem>>, vector<16x32xf32>
    %c32_386 = arith.constant 32 : index
    %c128_387 = arith.constant 128 : index
    %607 = vector.load %arg21[%c32_386, %c128_387] : memref<64x384xf32, #tpu.memory_space<vmem>>, vector<16x32xf32>
    %c32_388 = arith.constant 32 : index
    %c256_389 = arith.constant 256 : index
    %608 = vector.load %arg21[%c32_388, %c256_389] : memref<64x384xf32, #tpu.memory_space<vmem>>, vector<16x32xf32>
    %cst_390 = arith.constant dense<0.000000e+00> : vector<16x16xf32>
    %609 = tpu.matmul %606, %607, %cst_390 {dimension_numbers = #tpu.dot_dimension_numbers<[1], [1], [0], [0], [0, 0, 1, 0], [], []>} : vector<16x32xf32>, vector<16x32xf32>, vector<16x16xf32> -> vector<16x16xf32>
    %610 = vector.broadcast %605 : vector<1x16xf32> to vector<16x16xf32>
    %611 = arith.addf %609, %610 : vector<16x16xf32>
    %cst_391 = arith.constant dense<0xFF800000> : vector<16xf32>
    %612 = vector.multi_reduction <maximumf>, %611, %cst_391 [1] : vector<16x16xf32> to vector<16xf32>
    %cst_392 = arith.constant 0xFF800000 : f32
    %613 = vector.broadcast %cst_392 : f32 to vector<16xf32>
    %614 = arith.maximumf %613, %612 : vector<16xf32>
    %615 = vector.shape_cast %614 : vector<16xf32> to vector<16x1xf32>
    %616 = vector.broadcast %615 : vector<16x1xf32> to vector<16x16xf32>
    %617 = arith.subf %611, %616 : vector<16x16xf32>
    %618 = math.exp %617 : vector<16x16xf32>
    %cst_393 = arith.constant dense<0.000000e+00> : vector<16xf32>
    %619 = vector.multi_reduction <add>, %618, %cst_393 [1] : vector<16x16xf32> to vector<16xf32>
    %620 = vector.shape_cast %619 : vector<16xf32> to vector<16x1xf32>
    %621 = vector.broadcast %620 : vector<16x1xf32> to vector<16x16xf32>
    %622 = arith.divf %618, %621 : vector<16x16xf32>
    %cst_394 = arith.constant dense<0.000000e+00> : vector<16x32xf32>
    %623 = tpu.matmul %622, %608, %cst_394 {dimension_numbers = #tpu.dot_dimension_numbers<[1], [0], [0], [1], [0, 0, 1, 1], [], []>} : vector<16x16xf32>, vector<16x32xf32>, vector<16x32xf32> -> vector<16x32xf32>
    %c32_395 = arith.constant 32 : index
    %c0_396 = arith.constant 0 : index
    %624 = vector.load %arg22[%c32_395, %c0_396] : memref<64x128xf32, #tpu.memory_space<vmem>>, vector<16x32xf32>
    tpu.vector_store %arg22[%c32_395, %c0_396], %623 {strides = array<i32>} : memref<64x128xf32, #tpu.memory_space<vmem>>, vector<16x32xf32>,
    %c32_397 = arith.constant 32 : index
    %c32_398 = arith.constant 32 : index
    %625 = vector.load %arg21[%c32_397, %c32_398] : memref<64x384xf32, #tpu.memory_space<vmem>>, vector<16x32xf32>
    %c32_399 = arith.constant 32 : index
    %c160_400 = arith.constant 160 : index
    %626 = vector.load %arg21[%c32_399, %c160_400] : memref<64x384xf32, #tpu.memory_space<vmem>>, vector<16x32xf32>
    %c32_401 = arith.constant 32 : index
    %c288_402 = arith.constant 288 : index
    %627 = vector.load %arg21[%c32_401, %c288_402] : memref<64x384xf32, #tpu.memory_space<vmem>>, vector<16x32xf32>
    %cst_403 = arith.constant dense<0.000000e+00> : vector<16x16xf32>
    %628 = tpu.matmul %625, %626, %cst_403 {dimension_numbers = #tpu.dot_dimension_numbers<[1], [1], [0], [0], [0, 0, 1, 0], [], []>} : vector<16x32xf32>, vector<16x32xf32>, vector<16x16xf32> -> vector<16x16xf32>
    %629 = vector.broadcast %605 : vector<1x16xf32> to vector<16x16xf32>
    %630 = arith.addf %628, %629 : vector<16x16xf32>
    %cst_404 = arith.constant dense<0xFF800000> : vector<16xf32>
    %631 = vector.multi_reduction <maximumf>, %630, %cst_404 [1] : vector<16x16xf32> to vector<16xf32>
    %cst_405 = arith.constant 0xFF800000 : f32
    %632 = vector.broadcast %cst_405 : f32 to vector<16xf32>
    %633 = arith.maximumf %632, %631 : vector<16xf32>
    %634 = vector.shape_cast %633 : vector<16xf32> to vector<16x1xf32>
    %635 = vector.broadcast %634 : vector<16x1xf32> to vector<16x16xf32>
    %636 = arith.subf %630, %635 : vector<16x16xf32>
    %637 = math.exp %636 : vector<16x16xf32>
    %cst_406 = arith.constant dense<0.000000e+00> : vector<16xf32>
    %638 = vector.multi_reduction <add>, %637, %cst_406 [1] : vector<16x16xf32> to vector<16xf32>
    %639 = vector.shape_cast %638 : vector<16xf32> to vector<16x1xf32>
    %640 = vector.broadcast %639 : vector<16x1xf32> to vector<16x16xf32>
    %641 = arith.divf %637, %640 : vector<16x16xf32>
    %cst_407 = arith.constant dense<0.000000e+00> : vector<16x32xf32>
    %642 = tpu.matmul %641, %627, %cst_407 {dimension_numbers = #tpu.dot_dimension_numbers<[1], [0], [0], [1], [0, 0, 1, 1], [], []>} : vector<16x16xf32>, vector<16x32xf32>, vector<16x32xf32> -> vector<16x32xf32>
    %c32_408 = arith.constant 32 : index
    %c32_409 = arith.constant 32 : index
    %643 = vector.load %arg22[%c32_408, %c32_409] : memref<64x128xf32, #tpu.memory_space<vmem>>, vector<16x32xf32>
    tpu.vector_store %arg22[%c32_408, %c32_409], %642 {strides = array<i32>} : memref<64x128xf32, #tpu.memory_space<vmem>>, vector<16x32xf32>,
    %c32_410 = arith.constant 32 : index
    %c64_411 = arith.constant 64 : index
    %644 = vector.load %arg21[%c32_410, %c64_411] : memref<64x384xf32, #tpu.memory_space<vmem>>, vector<16x32xf32>
    %c32_412 = arith.constant 32 : index
    %c192_413 = arith.constant 192 : index
    %645 = vector.load %arg21[%c32_412, %c192_413] : memref<64x384xf32, #tpu.memory_space<vmem>>, vector<16x32xf32>
    %c32_414 = arith.constant 32 : index
    %c320_415 = arith.constant 320 : index
    %646 = vector.load %arg21[%c32_414, %c320_415] : memref<64x384xf32, #tpu.memory_space<vmem>>, vector<16x32xf32>
    %cst_416 = arith.constant dense<0.000000e+00> : vector<16x16xf32>
    %647 = tpu.matmul %644, %645, %cst_416 {dimension_numbers = #tpu.dot_dimension_numbers<[1], [1], [0], [0], [0, 0, 1, 0], [], []>} : vector<16x32xf32>, vector<16x32xf32>, vector<16x16xf32> -> vector<16x16xf32>
    %648 = vector.broadcast %605 : vector<1x16xf32> to vector<16x16xf32>
    %649 = arith.addf %647, %648 : vector<16x16xf32>
    %cst_417 = arith.constant dense<0xFF800000> : vector<16xf32>
    %650 = vector.multi_reduction <maximumf>, %649, %cst_417 [1] : vector<16x16xf32> to vector<16xf32>
    %cst_418 = arith.constant 0xFF800000 : f32
    %651 = vector.broadcast %cst_418 : f32 to vector<16xf32>
    %652 = arith.maximumf %651, %650 : vector<16xf32>
    %653 = vector.shape_cast %652 : vector<16xf32> to vector<16x1xf32>
    %654 = vector.broadcast %653 : vector<16x1xf32> to vector<16x16xf32>
    %655 = arith.subf %649, %654 : vector<16x16xf32>
    %656 = math.exp %655 : vector<16x16xf32>
    %cst_419 = arith.constant dense<0.000000e+00> : vector<16xf32>
    %657 = vector.multi_reduction <add>, %656, %cst_419 [1] : vector<16x16xf32> to vector<16xf32>
    %658 = vector.shape_cast %657 : vector<16xf32> to vector<16x1xf32>
    %659 = vector.broadcast %658 : vector<16x1xf32> to vector<16x16xf32>
    %660 = arith.divf %656, %659 : vector<16x16xf32>
    %cst_420 = arith.constant dense<0.000000e+00> : vector<16x32xf32>
    %661 = tpu.matmul %660, %646, %cst_420 {dimension_numbers = #tpu.dot_dimension_numbers<[1], [0], [0], [1], [0, 0, 1, 1], [], []>} : vector<16x16xf32>, vector<16x32xf32>, vector<16x32xf32> -> vector<16x32xf32>
    %c32_421 = arith.constant 32 : index
    %c64_422 = arith.constant 64 : index
    %662 = vector.load %arg22[%c32_421, %c64_422] : memref<64x128xf32, #tpu.memory_space<vmem>>, vector<16x32xf32>
    tpu.vector_store %arg22[%c32_421, %c64_422], %661 {strides = array<i32>} : memref<64x128xf32, #tpu.memory_space<vmem>>, vector<16x32xf32>,
    %c32_423 = arith.constant 32 : index
    %c96_424 = arith.constant 96 : index
    %663 = vector.load %arg21[%c32_423, %c96_424] : memref<64x384xf32, #tpu.memory_space<vmem>>, vector<16x32xf32>
    %c32_425 = arith.constant 32 : index
    %c224_426 = arith.constant 224 : index
    %664 = vector.load %arg21[%c32_425, %c224_426] : memref<64x384xf32, #tpu.memory_space<vmem>>, vector<16x32xf32>
    %c32_427 = arith.constant 32 : index
    %c352_428 = arith.constant 352 : index
    %665 = vector.load %arg21[%c32_427, %c352_428] : memref<64x384xf32, #tpu.memory_space<vmem>>, vector<16x32xf32>
    %cst_429 = arith.constant dense<0.000000e+00> : vector<16x16xf32>
    %666 = tpu.matmul %663, %664, %cst_429 {dimension_numbers = #tpu.dot_dimension_numbers<[1], [1], [0], [0], [0, 0, 1, 0], [], []>} : vector<16x32xf32>, vector<16x32xf32>, vector<16x16xf32> -> vector<16x16xf32>
    %667 = vector.broadcast %605 : vector<1x16xf32> to vector<16x16xf32>
    %668 = arith.addf %666, %667 : vector<16x16xf32>
    %cst_430 = arith.constant dense<0xFF800000> : vector<16xf32>
    %669 = vector.multi_reduction <maximumf>, %668, %cst_430 [1] : vector<16x16xf32> to vector<16xf32>
    %cst_431 = arith.constant 0xFF800000 : f32
    %670 = vector.broadcast %cst_431 : f32 to vector<16xf32>
    %671 = arith.maximumf %670, %669 : vector<16xf32>
    %672 = vector.shape_cast %671 : vector<16xf32> to vector<16x1xf32>
    %673 = vector.broadcast %672 : vector<16x1xf32> to vector<16x16xf32>
    %674 = arith.subf %668, %673 : vector<16x16xf32>
    %675 = math.exp %674 : vector<16x16xf32>
    %cst_432 = arith.constant dense<0.000000e+00> : vector<16xf32>
    %676 = vector.multi_reduction <add>, %675, %cst_432 [1] : vector<16x16xf32> to vector<16xf32>
    %677 = vector.shape_cast %676 : vector<16xf32> to vector<16x1xf32>
    %678 = vector.broadcast %677 : vector<16x1xf32> to vector<16x16xf32>
    %679 = arith.divf %675, %678 : vector<16x16xf32>
    %cst_433 = arith.constant dense<0.000000e+00> : vector<16x32xf32>
    %680 = tpu.matmul %679, %665, %cst_433 {dimension_numbers = #tpu.dot_dimension_numbers<[1], [0], [0], [1], [0, 0, 1, 1], [], []>} : vector<16x16xf32>, vector<16x32xf32>, vector<16x32xf32> -> vector<16x32xf32>
    %c32_434 = arith.constant 32 : index
    %c96_435 = arith.constant 96 : index
    %681 = vector.load %arg22[%c32_434, %c96_435] : memref<64x128xf32, #tpu.memory_space<vmem>>, vector<16x32xf32>
    tpu.vector_store %arg22[%c32_434, %c96_435], %680 {strides = array<i32>} : memref<64x128xf32, #tpu.memory_space<vmem>>, vector<16x32xf32>,
    %682 = vector.extract_strided_slice %0 {offsets = [3, 0], sizes = [1, 16], strides = [1, 1]} : vector<4x16xf32> to vector<1x16xf32>
    %c48_436 = arith.constant 48 : index
    %c0_437 = arith.constant 0 : index
    %683 = vector.load %arg21[%c48_436, %c0_437] : memref<64x384xf32, #tpu.memory_space<vmem>>, vector<16x32xf32>
    %c48_438 = arith.constant 48 : index
    %c128_439 = arith.constant 128 : index
    %684 = vector.load %arg21[%c48_438, %c128_439] : memref<64x384xf32, #tpu.memory_space<vmem>>, vector<16x32xf32>
    %c48_440 = arith.constant 48 : index
    %c256_441 = arith.constant 256 : index
    %685 = vector.load %arg21[%c48_440, %c256_441] : memref<64x384xf32, #tpu.memory_space<vmem>>, vector<16x32xf32>
    %cst_442 = arith.constant dense<0.000000e+00> : vector<16x16xf32>
    %686 = tpu.matmul %683, %684, %cst_442 {dimension_numbers = #tpu.dot_dimension_numbers<[1], [1], [0], [0], [0, 0, 1, 0], [], []>} : vector<16x32xf32>, vector<16x32xf32>, vector<16x16xf32> -> vector<16x16xf32>
    %687 = vector.broadcast %682 : vector<1x16xf32> to vector<16x16xf32>
    %688 = arith.addf %686, %687 : vector<16x16xf32>
    %cst_443 = arith.constant dense<0xFF800000> : vector<16xf32>
    %689 = vector.multi_reduction <maximumf>, %688, %cst_443 [1] : vector<16x16xf32> to vector<16xf32>
    %cst_444 = arith.constant 0xFF800000 : f32
    %690 = vector.broadcast %cst_444 : f32 to vector<16xf32>
    %691 = arith.maximumf %690, %689 : vector<16xf32>
    %692 = vector.shape_cast %691 : vector<16xf32> to vector<16x1xf32>
    %693 = vector.broadcast %692 : vector<16x1xf32> to vector<16x16xf32>
    %694 = arith.subf %688, %693 : vector<16x16xf32>
    %695 = math.exp %694 : vector<16x16xf32>
    %cst_445 = arith.constant dense<0.000000e+00> : vector<16xf32>
    %696 = vector.multi_reduction <add>, %695, %cst_445 [1] : vector<16x16xf32> to vector<16xf32>
    %697 = vector.shape_cast %696 : vector<16xf32> to vector<16x1xf32>
    %698 = vector.broadcast %697 : vector<16x1xf32> to vector<16x16xf32>
    %699 = arith.divf %695, %698 : vector<16x16xf32>
    %cst_446 = arith.constant dense<0.000000e+00> : vector<16x32xf32>
    %700 = tpu.matmul %699, %685, %cst_446 {dimension_numbers = #tpu.dot_dimension_numbers<[1], [0], [0], [1], [0, 0, 1, 1], [], []>} : vector<16x16xf32>, vector<16x32xf32>, vector<16x32xf32> -> vector<16x32xf32>
    %c48_447 = arith.constant 48 : index
    %c0_448 = arith.constant 0 : index
    %701 = vector.load %arg22[%c48_447, %c0_448] : memref<64x128xf32, #tpu.memory_space<vmem>>, vector<16x32xf32>
    tpu.vector_store %arg22[%c48_447, %c0_448], %700 {strides = array<i32>} : memref<64x128xf32, #tpu.memory_space<vmem>>, vector<16x32xf32>,
    %c48_449 = arith.constant 48 : index
    %c32_450 = arith.constant 32 : index
    %702 = vector.load %arg21[%c48_449, %c32_450] : memref<64x384xf32, #tpu.memory_space<vmem>>, vector<16x32xf32>
    %c48_451 = arith.constant 48 : index
    %c160_452 = arith.constant 160 : index
    %703 = vector.load %arg21[%c48_451, %c160_452] : memref<64x384xf32, #tpu.memory_space<vmem>>, vector<16x32xf32>
    %c48_453 = arith.constant 48 : index
    %c288_454 = arith.constant 288 : index
    %704 = vector.load %arg21[%c48_453, %c288_454] : memref<64x384xf32, #tpu.memory_space<vmem>>, vector<16x32xf32>
    %cst_455 = arith.constant dense<0.000000e+00> : vector<16x16xf32>
    %705 = tpu.matmul %702, %703, %cst_455 {dimension_numbers = #tpu.dot_dimension_numbers<[1], [1], [0], [0], [0, 0, 1, 0], [], []>} : vector<16x32xf32>, vector<16x32xf32>, vector<16x16xf32> -> vector<16x16xf32>
    %706 = vector.broadcast %682 : vector<1x16xf32> to vector<16x16xf32>
    %707 = arith.addf %705, %706 : vector<16x16xf32>
    %cst_456 = arith.constant dense<0xFF800000> : vector<16xf32>
    %708 = vector.multi_reduction <maximumf>, %707, %cst_456 [1] : vector<16x16xf32> to vector<16xf32>
    %cst_457 = arith.constant 0xFF800000 : f32
    %709 = vector.broadcast %cst_457 : f32 to vector<16xf32>
    %710 = arith.maximumf %709, %708 : vector<16xf32>
    %711 = vector.shape_cast %710 : vector<16xf32> to vector<16x1xf32>
    %712 = vector.broadcast %711 : vector<16x1xf32> to vector<16x16xf32>
    %713 = arith.subf %707, %712 : vector<16x16xf32>
    %714 = math.exp %713 : vector<16x16xf32>
    %cst_458 = arith.constant dense<0.000000e+00> : vector<16xf32>
    %715 = vector.multi_reduction <add>, %714, %cst_458 [1] : vector<16x16xf32> to vector<16xf32>
    %716 = vector.shape_cast %715 : vector<16xf32> to vector<16x1xf32>
    %717 = vector.broadcast %716 : vector<16x1xf32> to vector<16x16xf32>
    %718 = arith.divf %714, %717 : vector<16x16xf32>
    %cst_459 = arith.constant dense<0.000000e+00> : vector<16x32xf32>
    %719 = tpu.matmul %718, %704, %cst_459 {dimension_numbers = #tpu.dot_dimension_numbers<[1], [0], [0], [1], [0, 0, 1, 1], [], []>} : vector<16x16xf32>, vector<16x32xf32>, vector<16x32xf32> -> vector<16x32xf32>
    %c48_460 = arith.constant 48 : index
    %c32_461 = arith.constant 32 : index
    %720 = vector.load %arg22[%c48_460, %c32_461] : memref<64x128xf32, #tpu.memory_space<vmem>>, vector<16x32xf32>
    tpu.vector_store %arg22[%c48_460, %c32_461], %719 {strides = array<i32>} : memref<64x128xf32, #tpu.memory_space<vmem>>, vector<16x32xf32>,
    %c48_462 = arith.constant 48 : index
    %c64_463 = arith.constant 64 : index
    %721 = vector.load %arg21[%c48_462, %c64_463] : memref<64x384xf32, #tpu.memory_space<vmem>>, vector<16x32xf32>
    %c48_464 = arith.constant 48 : index
    %c192_465 = arith.constant 192 : index
    %722 = vector.load %arg21[%c48_464, %c192_465] : memref<64x384xf32, #tpu.memory_space<vmem>>, vector<16x32xf32>
    %c48_466 = arith.constant 48 : index
    %c320_467 = arith.constant 320 : index
    %723 = vector.load %arg21[%c48_466, %c320_467] : memref<64x384xf32, #tpu.memory_space<vmem>>, vector<16x32xf32>
    %cst_468 = arith.constant dense<0.000000e+00> : vector<16x16xf32>
    %724 = tpu.matmul %721, %722, %cst_468 {dimension_numbers = #tpu.dot_dimension_numbers<[1], [1], [0], [0], [0, 0, 1, 0], [], []>} : vector<16x32xf32>, vector<16x32xf32>, vector<16x16xf32> -> vector<16x16xf32>
    %725 = vector.broadcast %682 : vector<1x16xf32> to vector<16x16xf32>
    %726 = arith.addf %724, %725 : vector<16x16xf32>
    %cst_469 = arith.constant dense<0xFF800000> : vector<16xf32>
    %727 = vector.multi_reduction <maximumf>, %726, %cst_469 [1] : vector<16x16xf32> to vector<16xf32>
    %cst_470 = arith.constant 0xFF800000 : f32
    %728 = vector.broadcast %cst_470 : f32 to vector<16xf32>
    %729 = arith.maximumf %728, %727 : vector<16xf32>
    %730 = vector.shape_cast %729 : vector<16xf32> to vector<16x1xf32>
    %731 = vector.broadcast %730 : vector<16x1xf32> to vector<16x16xf32>
    %732 = arith.subf %726, %731 : vector<16x16xf32>
    %733 = math.exp %732 : vector<16x16xf32>
    %cst_471 = arith.constant dense<0.000000e+00> : vector<16xf32>
    %734 = vector.multi_reduction <add>, %733, %cst_471 [1] : vector<16x16xf32> to vector<16xf32>
    %735 = vector.shape_cast %734 : vector<16xf32> to vector<16x1xf32>
    %736 = vector.broadcast %735 : vector<16x1xf32> to vector<16x16xf32>
    %737 = arith.divf %733, %736 : vector<16x16xf32>
    %cst_472 = arith.constant dense<0.000000e+00> : vector<16x32xf32>
    %738 = tpu.matmul %737, %723, %cst_472 {dimension_numbers = #tpu.dot_dimension_numbers<[1], [0], [0], [1], [0, 0, 1, 1], [], []>} : vector<16x16xf32>, vector<16x32xf32>, vector<16x32xf32> -> vector<16x32xf32>
    %c48_473 = arith.constant 48 : index
    %c64_474 = arith.constant 64 : index
    %739 = vector.load %arg22[%c48_473, %c64_474] : memref<64x128xf32, #tpu.memory_space<vmem>>, vector<16x32xf32>
    tpu.vector_store %arg22[%c48_473, %c64_474], %738 {strides = array<i32>} : memref<64x128xf32, #tpu.memory_space<vmem>>, vector<16x32xf32>,
    %c48_475 = arith.constant 48 : index
    %c96_476 = arith.constant 96 : index
    %740 = vector.load %arg21[%c48_475, %c96_476] : memref<64x384xf32, #tpu.memory_space<vmem>>, vector<16x32xf32>
    %c48_477 = arith.constant 48 : index
    %c224_478 = arith.constant 224 : index
    %741 = vector.load %arg21[%c48_477, %c224_478] : memref<64x384xf32, #tpu.memory_space<vmem>>, vector<16x32xf32>
    %c48_479 = arith.constant 48 : index
    %c352_480 = arith.constant 352 : index
    %742 = vector.load %arg21[%c48_479, %c352_480] : memref<64x384xf32, #tpu.memory_space<vmem>>, vector<16x32xf32>
    %cst_481 = arith.constant dense<0.000000e+00> : vector<16x16xf32>
    %743 = tpu.matmul %740, %741, %cst_481 {dimension_numbers = #tpu.dot_dimension_numbers<[1], [1], [0], [0], [0, 0, 1, 0], [], []>} : vector<16x32xf32>, vector<16x32xf32>, vector<16x16xf32> -> vector<16x16xf32>
    %744 = vector.broadcast %682 : vector<1x16xf32> to vector<16x16xf32>
    %745 = arith.addf %743, %744 : vector<16x16xf32>
    %cst_482 = arith.constant dense<0xFF800000> : vector<16xf32>
    %746 = vector.multi_reduction <maximumf>, %745, %cst_482 [1] : vector<16x16xf32> to vector<16xf32>
    %cst_483 = arith.constant 0xFF800000 : f32
    %747 = vector.broadcast %cst_483 : f32 to vector<16xf32>
    %748 = arith.maximumf %747, %746 : vector<16xf32>
    %749 = vector.shape_cast %748 : vector<16xf32> to vector<16x1xf32>
    %750 = vector.broadcast %749 : vector<16x1xf32> to vector<16x16xf32>
    %751 = arith.subf %745, %750 : vector<16x16xf32>
    %752 = math.exp %751 : vector<16x16xf32>
    %cst_484 = arith.constant dense<0.000000e+00> : vector<16xf32>
    %753 = vector.multi_reduction <add>, %752, %cst_484 [1] : vector<16x16xf32> to vector<16xf32>
    %754 = vector.shape_cast %753 : vector<16xf32> to vector<16x1xf32>
    %755 = vector.broadcast %754 : vector<16x1xf32> to vector<16x16xf32>
    %756 = arith.divf %752, %755 : vector<16x16xf32>
    %cst_485 = arith.constant dense<0.000000e+00> : vector<16x32xf32>
    %757 = tpu.matmul %756, %742, %cst_485 {dimension_numbers = #tpu.dot_dimension_numbers<[1], [0], [0], [1], [0, 0, 1, 1], [], []>} : vector<16x16xf32>, vector<16x32xf32>, vector<16x32xf32> -> vector<16x32xf32>
    %c48_486 = arith.constant 48 : index
    %c96_487 = arith.constant 96 : index
    %758 = vector.load %arg22[%c48_486, %c96_487] : memref<64x128xf32, #tpu.memory_space<vmem>>, vector<16x32xf32>
    tpu.vector_store %arg22[%c48_486, %c96_487], %757 {strides = array<i32>} : memref<64x128xf32, #tpu.memory_space<vmem>>, vector<16x32xf32>,
    %c0_488 = arith.constant 0 : index
    %c0_489 = arith.constant 0 : index
    %759 = vector.load %arg22[%c0_488, %c0_489] : memref<64x128xf32, #tpu.memory_space<vmem>>, vector<64x128xf32>
    %c1_490 = arith.constant 1 : index
    %c0_491 = arith.constant 0 : index
    %c0_492 = arith.constant 0 : index
    %760 = vector.load %arg8[%c1_490, %c0_491, %c0_492] : memref<2x128x128xbf16, #tpu.memory_space<vmem>>, vector<1x128x128xbf16>
    %761 = vector.shape_cast %760 : vector<1x128x128xbf16> to vector<128x128xbf16>
    %762 = arith.truncf %759 : vector<64x128xf32> to vector<64x128xbf16>
    %cst_493 = arith.constant dense<0.000000e+00> : vector<64x128xf32>
    %763 = tpu.matmul %762, %761, %cst_493 {dimension_numbers = #tpu.dot_dimension_numbers<[1], [0], [0], [1], [0, 0, 1, 1], [], []>} : vector<64x128xbf16>, vector<128x128xbf16>, vector<64x128xf32> -> vector<64x128xf32>
    %c1_494 = arith.constant 1 : index
    %c0_495 = arith.constant 0 : index
    %c0_496 = arith.constant 0 : index
    %764 = vector.load %arg9[%c1_494, %c0_495, %c0_496] : memref<2x1x128xf32, #tpu.memory_space<vmem>>, vector<1x1x128xf32>
    %765 = vector.shape_cast %764 : vector<1x1x128xf32> to vector<1x128xf32>
    %766 = vector.broadcast %765 : vector<1x128xf32> to vector<64x128xf32>
    %767 = arith.addf %763, %766 : vector<64x128xf32>
    %768 = arith.addf %767, %437 : vector<64x128xf32>
    %c1_497 = arith.constant 1 : index
    %c0_498 = arith.constant 0 : index
    %c0_499 = arith.constant 0 : index
    %769 = vector.load %arg10[%c1_497, %c0_498, %c0_499] : memref<2x1x128xf32, #tpu.memory_space<vmem>>, vector<1x1x128xf32>
    %770 = vector.shape_cast %769 : vector<1x1x128xf32> to vector<1x128xf32>
    %c1_500 = arith.constant 1 : index
    %c0_501 = arith.constant 0 : index
    %c0_502 = arith.constant 0 : index
    %771 = vector.load %arg11[%c1_500, %c0_501, %c0_502] : memref<2x1x128xf32, #tpu.memory_space<vmem>>, vector<1x1x128xf32>
    %772 = vector.shape_cast %771 : vector<1x1x128xf32> to vector<1x128xf32>
    %cst_503 = arith.constant dense<0.000000e+00> : vector<64xf32>
    %773 = vector.multi_reduction <add>, %768, %cst_503 [1] : vector<64x128xf32> to vector<64xf32>
    %774 = vector.shape_cast %773 : vector<64xf32> to vector<64x1xf32>
    %cst_504 = arith.constant 1.280000e+02 : f32
    %775 = vector.broadcast %cst_504 : f32 to vector<64x1xf32>
    %776 = arith.divf %774, %775 : vector<64x1xf32>
    %777 = vector.broadcast %776 : vector<64x1xf32> to vector<64x128xf32>
    %778 = arith.subf %768, %777 : vector<64x128xf32>
    %779 = arith.mulf %778, %778 : vector<64x128xf32>
    %cst_505 = arith.constant dense<0.000000e+00> : vector<64xf32>
    %780 = vector.multi_reduction <add>, %779, %cst_505 [1] : vector<64x128xf32> to vector<64xf32>
    %781 = vector.shape_cast %780 : vector<64xf32> to vector<64x1xf32>
    %cst_506 = arith.constant 1.280000e+02 : f32
    %782 = vector.broadcast %cst_506 : f32 to vector<64x1xf32>
    %783 = arith.divf %781, %782 : vector<64x1xf32>
    %784 = vector.broadcast %776 : vector<64x1xf32> to vector<64x128xf32>
    %785 = arith.subf %768, %784 : vector<64x128xf32>
    %cst_507 = arith.constant 9.99999996E-13 : f32
    %786 = vector.broadcast %cst_507 : f32 to vector<64x1xf32>
    %787 = arith.addf %783, %786 : vector<64x1xf32>
    %788 = math.rsqrt %787 : vector<64x1xf32>
    %789 = vector.broadcast %788 : vector<64x1xf32> to vector<64x128xf32>
    %790 = arith.mulf %785, %789 : vector<64x128xf32>
    %791 = vector.broadcast %770 : vector<1x128xf32> to vector<64x128xf32>
    %792 = arith.mulf %790, %791 : vector<64x128xf32>
    %793 = vector.broadcast %772 : vector<1x128xf32> to vector<64x128xf32>
    %794 = arith.addf %792, %793 : vector<64x128xf32>
    %c1_508 = arith.constant 1 : index
    %c0_509 = arith.constant 0 : index
    %c0_510 = arith.constant 0 : index
    %795 = vector.load %arg12[%c1_508, %c0_509, %c0_510] : memref<2x128x256xbf16, #tpu.memory_space<vmem>>, vector<1x128x256xbf16>
    %796 = vector.shape_cast %795 : vector<1x128x256xbf16> to vector<128x256xbf16>
    %797 = arith.truncf %794 : vector<64x128xf32> to vector<64x128xbf16>
    %cst_511 = arith.constant dense<0.000000e+00> : vector<64x256xf32>
    %798 = tpu.matmul %797, %796, %cst_511 {dimension_numbers = #tpu.dot_dimension_numbers<[1], [0], [0], [1], [0, 0, 1, 1], [], []>} : vector<64x128xbf16>, vector<128x256xbf16>, vector<64x256xf32> -> vector<64x256xf32>
    %c1_512 = arith.constant 1 : index
    %c0_513 = arith.constant 0 : index
    %c0_514 = arith.constant 0 : index
    %799 = vector.load %arg13[%c1_512, %c0_513, %c0_514] : memref<2x1x256xf32, #tpu.memory_space<vmem>>, vector<1x1x256xf32>
    %800 = vector.shape_cast %799 : vector<1x1x256xf32> to vector<1x256xf32>
    %801 = vector.broadcast %800 : vector<1x256xf32> to vector<64x256xf32>
    %802 = arith.addf %798, %801 : vector<64x256xf32>
    %803 = arith.mulf %802, %802 : vector<64x256xf32>
    %804 = arith.mulf %802, %803 : vector<64x256xf32>
    %cst_515 = arith.constant 4.471500e-02 : f32
    %805 = vector.broadcast %cst_515 : f32 to vector<64x256xf32>
    %806 = arith.mulf %805, %804 : vector<64x256xf32>
    %807 = arith.addf %802, %806 : vector<64x256xf32>
    %cst_516 = arith.constant 0.797884583 : f32
    %808 = vector.broadcast %cst_516 : f32 to vector<64x256xf32>
    %809 = arith.mulf %808, %807 : vector<64x256xf32>
    %810 = math.tanh %809 : vector<64x256xf32>
    %cst_517 = arith.constant 1.000000e+00 : f32
    %811 = vector.broadcast %cst_517 : f32 to vector<64x256xf32>
    %812 = arith.addf %811, %810 : vector<64x256xf32>
    %cst_518 = arith.constant 5.000000e-01 : f32
    %813 = vector.broadcast %cst_518 : f32 to vector<64x256xf32>
    %814 = arith.mulf %813, %812 : vector<64x256xf32>
    %815 = arith.mulf %802, %814 : vector<64x256xf32>
    %c1_519 = arith.constant 1 : index
    %c0_520 = arith.constant 0 : index
    %c0_521 = arith.constant 0 : index
    %816 = vector.load %arg14[%c1_519, %c0_520, %c0_521] : memref<2x256x128xbf16, #tpu.memory_space<vmem>>, vector<1x256x128xbf16>
    %817 = vector.shape_cast %816 : vector<1x256x128xbf16> to vector<256x128xbf16>
    %818 = arith.truncf %815 : vector<64x256xf32> to vector<64x256xbf16>
    %cst_522 = arith.constant dense<0.000000e+00> : vector<64x128xf32>
    %819 = tpu.matmul %818, %817, %cst_522 {dimension_numbers = #tpu.dot_dimension_numbers<[1], [0], [0], [1], [0, 0, 1, 1], [], []>} : vector<64x256xbf16>, vector<256x128xbf16>, vector<64x128xf32> -> vector<64x128xf32>
    %c1_523 = arith.constant 1 : index
    %c0_524 = arith.constant 0 : index
    %c0_525 = arith.constant 0 : index
    %820 = vector.load %arg15[%c1_523, %c0_524, %c0_525] : memref<2x1x128xf32, #tpu.memory_space<vmem>>, vector<1x1x128xf32>
    %821 = vector.shape_cast %820 : vector<1x1x128xf32> to vector<1x128xf32>
    %822 = vector.broadcast %821 : vector<1x128xf32> to vector<64x128xf32>
    %823 = arith.addf %819, %822 : vector<64x128xf32>
    %824 = arith.addf %823, %794 : vector<64x128xf32>
    %c1_526 = arith.constant 1 : index
    %c0_527 = arith.constant 0 : index
    %c0_528 = arith.constant 0 : index
    %825 = vector.load %arg16[%c1_526, %c0_527, %c0_528] : memref<2x1x128xf32, #tpu.memory_space<vmem>>, vector<1x1x128xf32>
    %826 = vector.shape_cast %825 : vector<1x1x128xf32> to vector<1x128xf32>
    %c1_529 = arith.constant 1 : index
    %c0_530 = arith.constant 0 : index
    %c0_531 = arith.constant 0 : index
    %827 = vector.load %arg17[%c1_529, %c0_530, %c0_531] : memref<2x1x128xf32, #tpu.memory_space<vmem>>, vector<1x1x128xf32>
    %828 = vector.shape_cast %827 : vector<1x1x128xf32> to vector<1x128xf32>
    %cst_532 = arith.constant dense<0.000000e+00> : vector<64xf32>
    %829 = vector.multi_reduction <add>, %824, %cst_532 [1] : vector<64x128xf32> to vector<64xf32>
    %830 = vector.shape_cast %829 : vector<64xf32> to vector<64x1xf32>
    %cst_533 = arith.constant 1.280000e+02 : f32
    %831 = vector.broadcast %cst_533 : f32 to vector<64x1xf32>
    %832 = arith.divf %830, %831 : vector<64x1xf32>
    %833 = vector.broadcast %832 : vector<64x1xf32> to vector<64x128xf32>
    %834 = arith.subf %824, %833 : vector<64x128xf32>
    %835 = arith.mulf %834, %834 : vector<64x128xf32>
    %cst_534 = arith.constant dense<0.000000e+00> : vector<64xf32>
    %836 = vector.multi_reduction <add>, %835, %cst_534 [1] : vector<64x128xf32> to vector<64xf32>
    %837 = vector.shape_cast %836 : vector<64xf32> to vector<64x1xf32>
    %cst_535 = arith.constant 1.280000e+02 : f32
    %838 = vector.broadcast %cst_535 : f32 to vector<64x1xf32>
    %839 = arith.divf %837, %838 : vector<64x1xf32>
    %840 = vector.broadcast %832 : vector<64x1xf32> to vector<64x128xf32>
    %841 = arith.subf %824, %840 : vector<64x128xf32>
    %cst_536 = arith.constant 9.99999996E-13 : f32
    %842 = vector.broadcast %cst_536 : f32 to vector<64x1xf32>
    %843 = arith.addf %839, %842 : vector<64x1xf32>
    %844 = math.rsqrt %843 : vector<64x1xf32>
    %845 = vector.broadcast %844 : vector<64x1xf32> to vector<64x128xf32>
    %846 = arith.mulf %841, %845 : vector<64x128xf32>
    %847 = vector.broadcast %826 : vector<1x128xf32> to vector<64x128xf32>
    %848 = arith.mulf %846, %847 : vector<64x128xf32>
    %849 = vector.broadcast %828 : vector<1x128xf32> to vector<64x128xf32>
    %850 = arith.addf %848, %849 : vector<64x128xf32>
    %c2 = arith.constant 2 : index
    %c0_537 = arith.constant 0 : index
    %c0_538 = arith.constant 0 : index
    %851 = vector.load %arg2[%c2, %c0_537, %c0_538] : memref<3x4x64xf32, #tpu.memory_space<vmem>>, vector<1x4x64xf32>
    %852 = vector.shape_cast %851 : vector<1x4x64xf32> to vector<4x64xf32>
    %cst_539 = arith.constant dense<0.000000e+00> : vector<4x128xf32>
    %853 = tpu.matmul %852, %850, %cst_539 {dimension_numbers = #tpu.dot_dimension_numbers<[1], [0], [0], [1], [0, 0, 1, 1], [], []>} : vector<4x64xf32>, vector<64x128xf32>, vector<4x128xf32> -> vector<4x128xf32>
    %854 = arith.addf %441, %853 : vector<4x128xf32>
    %c0_540 = arith.constant 0 : index
    %c0_541 = arith.constant 0 : index
    %855 = vector.load %arg3[%c0_540, %c0_541] : memref<4x64xf32, #tpu.memory_space<vmem>>, vector<4x64xf32>
    %cst_542 = arith.constant dense<0.000000e+00> : vector<4x128xf32>
    %856 = tpu.matmul %855, %850, %cst_542 {dimension_numbers = #tpu.dot_dimension_numbers<[1], [0], [0], [1], [0, 0, 1, 1], [], []>} : vector<4x64xf32>, vector<64x128xf32>, vector<4x128xf32> -> vector<4x128xf32>
    %857 = vector.extract_strided_slice %854 {offsets = [0, 0], sizes = [2, 128], strides = [1, 1]} : vector<4x128xf32> to vector<2x128xf32>
    %858 = vector.extract_strided_slice %854 {offsets = [2, 0], sizes = [2, 128], strides = [1, 1]} : vector<4x128xf32> to vector<2x128xf32>
    %859 = vector.extract_strided_slice %856 {offsets = [0, 0], sizes = [2, 128], strides = [1, 1]} : vector<4x128xf32> to vector<2x128xf32>
    %860 = vector.extract_strided_slice %856 {offsets = [2, 0], sizes = [2, 128], strides = [1, 1]} : vector<4x128xf32> to vector<2x128xf32>
    %861 = tpu.concatenate %857, %859, %858, %860 in 1 : vector<2x128xf32>, vector<2x128xf32>, vector<2x128xf32>, vector<2x128xf32> -> vector<2x512xf32>
    %c0_543 = arith.constant 0 : index
    %c0_544 = arith.constant 0 : index
    %862 = vector.load %arg18[%c0_543, %c0_544] : memref<512x30xf32, #tpu.memory_space<vmem>>, vector<512x30xf32>
    %cst_545 = arith.constant dense<0.000000e+00> : vector<2x30xf32>
    %863 = tpu.matmul %861, %862, %cst_545 {dimension_numbers = #tpu.dot_dimension_numbers<[1], [0], [0], [1], [0, 0, 1, 1], [], []>} : vector<2x512xf32>, vector<512x30xf32>, vector<2x30xf32> -> vector<2x30xf32>
    %c0_546 = arith.constant 0 : index
    %c0_547 = arith.constant 0 : index
    %864 = vector.load %arg19[%c0_546, %c0_547] : memref<1x30xf32, #tpu.memory_space<vmem>>, vector<1x30xf32>
    %865 = vector.broadcast %864 : vector<1x30xf32> to vector<2x30xf32>
    %866 = arith.addf %863, %865 : vector<2x30xf32>
    %c0_548 = arith.constant 0 : index
    %c0_549 = arith.constant 0 : index
    %867 = vector.load %arg20[%c0_548, %c0_549] : memref<2x30xf32, #tpu.memory_space<vmem>>, vector<2x30xf32>
    tpu.vector_store %arg20[%c0_548, %c0_549], %866 {strides = array<i32>} : memref<2x30xf32, #tpu.memory_space<vmem>>, vector<2x30xf32>,
    return
  }
}

</mosaic_0001>

<bundles_post_ra>
// kernel: div.3
= control target key start
LH: loop header
LB: loop body
LE: loop exit
PB: predicated region body
PF: predicated region fallthrough
CT: control target
= control target key end

     0   :  { %s37_s0 = inlined_call_operand.vmem [shape: f32[64], index: 0, kind: input, shape index: {}]   ;;  %s38_s1 = inlined_call_operand.vmem [shape: f32[64], index: 1, kind: input, shape index: {}]   ;;  %s39_s2 = inlined_call_operand.vmem [shape: f32[64], index: 2, kind: output, shape index: {}]  }
   0x1   :  { %v4_v0 = vld [vmem:[%s38_s1] sm:$0x1] }
   0x2   :  { %11 = vrcp.f32 %v4_v0  ;;  %v3_v1 = vld [vmem:[%s37_s0] sm:$0x1] }
   0xc   :  { %v12_v2 = vpop.eup %11 }
   0xd   :  { %v8_v3 = vmul.f32 %v12_v2, %v3_v1 }
   0xf   :  { %10 = vst [vmem:[%s39_s2] sm:$0x1] %v8_v3 }

// kernel: double_berts_forward.1
= control target key start
LH: loop header
LB: loop body
LE: loop exit
PB: predicated region body
PF: predicated region fallthrough
CT: control target
= control target key end

     0   :  { %s15728_s0 = inlined_call_operand.vmem [shape: f32[64,128], index: 0, kind: input, shape index: {}]   ;;  %s15729_s1 = inlined_call_operand.vmem [shape: f32[4,16], index: 1, kind: input, shape index: {}]   ;;  %s15730_s2 = inlined_call_operand.vmem [shape: f32[3,4,64], index: 2, kind: input, shape index: {}]   ;;  %s15731_s3 = inlined_call_operand.vmem [shape: f32[4,64], index: 3, kind: input, shape index: {}]   ;;  %s15732_s4 = inlined_call_operand.vmem [shape: f32[1,128], index: 4, kind: input, shape index: {}]   ;;  %s15733_s5 = inlined_call_operand.vmem [shape: f32[1,128], index: 5, kind: input, shape index: {}]   ;;  %s15734_s6 = inlined_call_operand.vmem [shape: bf16[2,128,384], index: 6, kind: input, shape index: {}]   ;;  %s15735_s7 = inlined_call_operand.vmem [shape: f32[2,1,384], index: 7, kind: input, shape index: {}]   ;;  %s15736_s8 = inlined_call_operand.vmem [shape: bf16[2,128,128], index: 8, kind: input, shape index: {}]   ;;  %s15737_s9 = inlined_call_operand.vmem [shape: f32[2,1,128], index: 9, kind: input, shape index: {}]   ;;  %s15738_s10 = inlined_call_operand.vmem [shape: f32[2,1,128], index: 10, kind: input, shape index: {}]   ;;  %s15739_s11 = inlined_call_operand.vmem [shape: f32[2,1,128], index: 11, kind: input, shape index: {}]   ;;  %s15740_s12 = inlined_call_operand.vmem [shape: bf16[2,128,256], index: 12, kind: input, shape index: {}]   ;;  %s15741_s13 = inlined_call_operand.vmem [shape: f32[2,1,256], index: 13, kind: input, shape index: {}]   ;;  %s15742_s14 = inlined_call_operand.vmem [shape: bf16[2,256,128], index: 14, kind: input, shape index: {}]   ;;  %s15743_s15 = inlined_call_operand.vmem [shape: f32[2,1,128], index: 15, kind: input, shape index: {}]   ;;  %s15744_s16 = inlined_call_operand.vmem [shape: f32[2,1,128], index: 16, kind: input, shape index: {}]   ;;  %s15745_s17 = inlined_call_operand.vmem [shape: f32[2,1,128], index: 17, kind: input, shape index: {}]   ;;  %s15746_s18 = inlined_call_operand.vmem [shape: f32[512,30], index: 18, kind: input, shape index: {}]   ;;  %s15747_s19 = inlined_call_operand.vmem [shape: f32[1,30], index: 19, kind: input, shape index: {}]   ;;  %s15748_s20 = inlined_call_operand.hbm [shape: f32[2,30], index: 20, kind: output, shape index: {}]  }
   0x1   :  { %15752 = sst [smem:[#allocation7_spill]] %s15728_s0 }
   0x2   :  { %15753 = sst [smem:[#allocation8_spill]] %s15729_s1 }
   0x3   :  { %15754 = sst [smem:[#allocation9_spill]] %s15730_s2 }
   0x4   :  { %15755 = sst [smem:[#allocation10_spill]] %s15731_s3 }
   0x5   :  { %15756 = sst [smem:[#allocation11_spill]] %s15732_s4 }
   0x6   :  { %s15757_s23 = sld [smem:[#allocation7_spill]]  ;;  %v12488_v5 = vld [vmem:[%s15734_s6 + $0x4] ss:$12 sps:$4 sm:$0xff]   ;;  %v12490_v6 = vld [vmem:[%s15734_s6] ss:$12 sps:$4 sm:$0xff]  }
   0x7   :  { %v12491_v7 = vld [vmem:[%s15734_s6 + $0x1c] ss:$12 sps:$4 sm:$0xff]   ;;  %377 = vmatprep.subr.bf16.mxu0 %v12488_v5 }
   0x8   :  { %378 = vmatpush1.bf16.msra.mxu0 %v12490_v6 }
   0x9   :  { %379 = vmatprep.subr.bf16.mxu0 %v12491_v7 }
   0xc   :  { %v68_v0 = vld [vmem:[%s15757_s23] sm:$0xff]  ;;  %v69_v1 = vld [vmem:[%s15757_s23 + $0x8] sm:$0xff]  ;;  %v70_v2 = vld [vmem:[%s15757_s23 + $0x10] sm:$0xff] }
   0xd   :  { %78 = vadd.xlane.f32.xlu0 %v68_v0  ;;  %v72_v3 = vld [vmem:[%s15757_s23 + $0x20] sm:$0xff]  ;;  %v13201_v4 = vld [vmem:[%s15757_s23 + $0x30] sm:$0xff] }
  0x11   :  { %80 = vadd.xlane.f32.xlu0 %v69_v1 }
  0x15   :  { %82 = vadd.xlane.f32.xlu0 %v70_v2 }
  0x19   :  { %86 = vadd.xlane.f32.xlu0 %v72_v3 }
  0x1d   :  { %90 = vadd.xlane.f32.xlu0 %v13201_v4 }
  0x1e   :  { %25 = vsyncpa [#allocation5], 0  ;;  %v71_v16 = vld [vmem:[%s15757_s23 + $0x18] sm:$0xff]  ;;  %v13227_v17 = vld [vmem:[%s15757_s23 + $0x28] sm:$0xff]  ;;  %v13073_v39 = vmov 0   ;;  %s15758_s26 = sld [smem:[#allocation11_spill]] }
  0x1f   :  { %v12493_v18 = vld [vmem:[%s15734_s6 + $0x18] ss:$12 sps:$4 sm:$0xff]   ;;  %v12494_v20 = vld [vmem:[%s15734_s6 + $0x34] ss:$12 sps:$4 sm:$0xff]   ;;  %v12496_v21 = vld [vmem:[%s15734_s6 + $0x30] ss:$12 sps:$4 sm:$0xff]   ;;  %409 = vmatprep.mubr.bf16.mxu0 %v13073_v39 }
  0x20   :  { %v13236_v19 = vld [vmem:[%s15757_s23 + $0x38] sm:$0xff]  ;;  %380 = vmatpush1.bf16.msra.mxu0 %v12493_v18  ;;  %v12499_v23 = vld [vmem:[%s15734_s6 + $0x48] ss:$12 sps:$4 sm:$0xff]   ;;  %v12500_v26 = vld [vmem:[%s15734_s6 + $0x64] ss:$12 sps:$4 sm:$0xff]   ;;  %vm549_vm0 = vcmask 261120  }
  0x21   :  { %381 = vmatprep.subr.bf16.mxu0 %v12494_v20  ;;  %v12497_v22 = vld [vmem:[%s15734_s6 + $0x4c] ss:$12 sps:$4 sm:$0xff]   ;;  %v12503_v30 = vld [vmem:[%s15734_s6 + $0x7c] ss:$12 sps:$4 sm:$0xff]   ;;  %v12506_v33 = vld [vmem:[%s15734_s6 + $0x94] ss:$12 sps:$4 sm:$0xff]  }
  0x22   :  { %v12502_v27 = vld [vmem:[%s15734_s6 + $0x60] ss:$12 sps:$4 sm:$0xff]   ;;  %v12505_v32 = vld [vmem:[%s15734_s6 + $0x78] ss:$12 sps:$4 sm:$0xff]   ;;  %v12508_v35 = vld [vmem:[%s15734_s6 + $0x90] ss:$12 sps:$4 sm:$0xff]  }
  0x23   :  { %v12509_v37 = vld [vmem:[%s15734_s6 + $0xac] ss:$12 sps:$4 sm:$0xff]   ;;  %v12511_v41 = vld [vmem:[%s15734_s6 + $0xa8] ss:$12 sps:$4 sm:$0xff]   ;;  %vm13430_vm1 = vmpackc.low %vm549_vm0, %vm549_vm0  ;;  %s15761_s0 = sld [smem:[#allocation8_spill]]  ;;  %vm637_vm2 = vcmask 130048  }
  0x24   :  { %382 = vmatpush1.bf16.msra.mxu0 %v12496_v21  ;;  %v13302_v63 = vld [vmem:[%s15758_s26] ss:$0 sm:$0xff]  ;;  %v12518_v18 = vld [vmem:[%s15734_s6 + $0x98] ss:$12 sps:$4 sm:$0xff]   ;;  %s13074_s21 = smov 96   ;;  %s13075_s1 = smov 64  }
  0x25   :  { %383 = vmatprep.subr.bf16.mxu0 %v12497_v22  ;;  %v12519_v22 = vld [vmem:[%s15734_s6 + $0xb0] ss:$12 sps:$4 sm:$0xff]   ;;  %s13076_s22 = smov 32   ;;  %vm963_vm3 = vcmask 523520   ;;  %vm1186_vm4 = vcmask 785920   ;;  %vm1409_vm5 = vcmask 1048320  }
  0x26   :  { %vm13078_vm6 = vmmov 0   ;;  %s15762_s25 = sld [smem:[#allocation9_spill]]  ;;  %vm4955_vm7 = vcmask 523264   ;;  %vm10217_vm8 = vcmask 238592  }
  0x28   :  { %384 = vmatpush1.bf16.msra.mxu0 %v12499_v23 }
  0x29   :  { %385 = vmatprep.subr.bf16.mxu0 %v12500_v26 }
  0x2c   :  { %386 = vmatpush1.bf16.msra.mxu0 %v12502_v27 }
  0x2d   :  { %387 = vmatprep.subr.bf16.mxu0 %v12503_v30 }
  0x30   :  { %388 = vmatpush1.bf16.msra.mxu0 %v12505_v32 }
  0x31   :  { %389 = vmatprep.subr.bf16.mxu0 %v12506_v33 }
  0x34   :  { %390 = vmatpush1.bf16.msra.mxu0 %v12508_v35 }
  0x35   :  { %391 = vmatprep.subr.bf16.mxu0 %v12509_v37 }
  0x38   :  { %392 = vmatpush1.bf16.msra.mxu0 %v12511_v41 }
  0x9a   :  { %v79_v8 = vpop.xlane.xlu0 %78 }
  0x9b   :  { %v95_v9 = vmul.f32 0.0078125, %v79_v8 }
  0x9d   :  { %v13213_v10 = vsub.f32 %v68_v0, %v95_v9 }
  0x9e   :  { %v81_v11 = vpop.xlane.xlu0 %80 }
  0x9f   :  { %v96_v12 = vmul.f32 0.0078125, %v81_v11  ;;  %v111_v13 = vmul.f32 %v13213_v10, %v13213_v10  ;;  %v12513_v11 = vld [vmem:[%s15734_s6 + $0x20] ss:$12 sps:$4 sm:$0xff]  }
  0xa1   :  { %119 = vadd.xlane.f32.xlu1 %v111_v13  ;;  %v13217_v14 = vsub.f32 %v69_v1, %v96_v12  ;;  %v12514_v12 = vld [vmem:[%s15734_s6 + $0x38] ss:$12 sps:$4 sm:$0xff]   ;;  %v12515_v13 = vld [vmem:[%s15734_s6 + $0x50] ss:$12 sps:$4 sm:$0xff]  }
  0xa2   :  { %v83_v24 = vpop.xlane.xlu0 %82 }
  0xa3   :  { %v112_v15 = vmul.f32 %v13217_v14, %v13217_v14  ;;  %v97_v25 = vmul.f32 0.0078125, %v83_v24 }
  0xa5   :  { %121 = vadd.xlane.f32.xlu1 %v112_v15  ;;  %v13257_v28 = vsub.f32 %v70_v2, %v97_v25 }
  0xa6   :  { %v87_v31 = vpop.xlane.xlu0 %86 }
  0xa7   :  { %v113_v29 = vmul.f32 %v13257_v28, %v13257_v28  ;;  %v99_v34 = vmul.f32 0.0078125, %v87_v31 }
  0xa9   :  { %84 = vadd.xlane.f32.xlu1 %v71_v16  ;;  %123 = vadd.xlane.f32.xlu0 %v113_v29  ;;  %v13273_v36 = vsub.f32 %v72_v3, %v99_v34 }
  0xaa   :  { %v91_v38 = vpop.xlane.xlu0 %90 }
  0xab   :  { %v115_v40 = vmul.f32 %v13273_v36, %v13273_v36  ;;  %v101_v42 = vmul.f32 0.0078125, %v91_v38 }
  0xad   :  { %88 = vadd.xlane.f32.xlu1 %v13227_v17  ;;  %127 = vadd.xlane.f32.xlu0 %v115_v40  ;;  %v13285_v43 = vsub.f32 %v13201_v4, %v101_v42  ;;  %v13312_v4 = vld [vmem:[%s15733_s5] ss:$0 sm:$0xff] }
  0xaf   :  { %v117_v44 = vmul.f32 %v13285_v43, %v13285_v43 }
  0xb1   :  { %92 = vadd.xlane.f32.xlu1 %v13236_v19  ;;  %131 = vadd.xlane.f32.xlu0 %v117_v44 }
 0x12e   :  { %v120_v45 = vpop.xlane.xlu1 %119 }
 0x12f   :  { %v135_v46 = vmul.f32 0.0078125, %v120_v45 }
 0x131   :  { %v143_v47 = vadd.f32 1e-12, %v135_v46 }
 0x132   :  { %v122_v48 = vpop.xlane.xlu1 %121 }
 0x133   :  { %12648 = vrsqrt.f32 %v143_v47  ;;  %v136_v49 = vmul.f32 0.0078125, %v122_v48 }
 0x135   :  { %v144_v50 = vadd.f32 1e-12, %v136_v49 }
 0x136   :  { %v85_v51 = vpop.xlane.xlu1 %84  ;;  %v124_v15 = vpop.xlane.xlu0 %123 }
 0x137   :  { %12650 = vrsqrt.f32 %v144_v50  ;;  %v98_v52 = vmul.f32 0.0078125, %v85_v51 }
 0x139   :  { %v13289_v53 = vsub.f32 %v71_v16, %v98_v52  ;;  %v12517_v16 = vld [vmem:[%s15734_s6 + $0x80] ss:$12 sps:$4 sm:$0xff]  }
 0x13a   :  { %v89_v54 = vpop.xlane.xlu1 %88 }
 0x13b   :  { %v114_v55 = vmul.f32 %v13289_v53, %v13289_v53  ;;  %v100_v56 = vmul.f32 0.0078125, %v89_v54 }
 0x13d   :  { %v12649_v57 = vpop.eup %12648  ;;  %125 = vadd.xlane.f32.xlu1 %v114_v55  ;;  %v13294_v58 = vsub.f32 %v13227_v17, %v100_v56  ;;  %v137_v17 = vmul.f32 0.0078125, %v124_v15 }
 0x13e   :  { %v93_v59 = vpop.xlane.xlu1 %92  ;;  %v159_v60 = vmul.f32 %v12649_v57, %v13213_v10  ;;  %v12512_v10 = vld [vmem:[%s15734_s6 + $0x8] ss:$12 sps:$4 sm:$0xff]  }
 0x13f   :  { %v116_v61 = vmul.f32 %v13294_v58, %v13294_v58  ;;  %v102_v62 = vmul.f32 0.0078125, %v93_v59  ;;  %11168 = vmatprep.subr.bf16.mxu0 %v12512_v10  ;;  %v145_v20 = vadd.f32 1e-12, %v137_v17 }
 0x140   :  { %v173_v3 = vmul.f32 %v13302_v63, %v159_v60 }
 0x141   :  { %v12651_v0 = vpop.eup %12650  ;;  %129 = vadd.xlane.f32.xlu1 %v116_v61  ;;  %v13305_v1 = vsub.f32 %v13236_v19, %v102_v62  ;;  %v128_v19 = vpop.xlane.xlu0 %127  ;;  %12652 = vrsqrt.f32 %v145_v20 }
 0x142   :  { %v160_v2 = vmul.f32 %v12651_v0, %v13217_v14  ;;  %v13318_v7 = vadd.f32 %v13312_v4, %v173_v3  ;;  %v12516_v14 = vld [vmem:[%s15734_s6 + $0x68] ss:$12 sps:$4 sm:$0xff]   ;;  %v139_v21 = vmul.f32 0.0078125, %v128_v19  ;;  %v232_v3 = vld [vmem:[%s15735_s7] sm:$0x7] }
 0x143   :  { %v118_v5 = vmul.f32 %v13305_v1, %v13305_v1 }
 0x144   :  { %v174_v6 = vmul.f32 %v13302_v63, %v160_v2  ;;  %v147_v23 = vadd.f32 1e-12, %v139_v21 }
 0x145   :  { %133 = vadd.xlane.f32.xlu1 %v118_v5  ;;  %v132_v25 = vpop.xlane.xlu0 %131 }
 0x146   :  { %v13321_v8 = vadd.f32 %v13312_v4, %v174_v6  ;;  %12654 = vrsqrt.f32 %v147_v23  ;;  %v141_v29 = vmul.f32 0.0078125, %v132_v25 }
 0x148   :  { %v13325_v9 = vpack.c.bf16 %v13321_v8, %v13318_v7  ;;  %v149_v34 = vadd.f32 1e-12, %v141_v29 }
 0x14a   :  { %410 = vmatmul.mubr.bf16.vlgmr.msra.gmra.mrb[0].mxu0 %v13325_v9 }
 0x14b   :  { %419 = vmatprep.mubr.bf16.mxu0 %v13073_v39  ;;  %11169 = vmatpush3.bf16.msra.mxu0 %v12512_v10  ;;  %v12653_v32 = vpop.eup %12652 }
 0x14c   :  { %11170 = vmatprep.subr.bf16.mxu0 %v12513_v11  ;;  %v161_v38 = vmul.f32 %v12653_v32, %v13257_v28 }
 0x14e   :  { %v175_v42 = vmul.f32 %v13302_v63, %v161_v38 }
 0x14f   :  { %11171 = vmatpush3.bf16.msra.mxu0 %v12513_v11 }
 0x150   :  { %11172 = vmatprep.subr.bf16.mxu0 %v12514_v12  ;;  %v12655_v41 = vpop.eup %12654  ;;  %v13359_v48 = vadd.f32 %v13312_v4, %v175_v42 }
 0x151   :  { %v163_v46 = vmul.f32 %v12655_v41, %v13273_v36 }
 0x153   :  { %11173 = vmatpush3.bf16.msra.mxu0 %v12514_v12  ;;  %v177_v51 = vmul.f32 %v13302_v63, %v163_v46 }
 0x154   :  { %11174 = vmatprep.subr.bf16.mxu0 %v12515_v13 }
 0x155   :  { %v13373_v55 = vadd.f32 %v13312_v4, %v177_v51 }
 0x157   :  { %11175 = vmatpush3.bf16.msra.mxu0 %v12515_v13 }
 0x158   :  { %11176 = vmatprep.subr.bf16.mxu0 %v12516_v14 }
 0x15b   :  { %11177 = vmatpush3.bf16.msra.mxu0 %v12516_v14 }
 0x15c   :  { %11178 = vmatprep.subr.bf16.mxu0 %v12517_v16 }
 0x15f   :  { %11179 = vmatpush3.bf16.msra.mxu0 %v12517_v16 }
 0x160   :  { %11180 = vmatprep.subr.bf16.mxu0 %v12518_v18 }
 0x163   :  { %11181 = vmatpush3.bf16.msra.mxu0 %v12518_v18 }
 0x164   :  { %11182 = vmatprep.subr.bf16.mxu0 %v12519_v22 }
 0x167   :  { %11183 = vmatpush3.bf16.msra.mxu0 %v12519_v22 }
 0x1ca   :  { %v126_v24 = vpop.xlane.xlu1 %125 }
 0x1cb   :  { %v138_v26 = vmul.f32 0.0078125, %v126_v24 }
 0x1cd   :  { %v146_v27 = vadd.f32 1e-12, %v138_v26 }
 0x1ce   :  { %v130_v30 = vpop.xlane.xlu1 %129 }
 0x1cf   :  { %12656 = vrsqrt.f32 %v146_v27  ;;  %v140_v31 = vmul.f32 0.0078125, %v130_v30 }
 0x1d1   :  { %v148_v33 = vadd.f32 1e-12, %v140_v31 }
 0x1d2   :  { %v134_v35 = vpop.xlane.xlu1 %133 }
 0x1d3   :  { %12658 = vrsqrt.f32 %v148_v33  ;;  %v142_v37 = vmul.f32 0.0078125, %v134_v35 }
 0x1d4   :  { %12660 = vrsqrt.f32 %v149_v34 }
 0x1d5   :  { %v150_v40 = vadd.f32 1e-12, %v142_v37 }
 0x1d7   :  { %12662 = vrsqrt.f32 %v150_v40 }
 0x1d9   :  { %v12657_v44 = vpop.eup %12656 }
 0x1da   :  { %v162_v45 = vmul.f32 %v12657_v44, %v13289_v53 }
 0x1dc   :  { %v176_v47 = vmul.f32 %v13302_v63, %v162_v45 }
 0x1dd   :  { %v12659_v49 = vpop.eup %12658 }
 0x1de   :  { %v13362_v50 = vadd.f32 %v13312_v4, %v176_v47  ;;  %v164_v28 = vmul.f32 %v12659_v49, %v13294_v58  ;;  %v12661_v52 = vpop.eup %12660 }
 0x1df   :  { %v165_v57 = vmul.f32 %v12661_v52, %v13285_v43 }
 0x1e0   :  { %v13368_v54 = vpack.c.bf16 %v13362_v50, %v13359_v48  ;;  %v178_v36 = vmul.f32 %v13302_v63, %v164_v28 }
 0x1e1   :  { %v12663_v53 = vpop.eup %12662  ;;  %v179_v60 = vmul.f32 %v13302_v63, %v165_v57 }
 0x1e2   :  { %420 = vmatmul.mubr.bf16.gmra.mrb[4].mxu0 %v13368_v54  ;;  %v13376_v56 = vadd.f32 %v13312_v4, %v178_v36  ;;  %v166_v58 = vmul.f32 %v12663_v53, %v13305_v1 }
 0x1e3   :  { %429 = vmatprep.mubr.bf16.mxu0 %v13073_v39  ;;  %v13389_v62 = vadd.f32 %v13312_v4, %v179_v60 }
 0x1e4   :  { %v13383_v59 = vpack.c.bf16 %v13376_v56, %v13373_v55  ;;  %v180_v61 = vmul.f32 %v13302_v63, %v166_v58  ;;  %v234_v63 = vlaneseq }
 0x1e6   :  { %v13392_v0 = vadd.f32 %v13312_v4, %v180_v61  ;;  %v13404_v1 = vshrl.u32 %v234_v63, 7  ;;  %v13466_v63 = vld [vmem:[%s15761_s0] sm:$0xf] }
 0x1e8   :  { %v13397_v43 = vpack.c.bf16 %v13392_v0, %v13389_v62  ;;  %v13407_v2 = vsub.s32 0, %v13404_v1  ;;  %v13413_v4 = vsub.s32 1, %v13404_v1  ;;  %v13456_v32 = vsub.s32 2, %v13404_v1 }
 0x1ea   :  { %430 = vmatmul.mubr.bf16.gmra.mrb[8].mxu0 %v13383_v59  ;;  %v13416_v5 = vrot.slane %v232_v3, %v13407_v2  ;;  %v13419_v10 = vrot.slane %v232_v3, %v13413_v4  ;;  %v245_v35 = vrot.slane %v232_v3, %v13456_v32 }
 0x1eb   :  { %439 = vmatprep.mubr.bf16.mxu0 %v13073_v39 }
 0x1f2   :  { %440 = vmatmul.mubr.bf16.gmra.mrb[12].mxu0 %v13397_v43 }
 0x1f3   :  { %11184 = vmatprep.mubr.bf16.mxu0 %v13325_v9 }
 0x1fa   :  { %11185 = vmatmul.mubr.bf16.vlgmr.msra.gmra.mrb[16].mxu0 %v13368_v54 }
 0x1fb   :  { %11188 = vmatprep.mubr.bf16.mxu0 %v13383_v59 }
 0x202   :  { %11189 = vmatmul.mubr.bf16.gmra.mrb[20].mxu0 %v13397_v43 }
 0x21d   :  { %v411_v6 = vpop.f32.mrb[0].mxu0 }
 0x21e   :  { %v13422_v11 = vadd.f32 %v411_v6, %v13416_v5  ;;  %v413_v12 = vpop.f32.mrb[1].mxu0 }
 0x21f   :  { %v415_v13 = vpop.f32.mrb[2].mxu0  ;;  %v414_v15 = vadd.f32 %v413_v12, %v13419_v10 }
 0x220   :  { %v417_v14 = vpop.f32.mrb[3].mxu0  ;;  %11196 = vmatprep.mubr.msk.f32.mxu1 %vm549_vm0, %v13422_v11  ;;  %v13441_v20 = vadd.f32 %v415_v13, %v13416_v5 }
 0x221   :  { %v418_v16 = vadd.f32 %v417_v14, %v13419_v10 }
 0x223   :  { %v11788_v18 = vpack.c.bf16 %v418_v16, %v414_v15  ;;  %v13434_v19 = vpack.i.bf16 %v418_v16, %v414_v15  ;;  %v13480_v15 = vrot.slane %v13466_v63, %v13407_v2 }
 0x225   :  { %11790 = vmatprep.subr.msk.bf16.mxu1 %vm13430_vm1, %v11788_v18 }
 0x226   :  { %11793 = vmatpush3.bf16.xpose.msk.msra.mxu1 %vm13430_vm1, %v11788_v18 }
 0x22d   :  { %11197 = vmatmul.mubr.msk.f32.vlgmr.msra.gmra.mrb[0].mxu1 %vm549_vm0, %v13441_v20 }
 0x2b5   :  { %v13445_v21 = vpop.f32.mrb[4].mxu0 }
 0x2b6   :  { %v423_v22 = vpop.f32.mrb[5].mxu0 }
 0x2b7   :  { %v13447_v23 = vpop.f32.mrb[6].mxu0  ;;  %v424_v60 = vadd.f32 %v423_v22, %v13419_v10 }
 0x2b8   :  { %v427_v24 = vpop.f32.mrb[7].mxu0 }
 0x2b9   :  { %v428_v61 = vadd.f32 %v427_v24, %v13419_v10 }
 0x2bb   :  { %v13472_v12 = vpack.i.bf16 %v428_v61, %v424_v60  ;;  %v13474_v13 = vpack.c.bf16 %v428_v61, %v424_v60 }
 0x2bd   :  { %v13449_v25 = vpop.f32.mrb[8].mxu0 }
 0x2be   :  { %v433_v26 = vpop.f32.mrb[9].mxu0 }
 0x2bf   :  { %v13451_v27 = vpop.f32.mrb[10].mxu0 }
 0x2c0   :  { %v437_v29 = vpop.f32.mrb[11].mxu0 }
 0x2c5   :  { %v13453_v30 = vpop.f32.mrb[12].mxu0 }
 0x2c6   :  { %v443_v31 = vpop.f32.mrb[13].mxu0 }
 0x2c7   :  { %v13458_v33 = vpop.f32.mrb[14].mxu0 }
 0x2c8   :  { %v447_v34 = vpop.f32.mrb[15].mxu0 }
 0x2cd   :  { %v11186_v37 = vpop.f32.mrb[16].mxu0 }
 0x2ce   :  { %v493_v38 = vadd.f32 %v11186_v37, %v245_v35  ;;  %v484_v40 = vpop.f32.mrb[17].mxu0  ;;  %v438_v37 = vadd.f32 %v437_v29, %v13419_v10 }
 0x2cf   :  { %v485_v41 = vadd.f32 %v484_v40, %v245_v35  ;;  %v11187_v42 = vpop.f32.mrb[18].mxu0 }
 0x2d0   :  { %v496_v44 = vadd.f32 %v11187_v42, %v245_v35  ;;  %v487_v45 = vpop.f32.mrb[19].mxu0 }
 0x2d1   :  { %v488_v46 = vadd.f32 %v487_v45, %v245_v35  ;;  %v448_v45 = vadd.f32 %v447_v34, %v13419_v10 }
 0x2d2   :  { %v13470_v6 = vpack.c.bf16 %v496_v44, %v493_v38  ;;  %v13476_v14 = vpack.i.bf16 %v496_v44, %v493_v38  ;;  %v444_v44 = vadd.f32 %v443_v31, %v13419_v10 }
 0x2d3   :  { %v11794_v47 = vpack.c.bf16 %v488_v46, %v485_v41  ;;  %v13468_v3 = vpack.i.bf16 %v488_v46, %v485_v41 }
 0x2d4   :  { %v13500_v29 = vpack.i.bf16 %v448_v45, %v444_v44 }
 0x2d5   :  { %11795 = vmatprep.subr.bf16.mxu1 %v11794_v47  ;;  %v11190_v49 = vpop.f32.mrb[20].mxu0 }
 0x2d6   :  { %11797 = vmatpush3.bf16.msra.mxu1 %v11794_v47  ;;  %v509_v28 = vadd.f32 %v11190_v49, %v245_v35  ;;  %v500_v51 = vpop.f32.mrb[21].mxu0  ;;  %v13502_v49 = vpack.c.bf16 %v448_v45, %v444_v44 }
 0x2d7   :  { %v501_v52 = vadd.f32 %v500_v51, %v245_v35  ;;  %v11191_v36 = vpop.f32.mrb[22].mxu0 }
 0x2d8   :  { %v512_v53 = vadd.f32 %v11191_v36, %v245_v35  ;;  %v503_v57 = vpop.f32.mrb[23].mxu0 }
 0x2d9   :  { %v504_v58 = vadd.f32 %v503_v57, %v245_v35  ;;  %v434_v35 = vadd.f32 %v433_v26, %v13419_v10 }
 0x2da   :  { %v13498_v26 = vpack.c.bf16 %v512_v53, %v509_v28  ;;  %v13504_v51 = vpack.i.bf16 %v512_v53, %v509_v28 }
 0x2db   :  { %v13488_v41 = vpack.i.bf16 %v438_v37, %v434_v35  ;;  %v13490_v42 = vpack.c.bf16 %v438_v37, %v434_v35  ;;  %v13494_v46 = vpack.c.bf16 %v504_v58, %v501_v52  ;;  %v13496_v47 = vpack.i.bf16 %v504_v58, %v501_v52 }
 0x300   :  { %v11198_v16 = vpop.f32.mrb[0].mxu1 }
 0x301   :  { %v634_v18 = vadd.f32 %v11198_v16, %v13480_v15  ;;  %v628_v22 = vpop.f32.mrb[1].mxu1 }
 0x302   :  { %v629_v24 = vadd.f32 %v628_v22, %v13480_v15 }
 0x303   :  { %v641_v40 = vsel %vm637_vm2, %v634_v18, -inf }
 0x304   :  { %642 = vmax.xlane.f32.xlu1 %v641_v40  ;;  %v638_v38 = vsel %vm637_vm2, %v629_v24, -inf }
 0x305   :  { %639 = vmax.xlane.f32.xlu0 %v638_v38 }
 0x391   :  { %v643_v36 = vpop.xlane.xlu1 %642 }
 0x392   :  { %v645_v57 = vsub.f32 %v634_v18, %v643_v36  ;;  %v640_v60 = vpop.xlane.xlu0 %639 }
 0x393   :  { %v644_v61 = vsub.f32 %v629_v24, %v640_v60 }
 0x394   :  { %v648_v16 = vmul.f32 1.442695, %v645_v57 }
 0x395   :  { %v646_v31 = vmul.f32 1.442695, %v644_v61 }
 0x396   :  { %12664 = vpow2.f32 %v648_v16 }
 0x397   :  { %12666 = vpow2.f32 %v646_v31 }
 0x3a0   :  { %v12665_v10 = vpop.eup %12664 }
 0x3a1   :  { %v12667_v34 = vpop.eup %12666  ;;  %v653_v52 = vsel %vm637_vm2, %v12665_v10, 0.0 }
 0x3a2   :  { %654 = vadd.xlane.f32.xlu1 %v653_v52  ;;  %v650_v58 = vsel %vm637_vm2, %v12667_v34, 0.0 }
 0x3a3   :  { %651 = vadd.xlane.f32.xlu0 %v650_v58 }
 0x3b3   :  { %751 = vrot.lane.b32.xlu1 %v13422_v11, %s13074_s21 }
 0x3b7   :  { %12254 = vrot.lane.b32.xlu1 %v13434_v19, %s13075_s1 }
 0x3b9   :  { %12249 = vrot.lane.b32.xlu0 %v13434_v19, %s13074_s21 }
 0x3bb   :  { %753 = vrot.lane.b32.xlu1 %v13441_v20, %s13074_s21 }
 0x3bd   :  { %974 = vrot.lane.b32.xlu0 %v13422_v11, %s13075_s1 }
 0x3bf   :  { %976 = vrot.lane.b32.xlu1 %v13441_v20, %s13075_s1 }
 0x42f   :  { %v655_v28 = vpop.xlane.xlu1 %654 }
 0x430   :  { %12668 = vrcp.f32 %v655_v28  ;;  %v652_v53 = vpop.xlane.xlu0 %651 }
 0x431   :  { %12670 = vrcp.f32 %v652_v53 }
 0x433   :  { %v752_v18 = vpop.permute.xlu1 %751 }
 0x434   :  { %v12250_v22 = vpop.permute.xlu0 %12249 }
 0x435   :  { %v12252_v24 = vunpack.i.h.bf16 %v12250_v22  ;;  %v12251_v35 = vunpack.i.l.bf16 %v12250_v22 }
 0x437   :  { %v11798_v37 = vpack.c.bf16 %v12252_v24, %v12251_v35  ;;  %v12255_v40 = vpop.permute.xlu1 %12254 }
 0x438   :  { %v12257_v45 = vunpack.i.h.bf16 %v12255_v40  ;;  %v12256_v36 = vunpack.i.l.bf16 %v12255_v40  ;;  %v975_v31 = vpop.permute.xlu0 %974 }
 0x439   :  { %11800 = vmatprep.subr.msk.bf16.mxu1 %vm13430_vm1, %v11798_v37 }
 0x43a   :  { %v12669_v38 = vpop.eup %12668  ;;  %v11808_v61 = vpack.c.bf16 %v12257_v45, %v12256_v36 }
 0x43b   :  { %v12671_v44 = vpop.eup %12670  ;;  %v659_v60 = vmul.f32 %v12669_v38, %v12665_v10  ;;  %v754_v16 = vpop.permute.xlu1 %753 }
 0x43c   :  { %v657_v57 = vmul.f32 %v12671_v44, %v12667_v34 }
 0x43e   :  { %11203 = vmatprep.mubr.msk.f32.mxu1 %vm637_vm2, %v657_v57 }
 0x43f   :  { %11204 = vmatmul.mubr.msk.f32.vlgmr.msra.gmra.mrb[2].mxu1 %vm637_vm2, %v659_v60  ;;  %v977_v10 = vpop.permute.xlu1 %976 }
 0x440   :  { %11803 = vmatpush3.bf16.xpose.msk.msra.mxu1 %vm13430_vm1, %v11798_v37  ;;  %11210 = vmatprep.mubr.msk.f32.mxu1 %vm549_vm0, %v752_v18 }
 0x441   :  { %11810 = vmatprep.subr.msk.bf16.mxu1 %vm13430_vm1, %v11808_v61 }
 0x447   :  { %11211 = vmatmul.mubr.msk.f32.vlgmr.msra.gmra.mrb[4].mxu1 %vm549_vm0, %v754_v16 }
 0x448   :  { %11813 = vmatpush3.bf16.xpose.msk.msra.mxu1 %vm13430_vm1, %v11808_v61  ;;  %11224 = vmatprep.mubr.msk.f32.mxu1 %vm549_vm0, %v975_v31 }
 0x44f   :  { %11225 = vmatmul.mubr.msk.f32.vlgmr.msra.gmra.mrb[6].mxu1 %vm549_vm0, %v977_v10 }
 0x512   :  { %v11205_v34 = vpop.f32.mrb[2].mxu1 }
 0x513   :  { %742 = vst.msk [vmem:[#allocation3 + $0x8] sm:$0xff] %vm549_vm0, %v11205_v34  ;;  %v732_v52 = vpop.f32.mrb[3].mxu1 }
 0x514   :  { %741 = vst.msk [vmem:[#allocation3] sm:$0xff] %vm549_vm0, %v732_v52 }
 0x51a   :  { %v11212_v58 = vpop.f32.mrb[4].mxu1 }
 0x51b   :  { %v841_v28 = vadd.f32 %v11212_v58, %v13480_v15  ;;  %v835_v53 = vpop.f32.mrb[5].mxu1 }
 0x51c   :  { %v836_v18 = vadd.f32 %v835_v53, %v13480_v15 }
 0x51d   :  { %v847_v22 = vsel %vm637_vm2, %v841_v28, -inf }
 0x51e   :  { %848 = vmax.xlane.f32.xlu1 %v847_v22  ;;  %v844_v24 = vsel %vm637_vm2, %v836_v18, -inf }
 0x51f   :  { %845 = vmax.xlane.f32.xlu0 %v844_v24 }
 0x522   :  { %v11226_v35 = vpop.f32.mrb[6].mxu1 }
 0x523   :  { %v1058_v37 = vpop.f32.mrb[7].mxu1  ;;  %v1064_v38 = vadd.f32 %v11226_v35, %v13480_v15 }
 0x524   :  { %v1059_v40 = vadd.f32 %v1058_v37, %v13480_v15 }
 0x525   :  { %v1070_v45 = vsel %vm637_vm2, %v1064_v38, -inf }
 0x526   :  { %v1067_v44 = vsel %vm637_vm2, %v1059_v40, -inf }
 0x527   :  { %1068 = vmax.xlane.f32.xlu0 %v1067_v44 }
 0x52b   :  { %1071 = vmax.xlane.f32.xlu0 %v1070_v45 }
 0x5ab   :  { %v849_v36 = vpop.xlane.xlu1 %848 }
 0x5ac   :  { %v851_v57 = vsub.f32 %v841_v28, %v849_v36  ;;  %v846_v60 = vpop.xlane.xlu0 %845 }
 0x5ad   :  { %v850_v61 = vsub.f32 %v836_v18, %v846_v60 }
 0x5ae   :  { %v854_v16 = vmul.f32 1.442695, %v851_v57 }
 0x5af   :  { %v852_v31 = vmul.f32 1.442695, %v850_v61 }
 0x5b0   :  { %12672 = vpow2.f32 %v854_v16 }
 0x5b1   :  { %12674 = vpow2.f32 %v852_v31 }
 0x5b4   :  { %v1069_v10 = vpop.xlane.xlu0 %1068 }
 0x5b5   :  { %v1073_v34 = vsub.f32 %v1059_v40, %v1069_v10 }
 0x5b7   :  { %v1075_v52 = vmul.f32 1.442695, %v1073_v34 }
 0x5b8   :  { %v1072_v58 = vpop.xlane.xlu0 %1071 }
 0x5b9   :  { %12676 = vpow2.f32 %v1075_v52  ;;  %v1074_v53 = vsub.f32 %v1064_v38, %v1072_v58 }
 0x5ba   :  { %v12673_v22 = vpop.eup %12672 }
 0x5bb   :  { %v12675_v24 = vpop.eup %12674  ;;  %v1077_v35 = vmul.f32 1.442695, %v1074_v53  ;;  %v859_v37 = vsel %vm637_vm2, %v12673_v22, 0.0 }
 0x5bc   :  { %860 = vadd.xlane.f32.xlu1 %v859_v37  ;;  %v856_v28 = vsel %vm637_vm2, %v12675_v24, 0.0 }
 0x5bd   :  { %12678 = vpow2.f32 %v1077_v35  ;;  %857 = vadd.xlane.f32.xlu0 %v856_v28 }
 0x5c3   :  { %v12677_v18 = vpop.eup %12676 }
 0x5c4   :  { %v1079_v44 = vsel %vm637_vm2, %v12677_v18, 0.0 }
 0x5c5   :  { %1080 = vadd.xlane.f32.xlu0 %v1079_v44 }
 0x5c7   :  { %v12679_v45 = vpop.eup %12678 }
 0x5c8   :  { %v1082_v40 = vsel %vm637_vm2, %v12679_v45, 0.0 }
 0x5c9   :  { %1083 = vadd.xlane.f32.xlu1 %v1082_v40 }
 0x5da   :  { %12264 = vrot.lane.b32.xlu1 %v13468_v3, %s13075_s1 }
 0x5db   :  { %12259 = vrot.lane.b32.xlu0 %v13468_v3, %s13074_s21 }
 0x5de   :  { %12269 = vrot.lane.b32.xlu1 %v13434_v19, %s13076_s22 }
 0x5df   :  { %1199 = vrot.lane.b32.xlu0 %v13441_v20, %s13076_s22 }
 0x5e2   :  { %1197 = vrot.lane.b32.xlu1 %v13422_v11, %s13076_s22 }
 0x649   :  { %v861_v36 = vpop.xlane.xlu1 %860 }
 0x64a   :  { %v858_v38 = vpop.xlane.xlu0 %857 }
 0x64b   :  { %12680 = vrcp.f32 %v858_v38 }
 0x64c   :  { %12682 = vrcp.f32 %v861_v36 }
 0x652   :  { %v1081_v57 = vpop.xlane.xlu0 %1080 }
 0x653   :  { %12684 = vrcp.f32 %v1081_v57 }
 0x655   :  { %v12681_v60 = vpop.eup %12680 }
 0x656   :  { %v1084_v61 = vpop.xlane.xlu1 %1083  ;;  %v12260_v16 = vpop.permute.xlu0 %12259  ;;  %v863_v31 = vmul.f32 %v12681_v60, %v12675_v24 }
 0x657   :  { %12686 = vrcp.f32 %v1084_v61  ;;  %v12262_v10 = vunpack.i.h.bf16 %v12260_v16  ;;  %v12261_v34 = vunpack.i.l.bf16 %v12260_v16  ;;  %v12683_v20 = vpop.eup %12682 }
 0x658   :  { %11217 = vmatprep.mubr.msk.f32.mxu0 %vm637_vm2, %v863_v31  ;;  %v865_v35 = vmul.f32 %v12683_v20, %v12673_v22 }
 0x659   :  { %v11804_v19 = vpack.c.bf16 %v12262_v10, %v12261_v34 }
 0x65a   :  { %v12265_v52 = vpop.permute.xlu1 %12264  ;;  %v1200_v22 = vpop.permute.xlu0 %1199 }
 0x65b   :  { %v12267_v58 = vunpack.i.h.bf16 %v12265_v52  ;;  %v12266_v11 = vunpack.i.l.bf16 %v12265_v52  ;;  %11805 = vmatprep.subr.bf16.mxu0 %v11804_v19 }
 0x65c   :  { %11807 = vmatpush3.bf16.msra.mxu0 %v11804_v19 }
 0x65d   :  { %v12685_v53 = vpop.eup %12684  ;;  %v11814_v37 = vpack.c.bf16 %v12267_v58, %v12266_v11 }
 0x65e   :  { %v12270_v28 = vpop.permute.xlu1 %12269  ;;  %v1086_v44 = vmul.f32 %v12685_v53, %v12677_v18 }
 0x65f   :  { %v12272_v40 = vunpack.i.h.bf16 %v12270_v28  ;;  %v12271_v38 = vunpack.i.l.bf16 %v12270_v28  ;;  %11218 = vmatmul.mubr.msk.f32.vlgmr.msra.gmra.mrb[24].mxu0 %vm637_vm2, %v865_v35  ;;  %11815 = vmatprep.subr.bf16.mxu0 %v11814_v37 }
 0x660   :  { %11817 = vmatpush3.bf16.msra.mxu0 %v11814_v37  ;;  %11231 = vmatprep.mubr.msk.f32.mxu0 %vm637_vm2, %v1086_v44 }
 0x661   :  { %v12687_v24 = vpop.eup %12686  ;;  %v11818_v36 = vpack.c.bf16 %v12272_v40, %v12271_v38 }
 0x662   :  { %v1088_v57 = vmul.f32 %v12687_v24, %v12679_v45  ;;  %v1198_v60 = vpop.permute.xlu1 %1197 }
 0x663   :  { %11820 = vmatprep.subr.msk.bf16.mxu0 %vm13430_vm1, %v11818_v36 }
 0x664   :  { %11232 = vmatmul.mubr.msk.f32.vlgmr.msra.gmra.mrb[26].mxu0 %vm637_vm2, %v1088_v57 }
 0x665   :  { %11238 = vmatprep.mubr.msk.f32.mxu0 %vm549_vm0, %v1198_v60 }
 0x669   :  { %11823 = vmatpush3.bf16.xpose.msk.msra.mxu0 %vm13430_vm1, %v11818_v36 }
 0x66a   :  { %11835 = vmatprep.subr.bf16.mxu0 %v13470_v6 }
 0x670   :  { %11239 = vmatmul.mubr.msk.f32.vlgmr.msra.gmra.mrb[28].mxu0 %vm549_vm0, %v1200_v22 }
 0x671   :  { %11837 = vmatpush3.bf16.msra.mxu0 %v13470_v6  ;;  %v13588_v6 = vadd.f32 %v13447_v23, %v13416_v5 }
 0x732   :  { %v13570_v18 = vpop.f32.mrb[24].mxu0 }
 0x733   :  { %v13572_v45 = vpop.f32.mrb[25].mxu0 }
 0x737   :  { %v13574_v61 = vpop.f32.mrb[26].mxu0 }
 0x738   :  { %v13576_v16 = vpop.f32.mrb[27].mxu0 }
 0x743   :  { %v11240_v31 = vpop.f32.mrb[28].mxu0 }
 0x744   :  { %v1287_v10 = vadd.f32 %v11240_v31, %v13480_v15  ;;  %v1281_v34 = vpop.f32.mrb[29].mxu0 }
 0x745   :  { %v1282_v19 = vadd.f32 %v1281_v34, %v13480_v15 }
 0x746   :  { %v1293_v20 = vsel %vm637_vm2, %v1287_v10, -inf }
 0x747   :  { %1294 = vmax.xlane.f32.xlu0 %v1293_v20  ;;  %v1290_v52 = vsel %vm637_vm2, %v1282_v19, -inf }
 0x748   :  { %1291 = vmax.xlane.f32.xlu1 %v1290_v52 }
 0x759   :  { %12274 = vrot.lane.b32.xlu1 %v13468_v3, %s13076_s22 }
 0x75d   :  { %12279 = vrot.lane.b32.xlu1 %v13472_v12, %s13074_s21 }
 0x761   :  { %1624 = vrot.lane.b32.xlu1 %v13588_v6, %s13074_s21 }
 0x7d4   :  { %v1295_v58 = vpop.xlane.xlu0 %1294 }
 0x7d5   :  { %v1297_v11 = vsub.f32 %v1287_v10, %v1295_v58  ;;  %v1292_v53 = vpop.xlane.xlu1 %1291 }
 0x7d6   :  { %v1296_v35 = vsub.f32 %v1282_v19, %v1292_v53  ;;  %v13602_v53 = vadd.f32 %v13445_v21, %v13416_v5  ;;  %v13618_v21 = vrot.slane %v13466_v63, %v13413_v4 }
 0x7d7   :  { %v1300_v37 = vmul.f32 1.442695, %v1297_v11 }
 0x7d8   :  { %v1298_v28 = vmul.f32 1.442695, %v1296_v35 }
 0x7d9   :  { %v12275_v44 = vpop.permute.xlu1 %12274 }
 0x7da   :  { %12688 = vpow2.f32 %v1298_v28  ;;  %v12277_v40 = vunpack.i.h.bf16 %v12275_v44  ;;  %v12276_v3 = vunpack.i.l.bf16 %v12275_v44 }
 0x7db   :  { %12690 = vpow2.f32 %v1300_v37 }
 0x7dc   :  { %v11824_v38 = vpack.c.bf16 %v12277_v40, %v12276_v3 }
 0x7dd   :  { %v12280_v24 = vpop.permute.xlu1 %12279 }
 0x7de   :  { %v12282_v36 = vunpack.i.h.bf16 %v12280_v24  ;;  %v12281_v57 = vunpack.i.l.bf16 %v12280_v24  ;;  %11825 = vmatprep.subr.bf16.mxu1 %v11824_v38 }
 0x7df   :  { %11827 = vmatpush3.bf16.msra.mxu1 %v11824_v38 }
 0x7e0   :  { %v11838_v23 = vpack.c.bf16 %v12282_v36, %v12281_v57  ;;  %11830 = vmatprep.subr.msk.bf16.mxu1 %vm13430_vm1, %v13474_v13 }
 0x7e2   :  { %11840 = vmatprep.subr.msk.bf16.mxu0 %vm13430_vm1, %v11838_v23 }
 0x7e4   :  { %v12689_v60 = vpop.eup %12688 }
 0x7e5   :  { %v1302_v22 = vsel %vm637_vm2, %v12689_v60, 0.0  ;;  %v12691_v31 = vpop.eup %12690 }
 0x7e6   :  { %1303 = vadd.xlane.f32.xlu0 %v1302_v22  ;;  %v1305_v10 = vsel %vm637_vm2, %v12691_v31, 0.0 }
 0x7ea   :  { %1306 = vadd.xlane.f32.xlu0 %v1305_v10 }
 0x873   :  { %v1304_v34 = vpop.xlane.xlu0 %1303 }
 0x874   :  { %12692 = vrcp.f32 %v1304_v34 }
 0x877   :  { %v1307_v19 = vpop.xlane.xlu0 %1306 }
 0x878   :  { %12694 = vrcp.f32 %v1307_v19 }
 0x87e   :  { %v12693_v20 = vpop.eup %12692 }
 0x87f   :  { %v1309_v52 = vmul.f32 %v12693_v20, %v12689_v60 }
 0x881   :  { %11245 = vmatprep.mubr.msk.f32.mxu1 %vm637_vm2, %v1309_v52 }
 0x882   :  { %v12695_v58 = vpop.eup %12694 }
 0x883   :  { %v1311_v11 = vmul.f32 %v12695_v58, %v12691_v31 }
 0x885   :  { %11246 = vmatmul.mubr.msk.f32.vlgmr.msra.gmra.mrb[8].mxu1 %vm637_vm2, %v1311_v11 }
 0x886   :  { %11833 = vmatpush3.bf16.xpose.msk.msra.mxu1 %vm13430_vm1, %v13474_v13  ;;  %11252 = vmatprep.mubr.msk.f32.mxu1 %vm549_vm0, %v13602_v53 }
 0x88d   :  { %11253 = vmatmul.mubr.msk.f32.vlgmr.msra.gmra.mrb[10].mxu1 %vm549_vm0, %v13588_v6 }
 0x958   :  { %v13612_v35 = vpop.f32.mrb[8].mxu1 }
 0x959   :  { %v13614_v37 = vpop.f32.mrb[9].mxu1 }
 0x960   :  { %v11254_v28 = vpop.f32.mrb[10].mxu1 }
 0x961   :  { %v1500_v44 = vpop.f32.mrb[11].mxu1  ;;  %v1506_v13 = vadd.f32 %v11254_v28, %v13618_v21 }
 0x962   :  { %v1501_v40 = vadd.f32 %v1500_v44, %v13618_v21 }
 0x963   :  { %v1512_v38 = vsel %vm637_vm2, %v1506_v13, -inf }
 0x964   :  { %v1509_v3 = vsel %vm637_vm2, %v1501_v40, -inf }
 0x965   :  { %1510 = vmax.xlane.f32.xlu0 %v1509_v3  ;;  %v1625_v3 = vpop.permute.xlu1 %1624 }
 0x969   :  { %1513 = vmax.xlane.f32.xlu0 %v1512_v38 }
 0x9f2   :  { %v1511_v24 = vpop.xlane.xlu0 %1510 }
 0x9f3   :  { %v1515_v36 = vsub.f32 %v1501_v40, %v1511_v24 }
 0x9f5   :  { %v1517_v57 = vmul.f32 1.442695, %v1515_v36 }
 0x9f6   :  { %v1514_v60 = vpop.xlane.xlu0 %1513 }
 0x9f7   :  { %12696 = vpow2.f32 %v1517_v57  ;;  %v1516_v22 = vsub.f32 %v1506_v13, %v1514_v60 }
 0x9f9   :  { %v1519_v31 = vmul.f32 1.442695, %v1516_v22 }
 0x9fb   :  { %12698 = vpow2.f32 %v1519_v31 }
 0xa01   :  { %v12697_v10 = vpop.eup %12696 }
 0xa02   :  { %v1521_v34 = vsel %vm637_vm2, %v12697_v10, 0.0 }
 0xa03   :  { %1522 = vadd.xlane.f32.xlu0 %v1521_v34 }
 0xa05   :  { %v12699_v19 = vpop.eup %12698 }
 0xa06   :  { %v1524_v20 = vsel %vm637_vm2, %v12699_v19, 0.0 }
 0xa07   :  { %1525 = vadd.xlane.f32.xlu0 %v1524_v20 }
 0xa1d   :  { %1622 = vrot.lane.b32.xlu0 %v13602_v53, %s13074_s21 }
 0xa90   :  { %v1523_v52 = vpop.xlane.xlu0 %1522 }
 0xa91   :  { %12700 = vrcp.f32 %v1523_v52 }
 0xa94   :  { %v1526_v58 = vpop.xlane.xlu0 %1525 }
 0xa95   :  { %12702 = vrcp.f32 %v1526_v58 }
 0xa98   :  { %v1623_v13 = vpop.permute.xlu0 %1622 }
 0xa9b   :  { %v12701_v11 = vpop.eup %12700 }
 0xa9c   :  { %v1528_v28 = vmul.f32 %v12701_v11, %v12697_v10 }
 0xa9e   :  { %11259 = vmatprep.mubr.msk.f32.mxu0 %vm637_vm2, %v1528_v28 }
 0xa9f   :  { %v12703_v44 = vpop.eup %12702 }
 0xaa0   :  { %v1530_v40 = vmul.f32 %v12703_v44, %v12699_v19 }
 0xaa2   :  { %11260 = vmatmul.mubr.msk.f32.vlgmr.msra.gmra.mrb[30].mxu0 %vm637_vm2, %v1530_v40 }
 0xaa3   :  { %11843 = vmatpush3.bf16.xpose.msk.msra.mxu0 %vm13430_vm1, %v11838_v23  ;;  %11266 = vmatprep.mubr.msk.f32.mxu0 %vm549_vm0, %v1623_v13 }
 0xaaa   :  { %11267 = vmatmul.mubr.msk.f32.vlgmr.msra.gmra.mrb[32].mxu0 %vm549_vm0, %v1625_v3 }
 0xb75   :  { %v11261_v38 = vpop.f32.mrb[30].mxu0 }
 0xb76   :  { %1613 = vst.msk [vmem:[#allocation3 + $0x18] sm:$0xff] %vm549_vm0, %v11261_v38  ;;  %v1603_v24 = vpop.f32.mrb[31].mxu0 }
 0xb77   :  { %1612 = vst.msk [vmem:[#allocation3 + $0x10] sm:$0xff] %vm549_vm0, %v1603_v24 }
 0xb7d   :  { %v11268_v36 = vpop.f32.mrb[32].mxu0 }
 0xb7e   :  { %v1712_v57 = vadd.f32 %v11268_v36, %v13618_v21  ;;  %v1706_v60 = vpop.f32.mrb[33].mxu0 }
 0xb7f   :  { %v1707_v22 = vadd.f32 %v1706_v60, %v13618_v21 }
 0xb80   :  { %v1718_v31 = vsel %vm637_vm2, %v1712_v57, -inf }
 0xb81   :  { %1719 = vmax.xlane.f32.xlu0 %v1718_v31  ;;  %v1715_v23 = vsel %vm637_vm2, %v1707_v22, -inf }
 0xb82   :  { %1716 = vmax.xlane.f32.xlu1 %v1715_v23 }
 0xb93   :  { %12284 = vrot.lane.b32.xlu1 %v13476_v14, %s13074_s21 }
 0xb97   :  { %12289 = vrot.lane.b32.xlu0 %v13472_v12, %s13075_s1  ;;  %1844 = vrot.lane.b32.xlu1 %v13602_v53, %s13075_s1 }
 0xc0e   :  { %v1720_v10 = vpop.xlane.xlu0 %1719 }
 0xc0f   :  { %v1722_v34 = vsub.f32 %v1712_v57, %v1720_v10  ;;  %v1717_v19 = vpop.xlane.xlu1 %1716 }
 0xc10   :  { %v1721_v20 = vsub.f32 %v1707_v22, %v1717_v19 }
 0xc11   :  { %v1725_v52 = vmul.f32 1.442695, %v1722_v34 }
 0xc12   :  { %v1723_v58 = vmul.f32 1.442695, %v1721_v20  ;;  %v12290_v11 = vpop.permute.xlu0 %12289 }
 0xc13   :  { %12704 = vpow2.f32 %v1725_v52  ;;  %v12285_v28 = vpop.permute.xlu1 %12284  ;;  %v12292_v44 = vunpack.i.h.bf16 %v12290_v11  ;;  %v12291_v40 = vunpack.i.l.bf16 %v12290_v11 }
 0xc14   :  { %v12287_v13 = vunpack.i.h.bf16 %v12285_v28  ;;  %v12286_v3 = vunpack.i.l.bf16 %v12285_v28  ;;  %12706 = vpow2.f32 %v1723_v58 }
 0xc15   :  { %v11848_v24 = vpack.c.bf16 %v12292_v44, %v12291_v40 }
 0xc16   :  { %v11844_v38 = vpack.c.bf16 %v12287_v13, %v12286_v3 }
 0xc17   :  { %v1845_v31 = vpop.permute.xlu1 %1844 }
 0xc18   :  { %11845 = vmatprep.subr.bf16.mxu1 %v11844_v38 }
 0xc19   :  { %11847 = vmatpush3.bf16.msra.mxu1 %v11844_v38 }
 0xc1a   :  { %11850 = vmatprep.subr.msk.bf16.mxu1 %vm13430_vm1, %v11848_v24 }
 0xc1d   :  { %v12705_v36 = vpop.eup %12704 }
 0xc1e   :  { %v1730_v57 = vsel %vm637_vm2, %v12705_v36, 0.0  ;;  %v12707_v60 = vpop.eup %12706 }
 0xc1f   :  { %1731 = vadd.xlane.f32.xlu1 %v1730_v57  ;;  %v1727_v22 = vsel %vm637_vm2, %v12707_v60, 0.0 }
 0xc23   :  { %1728 = vadd.xlane.f32.xlu1 %v1727_v22 }
 0xc34   :  { %1846 = vrot.lane.b32.xlu1 %v13588_v6, %s13075_s1 }
 0xcac   :  { %v1732_v23 = vpop.xlane.xlu1 %1731 }
 0xcad   :  { %12708 = vrcp.f32 %v1732_v23 }
 0xcb0   :  { %v1729_v10 = vpop.xlane.xlu1 %1728 }
 0xcb1   :  { %12710 = vrcp.f32 %v1729_v10 }
 0xcb4   :  { %v1847_v58 = vpop.permute.xlu1 %1846 }
 0xcb7   :  { %v12709_v34 = vpop.eup %12708 }
 0xcb8   :  { %v1736_v52 = vmul.f32 %v12709_v34, %v12705_v36 }
 0xcbb   :  { %v12711_v19 = vpop.eup %12710 }
 0xcbc   :  { %v1734_v20 = vmul.f32 %v12711_v19, %v12707_v60 }
 0xcbe   :  { %11273 = vmatprep.mubr.msk.f32.mxu1 %vm637_vm2, %v1734_v20 }
 0xcbf   :  { %11274 = vmatmul.mubr.msk.f32.vlgmr.msra.gmra.mrb[12].mxu1 %vm637_vm2, %v1736_v52 }
 0xcc0   :  { %11853 = vmatpush3.bf16.xpose.msk.msra.mxu1 %vm13430_vm1, %v11848_v24  ;;  %11280 = vmatprep.mubr.msk.f32.mxu1 %vm549_vm0, %v1845_v31 }
 0xcc7   :  { %11281 = vmatmul.mubr.msk.f32.vlgmr.msra.gmra.mrb[14].mxu1 %vm549_vm0, %v1847_v58 }
 0xd92   :  { %v13658_v11 = vpop.f32.mrb[12].mxu1 }
 0xd93   :  { %v13660_v28 = vpop.f32.mrb[13].mxu1 }
 0xd9a   :  { %v11282_v44 = vpop.f32.mrb[14].mxu1 }
 0xd9b   :  { %v1934_v40 = vadd.f32 %v11282_v44, %v13618_v21  ;;  %v1928_v13 = vpop.f32.mrb[15].mxu1 }
 0xd9c   :  { %v1929_v3 = vadd.f32 %v1928_v13, %v13618_v21 }
 0xd9d   :  { %v1940_v38 = vsel %vm637_vm2, %v1934_v40, -inf }
 0xd9e   :  { %1941 = vmax.xlane.f32.xlu0 %v1940_v38  ;;  %v1937_v24 = vsel %vm637_vm2, %v1929_v3, -inf }
 0xd9f   :  { %1938 = vmax.xlane.f32.xlu1 %v1937_v24 }
 0xdb0   :  { %12294 = vrot.lane.b32.xlu1 %v13476_v14, %s13075_s1 }
 0xdb4   :  { %2066 = vrot.lane.b32.xlu1 %v13602_v53, %s13076_s22 }
 0xdb8   :  { %2068 = vrot.lane.b32.xlu1 %v13588_v6, %s13076_s22 }
 0xe2b   :  { %v1942_v36 = vpop.xlane.xlu0 %1941 }
 0xe2c   :  { %v1944_v57 = vsub.f32 %v1934_v40, %v1942_v36  ;;  %v1939_v60 = vpop.xlane.xlu1 %1938 }
 0xe2d   :  { %v1943_v22 = vsub.f32 %v1929_v3, %v1939_v60 }
 0xe2e   :  { %v1947_v31 = vmul.f32 1.442695, %v1944_v57 }
 0xe2f   :  { %v1945_v23 = vmul.f32 1.442695, %v1943_v22 }
 0xe30   :  { %12712 = vpow2.f32 %v1947_v31  ;;  %v12295_v10 = vpop.permute.xlu1 %12294 }
 0xe31   :  { %v12297_v34 = vunpack.i.h.bf16 %v12295_v10  ;;  %v12296_v19 = vunpack.i.l.bf16 %v12295_v10  ;;  %12714 = vpow2.f32 %v1945_v23 }
 0xe33   :  { %v11854_v20 = vpack.c.bf16 %v12297_v34, %v12296_v19 }
 0xe34   :  { %v2067_v31 = vpop.permute.xlu1 %2066 }
 0xe35   :  { %11855 = vmatprep.subr.bf16.mxu0 %v11854_v20 }
 0xe36   :  { %11857 = vmatpush3.bf16.msra.mxu0 %v11854_v20 }
 0xe3a   :  { %v12713_v52 = vpop.eup %12712 }
 0xe3b   :  { %v1952_v53 = vsel %vm637_vm2, %v12713_v52, 0.0  ;;  %v12715_v58 = vpop.eup %12714 }
 0xe3c   :  { %1953 = vadd.xlane.f32.xlu0 %v1952_v53  ;;  %v1949_v6 = vsel %vm637_vm2, %v12715_v58, 0.0 }
 0xe40   :  { %1950 = vadd.xlane.f32.xlu0 %v1949_v6 }
 0xe56   :  { %12299 = vrot.lane.b32.xlu0 %v13472_v12, %s13076_s22  ;;  %v2069_v12 = vpop.permute.xlu1 %2068 }
 0xec9   :  { %v1954_v44 = vpop.xlane.xlu0 %1953 }
 0xeca   :  { %12716 = vrcp.f32 %v1954_v44 }
 0xecd   :  { %v1951_v40 = vpop.xlane.xlu0 %1950 }
 0xece   :  { %12718 = vrcp.f32 %v1951_v40 }
 0xed1   :  { %v12300_v13 = vpop.permute.xlu0 %12299 }
 0xed2   :  { %v12302_v3 = vunpack.i.h.bf16 %v12300_v13  ;;  %v12301_v38 = vunpack.i.l.bf16 %v12300_v13 }
 0xed4   :  { %v11858_v24 = vpack.c.bf16 %v12302_v3, %v12301_v38  ;;  %v12717_v36 = vpop.eup %12716 }
 0xed5   :  { %v1958_v22 = vmul.f32 %v12717_v36, %v12713_v52 }
 0xed6   :  { %11860 = vmatprep.subr.msk.bf16.mxu0 %vm13430_vm1, %v11858_v24 }
 0xed8   :  { %v12719_v57 = vpop.eup %12718 }
 0xed9   :  { %v1956_v60 = vmul.f32 %v12719_v57, %v12715_v58 }
 0xedb   :  { %11287 = vmatprep.mubr.msk.f32.mxu0 %vm637_vm2, %v1956_v60 }
 0xedc   :  { %11288 = vmatmul.mubr.msk.f32.vlgmr.msra.gmra.mrb[34].mxu0 %vm637_vm2, %v1958_v22 }
 0xedd   :  { %11863 = vmatpush3.bf16.xpose.msk.msra.mxu0 %vm13430_vm1, %v11858_v24  ;;  %11294 = vmatprep.mubr.msk.f32.mxu0 %vm549_vm0, %v2067_v31 }
 0xede   :  { %11875 = vmatprep.subr.bf16.mxu0 %v13494_v46 }
 0xee4   :  { %11295 = vmatmul.mubr.msk.f32.vlgmr.msra.gmra.mrb[36].mxu0 %vm549_vm0, %v2069_v12 }
 0xee5   :  { %11877 = vmatpush3.bf16.msra.mxu0 %v13494_v46  ;;  %v13700_v46 = vadd.f32 %v13451_v27, %v13416_v5 }
 0xfaf   :  { %v13686_v23 = vpop.f32.mrb[34].mxu0 }
 0xfb0   :  { %v13688_v10 = vpop.f32.mrb[35].mxu0 }
 0xfb7   :  { %v11296_v34 = vpop.f32.mrb[36].mxu0 }
 0xfb8   :  { %v2156_v19 = vadd.f32 %v11296_v34, %v13618_v21  ;;  %v2150_v20 = vpop.f32.mrb[37].mxu0 }
 0xfb9   :  { %v2151_v52 = vadd.f32 %v2150_v20, %v13618_v21 }
 0xfba   :  { %v2162_v53 = vsel %vm637_vm2, %v2156_v19, -inf }
 0xfbb   :  { %2163 = vmax.xlane.f32.xlu0 %v2162_v53  ;;  %v2159_v58 = vsel %vm637_vm2, %v2151_v52, -inf }
 0xfbc   :  { %2160 = vmax.xlane.f32.xlu1 %v2159_v58 }
 0xfcd   :  { %12304 = vrot.lane.b32.xlu1 %v13476_v14, %s13076_s22 }
 0xfd1   :  { %12309 = vrot.lane.b32.xlu1 %v13488_v41, %s13074_s21 }
 0xfd5   :  { %2492 = vrot.lane.b32.xlu1 %v13700_v46, %s13074_s21 }
0x1048   :  { %v2164_v6 = vpop.xlane.xlu0 %2163 }
0x1049   :  { %v2166_v44 = vsub.f32 %v2156_v19, %v2164_v6  ;;  %v2161_v40 = vpop.xlane.xlu1 %2160 }
0x104a   :  { %v2165_v13 = vsub.f32 %v2151_v52, %v2161_v40 }
0x104b   :  { %v2169_v3 = vmul.f32 1.442695, %v2166_v44 }
0x104c   :  { %v2167_v38 = vmul.f32 1.442695, %v2165_v13  ;;  %v13714_v13 = vadd.f32 %v13449_v25, %v13416_v5  ;;  %v13730_v25 = vrot.slane %v13466_v63, %v13456_v32 }
0x104d   :  { %v12305_v24 = vpop.permute.xlu1 %12304 }
0x104e   :  { %12720 = vpow2.f32 %v2167_v38  ;;  %v12307_v36 = vunpack.i.h.bf16 %v12305_v24  ;;  %v12306_v14 = vunpack.i.l.bf16 %v12305_v24 }
0x104f   :  { %12722 = vpow2.f32 %v2169_v3 }
0x1050   :  { %v11864_v57 = vpack.c.bf16 %v12307_v36, %v12306_v14 }
0x1051   :  { %v12310_v60 = vpop.permute.xlu1 %12309 }
0x1052   :  { %v12312_v22 = vunpack.i.h.bf16 %v12310_v60  ;;  %v12311_v31 = vunpack.i.l.bf16 %v12310_v60  ;;  %11865 = vmatprep.subr.bf16.mxu1 %v11864_v57 }
0x1053   :  { %11867 = vmatpush3.bf16.msra.mxu1 %v11864_v57 }
0x1054   :  { %v11878_v27 = vpack.c.bf16 %v12312_v22, %v12311_v31  ;;  %11870 = vmatprep.subr.msk.bf16.mxu1 %vm13430_vm1, %v13490_v42 }
0x1056   :  { %11880 = vmatprep.subr.msk.bf16.mxu0 %vm13430_vm1, %v11878_v27 }
0x1058   :  { %v12721_v12 = vpop.eup %12720 }
0x1059   :  { %v2171_v34 = vsel %vm637_vm2, %v12721_v12, 0.0  ;;  %v12723_v19 = vpop.eup %12722 }
0x105a   :  { %2172 = vadd.xlane.f32.xlu0 %v2171_v34  ;;  %v2174_v20 = vsel %vm637_vm2, %v12723_v19, 0.0 }
0x105e   :  { %2175 = vadd.xlane.f32.xlu0 %v2174_v20 }
0x10e7   :  { %v2173_v52 = vpop.xlane.xlu0 %2172 }
0x10e8   :  { %12724 = vrcp.f32 %v2173_v52 }
0x10eb   :  { %v2176_v53 = vpop.xlane.xlu0 %2175 }
0x10ec   :  { %12726 = vrcp.f32 %v2176_v53 }
0x10f2   :  { %v12725_v58 = vpop.eup %12724 }
0x10f3   :  { %v2178_v6 = vmul.f32 %v12725_v58, %v12721_v12 }
0x10f5   :  { %11301 = vmatprep.mubr.msk.f32.mxu1 %vm637_vm2, %v2178_v6 }
0x10f6   :  { %v12727_v44 = vpop.eup %12726 }
0x10f7   :  { %v2180_v40 = vmul.f32 %v12727_v44, %v12723_v19 }
0x10f9   :  { %11302 = vmatmul.mubr.msk.f32.vlgmr.msra.gmra.mrb[16].mxu1 %vm637_vm2, %v2180_v40 }
0x10fa   :  { %11873 = vmatpush3.bf16.xpose.msk.msra.mxu1 %vm13430_vm1, %v13490_v42  ;;  %11308 = vmatprep.mubr.msk.f32.mxu1 %vm549_vm0, %v13714_v13 }
0x1101   :  { %11309 = vmatmul.mubr.msk.f32.vlgmr.msra.gmra.mrb[18].mxu1 %vm549_vm0, %v13700_v46 }
0x11cc   :  { %v13724_v3 = vpop.f32.mrb[16].mxu1 }
0x11cd   :  { %v13726_v38 = vpop.f32.mrb[17].mxu1 }
0x11d4   :  { %v11310_v24 = vpop.f32.mrb[18].mxu1 }
0x11d5   :  { %v2368_v36 = vpop.f32.mrb[19].mxu1  ;;  %v2374_v42 = vadd.f32 %v11310_v24, %v13730_v25 }
0x11d6   :  { %v2369_v14 = vadd.f32 %v2368_v36, %v13730_v25 }
0x11d7   :  { %v2380_v60 = vsel %vm637_vm2, %v2374_v42, -inf }
0x11d8   :  { %v2377_v57 = vsel %vm637_vm2, %v2369_v14, -inf }
0x11d9   :  { %2378 = vmax.xlane.f32.xlu0 %v2377_v57  ;;  %v2493_v57 = vpop.permute.xlu1 %2492 }
0x11dd   :  { %2381 = vmax.xlane.f32.xlu0 %v2380_v60 }
0x1266   :  { %v2379_v22 = vpop.xlane.xlu0 %2378 }
0x1267   :  { %v2383_v31 = vsub.f32 %v2369_v14, %v2379_v22 }
0x1269   :  { %v2385_v12 = vmul.f32 1.442695, %v2383_v31 }
0x126a   :  { %v2382_v34 = vpop.xlane.xlu0 %2381 }
0x126b   :  { %12728 = vpow2.f32 %v2385_v12  ;;  %v2384_v19 = vsub.f32 %v2374_v42, %v2382_v34 }
0x126d   :  { %v2387_v63 = vmul.f32 1.442695, %v2384_v19 }
0x126f   :  { %12730 = vpow2.f32 %v2387_v63 }
0x1275   :  { %v12729_v20 = vpop.eup %12728 }
0x1276   :  { %v2389_v52 = vsel %vm637_vm2, %v12729_v20, 0.0 }
0x1277   :  { %2390 = vadd.xlane.f32.xlu0 %v2389_v52 }
0x1279   :  { %v12731_v53 = vpop.eup %12730 }
0x127a   :  { %v2392_v58 = vsel %vm637_vm2, %v12731_v53, 0.0 }
0x127b   :  { %2393 = vadd.xlane.f32.xlu0 %v2392_v58 }
0x1291   :  { %2490 = vrot.lane.b32.xlu0 %v13714_v13, %s13074_s21 }
0x1304   :  { %v2391_v6 = vpop.xlane.xlu0 %2390 }
0x1305   :  { %12732 = vrcp.f32 %v2391_v6 }
0x1308   :  { %v2394_v44 = vpop.xlane.xlu0 %2393 }
0x1309   :  { %12734 = vrcp.f32 %v2394_v44 }
0x130c   :  { %v2491_v42 = vpop.permute.xlu0 %2490 }
0x130f   :  { %v12733_v40 = vpop.eup %12732 }
0x1310   :  { %v2396_v24 = vmul.f32 %v12733_v40, %v12729_v20 }
0x1312   :  { %11315 = vmatprep.mubr.msk.f32.mxu0 %vm637_vm2, %v2396_v24 }
0x1313   :  { %v12735_v36 = vpop.eup %12734 }
0x1314   :  { %v2398_v14 = vmul.f32 %v12735_v36, %v12731_v53 }
0x1316   :  { %11316 = vmatmul.mubr.msk.f32.vlgmr.msra.gmra.mrb[38].mxu0 %vm637_vm2, %v2398_v14 }
0x1317   :  { %11883 = vmatpush3.bf16.xpose.msk.msra.mxu0 %vm13430_vm1, %v11878_v27  ;;  %11322 = vmatprep.mubr.msk.f32.mxu0 %vm549_vm0, %v2491_v42 }
0x131e   :  { %11323 = vmatmul.mubr.msk.f32.vlgmr.msra.gmra.mrb[40].mxu0 %vm549_vm0, %v2493_v57 }
0x13e9   :  { %v11317_v60 = vpop.f32.mrb[38].mxu0 }
0x13ea   :  { %2481 = vst.msk [vmem:[#allocation3 + $0x28] sm:$0xff] %vm549_vm0, %v11317_v60  ;;  %v2471_v22 = vpop.f32.mrb[39].mxu0 }
0x13eb   :  { %2480 = vst.msk [vmem:[#allocation3 + $0x20] sm:$0xff] %vm549_vm0, %v2471_v22 }
0x13f1   :  { %v11324_v31 = vpop.f32.mrb[40].mxu0 }
0x13f2   :  { %v2580_v12 = vadd.f32 %v11324_v31, %v13730_v25  ;;  %v2574_v34 = vpop.f32.mrb[41].mxu0 }
0x13f3   :  { %v2575_v19 = vadd.f32 %v2574_v34, %v13730_v25 }
0x13f4   :  { %v2586_v63 = vsel %vm637_vm2, %v2580_v12, -inf }
0x13f5   :  { %2587 = vmax.xlane.f32.xlu0 %v2586_v63  ;;  %v2583_v27 = vsel %vm637_vm2, %v2575_v19, -inf }
0x13f6   :  { %2584 = vmax.xlane.f32.xlu1 %v2583_v27 }
0x1407   :  { %12314 = vrot.lane.b32.xlu1 %v13496_v47, %s13074_s21 }
0x140b   :  { %12319 = vrot.lane.b32.xlu0 %v13488_v41, %s13075_s1  ;;  %2712 = vrot.lane.b32.xlu1 %v13714_v13, %s13075_s1 }
0x1482   :  { %v2588_v20 = vpop.xlane.xlu0 %2587 }
0x1483   :  { %v2590_v52 = vsub.f32 %v2580_v12, %v2588_v20  ;;  %v2585_v53 = vpop.xlane.xlu1 %2584 }
0x1484   :  { %v2589_v58 = vsub.f32 %v2575_v19, %v2585_v53 }
0x1485   :  { %v2593_v6 = vmul.f32 1.442695, %v2590_v52 }
0x1486   :  { %v2591_v44 = vmul.f32 1.442695, %v2589_v58  ;;  %v12320_v40 = vpop.permute.xlu0 %12319 }
0x1487   :  { %12736 = vpow2.f32 %v2593_v6  ;;  %v12315_v24 = vpop.permute.xlu1 %12314  ;;  %v12322_v36 = vunpack.i.h.bf16 %v12320_v40  ;;  %v12321_v14 = vunpack.i.l.bf16 %v12320_v40 }
0x1488   :  { %v12317_v42 = vunpack.i.h.bf16 %v12315_v24  ;;  %v12316_v57 = vunpack.i.l.bf16 %v12315_v24  ;;  %12738 = vpow2.f32 %v2591_v44 }
0x1489   :  { %v11888_v22 = vpack.c.bf16 %v12322_v36, %v12321_v14 }
0x148a   :  { %v11884_v60 = vpack.c.bf16 %v12317_v42, %v12316_v57 }
0x148b   :  { %v2713_v63 = vpop.permute.xlu1 %2712 }
0x148c   :  { %11885 = vmatprep.subr.bf16.mxu1 %v11884_v60 }
0x148d   :  { %11887 = vmatpush3.bf16.msra.mxu1 %v11884_v60 }
0x148e   :  { %11890 = vmatprep.subr.msk.bf16.mxu1 %vm13430_vm1, %v11888_v22 }
0x1491   :  { %v12737_v31 = vpop.eup %12736 }
0x1492   :  { %v2598_v12 = vsel %vm637_vm2, %v12737_v31, 0.0  ;;  %v12739_v34 = vpop.eup %12738 }
0x1493   :  { %2599 = vadd.xlane.f32.xlu1 %v2598_v12  ;;  %v2595_v19 = vsel %vm637_vm2, %v12739_v34, 0.0 }
0x1497   :  { %2596 = vadd.xlane.f32.xlu1 %v2595_v19 }
0x14a8   :  { %2714 = vrot.lane.b32.xlu1 %v13700_v46, %s13075_s1 }
0x1520   :  { %v2600_v27 = vpop.xlane.xlu1 %2599 }
0x1521   :  { %12740 = vrcp.f32 %v2600_v27 }
0x1524   :  { %v2597_v20 = vpop.xlane.xlu1 %2596 }
0x1525   :  { %12742 = vrcp.f32 %v2597_v20 }
0x1528   :  { %v2715_v44 = vpop.permute.xlu1 %2714 }
0x152b   :  { %v12741_v52 = vpop.eup %12740 }
0x152c   :  { %v2604_v6 = vmul.f32 %v12741_v52, %v12737_v31 }
0x152f   :  { %v12743_v53 = vpop.eup %12742 }
0x1530   :  { %v2602_v58 = vmul.f32 %v12743_v53, %v12739_v34 }
0x1532   :  { %11329 = vmatprep.mubr.msk.f32.mxu1 %vm637_vm2, %v2602_v58 }
0x1533   :  { %11330 = vmatmul.mubr.msk.f32.vlgmr.msra.gmra.mrb[20].mxu1 %vm637_vm2, %v2604_v6 }
0x1534   :  { %11893 = vmatpush3.bf16.xpose.msk.msra.mxu1 %vm13430_vm1, %v11888_v22  ;;  %11336 = vmatprep.mubr.msk.f32.mxu1 %vm549_vm0, %v2713_v63 }
0x153b   :  { %11337 = vmatmul.mubr.msk.f32.vlgmr.msra.gmra.mrb[22].mxu1 %vm549_vm0, %v2715_v44 }
0x1606   :  { %v13770_v40 = vpop.f32.mrb[20].mxu1 }
0x1607   :  { %v13772_v24 = vpop.f32.mrb[21].mxu1 }
0x160e   :  { %v11338_v36 = vpop.f32.mrb[22].mxu1 }
0x160f   :  { %v2802_v14 = vadd.f32 %v11338_v36, %v13730_v25  ;;  %v2796_v42 = vpop.f32.mrb[23].mxu1 }
0x1610   :  { %v2797_v57 = vadd.f32 %v2796_v42, %v13730_v25 }
0x1611   :  { %v2808_v60 = vsel %vm637_vm2, %v2802_v14, -inf }
0x1612   :  { %2809 = vmax.xlane.f32.xlu0 %v2808_v60  ;;  %v2805_v22 = vsel %vm637_vm2, %v2797_v57, -inf }
0x1613   :  { %2806 = vmax.xlane.f32.xlu1 %v2805_v22 }
0x1624   :  { %12324 = vrot.lane.b32.xlu1 %v13496_v47, %s13075_s1 }
0x1628   :  { %2934 = vrot.lane.b32.xlu1 %v13714_v13, %s13076_s22 }
0x162c   :  { %2936 = vrot.lane.b32.xlu1 %v13700_v46, %s13076_s22 }
0x169f   :  { %v2810_v31 = vpop.xlane.xlu0 %2809 }
0x16a0   :  { %v2812_v12 = vsub.f32 %v2802_v14, %v2810_v31  ;;  %v2807_v34 = vpop.xlane.xlu1 %2806 }
0x16a1   :  { %v2811_v19 = vsub.f32 %v2797_v57, %v2807_v34 }
0x16a2   :  { %v2815_v63 = vmul.f32 1.442695, %v2812_v12 }
0x16a3   :  { %v2813_v27 = vmul.f32 1.442695, %v2811_v19 }
0x16a4   :  { %12744 = vpow2.f32 %v2815_v63  ;;  %v12325_v20 = vpop.permute.xlu1 %12324 }
0x16a5   :  { %v12327_v52 = vunpack.i.h.bf16 %v12325_v20  ;;  %v12326_v53 = vunpack.i.l.bf16 %v12325_v20  ;;  %12746 = vpow2.f32 %v2813_v27 }
0x16a7   :  { %v11894_v58 = vpack.c.bf16 %v12327_v52, %v12326_v53 }
0x16a8   :  { %v2935_v63 = vpop.permute.xlu1 %2934 }
0x16a9   :  { %11895 = vmatprep.subr.bf16.mxu0 %v11894_v58 }
0x16aa   :  { %11897 = vmatpush3.bf16.msra.mxu0 %v11894_v58 }
0x16ae   :  { %v12745_v6 = vpop.eup %12744 }
0x16af   :  { %v2820_v13 = vsel %vm637_vm2, %v12745_v6, 0.0  ;;  %v12747_v44 = vpop.eup %12746 }
0x16b0   :  { %2821 = vadd.xlane.f32.xlu0 %v2820_v13  ;;  %v2817_v46 = vsel %vm637_vm2, %v12747_v44, 0.0 }
0x16b4   :  { %2818 = vadd.xlane.f32.xlu0 %v2817_v46 }
0x16ca   :  { %12329 = vrot.lane.b32.xlu0 %v13488_v41, %s13076_s22  ;;  %v2937_v41 = vpop.permute.xlu1 %2936 }
0x173d   :  { %v2822_v36 = vpop.xlane.xlu0 %2821 }
0x173e   :  { %12748 = vrcp.f32 %v2822_v36 }
0x1741   :  { %v2819_v14 = vpop.xlane.xlu0 %2818 }
0x1742   :  { %12750 = vrcp.f32 %v2819_v14 }
0x1745   :  { %v12330_v42 = vpop.permute.xlu0 %12329 }
0x1746   :  { %v12332_v57 = vunpack.i.h.bf16 %v12330_v42  ;;  %v12331_v60 = vunpack.i.l.bf16 %v12330_v42 }
0x1748   :  { %v11898_v22 = vpack.c.bf16 %v12332_v57, %v12331_v60  ;;  %v12749_v31 = vpop.eup %12748 }
0x1749   :  { %v2826_v19 = vmul.f32 %v12749_v31, %v12745_v6 }
0x174a   :  { %11900 = vmatprep.subr.msk.bf16.mxu0 %vm13430_vm1, %v11898_v22 }
0x174c   :  { %v12751_v12 = vpop.eup %12750 }
0x174d   :  { %v2824_v34 = vmul.f32 %v12751_v12, %v12747_v44 }
0x174f   :  { %11343 = vmatprep.mubr.msk.f32.mxu0 %vm637_vm2, %v2824_v34 }
0x1750   :  { %11344 = vmatmul.mubr.msk.f32.vlgmr.msra.gmra.mrb[42].mxu0 %vm637_vm2, %v2826_v19 }
0x1751   :  { %11903 = vmatpush3.bf16.xpose.msk.msra.mxu0 %vm13430_vm1, %v11898_v22  ;;  %11350 = vmatprep.mubr.msk.f32.mxu0 %vm549_vm0, %v2935_v63 }
0x1752   :  { %11915 = vmatprep.subr.bf16.mxu0 %v13498_v26 }
0x1758   :  { %11351 = vmatmul.mubr.msk.f32.vlgmr.msra.gmra.mrb[44].mxu0 %vm549_vm0, %v2937_v41 }
0x1759   :  { %11917 = vmatpush3.bf16.msra.mxu0 %v13498_v26  ;;  %v13812_v26 = vadd.f32 %v13458_v33, %v13416_v5 }
0x1823   :  { %v13798_v27 = vpop.f32.mrb[42].mxu0 }
0x1824   :  { %v13800_v20 = vpop.f32.mrb[43].mxu0 }
0x182b   :  { %v11352_v52 = vpop.f32.mrb[44].mxu0 }
0x182c   :  { %v3024_v53 = vadd.f32 %v11352_v52, %v13730_v25  ;;  %v3018_v58 = vpop.f32.mrb[45].mxu0 }
0x182d   :  { %v3019_v6 = vadd.f32 %v3018_v58, %v13730_v25 }
0x182e   :  { %v3030_v13 = vsel %vm637_vm2, %v3024_v53, -inf }
0x182f   :  { %3031 = vmax.xlane.f32.xlu0 %v3030_v13  ;;  %v3027_v44 = vsel %vm637_vm2, %v3019_v6, -inf }
0x1830   :  { %3028 = vmax.xlane.f32.xlu1 %v3027_v44 }
0x1841   :  { %12334 = vrot.lane.b32.xlu1 %v13496_v47, %s13076_s22 }
0x1845   :  { %12339 = vrot.lane.b32.xlu1 %v13500_v29, %s13074_s21 }
0x1849   :  { %3360 = vrot.lane.b32.xlu1 %v13812_v26, %s13074_s21 }
0x18bc   :  { %v3032_v46 = vpop.xlane.xlu0 %3031 }
0x18bd   :  { %v3034_v36 = vsub.f32 %v3024_v53, %v3032_v46  ;;  %v3029_v14 = vpop.xlane.xlu1 %3028 }
0x18be   :  { %v3033_v42 = vsub.f32 %v3019_v6, %v3029_v14 }
0x18bf   :  { %v3037_v57 = vmul.f32 1.442695, %v3034_v36 }
0x18c0   :  { %v3035_v60 = vmul.f32 1.442695, %v3033_v42  ;;  %v13826_v42 = vadd.f32 %v13453_v30, %v13416_v5  ;;  %v13048_v5 = vld [vmem:[%s15761_s0] sm:$0xf] }
0x18c1   :  { %v12335_v22 = vpop.permute.xlu1 %12334 }
0x18c2   :  { %12752 = vpow2.f32 %v3035_v60  ;;  %v12337_v31 = vunpack.i.h.bf16 %v12335_v22  ;;  %v12336_v47 = vunpack.i.l.bf16 %v12335_v22  ;;  %v3156_v22 = vsub.s32 3, %v13404_v1 }
0x18c3   :  { %12754 = vpow2.f32 %v3037_v57 }
0x18c4   :  { %v11904_v12 = vpack.c.bf16 %v12337_v31, %v12336_v47  ;;  %v13844_v30 = vrot.slane %v13048_v5, %v3156_v22 }
0x18c5   :  { %v12340_v34 = vpop.permute.xlu1 %12339 }
0x18c6   :  { %v12342_v19 = vunpack.i.h.bf16 %v12340_v34  ;;  %v12341_v63 = vunpack.i.l.bf16 %v12340_v34  ;;  %11905 = vmatprep.subr.bf16.mxu1 %v11904_v12 }
0x18c7   :  { %11907 = vmatpush3.bf16.msra.mxu1 %v11904_v12 }
0x18c8   :  { %v11918_v33 = vpack.c.bf16 %v12342_v19, %v12341_v63  ;;  %11910 = vmatprep.subr.msk.bf16.mxu1 %vm13430_vm1, %v13502_v49 }
0x18ca   :  { %11920 = vmatprep.subr.msk.bf16.mxu0 %vm13430_vm1, %v11918_v33 }
0x18cc   :  { %v12753_v41 = vpop.eup %12752 }
0x18cd   :  { %v3039_v52 = vsel %vm637_vm2, %v12753_v41, 0.0  ;;  %v12755_v53 = vpop.eup %12754 }
0x18ce   :  { %3040 = vadd.xlane.f32.xlu0 %v3039_v52  ;;  %v3042_v58 = vsel %vm637_vm2, %v12755_v53, 0.0 }
0x18d2   :  { %3043 = vadd.xlane.f32.xlu0 %v3042_v58 }
0x195b   :  { %v3041_v6 = vpop.xlane.xlu0 %3040 }
0x195c   :  { %12756 = vrcp.f32 %v3041_v6 }
0x195f   :  { %v3044_v13 = vpop.xlane.xlu0 %3043 }
0x1960   :  { %12758 = vrcp.f32 %v3044_v13 }
0x1966   :  { %v12757_v44 = vpop.eup %12756 }
0x1967   :  { %v3046_v46 = vmul.f32 %v12757_v44, %v12753_v41 }
0x1969   :  { %11357 = vmatprep.mubr.msk.f32.mxu1 %vm637_vm2, %v3046_v46 }
0x196a   :  { %v12759_v36 = vpop.eup %12758 }
0x196b   :  { %v3048_v14 = vmul.f32 %v12759_v36, %v12755_v53 }
0x196d   :  { %11358 = vmatmul.mubr.msk.f32.vlgmr.msra.gmra.mrb[24].mxu1 %vm637_vm2, %v3048_v14 }
0x196e   :  { %11913 = vmatpush3.bf16.xpose.msk.msra.mxu1 %vm13430_vm1, %v13502_v49  ;;  %11364 = vmatprep.mubr.msk.f32.mxu1 %vm549_vm0, %v13826_v42 }
0x1975   :  { %11365 = vmatmul.mubr.msk.f32.vlgmr.msra.gmra.mrb[26].mxu1 %vm549_vm0, %v13812_v26 }
0x1a40   :  { %v13836_v57 = vpop.f32.mrb[24].mxu1 }
0x1a41   :  { %v13838_v60 = vpop.f32.mrb[25].mxu1 }
0x1a48   :  { %v11366_v31 = vpop.f32.mrb[26].mxu1 }
0x1a49   :  { %v3236_v49 = vpop.f32.mrb[27].mxu1  ;;  %v3242_v12 = vadd.f32 %v11366_v31, %v13844_v30 }
0x1a4a   :  { %v3237_v47 = vadd.f32 %v3236_v49, %v13844_v30 }
0x1a4b   :  { %v3248_v19 = vsel %vm637_vm2, %v3242_v12, -inf }
0x1a4c   :  { %v3245_v34 = vsel %vm637_vm2, %v3237_v47, -inf }
0x1a4d   :  { %3246 = vmax.xlane.f32.xlu0 %v3245_v34 }
0x1a51   :  { %3249 = vmax.xlane.f32.xlu0 %v3248_v19 }
0x1ada   :  { %v3247_v63 = vpop.xlane.xlu0 %3246 }
0x1adb   :  { %v3251_v1 = vsub.f32 %v3237_v47, %v3247_v63 }
0x1add   :  { %v3253_v41 = vmul.f32 1.442695, %v3251_v1 }
0x1ade   :  { %v3250_v52 = vpop.xlane.xlu0 %3249 }
0x1adf   :  { %12760 = vpow2.f32 %v3253_v41  ;;  %v3252_v53 = vsub.f32 %v3242_v12, %v3250_v52  ;;  %v3361_v12 = vpop.permute.xlu1 %3360 }
0x1ae1   :  { %v3255_v58 = vmul.f32 1.442695, %v3252_v53 }
0x1ae3   :  { %12762 = vpow2.f32 %v3255_v58 }
0x1ae9   :  { %v12761_v6 = vpop.eup %12760 }
0x1aea   :  { %v3257_v13 = vsel %vm637_vm2, %v12761_v6, 0.0 }
0x1aeb   :  { %3258 = vadd.xlane.f32.xlu0 %v3257_v13 }
0x1aed   :  { %v12763_v44 = vpop.eup %12762 }
0x1aee   :  { %v3260_v46 = vsel %vm637_vm2, %v12763_v44, 0.0 }
0x1aef   :  { %3261 = vadd.xlane.f32.xlu0 %v3260_v46 }
0x1b05   :  { %3358 = vrot.lane.b32.xlu0 %v13826_v42, %s13074_s21 }
0x1b78   :  { %v3259_v36 = vpop.xlane.xlu0 %3258 }
0x1b79   :  { %12764 = vrcp.f32 %v3259_v36 }
0x1b7c   :  { %v3262_v14 = vpop.xlane.xlu0 %3261 }
0x1b7d   :  { %12766 = vrcp.f32 %v3262_v14 }
0x1b80   :  { %v3359_v47 = vpop.permute.xlu0 %3358 }
0x1b83   :  { %v12765_v22 = vpop.eup %12764 }
0x1b84   :  { %v3264_v5 = vmul.f32 %v12765_v22, %v12761_v6 }
0x1b86   :  { %11371 = vmatprep.mubr.msk.f32.mxu0 %vm637_vm2, %v3264_v5 }
0x1b87   :  { %v12767_v31 = vpop.eup %12766 }
0x1b88   :  { %v3266_v49 = vmul.f32 %v12767_v31, %v12763_v44 }
0x1b8a   :  { %11372 = vmatmul.mubr.msk.f32.vlgmr.msra.gmra.mrb[46].mxu0 %vm637_vm2, %v3266_v49 }
0x1b8b   :  { %11923 = vmatpush3.bf16.xpose.msk.msra.mxu0 %vm13430_vm1, %v11918_v33  ;;  %11378 = vmatprep.mubr.msk.f32.mxu0 %vm549_vm0, %v3359_v47 }
0x1b92   :  { %11379 = vmatmul.mubr.msk.f32.vlgmr.msra.gmra.mrb[48].mxu0 %vm549_vm0, %v3361_v12 }
0x1c5d   :  { %v11373_v34 = vpop.f32.mrb[46].mxu0 }
0x1c5e   :  { %3349 = vst.msk [vmem:[#allocation3 + $0x38] sm:$0xff] %vm549_vm0, %v11373_v34  ;;  %v3339_v19 = vpop.f32.mrb[47].mxu0 }
0x1c5f   :  { %3348 = vst.msk [vmem:[#allocation3 + $0x30] sm:$0xff] %vm549_vm0, %v3339_v19 }
0x1c65   :  { %v11380_v63 = vpop.f32.mrb[48].mxu0 }
0x1c66   :  { %v3448_v1 = vadd.f32 %v11380_v63, %v13844_v30  ;;  %v3442_v41 = vpop.f32.mrb[49].mxu0 }
0x1c67   :  { %v3443_v52 = vadd.f32 %v3442_v41, %v13844_v30 }
0x1c68   :  { %v3454_v53 = vsel %vm637_vm2, %v3448_v1, -inf }
0x1c69   :  { %3455 = vmax.xlane.f32.xlu0 %v3454_v53  ;;  %v3451_v33 = vsel %vm637_vm2, %v3443_v52, -inf }
0x1c6a   :  { %3452 = vmax.xlane.f32.xlu1 %v3451_v33 }
0x1c7b   :  { %12344 = vrot.lane.b32.xlu1 %v13504_v51, %s13074_s21 }
0x1c7f   :  { %12349 = vrot.lane.b32.xlu0 %v13500_v29, %s13075_s1  ;;  %3580 = vrot.lane.b32.xlu1 %v13826_v42, %s13075_s1 }
0x1cf6   :  { %v3456_v58 = vpop.xlane.xlu0 %3455 }
0x1cf7   :  { %v3458_v6 = vsub.f32 %v3448_v1, %v3456_v58  ;;  %v3453_v13 = vpop.xlane.xlu1 %3452 }
0x1cf8   :  { %v3457_v44 = vsub.f32 %v3443_v52, %v3453_v13 }
0x1cf9   :  { %v3461_v46 = vmul.f32 1.442695, %v3458_v6 }
0x1cfa   :  { %v3459_v36 = vmul.f32 1.442695, %v3457_v44  ;;  %v12350_v14 = vpop.permute.xlu0 %12349 }
0x1cfb   :  { %12768 = vpow2.f32 %v3461_v46  ;;  %v12345_v22 = vpop.permute.xlu1 %12344  ;;  %v12352_v5 = vunpack.i.h.bf16 %v12350_v14  ;;  %v12351_v31 = vunpack.i.l.bf16 %v12350_v14 }
0x1cfc   :  { %v12347_v49 = vunpack.i.h.bf16 %v12345_v22  ;;  %v12346_v47 = vunpack.i.l.bf16 %v12345_v22  ;;  %12770 = vpow2.f32 %v3459_v36 }
0x1cfd   :  { %v11928_v34 = vpack.c.bf16 %v12352_v5, %v12351_v31 }
0x1cfe   :  { %v11924_v12 = vpack.c.bf16 %v12347_v49, %v12346_v47 }
0x1cff   :  { %v3581_v52 = vpop.permute.xlu1 %3580 }
0x1d00   :  { %11925 = vmatprep.subr.bf16.mxu1 %v11924_v12 }
0x1d01   :  { %11927 = vmatpush3.bf16.msra.mxu1 %v11924_v12 }
0x1d02   :  { %11930 = vmatprep.subr.msk.bf16.mxu1 %vm13430_vm1, %v11928_v34 }
0x1d05   :  { %v12769_v19 = vpop.eup %12768 }
0x1d06   :  { %v3466_v63 = vsel %vm637_vm2, %v12769_v19, 0.0  ;;  %v12771_v1 = vpop.eup %12770 }
0x1d07   :  { %3467 = vadd.xlane.f32.xlu1 %v3466_v63  ;;  %v3463_v41 = vsel %vm637_vm2, %v12771_v1, 0.0 }
0x1d0b   :  { %3464 = vadd.xlane.f32.xlu1 %v3463_v41 }
0x1d1c   :  { %3582 = vrot.lane.b32.xlu1 %v13812_v26, %s13075_s1 }
0x1d94   :  { %v3468_v53 = vpop.xlane.xlu1 %3467 }
0x1d95   :  { %12772 = vrcp.f32 %v3468_v53 }
0x1d98   :  { %v3465_v33 = vpop.xlane.xlu1 %3464 }
0x1d99   :  { %12774 = vrcp.f32 %v3465_v33 }
0x1d9c   :  { %v3583_v46 = vpop.permute.xlu1 %3582 }
0x1d9f   :  { %v12773_v58 = vpop.eup %12772 }
0x1da0   :  { %v3472_v44 = vmul.f32 %v12773_v58, %v12769_v19 }
0x1da3   :  { %v12775_v6 = vpop.eup %12774 }
0x1da4   :  { %v3470_v13 = vmul.f32 %v12775_v6, %v12771_v1 }
0x1da6   :  { %11385 = vmatprep.mubr.msk.f32.mxu1 %vm637_vm2, %v3470_v13 }
0x1da7   :  { %11386 = vmatmul.mubr.msk.f32.vlgmr.msra.gmra.mrb[28].mxu1 %vm637_vm2, %v3472_v44 }
0x1da8   :  { %11933 = vmatpush3.bf16.xpose.msk.msra.mxu1 %vm13430_vm1, %v11928_v34  ;;  %11392 = vmatprep.mubr.msk.f32.mxu1 %vm549_vm0, %v3581_v52 }
0x1daf   :  { %11393 = vmatmul.mubr.msk.f32.vlgmr.msra.gmra.mrb[30].mxu1 %vm549_vm0, %v3583_v46 }
0x1e7a   :  { %v13884_v36 = vpop.f32.mrb[28].mxu1 }
0x1e7b   :  { %v13886_v14 = vpop.f32.mrb[29].mxu1 }
0x1e82   :  { %v11394_v22 = vpop.f32.mrb[30].mxu1 }
0x1e83   :  { %v3670_v5 = vadd.f32 %v11394_v22, %v13844_v30  ;;  %v3664_v31 = vpop.f32.mrb[31].mxu1 }
0x1e84   :  { %v3665_v49 = vadd.f32 %v3664_v31, %v13844_v30 }
0x1e85   :  { %v3676_v47 = vsel %vm637_vm2, %v3670_v5, -inf }
0x1e86   :  { %3677 = vmax.xlane.f32.xlu0 %v3676_v47  ;;  %v3673_v12 = vsel %vm637_vm2, %v3665_v49, -inf }
0x1e87   :  { %3674 = vmax.xlane.f32.xlu1 %v3673_v12 }
0x1e98   :  { %12354 = vrot.lane.b32.xlu1 %v13504_v51, %s13075_s1 }
0x1e9c   :  { %3802 = vrot.lane.b32.xlu1 %v13826_v42, %s13076_s22 }
0x1ea0   :  { %3804 = vrot.lane.b32.xlu1 %v13812_v26, %s13076_s22 }
0x1f13   :  { %v3678_v34 = vpop.xlane.xlu0 %3677 }
0x1f14   :  { %v3680_v19 = vsub.f32 %v3670_v5, %v3678_v34  ;;  %v3675_v63 = vpop.xlane.xlu1 %3674 }
0x1f15   :  { %v3679_v1 = vsub.f32 %v3665_v49, %v3675_v63 }
0x1f16   :  { %v3683_v41 = vmul.f32 1.442695, %v3680_v19 }
0x1f17   :  { %v3681_v52 = vmul.f32 1.442695, %v3679_v1 }
0x1f18   :  { %12776 = vpow2.f32 %v3683_v41  ;;  %v12355_v53 = vpop.permute.xlu1 %12354 }
0x1f19   :  { %v12357_v33 = vunpack.i.h.bf16 %v12355_v53  ;;  %v12356_v58 = vunpack.i.l.bf16 %v12355_v53  ;;  %12778 = vpow2.f32 %v3681_v52 }
0x1f1b   :  { %v11934_v6 = vpack.c.bf16 %v12357_v33, %v12356_v58 }
0x1f1c   :  { %v3803_v1 = vpop.permute.xlu1 %3802 }
0x1f1d   :  { %11935 = vmatprep.subr.bf16.mxu0 %v11934_v6 }
0x1f1e   :  { %11937 = vmatpush3.bf16.msra.mxu0 %v11934_v6 }
0x1f22   :  { %v12777_v13 = vpop.eup %12776 }
0x1f23   :  { %v3688_v42 = vsel %vm637_vm2, %v12777_v13, 0.0  ;;  %v12779_v44 = vpop.eup %12778 }
0x1f24   :  { %3689 = vadd.xlane.f32.xlu0 %v3688_v42  ;;  %v3685_v26 = vsel %vm637_vm2, %v12779_v44, 0.0 }
0x1f28   :  { %3686 = vadd.xlane.f32.xlu0 %v3685_v26 }
0x1f3e   :  { %12359 = vrot.lane.b32.xlu0 %v13500_v29, %s13076_s22  ;;  %v3805_v29 = vpop.permute.xlu1 %3804 }
0x1fb1   :  { %v3690_v46 = vpop.xlane.xlu0 %3689 }
0x1fb2   :  { %12780 = vrcp.f32 %v3690_v46 }
0x1fb5   :  { %v3687_v22 = vpop.xlane.xlu0 %3686 }
0x1fb6   :  { %12782 = vrcp.f32 %v3687_v22 }
0x1fb9   :  { %v12360_v5 = vpop.permute.xlu0 %12359 }
0x1fba   :  { %v12362_v31 = vunpack.i.h.bf16 %v12360_v5  ;;  %v12361_v49 = vunpack.i.l.bf16 %v12360_v5 }
0x1fbc   :  { %v11938_v47 = vpack.c.bf16 %v12362_v31, %v12361_v49  ;;  %v12781_v12 = vpop.eup %12780 }
0x1fbd   :  { %v3694_v63 = vmul.f32 %v12781_v12, %v12777_v13 }
0x1fbe   :  { %11940 = vmatprep.subr.msk.bf16.mxu0 %vm13430_vm1, %v11938_v47 }
0x1fc0   :  { %v12783_v34 = vpop.eup %12782 }
0x1fc1   :  { %v3692_v19 = vmul.f32 %v12783_v34, %v12779_v44 }
0x1fc3   :  { %11399 = vmatprep.mubr.msk.f32.mxu0 %vm637_vm2, %v3692_v19 }
0x1fc4   :  { %11400 = vmatmul.mubr.msk.f32.vlgmr.msra.gmra.mrb[50].mxu0 %vm637_vm2, %v3694_v63 }
0x1fc5   :  { %11943 = vmatpush3.bf16.xpose.msk.msra.mxu0 %vm13430_vm1, %v11938_v47  ;;  %11406 = vmatprep.mubr.msk.f32.mxu0 %vm549_vm0, %v3803_v1  ;;  %v12520_v1 = vld [vmem:[%s15736_s8] sm:$0xff]  }
0x1fcc   :  { %11407 = vmatmul.mubr.msk.f32.vlgmr.msra.gmra.mrb[52].mxu0 %vm549_vm0, %v3805_v29 }
0x1fcd   :  { %4434 = vmatprep.mubr.bf16.mxu0 %v13073_v39 }
0x2097   :  { %v11401_v41 = vpop.f32.mrb[50].mxu0 }
0x2098   :  { %v13911_v52 = vpop.f32.mrb[51].mxu0 }
0x209f   :  { %v11408_v53 = vpop.f32.mrb[52].mxu0 }
0x20a0   :  { %v3892_v33 = vadd.f32 %v11408_v53, %v13844_v30  ;;  %v3886_v58 = vpop.f32.mrb[53].mxu0 }
0x20a1   :  { %v3887_v6 = vadd.f32 %v3886_v58, %v13844_v30 }
0x20a2   :  { %v3898_v13 = vsel %vm637_vm2, %v3892_v33, -inf }
0x20a3   :  { %3899 = vmax.xlane.f32.xlu0 %v3898_v13  ;;  %v3895_v42 = vsel %vm637_vm2, %v3887_v6, -inf }
0x20a4   :  { %3896 = vmax.xlane.f32.xlu1 %v3895_v42  ;;  %v12523_v42 = vld [vmem:[%s15736_s8 + $0x18] sm:$0xff]  }
0x20b5   :  { %12364 = vrot.lane.b32.xlu1 %v13504_v51, %s13076_s22 }
0x20b9   :  { %959 = vrot.lane.b32.xlu1 %v13570_v18, %s13076_s22 }
0x20bd   :  { %1180 = vrot.lane.b32.xlu1 %v13576_v16, %s13075_s1 }
0x20c1   :  { %1182 = vrot.lane.b32.xlu1 %v13574_v61, %s13075_s1 }
0x20c5   :  { %1830 = vrot.lane.b32.xlu1 %v13658_v11, %s13076_s22 }
0x20c9   :  { %1405 = vrot.lane.b32.xlu1 %v13612_v35, %s13074_s21 }
0x20cd   :  { %2052 = vrot.lane.b32.xlu1 %v13686_v23, %s13075_s1 }
0x20d1   :  { %2274 = vrot.lane.b32.xlu1 %v13724_v3, %s13074_s21 }
0x20d5   :  { %2698 = vrot.lane.b32.xlu1 %v13770_v40, %s13076_s22 }
0x20d9   :  { %2920 = vrot.lane.b32.xlu1 %v13798_v27, %s13075_s1 }
0x20dd   :  { %3566 = vrot.lane.b32.xlu1 %v13884_v36, %s13076_s22 }
0x20e1   :  { %3142 = vrot.lane.b32.xlu1 %v13836_v57, %s13074_s21 }
0x20e5   :  { %3788 = vrot.lane.b32.xlu1 %v11401_v41, %s13075_s1 }
0x2130   :  { %v3900_v51 = vpop.xlane.xlu0 %3899 }
0x2131   :  { %v3902_v18 = vsub.f32 %v3892_v33, %v3900_v51  ;;  %v3897_v61 = vpop.xlane.xlu1 %3896  ;;  %v12522_v33 = vld [vmem:[%s15736_s8 + $0x10] sm:$0xff]  }
0x2132   :  { %v3901_v16 = vsub.f32 %v3887_v6, %v3897_v61  ;;  %v12524_v61 = vld [vmem:[%s15736_s8 + $0x20] sm:$0xff]  }
0x2133   :  { %v3905_v35 = vmul.f32 1.442695, %v3902_v18 }
0x2134   :  { %v3903_v11 = vmul.f32 1.442695, %v3901_v16 }
0x2135   :  { %v12365_v23 = vpop.permute.xlu1 %12364 }
0x2136   :  { %12784 = vpow2.f32 %v3903_v11  ;;  %v12367_v3 = vunpack.i.h.bf16 %v12365_v23  ;;  %v12366_v40 = vunpack.i.l.bf16 %v12365_v23  ;;  %v12526_v23 = vld [vmem:[%s15736_s8 + $0x30] sm:$0xff]  }
0x2137   :  { %12786 = vpow2.f32 %v3905_v35  ;;  %v12525_v35 = vld [vmem:[%s15736_s8 + $0x28] sm:$0xff]  }
0x2138   :  { %v11944_v27 = vpack.c.bf16 %v12367_v3, %v12366_v40  ;;  %v12527_v40 = vld [vmem:[%s15736_s8 + $0x38] sm:$0xff]  }
0x2139   :  { %v960_v44 = vpop.permute.xlu1 %959 }
0x213a   :  { %965 = vst.msk [vmem:[#allocation3 + $0x8] sm:$0xff] %vm963_vm3, %v960_v44  ;;  %11945 = vmatprep.subr.bf16.mxu1 %v11944_v27 }
0x213b   :  { %11947 = vmatpush3.bf16.msra.mxu1 %v11944_v27 }
0x213c   :  { %11416 = vmatprep.subr.bf16.mxu1 %v12520_v1 }
0x213d   :  { %v1181_v57 = vpop.permute.xlu1 %1180 }
0x2140   :  { %v12785_v36 = vpop.eup %12784 }
0x2141   :  { %v1183_v26 = vpop.permute.xlu1 %1182  ;;  %v3907_v46 = vsel %vm637_vm2, %v12785_v36, 0.0  ;;  %v12787_v22 = vpop.eup %12786 }
0x2142   :  { %1188 = vst.msk [vmem:[#allocation3 + $0x8] sm:$0xff] %vm1186_vm4, %v1183_v26  ;;  %3908 = vadd.xlane.f32.xlu0 %v3907_v46  ;;  %v3910_v31 = vsel %vm637_vm2, %v12787_v22, 0.0 }
0x2145   :  { %v1831_v5 = vpop.permute.xlu1 %1830 }
0x2146   :  { %1835 = vst.msk [vmem:[#allocation3 + $0x18] sm:$0xff] %vm963_vm3, %v1831_v5  ;;  %3911 = vadd.xlane.f32.xlu0 %v3910_v31 }
0x2149   :  { %v1406_v49 = vpop.permute.xlu1 %1405 }
0x214a   :  { %1411 = vst.msk [vmem:[#allocation3 + $0x8] sm:$0xff] %vm1409_vm5, %v1406_v49  ;;  %v14017_v49 = vld [vmem:[%s15737_s9] ss:$0 sm:$0xff] }
0x214d   :  { %v2053_v47 = vpop.permute.xlu1 %2052 }
0x214e   :  { %2057 = vst.msk [vmem:[#allocation3 + $0x18] sm:$0xff] %vm1186_vm4, %v2053_v47 }
0x2151   :  { %v2275_v12 = vpop.permute.xlu1 %2274  ;;  %v4017_v13 = vld [vmem:[#allocation3 + $0x8] sm:$0xff] }
0x2152   :  { %2279 = vst.msk [vmem:[#allocation3 + $0x18] sm:$0xff] %vm1409_vm5, %v2275_v12 }
0x2155   :  { %v2699_v34 = vpop.permute.xlu1 %2698 }
0x2156   :  { %2703 = vst.msk [vmem:[#allocation3 + $0x28] sm:$0xff] %vm963_vm3, %v2699_v34 }
0x2159   :  { %v2921_v19 = vpop.permute.xlu1 %2920 }
0x215a   :  { %2925 = vst.msk [vmem:[#allocation3 + $0x28] sm:$0xff] %vm1186_vm4, %v2921_v19 }
0x215c   :  { %957 = vrot.lane.b32.xlu0 %v13572_v45, %s13076_s22 }
0x215d   :  { %v3567_v63 = vpop.permute.xlu1 %3566 }
0x215e   :  { %3571 = vst.msk [vmem:[#allocation3 + $0x38] sm:$0xff] %vm963_vm3, %v3567_v63 }
0x2160   :  { %1828 = vrot.lane.b32.xlu0 %v13660_v28, %s13076_s22 }
0x2161   :  { %v3143_v29 = vpop.permute.xlu1 %3142 }
0x2162   :  { %3147 = vst.msk [vmem:[#allocation3 + $0x28] sm:$0xff] %vm1409_vm5, %v3143_v29 }
0x2164   :  { %1403 = vrot.lane.b32.xlu0 %v13614_v37, %s13074_s21 }
0x2165   :  { %v3789_v41 = vpop.permute.xlu1 %3788 }
0x2166   :  { %3793 = vst.msk [vmem:[#allocation3 + $0x38] sm:$0xff] %vm1186_vm4, %v3789_v41 }
0x2168   :  { %2050 = vrot.lane.b32.xlu0 %v13688_v10, %s13075_s1 }
0x2169   :  { %v4021_v46 = vld [vmem:[#allocation3 + $0x28] sm:$0xff] }
0x216c   :  { %2272 = vrot.lane.b32.xlu0 %v13726_v38, %s13074_s21 }
0x2170   :  { %2696 = vrot.lane.b32.xlu0 %v13772_v24, %s13076_s22 }
0x2174   :  { %2918 = vrot.lane.b32.xlu0 %v13800_v20, %s13075_s1 }
0x2178   :  { %3564 = vrot.lane.b32.xlu0 %v13886_v14, %s13076_s22 }
0x217c   :  { %3140 = vrot.lane.b32.xlu0 %v13838_v60, %s13074_s21 }
0x2180   :  { %3786 = vrot.lane.b32.xlu0 %v13911_v52, %s13075_s1  ;;  %v12521_v52 = vld [vmem:[%s15736_s8 + $0x8] sm:$0xff]  }
0x21cf   :  { %v3909_v45 = vpop.xlane.xlu0 %3908 }
0x21d0   :  { %12788 = vrcp.f32 %v3909_v45 }
0x21d3   :  { %v3912_v37 = vpop.xlane.xlu0 %3911 }
0x21d4   :  { %12790 = vrcp.f32 %v3912_v37 }
0x21d7   :  { %v958_v28 = vpop.permute.xlu0 %957 }
0x21d8   :  { %964 = vst.msk [vmem:[#allocation3] sm:$0xff] %vm963_vm3, %v958_v28  ;;  %v12528_v28 = vld [vmem:[%s15740_s12] ss:$8 sps:$4 sm:$0xff]  }
0x21d9   :  { %1187 = vst.msk [vmem:[#allocation3] sm:$0xff] %vm1186_vm4, %v1181_v57  ;;  %v4019_v57 = vld [vmem:[#allocation3 + $0x18] sm:$0xff] }
0x21da   :  { %v12789_v10 = vpop.eup %12788 }
0x21db   :  { %v1829_v38 = vpop.permute.xlu0 %1828  ;;  %v3914_v24 = vmul.f32 %v12789_v10, %v12785_v36  ;;  %v12533_v10 = vld [vmem:[%s15740_s12 + $0x14] ss:$8 sps:$4 sm:$0xff]  }
0x21dc   :  { %1834 = vst.msk [vmem:[#allocation3 + $0x10] sm:$0xff] %vm963_vm3, %v1829_v38 }
0x21dd   :  { %11413 = vmatprep.mubr.msk.f32.mxu1 %vm637_vm2, %v3914_v24 }
0x21de   :  { %v12791_v20 = vpop.eup %12790 }
0x21df   :  { %v1404_v60 = vpop.permute.xlu0 %1403  ;;  %v3916_v14 = vmul.f32 %v12791_v20, %v12787_v22 }
0x21e0   :  { %1410 = vst.msk [vmem:[#allocation3] sm:$0xff] %vm1409_vm5, %v1404_v60 }
0x21e1   :  { %11414 = vmatmul.mubr.msk.f32.vlgmr.msra.gmra.mrb[32].mxu1 %vm637_vm2, %v3916_v14 }
0x21e2   :  { %11417 = vmatpush3.bf16.msra.mxu1 %v12520_v1 }
0x21e3   :  { %v2051_v53 = vpop.permute.xlu0 %2050  ;;  %11418 = vmatprep.subr.bf16.mxu1 %v12521_v52 }
0x21e4   :  { %2056 = vst.msk [vmem:[#allocation3 + $0x10] sm:$0xff] %vm1186_vm4, %v2051_v53 }
0x21e6   :  { %11419 = vmatpush3.bf16.msra.mxu1 %v12521_v52 }
0x21e7   :  { %v2273_v58 = vpop.permute.xlu0 %2272  ;;  %11420 = vmatprep.subr.bf16.mxu1 %v12522_v33  ;;  %v4016_v6 = vld [vmem:[#allocation3] sm:$0xff] }
0x21e8   :  { %2278 = vst.msk [vmem:[#allocation3 + $0x10] sm:$0xff] %vm1409_vm5, %v2273_v58  ;;  %v4040_v51 = vpack.c.bf16 %v4017_v13, %v4016_v6 }
0x21ea   :  { %11421 = vmatpush3.bf16.msra.mxu1 %v12522_v33  ;;  %11432 = vmatprep.mubr.bf16.mxu1 %v4040_v51 }
0x21eb   :  { %v2697_v18 = vpop.permute.xlu0 %2696  ;;  %11422 = vmatprep.subr.bf16.mxu1 %v12523_v42 }
0x21ec   :  { %2702 = vst.msk [vmem:[#allocation3 + $0x20] sm:$0xff] %vm963_vm3, %v2697_v18 }
0x21ee   :  { %11423 = vmatpush3.bf16.msra.mxu1 %v12523_v42 }
0x21ef   :  { %v2919_v16 = vpop.permute.xlu0 %2918  ;;  %11424 = vmatprep.subr.bf16.mxu1 %v12524_v61  ;;  %v4018_v44 = vld [vmem:[#allocation3 + $0x10] sm:$0xff] }
0x21f0   :  { %2924 = vst.msk [vmem:[#allocation3 + $0x20] sm:$0xff] %vm1186_vm4, %v2919_v16  ;;  %v4041_v36 = vpack.c.bf16 %v4019_v57, %v4018_v44  ;;  %v12534_v16 = vld [vmem:[%s15740_s12 + $0x20] ss:$8 sps:$4 sm:$0xff]   ;;  %v12548_v44 = vld [vmem:[%s15740_s12 + $0x64] ss:$8 sps:$4 sm:$0xff]  }
0x21f1   :  { %v12549_v57 = vld [vmem:[%s15740_s12 + $0x70] ss:$8 sps:$4 sm:$0xff]  }
0x21f2   :  { %11425 = vmatpush3.bf16.msra.mxu1 %v12524_v61  ;;  %v12536_v61 = vld [vmem:[%s15740_s12 + $0x24] ss:$8 sps:$4 sm:$0xff]  }
0x21f3   :  { %v3565_v11 = vpop.permute.xlu0 %3564  ;;  %11426 = vmatprep.subr.bf16.mxu1 %v12525_v35 }
0x21f4   :  { %3570 = vst.msk [vmem:[#allocation3 + $0x30] sm:$0xff] %vm963_vm3, %v3565_v11  ;;  %v12537_v11 = vld [vmem:[%s15740_s12 + $0x30] ss:$8 sps:$4 sm:$0xff]  }
0x21f6   :  { %11427 = vmatpush3.bf16.msra.mxu1 %v12525_v35  ;;  %v12539_v35 = vld [vmem:[%s15740_s12 + $0x34] ss:$8 sps:$4 sm:$0xff]  }
0x21f7   :  { %v3141_v3 = vpop.permute.xlu0 %3140  ;;  %11428 = vmatprep.subr.bf16.mxu1 %v12526_v23 }
0x21f8   :  { %3146 = vst.msk [vmem:[#allocation3 + $0x20] sm:$0xff] %vm1409_vm5, %v3141_v3  ;;  %v12545_v3 = vld [vmem:[%s15740_s12 + $0x54] ss:$8 sps:$4 sm:$0xff]  }
0x21fa   :  { %11429 = vmatpush3.bf16.msra.mxu1 %v12526_v23  ;;  %v12540_v23 = vld [vmem:[%s15740_s12 + $0x40] ss:$8 sps:$4 sm:$0xff]  }
0x21fb   :  { %v3787_v27 = vpop.permute.xlu0 %3786  ;;  %11430 = vmatprep.subr.bf16.mxu1 %v12527_v40 }
0x21fc   :  { %3792 = vst.msk [vmem:[#allocation3 + $0x30] sm:$0xff] %vm1186_vm4, %v3787_v27  ;;  %v12546_v27 = vld [vmem:[%s15740_s12 + $0x60] ss:$8 sps:$4 sm:$0xff]  }
0x21fe   :  { %11431 = vmatpush3.bf16.msra.mxu1 %v12527_v40  ;;  %v12543_v40 = vld [vmem:[%s15740_s12 + $0x50] ss:$8 sps:$4 sm:$0xff]  }
0x21ff   :  { %v4020_v26 = vld [vmem:[#allocation3 + $0x20] sm:$0xff] }
0x2200   :  { %v4042_v22 = vpack.c.bf16 %v4021_v46, %v4020_v26 }
0x2201   :  { %11433 = vmatmul.mubr.bf16.vlgmr.msra.gmra.mrb[36].mxu1 %v4041_v36  ;;  %v12551_v36 = vld [vmem:[%s15740_s12 + $0x74] ss:$8 sps:$4 sm:$0xff]  }
0x2202   :  { %11436 = vmatprep.mubr.bf16.mxu1 %v4042_v22 }
0x22b4   :  { %v11415_v5 = vpop.f32.mrb[32].mxu1 }
0x22b5   :  { %4010 = vrot.lane.b32.xlu1 %v11415_v5, %s13074_s21  ;;  %v3997_v31 = vpop.f32.mrb[33].mxu1 }
0x22b6   :  { %4008 = vrot.lane.b32.xlu0 %v3997_v31, %s13074_s21 }
0x22d4   :  { %v11434_v47 = vpop.f32.mrb[36].mxu1 }
0x22d5   :  { %v4133_v12 = vpop.f32.mrb[37].mxu1  ;;  %v4142_v42 = vadd.f32 %v11434_v47, %v14017_v49 }
0x22d6   :  { %v4134_v34 = vadd.f32 %v14017_v49, %v4133_v12  ;;  %v11435_v19 = vpop.f32.mrb[38].mxu1 }
0x22d7   :  { %v4136_v63 = vpop.f32.mrb[39].mxu1  ;;  %v4145_v41 = vadd.f32 %v11435_v19, %v14017_v49  ;;  %v4166_v18 = vadd.f32 %v4142_v42, %v13359_v48  ;;  %v12542_v48 = vld [vmem:[%s15740_s12 + $0x44] ss:$8 sps:$4 sm:$0xff]  }
0x22d8   :  { %v4164_v1 = vadd.f32 %v4134_v34, %v13318_v7  ;;  %v4137_v29 = vadd.f32 %v14017_v49, %v4136_v63  ;;  %v12530_v7 = vld [vmem:[%s15740_s12 + $0x4] ss:$8 sps:$4 sm:$0xff]  }
0x22d9   :  { %v14025_v37 = vadd.f32 %v4145_v41, %v13362_v50  ;;  %4402 = vmatprep.subr.bf16.mxu0 %v12530_v7 }
0x22da   :  { %v4165_v45 = vadd.f32 %v4137_v29, %v13321_v8  ;;  %4174 = vadd.xlane.f32.xlu0 %v4164_v1  ;;  %4403 = vmatpush1.bf16.msra.mxu0 %v12528_v28  ;;  %v12531_v8 = vld [vmem:[%s15740_s12 + $0x10] ss:$8 sps:$4 sm:$0xff]  }
0x22db   :  { %4404 = vmatprep.subr.bf16.mxu0 %v12533_v10 }
0x22dc   :  { %4176 = vadd.xlane.f32.xlu1 %v4165_v45 }
0x22de   :  { %4405 = vmatpush1.bf16.msra.mxu0 %v12531_v8 }
0x22df   :  { %4406 = vmatprep.subr.bf16.mxu0 %v12536_v61  ;;  %v12554_v61 = vld [vmem:[%s15742_s14 + $0x48] sm:$0xff]  }
0x22e0   :  { %4180 = vadd.xlane.f32.xlu1 %v14025_v37 }
0x22e2   :  { %4407 = vmatpush1.bf16.msra.mxu0 %v12534_v16  ;;  %v12555_v16 = vld [vmem:[%s15742_s14 + $0x8] sm:$0xff]  }
0x22e3   :  { %4408 = vmatprep.subr.bf16.mxu0 %v12539_v35  ;;  %v12556_v35 = vld [vmem:[%s15742_s14 + $0x50] sm:$0xff]  }
0x22e6   :  { %4409 = vmatpush1.bf16.msra.mxu0 %v12537_v11  ;;  %v12557_v11 = vld [vmem:[%s15742_s14 + $0x10] sm:$0xff]  }
0x22e7   :  { %4410 = vmatprep.subr.bf16.mxu0 %v12542_v48  ;;  %v12558_v48 = vld [vmem:[%s15742_s14 + $0x58] sm:$0xff]  }
0x22ea   :  { %4411 = vmatpush1.bf16.msra.mxu0 %v12540_v23  ;;  %v12559_v23 = vld [vmem:[%s15742_s14 + $0x18] sm:$0xff]  }
0x22eb   :  { %4412 = vmatprep.subr.bf16.mxu0 %v12545_v3  ;;  %v12560_v3 = vld [vmem:[%s15742_s14 + $0x60] sm:$0xff]  }
0x22ee   :  { %4413 = vmatpush1.bf16.msra.mxu0 %v12543_v40  ;;  %v12561_v40 = vld [vmem:[%s15742_s14 + $0x20] sm:$0xff]  }
0x22ef   :  { %4414 = vmatprep.subr.bf16.mxu0 %v12548_v44  ;;  %v12563_v44 = vld [vmem:[%s15742_s14 + $0x28] sm:$0xff]  }
0x22f2   :  { %4415 = vmatpush1.bf16.msra.mxu0 %v12546_v27  ;;  %v12562_v27 = vld [vmem:[%s15742_s14 + $0x68] sm:$0xff]  }
0x22f3   :  { %4416 = vmatprep.subr.bf16.mxu0 %v12551_v36  ;;  %v12565_v36 = vld [vmem:[%s15742_s14 + $0x30] sm:$0xff]  }
0x22f6   :  { %4417 = vmatpush1.bf16.msra.mxu0 %v12549_v57  ;;  %v12564_v57 = vld [vmem:[%s15742_s14 + $0x70] sm:$0xff]  }
0x2327   :  { %v4011_v50 = vpop.permute.xlu1 %4010 }
0x2328   :  { %4015 = vst.msk [vmem:[#allocation3 + $0x38] sm:$0xff] %vm1409_vm5, %v4011_v50  ;;  %v4009_v38 = vpop.permute.xlu0 %4008 }
0x2329   :  { %4014 = vst.msk [vmem:[#allocation3 + $0x30] sm:$0xff] %vm1409_vm5, %v4009_v38 }
0x232f   :  { %v4023_v24 = vld [vmem:[#allocation3 + $0x38] sm:$0xff] }
0x2330   :  { %v4022_v20 = vld [vmem:[#allocation3 + $0x30] sm:$0xff] }
0x2331   :  { %v4043_v60 = vpack.c.bf16 %v4023_v24, %v4022_v20 }
0x2333   :  { %11437 = vmatmul.mubr.bf16.gmra.mrb[40].mxu1 %v4043_v60  ;;  %v14092_v60 = vld [vmem:[%s15738_s10] ss:$0 sm:$0xff] }
0x2367   :  { %v4175_v14 = vpop.xlane.xlu0 %4174 }
0x2368   :  { %v4190_v52 = vmul.f32 0.0078125, %v4175_v14 }
0x2369   :  { %v4177_v53 = vpop.xlane.xlu1 %4176 }
0x236a   :  { %v4198_v33 = vsub.f32 %v4164_v1, %v4190_v52  ;;  %v4191_v58 = vmul.f32 0.0078125, %v4177_v53 }
0x236c   :  { %v4199_v6 = vsub.f32 %v4165_v45, %v4191_v58  ;;  %v4206_v13 = vmul.f32 %v4198_v33, %v4198_v33  ;;  %v14105_v58 = vld [vmem:[%s15739_s11] ss:$0 sm:$0xff] }
0x236d   :  { %v4181_v29 = vpop.xlane.xlu1 %4180 }
0x236e   :  { %4214 = vadd.xlane.f32.xlu0 %v4206_v13  ;;  %v4207_v51 = vmul.f32 %v4199_v6, %v4199_v6  ;;  %v4193_v38 = vmul.f32 0.0078125, %v4181_v29 }
0x2372   :  { %4216 = vadd.xlane.f32.xlu0 %v4207_v51  ;;  %v12552_v51 = vld [vmem:[%s15742_s14 + $0x40] sm:$0xff]  }
0x2373   :  { %10830 = vmatprep.subr.bf16.mxu1 %v12552_v51 }
0x2376   :  { %4178 = vadd.xlane.f32.xlu0 %v4166_v18 }
0x23fb   :  { %v4215_v26 = vpop.xlane.xlu0 %4214 }
0x23fc   :  { %v4230_v46 = vmul.f32 0.0078125, %v4215_v26  ;;  %v12566_v26 = vld [vmem:[%s15742_s14 + $0x78] sm:$0xff]  }
0x23fe   :  { %v4238_v22 = vadd.f32 1e-12, %v4230_v46  ;;  %v12567_v46 = vld [vmem:[%s15742_s14 + $0x38] sm:$0xff]  }
0x23ff   :  { %v4217_v5 = vpop.xlane.xlu0 %4216 }
0x2400   :  { %12792 = vrsqrt.f32 %v4238_v22  ;;  %v4231_v31 = vmul.f32 0.0078125, %v4217_v5 }
0x2402   :  { %v4239_v47 = vadd.f32 1e-12, %v4231_v31 }
0x2403   :  { %v4179_v34 = vpop.xlane.xlu0 %4178 }
0x2404   :  { %12794 = vrsqrt.f32 %v4239_v47  ;;  %v4192_v28 = vmul.f32 0.0078125, %v4179_v34 }
0x2406   :  { %v11438_v12 = vpop.f32.mrb[40].mxu1  ;;  %v14094_v52 = vsub.f32 %v4166_v18, %v4192_v28  ;;  %v12553_v18 = vld [vmem:[%s15742_s14] sm:$0xff]  }
0x2407   :  { %v4149_v19 = vpop.f32.mrb[41].mxu1  ;;  %v4158_v7 = vadd.f32 %v11438_v12, %v14017_v49  ;;  %10831 = vmatpush3.bf16.msra.mxu1 %v12553_v18 }
0x2408   :  { %v4150_v63 = vadd.f32 %v14017_v49, %v4149_v19  ;;  %v11439_v1 = vpop.f32.mrb[42].mxu1  ;;  %10832 = vmatprep.subr.bf16.mxu1 %v12554_v61 }
0x2409   :  { %v4152_v41 = vpop.f32.mrb[43].mxu1  ;;  %v4161_v24 = vadd.f32 %v11439_v1, %v14017_v49 }
0x240a   :  { %v12793_v45 = vpop.eup %12792  ;;  %v14083_v10 = vadd.f32 %v4150_v63, %v13373_v55  ;;  %v4153_v8 = vadd.f32 %v14017_v49, %v4152_v41  ;;  %v4170_v55 = vadd.f32 %v4158_v7, %v13389_v62  ;;  %v14099_v49 = vsub.f32 %v14025_v37, %v4193_v38 }
0x240b   :  { %v4254_v50 = vmul.f32 %v12793_v45, %v4198_v33  ;;  %v4208_v62 = vmul.f32 %v14094_v52, %v14094_v52  ;;  %10833 = vmatpush3.bf16.msra.mxu1 %v12555_v16 }
0x240c   :  { %v4169_v20 = vadd.f32 %v4153_v8, %v13376_v56  ;;  %4182 = vadd.xlane.f32.xlu0 %v14083_v10  ;;  %v4171_v56 = vadd.f32 %v4161_v24, %v13392_v0  ;;  %v4209_v0 = vmul.f32 %v14099_v49, %v14099_v49  ;;  %10834 = vmatprep.subr.bf16.mxu1 %v12556_v35 }
0x240d   :  { %v4268_v33 = vmul.f32 %v14092_v60, %v4254_v50 }
0x240e   :  { %v12795_v14 = vpop.eup %12794  ;;  %4184 = vadd.xlane.f32.xlu1 %v4169_v20 }
0x240f   :  { %v4255_v53 = vmul.f32 %v12795_v14, %v4199_v6  ;;  %v14111_v6 = vadd.f32 %v14105_v58, %v4268_v33  ;;  %10835 = vmatpush3.bf16.msra.mxu1 %v12557_v11 }
0x2410   :  { %4186 = vadd.xlane.f32.xlu0 %v4170_v55  ;;  %10836 = vmatprep.subr.bf16.mxu1 %v12558_v48 }
0x2411   :  { %v4269_v13 = vmul.f32 %v14092_v60, %v4255_v53 }
0x2412   :  { %4188 = vadd.xlane.f32.xlu1 %v4171_v56 }
0x2413   :  { %v14114_v37 = vadd.f32 %v14105_v58, %v4269_v13  ;;  %10837 = vmatpush3.bf16.msra.mxu1 %v12559_v23 }
0x2414   :  { %4218 = vadd.xlane.f32.xlu0 %v4208_v62  ;;  %10838 = vmatprep.subr.bf16.mxu1 %v12560_v3 }
0x2415   :  { %v4306_v42 = vpack.c.bf16 %v14114_v37, %v14111_v6 }
0x2416   :  { %4220 = vadd.xlane.f32.xlu1 %v4209_v0 }
0x2417   :  { %4435 = vmatmul.mubr.bf16.vlgmr.msra.gmra.mrb[56].mxu0 %v4306_v42  ;;  %10839 = vmatpush3.bf16.msra.mxu1 %v12561_v40 }
0x2418   :  { %4444 = vmatprep.mubr.bf16.mxu0 %v13073_v39  ;;  %10840 = vmatprep.subr.bf16.mxu1 %v12562_v27 }
0x241b   :  { %10841 = vmatpush3.bf16.msra.mxu1 %v12563_v44 }
0x241c   :  { %10842 = vmatprep.subr.bf16.mxu1 %v12564_v57 }
0x241f   :  { %10843 = vmatpush3.bf16.msra.mxu1 %v12565_v36 }
0x2420   :  { %10844 = vmatprep.subr.bf16.mxu1 %v12566_v26 }
0x2423   :  { %10845 = vmatpush3.bf16.msra.mxu1 %v12567_v46 }
0x2499   :  { %v4183_v22 = vpop.xlane.xlu0 %4182 }
0x249a   :  { %v4194_v5 = vmul.f32 0.0078125, %v4183_v22 }
0x249b   :  { %v4185_v31 = vpop.xlane.xlu1 %4184 }
0x249c   :  { %v14170_v47 = vsub.f32 %v14083_v10, %v4194_v5  ;;  %v4195_v12 = vmul.f32 0.0078125, %v4185_v31 }
0x249d   :  { %v4187_v34 = vpop.xlane.xlu0 %4186 }
0x249e   :  { %v14172_v19 = vsub.f32 %v4169_v20, %v4195_v12  ;;  %v4196_v63 = vmul.f32 0.0078125, %v4187_v34  ;;  %v4210_v1 = vmul.f32 %v14170_v47, %v14170_v47 }
0x249f   :  { %v4189_v29 = vpop.xlane.xlu1 %4188 }
0x24a0   :  { %v14176_v41 = vsub.f32 %v4170_v55, %v4196_v63  ;;  %v4197_v45 = vmul.f32 0.0078125, %v4189_v29  ;;  %4222 = vadd.xlane.f32.xlu0 %v4210_v1  ;;  %v4211_v28 = vmul.f32 %v14172_v19, %v14172_v19 }
0x24a1   :  { %v4219_v7 = vpop.xlane.xlu0 %4218 }
0x24a2   :  { %v14180_v8 = vsub.f32 %v4171_v56, %v4197_v45  ;;  %v4232_v10 = vmul.f32 0.0078125, %v4219_v7  ;;  %4224 = vadd.xlane.f32.xlu1 %v4211_v28  ;;  %v4212_v50 = vmul.f32 %v14176_v41, %v14176_v41 }
0x24a3   :  { %v4221_v38 = vpop.xlane.xlu1 %4220 }
0x24a4   :  { %v4240_v24 = vadd.f32 1e-12, %v4232_v10  ;;  %v4233_v20 = vmul.f32 0.0078125, %v4221_v38  ;;  %4226 = vadd.xlane.f32.xlu0 %v4212_v50  ;;  %v4213_v14 = vmul.f32 %v14180_v8, %v14180_v8 }
0x24a6   :  { %12796 = vrsqrt.f32 %v4240_v24  ;;  %v4241_v55 = vadd.f32 1e-12, %v4233_v20  ;;  %4228 = vadd.xlane.f32.xlu1 %v4213_v14 }
0x24a8   :  { %12798 = vrsqrt.f32 %v4241_v55 }
0x24b0   :  { %v12797_v53 = vpop.eup %12796 }
0x24b1   :  { %v4256_v33 = vmul.f32 %v12797_v53, %v14094_v52  ;;  %v4310_v52 = vld [vmem:[%s15741_s13] sm:$0x3] }
0x24b2   :  { %v12799_v56 = vpop.eup %12798  ;;  %v14206_v61 = vrot.slane %v4310_v52, %v13413_v4 }
0x24b3   :  { %v4257_v13 = vmul.f32 %v12799_v56, %v14099_v49  ;;  %v4270_v62 = vmul.f32 %v14092_v60, %v4256_v33  ;;  %v14203_v49 = vrot.slane %v4310_v52, %v13407_v2 }
0x24b5   :  { %v4271_v0 = vmul.f32 %v14092_v60, %v4257_v13  ;;  %v14191_v42 = vadd.f32 %v14105_v58, %v4270_v62 }
0x24b7   :  { %v14194_v51 = vadd.f32 %v14105_v58, %v4271_v0 }
0x24b9   :  { %v4307_v18 = vpack.c.bf16 %v14194_v51, %v14191_v42 }
0x24bb   :  { %4445 = vmatmul.mubr.bf16.gmra.mrb[60].mxu0 %v4307_v18 }
0x24bc   :  { %4454 = vmatprep.mubr.bf16.mxu0 %v13073_v39 }
0x24ea   :  { %v4436_v16 = vpop.f32.mrb[56].mxu0 }
0x24eb   :  { %v4437_v35 = vadd.f32 %v4436_v16, %v14203_v49  ;;  %v4438_v11 = vpop.f32.mrb[57].mxu0 }
0x24ec   :  { %v4439_v48 = vadd.f32 %v4438_v11, %v14206_v61  ;;  %v4440_v23 = vpop.f32.mrb[58].mxu0 }
0x24ed   :  { %v4475_v3 = vmul.f32 %v4437_v35, %v4437_v35  ;;  %v4441_v40 = vadd.f32 %v4440_v23, %v14203_v49  ;;  %v4442_v27 = vpop.f32.mrb[59].mxu0 }
0x24ee   :  { %v4476_v44 = vmul.f32 %v4439_v48, %v4439_v48  ;;  %v4443_v57 = vadd.f32 %v4442_v27, %v14206_v61 }
0x24ef   :  { %v4491_v36 = vmul.f32 %v4475_v3, %v4437_v35  ;;  %v4477_v26 = vmul.f32 %v4441_v40, %v4441_v40 }
0x24f0   :  { %v4492_v46 = vmul.f32 %v4476_v44, %v4439_v48  ;;  %v4478_v22 = vmul.f32 %v4443_v57, %v4443_v57 }
0x24f1   :  { %v4507_v5 = vmul.f32 0.044715, %v4491_v36  ;;  %v4493_v31 = vmul.f32 %v4477_v26, %v4441_v40 }
0x24f2   :  { %v4508_v12 = vmul.f32 0.044715, %v4492_v46  ;;  %v4494_v34 = vmul.f32 %v4478_v22, %v4443_v57 }
0x24f3   :  { %v4523_v63 = vadd.f32 %v4507_v5, %v4437_v35  ;;  %v4509_v1 = vmul.f32 0.044715, %v4493_v31 }
0x24f4   :  { %v4524_v29 = vadd.f32 %v4508_v12, %v4439_v48  ;;  %v4510_v45 = vmul.f32 0.044715, %v4494_v34 }
0x24f5   :  { %v4539_v28 = vmul.f32 0.7978846, %v4523_v63  ;;  %v4525_v7 = vadd.f32 %v4509_v1, %v4441_v40 }
0x24f6   :  { %v4540_v10 = vmul.f32 0.7978846, %v4524_v29  ;;  %v4526_v50 = vadd.f32 %v4510_v45, %v4443_v57 }
0x24f7   :  { %12800 = vtanh.f32 %v4539_v28  ;;  %v4541_v38 = vmul.f32 0.7978846, %v4525_v7 }
0x24f8   :  { %12802 = vtanh.f32 %v4540_v10  ;;  %v4542_v24 = vmul.f32 0.7978846, %v4526_v50 }
0x24f9   :  { %12804 = vtanh.f32 %v4541_v38 }
0x24fa   :  { %12806 = vtanh.f32 %v4542_v24 }
0x2501   :  { %v12801_v20 = vpop.eup %12800 }
0x2502   :  { %v12803_v14 = vpop.eup %12802  ;;  %v4571_v55 = vadd.f32 1.0, %v12801_v20 }
0x2503   :  { %v12805_v53 = vpop.eup %12804  ;;  %v4572_v33 = vadd.f32 1.0, %v12803_v14 }
0x2504   :  { %v12807_v56 = vpop.eup %12806  ;;  %v4587_v13 = vmul.f32 0.5, %v4571_v55  ;;  %v4573_v62 = vadd.f32 1.0, %v12805_v53 }
0x2505   :  { %v4574_v0 = vadd.f32 1.0, %v12807_v56  ;;  %v4588_v18 = vmul.f32 0.5, %v4572_v33 }
0x2506   :  { %v4589_v52 = vmul.f32 0.5, %v4573_v62  ;;  %v4603_v11 = vmul.f32 %v4587_v13, %v4437_v35 }
0x2507   :  { %v4590_v16 = vmul.f32 0.5, %v4574_v0  ;;  %v4604_v3 = vmul.f32 %v4588_v18, %v4439_v48 }
0x2508   :  { %v4605_v23 = vmul.f32 %v4589_v52, %v4441_v40 }
0x2509   :  { %v4606_v27 = vmul.f32 %v4590_v16, %v4443_v57 }
0x250a   :  { %v4651_v44 = vpack.c.bf16 %v4605_v23, %v4603_v11 }
0x250b   :  { %v4652_v36 = vpack.c.bf16 %v4606_v27, %v4604_v3 }
0x250d   :  { %4794 = vmatprep.mubr.bf16.mxu1 %v4652_v36 }
0x250e   :  { %4795 = vmatmul.mubr.bf16.vlgmr.msra.gmra.mrb[44].mxu1 %v4651_v44 }
0x252d   :  { %v4223_v26 = vpop.xlane.xlu0 %4222 }
0x252e   :  { %v4234_v46 = vmul.f32 0.0078125, %v4223_v26 }
0x252f   :  { %v4225_v22 = vpop.xlane.xlu1 %4224 }
0x2530   :  { %v4242_v5 = vadd.f32 1e-12, %v4234_v46  ;;  %v4235_v31 = vmul.f32 0.0078125, %v4225_v22 }
0x2531   :  { %v4227_v12 = vpop.xlane.xlu0 %4226 }
0x2532   :  { %12808 = vrsqrt.f32 %v4242_v5  ;;  %v4243_v34 = vadd.f32 1e-12, %v4235_v31  ;;  %v4236_v63 = vmul.f32 0.0078125, %v4227_v12 }
0x2533   :  { %v4229_v1 = vpop.xlane.xlu1 %4228 }
0x2534   :  { %12810 = vrsqrt.f32 %v4243_v34  ;;  %v4244_v29 = vadd.f32 1e-12, %v4236_v63  ;;  %v4237_v35 = vmul.f32 0.0078125, %v4229_v1 }
0x2536   :  { %12812 = vrsqrt.f32 %v4244_v29  ;;  %v4245_v48 = vadd.f32 1e-12, %v4237_v35 }
0x2538   :  { %12814 = vrsqrt.f32 %v4245_v48 }
0x253c   :  { %v12809_v40 = vpop.eup %12808 }
0x253d   :  { %v4258_v57 = vmul.f32 %v12809_v40, %v14170_v47 }
0x253e   :  { %v12811_v45 = vpop.eup %12810 }
0x253f   :  { %v4259_v28 = vmul.f32 %v12811_v45, %v14172_v19  ;;  %v4272_v7 = vmul.f32 %v14092_v60, %v4258_v57 }
0x2540   :  { %v12813_v10 = vpop.eup %12812 }
0x2541   :  { %v4273_v50 = vmul.f32 %v14092_v60, %v4259_v28  ;;  %v14217_v24 = vadd.f32 %v14105_v58, %v4272_v7  ;;  %v4260_v14 = vmul.f32 %v12813_v10, %v14176_v41 }
0x2542   :  { %v12815_v38 = vpop.eup %12814 }
0x2543   :  { %v14220_v20 = vadd.f32 %v14105_v58, %v4273_v50  ;;  %v4261_v55 = vmul.f32 %v12815_v38, %v14180_v8  ;;  %v4274_v53 = vmul.f32 %v14092_v60, %v4260_v14 }
0x2545   :  { %v4308_v47 = vpack.c.bf16 %v14220_v20, %v14217_v24  ;;  %v4275_v19 = vmul.f32 %v14092_v60, %v4261_v55  ;;  %v14233_v56 = vadd.f32 %v14105_v58, %v4274_v53 }
0x2547   :  { %4455 = vmatmul.mubr.bf16.gmra.mrb[64].mxu0 %v4308_v47  ;;  %v14230_v33 = vadd.f32 %v14105_v58, %v4275_v19 }
0x2548   :  { %4464 = vmatprep.mubr.bf16.mxu0 %v13073_v39 }
0x2549   :  { %v4309_v41 = vpack.c.bf16 %v14230_v33, %v14233_v56 }
0x254f   :  { %4465 = vmatmul.mubr.bf16.gmra.mrb[68].mxu0 %v4309_v41 }
0x258e   :  { %v4446_v8 = vpop.f32.mrb[60].mxu0 }
0x258f   :  { %v4447_v13 = vadd.f32 %v4446_v8, %v14203_v49  ;;  %v4448_v62 = vpop.f32.mrb[61].mxu0 }
0x2590   :  { %v4449_v0 = vadd.f32 %v4448_v62, %v14206_v61  ;;  %v4450_v18 = vpop.f32.mrb[62].mxu0 }
0x2591   :  { %v4479_v60 = vmul.f32 %v4447_v13, %v4447_v13  ;;  %v4451_v52 = vadd.f32 %v4450_v18, %v14203_v49  ;;  %v4452_v16 = vpop.f32.mrb[63].mxu0 }
0x2592   :  { %v4480_v11 = vmul.f32 %v4449_v0, %v4449_v0  ;;  %v4453_v23 = vadd.f32 %v4452_v16, %v14206_v61 }
0x2593   :  { %v4495_v58 = vmul.f32 %v4479_v60, %v4447_v13  ;;  %v4481_v3 = vmul.f32 %v4451_v52, %v4451_v52 }
0x2594   :  { %v4496_v27 = vmul.f32 %v4480_v11, %v4449_v0  ;;  %v4482_v44 = vmul.f32 %v4453_v23, %v4453_v23 }
0x2595   :  { %v4511_v36 = vmul.f32 0.044715, %v4495_v58  ;;  %v4497_v26 = vmul.f32 %v4481_v3, %v4451_v52  ;;  %v14244_v58 = vld [vmem:[%s15743_s15] ss:$0 sm:$0xff] }
0x2596   :  { %v4512_v46 = vmul.f32 0.044715, %v4496_v27  ;;  %v4498_v22 = vmul.f32 %v4482_v44, %v4453_v23 }
0x2597   :  { %v4527_v5 = vadd.f32 %v4511_v36, %v4447_v13  ;;  %v4513_v31 = vmul.f32 0.044715, %v4497_v26 }
0x2598   :  { %v4528_v12 = vadd.f32 %v4512_v46, %v4449_v0  ;;  %v4514_v34 = vmul.f32 0.044715, %v4498_v22  ;;  %v12568_v46 = vld [vmem:[%s15734_s6 + $0xc0] ss:$12 sps:$4 sm:$0xff]   ;;  %v12570_v22 = vld [vmem:[%s15734_s6 + $0xc4] ss:$12 sps:$4 sm:$0xff]  }
0x2599   :  { %v4543_v63 = vmul.f32 0.7978846, %v4527_v5  ;;  %v4529_v1 = vadd.f32 %v4513_v31, %v4451_v52  ;;  %5285 = vmatprep.subr.bf16.mxu1 %v12570_v22 }
0x259a   :  { %v4544_v29 = vmul.f32 0.7978846, %v4528_v12  ;;  %v4530_v35 = vadd.f32 %v4514_v34, %v4453_v23  ;;  %5286 = vmatpush1.bf16.msra.mxu1 %v12568_v46 }
0x259b   :  { %12816 = vtanh.f32 %v4543_v63  ;;  %v4545_v48 = vmul.f32 0.7978846, %v4529_v1 }
0x259c   :  { %12818 = vtanh.f32 %v4544_v29  ;;  %v4546_v40 = vmul.f32 0.7978846, %v4530_v35 }
0x259d   :  { %12820 = vtanh.f32 %v4545_v48 }
0x259e   :  { %12822 = vtanh.f32 %v4546_v40 }
0x25a5   :  { %v12817_v57 = vpop.eup %12816 }
0x25a6   :  { %v12819_v45 = vpop.eup %12818  ;;  %v4575_v28 = vadd.f32 1.0, %v12817_v57 }
0x25a7   :  { %v12821_v7 = vpop.eup %12820  ;;  %v4576_v10 = vadd.f32 1.0, %v12819_v45 }
0x25a8   :  { %v12823_v50 = vpop.eup %12822  ;;  %v4577_v38 = vadd.f32 1.0, %v12821_v7  ;;  %v4591_v14 = vmul.f32 0.5, %v4575_v28 }
0x25a9   :  { %v4578_v55 = vadd.f32 1.0, %v12823_v50  ;;  %v4592_v47 = vmul.f32 0.5, %v4576_v10 }
0x25aa   :  { %v4593_v19 = vmul.f32 0.5, %v4577_v38  ;;  %v4607_v41 = vmul.f32 %v4591_v14, %v4447_v13 }
0x25ab   :  { %v4594_v53 = vmul.f32 0.5, %v4578_v55  ;;  %v4608_v62 = vmul.f32 %v4592_v47, %v4449_v0 }
0x25ac   :  { %v4609_v8 = vmul.f32 %v4593_v19, %v4451_v52 }
0x25ad   :  { %v4610_v18 = vmul.f32 %v4594_v53, %v4453_v23 }
0x25ae   :  { %v4653_v60 = vpack.c.bf16 %v4609_v8, %v4607_v41 }
0x25af   :  { %v4654_v16 = vpack.c.bf16 %v4610_v18, %v4608_v62 }
0x25b1   :  { %4802 = vmatprep.mubr.bf16.mxu1 %v4654_v16 }
0x25b2   :  { %4803 = vmatmul.mubr.bf16.gmra.mrb[48].mxu1 %v4653_v60 }
0x25e1   :  { %v10846_v11 = vpop.f32.mrb[44].mxu1 }
0x25e2   :  { %v10847_v3 = vpop.f32.mrb[45].mxu1 }
0x25e3   :  { %v10848_v27 = vadd.f32 %v10847_v3, %v10846_v11  ;;  %v10849_v44 = vpop.f32.mrb[46].mxu1 }
0x25e4   :  { %v10850_v36 = vpop.f32.mrb[47].mxu1 }
0x25e5   :  { %v4797_v26 = vadd.f32 %v10848_v27, %v14244_v58  ;;  %v10851_v13 = vadd.f32 %v10850_v36, %v10849_v44 }
0x25e7   :  { %v4800_v0 = vadd.f32 %v10851_v13, %v14244_v58  ;;  %v14249_v52 = vadd.f32 %v4797_v26, %v14111_v6  ;;  %v12573_v6 = vld [vmem:[%s15734_s6 + $0xdc] ss:$12 sps:$4 sm:$0xff]  }
0x25e8   :  { %5287 = vmatprep.subr.bf16.mxu1 %v12573_v6 }
0x25e9   :  { %4837 = vadd.xlane.f32.xlu0 %v14249_v52  ;;  %v14253_v23 = vadd.f32 %v4800_v0, %v14114_v37  ;;  %v12571_v37 = vld [vmem:[%s15734_s6 + $0xd8] ss:$12 sps:$4 sm:$0xff]  }
0x25ea   :  { %5288 = vmatpush1.bf16.msra.mxu1 %v12571_v37 }
0x25eb   :  { %4839 = vadd.xlane.f32.xlu1 %v14253_v23 }
0x261a   :  { %v4456_v5 = vpop.f32.mrb[64].mxu0 }
0x261b   :  { %v14269_v31 = vadd.f32 %v4456_v5, %v14203_v49  ;;  %v4458_v12 = vpop.f32.mrb[65].mxu0 }
0x261c   :  { %v14272_v34 = vadd.f32 %v4458_v12, %v14206_v61  ;;  %v4460_v63 = vpop.f32.mrb[66].mxu0 }
0x261d   :  { %v4483_v1 = vmul.f32 %v14269_v31, %v14269_v31  ;;  %v14277_v29 = vadd.f32 %v4460_v63, %v14203_v49  ;;  %v4462_v35 = vpop.f32.mrb[67].mxu0 }
0x261e   :  { %v4484_v48 = vmul.f32 %v14272_v34, %v14272_v34  ;;  %v14282_v40 = vadd.f32 %v4462_v35, %v14206_v61 }
0x261f   :  { %v4499_v57 = vmul.f32 %v4483_v1, %v14269_v31  ;;  %v4485_v45 = vmul.f32 %v14277_v29, %v14277_v29 }
0x2620   :  { %v4500_v28 = vmul.f32 %v4484_v48, %v14272_v34  ;;  %v4486_v7 = vmul.f32 %v14282_v40, %v14282_v40 }
0x2621   :  { %v4515_v10 = vmul.f32 0.044715, %v4499_v57  ;;  %v4501_v50 = vmul.f32 %v4485_v45, %v14277_v29 }
0x2622   :  { %v4516_v38 = vmul.f32 0.044715, %v4500_v28  ;;  %v4502_v14 = vmul.f32 %v4486_v7, %v14282_v40  ;;  %v4466_v55 = vpop.f32.mrb[68].mxu0 }
0x2623   :  { %v4531_v47 = vadd.f32 %v4515_v10, %v14269_v31  ;;  %v4517_v19 = vmul.f32 0.044715, %v4501_v50  ;;  %v14294_v53 = vadd.f32 %v4466_v55, %v14203_v49  ;;  %v4468_v41 = vpop.f32.mrb[69].mxu0 }
0x2624   :  { %v4532_v8 = vadd.f32 %v4516_v38, %v14272_v34  ;;  %v4518_v62 = vmul.f32 0.044715, %v4502_v14  ;;  %v14298_v18 = vadd.f32 %v4468_v41, %v14206_v61  ;;  %v4470_v60 = vpop.f32.mrb[70].mxu0 }
0x2625   :  { %v4547_v16 = vmul.f32 0.7978846, %v4531_v47  ;;  %v4533_v11 = vadd.f32 %v4517_v19, %v14277_v29  ;;  %v4487_v3 = vmul.f32 %v14294_v53, %v14294_v53  ;;  %v14304_v27 = vadd.f32 %v4470_v60, %v14203_v49  ;;  %v4472_v44 = vpop.f32.mrb[71].mxu0 }
0x2626   :  { %v4548_v36 = vmul.f32 0.7978846, %v4532_v8  ;;  %v4534_v26 = vadd.f32 %v4518_v62, %v14282_v40  ;;  %v4488_v13 = vmul.f32 %v14298_v18, %v14298_v18  ;;  %v14310_v0 = vadd.f32 %v4472_v44, %v14206_v61 }
0x2627   :  { %12824 = vtanh.f32 %v4547_v16  ;;  %v4549_v46 = vmul.f32 0.7978846, %v4533_v11  ;;  %v4503_v22 = vmul.f32 %v4487_v3, %v14294_v53  ;;  %v4489_v6 = vmul.f32 %v14304_v27, %v14304_v27 }
0x2628   :  { %12826 = vtanh.f32 %v4548_v36  ;;  %v4550_v49 = vmul.f32 0.7978846, %v4534_v26  ;;  %v4504_v37 = vmul.f32 %v4488_v13, %v14298_v18  ;;  %v4490_v5 = vmul.f32 %v14310_v0, %v14310_v0 }
0x2629   :  { %12828 = vtanh.f32 %v4549_v46  ;;  %v4519_v12 = vmul.f32 0.044715, %v4503_v22  ;;  %v4505_v63 = vmul.f32 %v4489_v6, %v14304_v27 }
0x262a   :  { %12830 = vtanh.f32 %v4550_v49  ;;  %v4520_v61 = vmul.f32 0.044715, %v4504_v37  ;;  %v4506_v1 = vmul.f32 %v4490_v5, %v14310_v0 }
0x262b   :  { %v4535_v35 = vadd.f32 %v4519_v12, %v14294_v53  ;;  %v4521_v48 = vmul.f32 0.044715, %v4505_v63 }
0x262c   :  { %v4536_v57 = vadd.f32 %v4520_v61, %v14298_v18  ;;  %v4522_v45 = vmul.f32 0.044715, %v4506_v1 }
0x262d   :  { %v4551_v28 = vmul.f32 0.7978846, %v4535_v35  ;;  %v4537_v7 = vadd.f32 %v4521_v48, %v14304_v27 }
0x262e   :  { %v4552_v10 = vmul.f32 0.7978846, %v4536_v57  ;;  %v4538_v50 = vadd.f32 %v4522_v45, %v14310_v0 }
0x262f   :  { %12832 = vtanh.f32 %v4551_v28  ;;  %v4553_v38 = vmul.f32 0.7978846, %v4537_v7 }
0x2630   :  { %12834 = vtanh.f32 %v4552_v10  ;;  %v4554_v14 = vmul.f32 0.7978846, %v4538_v50 }
0x2631   :  { %v12825_v55 = vpop.eup %12824  ;;  %12836 = vtanh.f32 %v4553_v38 }
0x2632   :  { %v12827_v47 = vpop.eup %12826  ;;  %12838 = vtanh.f32 %v4554_v14  ;;  %v4579_v19 = vadd.f32 1.0, %v12825_v55 }
0x2633   :  { %v12829_v41 = vpop.eup %12828  ;;  %v4580_v8 = vadd.f32 1.0, %v12827_v47 }
0x2634   :  { %v12831_v62 = vpop.eup %12830  ;;  %v4581_v60 = vadd.f32 1.0, %v12829_v41  ;;  %v4595_v16 = vmul.f32 0.5, %v4579_v19 }
0x2635   :  { %v4582_v11 = vadd.f32 1.0, %v12831_v62  ;;  %v4596_v3 = vmul.f32 0.5, %v4580_v8 }
0x2636   :  { %v4597_v44 = vmul.f32 0.5, %v4581_v60  ;;  %v4611_v26 = vmul.f32 %v4595_v16, %v14269_v31 }
0x2637   :  { %v4598_v36 = vmul.f32 0.5, %v4582_v11  ;;  %v4612_v22 = vmul.f32 %v4596_v3, %v14272_v34 }
0x2638   :  { %v4613_v13 = vmul.f32 %v4597_v44, %v14277_v29  ;;  %v12574_v44 = vld [vmem:[%s15734_s6 + $0xf0] ss:$12 sps:$4 sm:$0xff]  }
0x2639   :  { %v12833_v46 = vpop.eup %12832  ;;  %v4614_v6 = vmul.f32 %v4598_v36, %v14282_v40 }
0x263a   :  { %v12835_v49 = vpop.eup %12834  ;;  %v4655_v37 = vpack.c.bf16 %v4613_v13, %v4611_v26  ;;  %v4583_v5 = vadd.f32 1.0, %v12833_v46  ;;  %v12579_v26 = vld [vmem:[%s15734_s6 + $0x10c] ss:$12 sps:$4 sm:$0xff]   ;;  %v12582_v13 = vld [vmem:[%s15734_s6 + $0x124] ss:$12 sps:$4 sm:$0xff]  }
0x263b   :  { %v12837_v12 = vpop.eup %12836  ;;  %v4656_v63 = vpack.c.bf16 %v4614_v6, %v4612_v22  ;;  %v4584_v61 = vadd.f32 1.0, %v12835_v49  ;;  %v12585_v46 = vld [vmem:[%s15734_s6 + $0x13c] ss:$12 sps:$4 sm:$0xff]   ;;  %v12583_v22 = vld [vmem:[%s15734_s6 + $0x138] ss:$12 sps:$4 sm:$0xff]  }
0x263c   :  { %v12839_v1 = vpop.eup %12838  ;;  %v4585_v35 = vadd.f32 1.0, %v12837_v12  ;;  %v4599_v48 = vmul.f32 0.5, %v4583_v5  ;;  %v12588_v6 = vld [vmem:[%s15734_s6 + $0x154] ss:$12 sps:$4 sm:$0xff]   ;;  %v12586_v49 = vld [vmem:[%s15734_s6 + $0x150] ss:$12 sps:$4 sm:$0xff]  }
0x263d   :  { %4810 = vmatprep.mubr.bf16.mxu1 %v4656_v63  ;;  %v4586_v57 = vadd.f32 1.0, %v12839_v1  ;;  %v4600_v45 = vmul.f32 0.5, %v4584_v61  ;;  %v12589_v5 = vld [vmem:[%s15734_s6 + $0x168] ss:$12 sps:$4 sm:$0xff]   ;;  %v13077_v12 = vmov 0.0|0.0  }
0x263e   :  { %4811 = vmatmul.mubr.bf16.gmra.mrb[52].mxu1 %v4655_v37  ;;  %v4601_v31 = vmul.f32 0.5, %v4585_v35  ;;  %v4615_v28 = vmul.f32 %v4599_v48, %v14294_v53  ;;  %v12591_v37 = vld [vmem:[%s15734_s6 + $0x16c] ss:$12 sps:$4 sm:$0xff]   ;;  %11948 = vmatprep.subr.bf16.mxu0 %v13077_v12 }
0x263f   :  { %v4602_v29 = vmul.f32 0.5, %v4586_v57  ;;  %v4616_v40 = vmul.f32 %v4600_v45, %v14298_v18 }
0x2640   :  { %v4617_v34 = vmul.f32 %v4601_v31, %v14304_v27 }
0x2641   :  { %v4618_v7 = vmul.f32 %v4602_v29, %v14310_v0 }
0x2642   :  { %v4657_v10 = vpack.c.bf16 %v4617_v34, %v4615_v28 }
0x2643   :  { %v4658_v50 = vpack.c.bf16 %v4618_v7, %v4616_v40 }
0x2645   :  { %4818 = vmatprep.mubr.bf16.mxu1 %v4658_v50 }
0x2646   :  { %4819 = vmatmul.mubr.bf16.gmra.mrb[56].mxu1 %v4657_v10 }
0x2647   :  { %5317 = vmatprep.mubr.bf16.mxu1 %v13073_v39 }
0x2676   :  { %v4838_v38 = vpop.xlane.xlu0 %4837 }
0x2677   :  { %v4853_v14 = vmul.f32 0.0078125, %v4838_v38 }
0x2678   :  { %v4840_v55 = vpop.xlane.xlu1 %4839 }
0x2679   :  { %v14334_v47 = vsub.f32 %v14249_v52, %v4853_v14  ;;  %v4854_v19 = vmul.f32 0.0078125, %v4840_v55 }
0x267b   :  { %v14337_v53 = vsub.f32 %v14253_v23, %v4854_v19  ;;  %v4869_v18 = vmul.f32 %v14334_v47, %v14334_v47  ;;  %v12576_v23 = vld [vmem:[%s15734_s6 + $0xf4] ss:$12 sps:$4 sm:$0xff]  }
0x267c   :  { %5289 = vmatprep.subr.bf16.mxu1 %v12576_v23  ;;  %v14402_v19 = vld [vmem:[%s15744_s16] ss:$0 sm:$0xff] }
0x267d   :  { %4877 = vadd.xlane.f32.xlu0 %v4869_v18  ;;  %v4870_v27 = vmul.f32 %v14337_v53, %v14337_v53  ;;  %5290 = vmatpush1.bf16.msra.mxu1 %v12574_v44 }
0x267e   :  { %5291 = vmatprep.subr.bf16.mxu1 %v12579_v26 }
0x267f   :  { %4879 = vadd.xlane.f32.xlu1 %v4870_v27 }
0x2685   :  { %v10852_v0 = vpop.f32.mrb[48].mxu1 }
0x2686   :  { %v10853_v41 = vpop.f32.mrb[49].mxu1 }
0x2687   :  { %v10854_v8 = vadd.f32 %v10853_v41, %v10852_v0  ;;  %v10855_v62 = vpop.f32.mrb[50].mxu1 }
0x2688   :  { %v10856_v60 = vpop.f32.mrb[51].mxu1 }
0x2689   :  { %v4805_v52 = vadd.f32 %v10854_v8, %v14244_v58  ;;  %v10857_v16 = vadd.f32 %v10856_v60, %v10855_v62 }
0x268b   :  { %v4808_v11 = vadd.f32 %v10857_v16, %v14244_v58  ;;  %v14349_v3 = vadd.f32 %v4805_v52, %v14191_v42  ;;  %v12577_v42 = vld [vmem:[%s15734_s6 + $0x108] ss:$12 sps:$4 sm:$0xff]  }
0x268c   :  { %5292 = vmatpush1.bf16.msra.mxu1 %v12577_v42 }
0x268d   :  { %4841 = vadd.xlane.f32.xlu0 %v14349_v3  ;;  %v14356_v36 = vadd.f32 %v4808_v11, %v14194_v51  ;;  %v12580_v51 = vld [vmem:[%s15734_s6 + $0x120] ss:$12 sps:$4 sm:$0xff]   ;;  %5293 = vmatprep.subr.bf16.mxu1 %v12582_v13 }
0x268f   :  { %4843 = vadd.xlane.f32.xlu1 %v14356_v36 }
0x2690   :  { %5294 = vmatpush1.bf16.msra.mxu1 %v12580_v51 }
0x2691   :  { %5295 = vmatprep.subr.bf16.mxu1 %v12585_v46 }
0x2694   :  { %5296 = vmatpush1.bf16.msra.mxu1 %v12583_v22 }
0x2695   :  { %5297 = vmatprep.subr.bf16.mxu1 %v12588_v6 }
0x2698   :  { %5298 = vmatpush1.bf16.msra.mxu1 %v12586_v49  ;;  %v12594_v49 = vld [vmem:[%s15734_s6 + $0xf8] ss:$12 sps:$4 sm:$0xff]  }
0x2699   :  { %5299 = vmatprep.subr.bf16.mxu1 %v12591_v37  ;;  %v12595_v37 = vld [vmem:[%s15734_s6 + $0x110] ss:$12 sps:$4 sm:$0xff]  }
0x269c   :  { %5300 = vmatpush1.bf16.msra.mxu1 %v12589_v5  ;;  %v12596_v5 = vld [vmem:[%s15734_s6 + $0x128] ss:$12 sps:$4 sm:$0xff]  }
0x270a   :  { %v4878_v63 = vpop.xlane.xlu0 %4877 }
0x270b   :  { %v4893_v61 = vmul.f32 0.0078125, %v4878_v63  ;;  %v12597_v63 = vld [vmem:[%s15734_s6 + $0x140] ss:$12 sps:$4 sm:$0xff]  }
0x270c   :  { %v4880_v1 = vpop.xlane.xlu1 %4879 }
0x270d   :  { %v4901_v35 = vadd.f32 1e-12, %v4893_v61  ;;  %v4894_v48 = vmul.f32 0.0078125, %v4880_v1  ;;  %v12598_v61 = vld [vmem:[%s15734_s6 + $0x158] ss:$12 sps:$4 sm:$0xff]  }
0x270e   :  { %v12599_v1 = vld [vmem:[%s15734_s6 + $0x170] ss:$12 sps:$4 sm:$0xff]  }
0x270f   :  { %12840 = vrsqrt.f32 %v4901_v35  ;;  %v4902_v57 = vadd.f32 1e-12, %v4894_v48 }
0x2711   :  { %12842 = vrsqrt.f32 %v4902_v57  ;;  %v10858_v45 = vpop.f32.mrb[52].mxu1 }
0x2712   :  { %v10859_v31 = vpop.f32.mrb[53].mxu1 }
0x2713   :  { %v10860_v29 = vadd.f32 %v10859_v31, %v10858_v45  ;;  %v10861_v28 = vpop.f32.mrb[54].mxu1 }
0x2714   :  { %v10862_v34 = vpop.f32.mrb[55].mxu1 }
0x2715   :  { %v4813_v40 = vadd.f32 %v10860_v29, %v14244_v58  ;;  %v10863_v7 = vadd.f32 %v10862_v34, %v10861_v28 }
0x2717   :  { %v4816_v10 = vadd.f32 %v10863_v7, %v14244_v58  ;;  %v14393_v50 = vadd.f32 %v4813_v40, %v14217_v24 }
0x2719   :  { %v12841_v38 = vpop.eup %12840  ;;  %v10864_v14 = vpop.f32.mrb[56].mxu1  ;;  %4845 = vadd.xlane.f32.xlu0 %v14393_v50  ;;  %v14397_v55 = vadd.f32 %v4816_v10, %v14220_v20 }
0x271a   :  { %v10865_v18 = vpop.f32.mrb[57].mxu1  ;;  %v4842_v27 = vpop.xlane.xlu0 %4841  ;;  %v4917_v0 = vmul.f32 %v12841_v38, %v14334_v47  ;;  %v14412_v47 = vld [vmem:[%s15745_s17] ss:$0 sm:$0xff] }
0x271b   :  { %v12843_v41 = vpop.eup %12842  ;;  %v10866_v8 = vadd.f32 %v10865_v18, %v10864_v14  ;;  %v4855_v24 = vmul.f32 0.0078125, %v4842_v27  ;;  %4847 = vadd.xlane.f32.xlu1 %v14397_v55  ;;  %v10867_v62 = vpop.f32.mrb[58].mxu1 }
0x271c   :  { %v4844_v60 = vpop.xlane.xlu1 %4843  ;;  %v10868_v52 = vpop.f32.mrb[59].mxu1  ;;  %v4918_v20 = vmul.f32 %v12843_v41, %v14337_v53  ;;  %v4931_v16 = vmul.f32 %v14402_v19, %v4917_v0 }
0x271d   :  { %v4821_v23 = vadd.f32 %v10866_v8, %v14244_v58  ;;  %v4856_v11 = vmul.f32 0.0078125, %v4844_v60  ;;  %v10869_v44 = vadd.f32 %v10868_v52, %v10867_v62  ;;  %v14416_v42 = vsub.f32 %v14349_v3, %v4855_v24 }
0x271e   :  { %v4932_v26 = vmul.f32 %v14402_v19, %v4918_v20  ;;  %v14421_v51 = vadd.f32 %v14412_v47, %v4931_v16 }
0x271f   :  { %v4824_v13 = vadd.f32 %v10869_v44, %v14244_v58  ;;  %v4833_v53 = vadd.f32 %v4821_v23, %v14233_v56  ;;  %v14427_v22 = vsub.f32 %v14356_v36, %v4856_v11  ;;  %v4871_v56 = vmul.f32 %v14416_v42, %v14416_v42  ;;  %v12593_v36 = vld [vmem:[%s15734_s6 + $0xe0] ss:$12 sps:$4 sm:$0xff]  }
0x2720   :  { %v14424_v46 = vadd.f32 %v14412_v47, %v4932_v26 }
0x2721   :  { %4849 = vadd.xlane.f32.xlu0 %v4833_v53  ;;  %v4834_v6 = vadd.f32 %v4824_v13, %v14230_v33  ;;  %v4872_v58 = vmul.f32 %v14427_v22, %v14427_v22  ;;  %v12592_v33 = vld [vmem:[%s15734_s6 + $0xc8] ss:$12 sps:$4 sm:$0xff]  }
0x2722   :  { %v14432_v3 = vpack.c.bf16 %v14424_v46, %v14421_v51  ;;  %11478 = vmatprep.subr.bf16.mxu1 %v12592_v33 }
0x2723   :  { %4851 = vadd.xlane.f32.xlu1 %v4834_v6 }
0x2724   :  { %11950 = vmatpush3.bf16.msra.mxu0 %v14432_v3  ;;  %5318 = vmatmul.mubr.bf16.vlgmr.msra.gmra.mrb[60].mxu1 %v14432_v3 }
0x2725   :  { %4881 = vadd.xlane.f32.xlu0 %v4871_v56  ;;  %11951 = vmatprep.subr.bf16.mxu0 %v13077_v12 }
0x2726   :  { %5327 = vmatprep.mubr.bf16.mxu1 %v13073_v39  ;;  %11479 = vmatpush3.bf16.msra.mxu1 %v12592_v33 }
0x2727   :  { %4883 = vadd.xlane.f32.xlu1 %v4872_v58  ;;  %11480 = vmatprep.subr.bf16.mxu1 %v12593_v36 }
0x272a   :  { %11481 = vmatpush3.bf16.msra.mxu1 %v12593_v36 }
0x272b   :  { %11482 = vmatprep.subr.bf16.mxu1 %v12594_v49 }
0x272e   :  { %11483 = vmatpush3.bf16.msra.mxu1 %v12594_v49 }
0x272f   :  { %11484 = vmatprep.subr.bf16.mxu1 %v12595_v37 }
0x2732   :  { %11485 = vmatpush3.bf16.msra.mxu1 %v12595_v37 }
0x2733   :  { %11486 = vmatprep.subr.bf16.mxu1 %v12596_v5 }
0x2736   :  { %11487 = vmatpush3.bf16.msra.mxu1 %v12596_v5 }
0x2737   :  { %11488 = vmatprep.subr.bf16.mxu1 %v12597_v63 }
0x273a   :  { %11489 = vmatpush3.bf16.msra.mxu1 %v12597_v63 }
0x273b   :  { %11490 = vmatprep.subr.bf16.mxu1 %v12598_v61 }
0x273e   :  { %11491 = vmatpush3.bf16.msra.mxu1 %v12598_v61 }
0x273f   :  { %11492 = vmatprep.subr.bf16.mxu1 %v12599_v1 }
0x2742   :  { %11493 = vmatpush3.bf16.msra.mxu1 %v12599_v1 }
0x27a6   :  { %v4846_v35 = vpop.xlane.xlu0 %4845 }
0x27a7   :  { %v4857_v48 = vmul.f32 0.0078125, %v4846_v35 }
0x27a8   :  { %v4848_v57 = vpop.xlane.xlu1 %4847 }
0x27a9   :  { %v14467_v45 = vsub.f32 %v14393_v50, %v4857_v48  ;;  %v4858_v31 = vmul.f32 0.0078125, %v4848_v57 }
0x27ab   :  { %v14470_v29 = vsub.f32 %v14397_v55, %v4858_v31  ;;  %v4873_v28 = vmul.f32 %v14467_v45, %v14467_v45 }
0x27ad   :  { %4885 = vadd.xlane.f32.xlu0 %v4873_v28  ;;  %v4874_v34 = vmul.f32 %v14470_v29, %v14470_v29 }
0x27ae   :  { %v4850_v40 = vpop.xlane.xlu0 %4849 }
0x27af   :  { %v4859_v7 = vmul.f32 0.0078125, %v4850_v40  ;;  %4887 = vadd.xlane.f32.xlu1 %v4874_v34 }
0x27b0   :  { %v4852_v10 = vpop.xlane.xlu1 %4851 }
0x27b1   :  { %v14476_v38 = vsub.f32 %v4833_v53, %v4859_v7  ;;  %v4860_v14 = vmul.f32 0.0078125, %v4852_v10  ;;  %v14507_v53 = vld [vmem:[%s15735_s7 + $0x3] sm:$0x7] }
0x27b2   :  { %v4882_v50 = vpop.xlane.xlu0 %4881  ;;  %v14515_v56 = vrot.slane %v14507_v53, %v13413_v4 }
0x27b3   :  { %v14478_v18 = vsub.f32 %v4834_v6, %v4860_v14  ;;  %v4895_v27 = vmul.f32 0.0078125, %v4882_v50  ;;  %v4875_v55 = vmul.f32 %v14476_v38, %v14476_v38 }
0x27b4   :  { %v4884_v0 = vpop.xlane.xlu1 %4883 }
0x27b5   :  { %v4903_v41 = vadd.f32 1e-12, %v4895_v27  ;;  %v4896_v8 = vmul.f32 0.0078125, %v4884_v0  ;;  %4889 = vadd.xlane.f32.xlu0 %v4875_v55  ;;  %v4876_v24 = vmul.f32 %v14478_v18, %v14478_v18 }
0x27b7   :  { %12844 = vrsqrt.f32 %v4903_v41  ;;  %v4904_v62 = vadd.f32 1e-12, %v4896_v8  ;;  %4891 = vadd.xlane.f32.xlu1 %v4876_v24 }
0x27b9   :  { %12846 = vrsqrt.f32 %v4904_v62 }
0x27c1   :  { %v12845_v60 = vpop.eup %12844 }
0x27c2   :  { %v4919_v52 = vmul.f32 %v12845_v60, %v14416_v42  ;;  %v13079_v42 = vmov 0.0  }
0x27c3   :  { %v12847_v20 = vpop.eup %12846  ;;  %11456 = vmatprep.mubr.msk.f32.mxu0 %vm13078_vm6, %v13079_v42 }
0x27c4   :  { %v4920_v16 = vmul.f32 %v12847_v20, %v14427_v22  ;;  %v4933_v23 = vmul.f32 %v14402_v19, %v4919_v52  ;;  %v14511_v22 = vrot.slane %v14507_v53, %v13407_v2 }
0x27c6   :  { %v4934_v11 = vmul.f32 %v14402_v19, %v4920_v16  ;;  %v14489_v44 = vadd.f32 %v14412_v47, %v4933_v23 }
0x27c8   :  { %v14492_v26 = vadd.f32 %v14412_v47, %v4934_v11 }
0x27ca   :  { %v14496_v13 = vpack.c.bf16 %v14492_v26, %v14489_v44 }
0x27cc   :  { %11953 = vmatpush3.bf16.msra.mxu0 %v14496_v13  ;;  %5328 = vmatmul.mubr.bf16.gmra.mrb[64].mxu1 %v14496_v13 }
0x27cd   :  { %11954 = vmatprep.subr.bf16.mxu0 %v13077_v12  ;;  %5337 = vmatprep.mubr.bf16.mxu1 %v13073_v39 }
0x27f7   :  { %v5319_v6 = vpop.f32.mrb[60].mxu1 }
0x27f8   :  { %v14518_v58 = vadd.f32 %v5319_v6, %v14511_v22  ;;  %v5321_v33 = vpop.f32.mrb[61].mxu1 }
0x27f9   :  { %v5323_v36 = vpop.f32.mrb[62].mxu1  ;;  %v5322_v37 = vadd.f32 %v5321_v33, %v14515_v56 }
0x27fa   :  { %v5325_v49 = vpop.f32.mrb[63].mxu1  ;;  %5653 = vrot.lane.b32.xlu1 %v14518_v58, %s13074_s21  ;;  %v14525_v63 = vadd.f32 %v5323_v36, %v14511_v22 }
0x27fb   :  { %v5326_v5 = vadd.f32 %v5325_v49, %v14515_v56 }
0x27fd   :  { %v11972_v61 = vpack.c.bf16 %v5326_v5, %v5322_v37  ;;  %v14527_v1 = vpack.i.bf16 %v5326_v5, %v5322_v37 }
0x27fe   :  { %5655 = vrot.lane.b32.xlu1 %v14525_v63, %s13074_s21 }
0x27ff   :  { %11974 = vmatprep.subr.msk.bf16.mxu1 %vm13430_vm1, %v11972_v61  ;;  %12369 = vrot.lane.b32.xlu0 %v14527_v1, %s13074_s21 }
0x283a   :  { %v4886_v35 = vpop.xlane.xlu0 %4885 }
0x283b   :  { %v4897_v48 = vmul.f32 0.0078125, %v4886_v35 }
0x283c   :  { %v4888_v57 = vpop.xlane.xlu1 %4887 }
0x283d   :  { %v4905_v31 = vadd.f32 1e-12, %v4897_v48  ;;  %v4898_v28 = vmul.f32 0.0078125, %v4888_v57  ;;  %v195_v57 = vld [vmem:[%s15762_s25] sm:$0xf] }
0x283f   :  { %12848 = vrsqrt.f32 %v4905_v31  ;;  %v4906_v34 = vadd.f32 1e-12, %v4898_v28 }
0x2841   :  { %12850 = vrsqrt.f32 %v4906_v34 }
0x2842   :  { %v4890_v40 = vpop.xlane.xlu0 %4889 }
0x2843   :  { %v4899_v7 = vmul.f32 0.0078125, %v4890_v40 }
0x2844   :  { %v4892_v10 = vpop.xlane.xlu1 %4891 }
0x2845   :  { %v4907_v14 = vadd.f32 1e-12, %v4899_v7  ;;  %v4900_v50 = vmul.f32 0.0078125, %v4892_v10 }
0x2847   :  { %12852 = vrsqrt.f32 %v4907_v14  ;;  %v4908_v27 = vadd.f32 1e-12, %v4900_v50 }
0x2849   :  { %v12849_v55 = vpop.eup %12848  ;;  %12854 = vrsqrt.f32 %v4908_v27 }
0x284a   :  { %v4921_v0 = vmul.f32 %v12849_v55, %v14467_v45 }
0x284b   :  { %v12851_v41 = vpop.eup %12850 }
0x284c   :  { %v4922_v8 = vmul.f32 %v12851_v41, %v14470_v29  ;;  %v4935_v24 = vmul.f32 %v14402_v19, %v4921_v0 }
0x284e   :  { %v4936_v62 = vmul.f32 %v14402_v19, %v4922_v8  ;;  %v14540_v60 = vadd.f32 %v14412_v47, %v4935_v24 }
0x2850   :  { %v14543_v52 = vadd.f32 %v14412_v47, %v4936_v62  ;;  %v5153_v62 = vrot.slane %v14507_v53, %v13456_v32 }
0x2851   :  { %v12853_v20 = vpop.eup %12852 }
0x2852   :  { %v11955_v16 = vpack.c.bf16 %v14543_v52, %v14540_v60  ;;  %v4923_v23 = vmul.f32 %v12853_v20, %v14476_v38 }
0x2853   :  { %v12855_v45 = vpop.eup %12854 }
0x2854   :  { %11956 = vmatpush3.bf16.msra.mxu0 %v11955_v16  ;;  %5338 = vmatmul.mubr.bf16.gmra.mrb[68].mxu1 %v11955_v16  ;;  %v4924_v29 = vmul.f32 %v12855_v45, %v14478_v18  ;;  %v4937_v11 = vmul.f32 %v14402_v19, %v4923_v23  ;;  %v10401_v18 = vld [vmem:[%s15762_s25 + $0x4] sm:$0xf] }
0x2855   :  { %11957 = vmatprep.subr.bf16.mxu0 %v13077_v12  ;;  %5347 = vmatprep.mubr.bf16.mxu1 %v13073_v39 }
0x2856   :  { %v4938_v6 = vmul.f32 %v14402_v19, %v4924_v29  ;;  %v14554_v33 = vadd.f32 %v14412_v47, %v4937_v11 }
0x2858   :  { %v14557_v36 = vadd.f32 %v14412_v47, %v4938_v6 }
0x285a   :  { %v11958_v38 = vpack.c.bf16 %v14557_v36, %v14554_v33 }
0x285c   :  { %11959 = vmatpush3.bf16.msra.mxu0 %v11958_v38  ;;  %5348 = vmatmul.mubr.bf16.gmra.mrb[72].mxu1 %v11958_v38 }
0x285d   :  { %11494 = vmatprep.mubr.bf16.mxu1 %v14432_v3  ;;  %11960 = vmatprep.subr.bf16.mxu0 %v13077_v12 }
0x285f   :  { %11457 = vmatmul.mubr.msk.f32.vlgmr.msra.gmra.mrb[54].mxu0 %vm4955_vm7, %v10401_v18 }
0x2860   :  { %11962 = vmatpush3.bf16.msra.mxu0 %v13325_v9  ;;  %11475 = vmatprep.mubr.msk.f32.mxu0 %vm13078_vm6, %v13079_v42 }
0x2861   :  { %11963 = vmatprep.subr.bf16.mxu0 %v13077_v12 }
0x2864   :  { %11965 = vmatpush3.bf16.msra.mxu0 %v13368_v54  ;;  %11495 = vmatmul.mubr.bf16.vlgmr.msra.gmra.mrb[76].mxu1 %v14496_v13 }
0x2865   :  { %11977 = vmatpush3.bf16.xpose.msk.msra.mxu1 %vm13430_vm1, %v11972_v61  ;;  %11498 = vmatprep.mubr.bf16.mxu1 %v11955_v16 }
0x2866   :  { %11966 = vmatprep.subr.bf16.mxu0 %v13077_v12 }
0x2868   :  { %11968 = vmatpush3.bf16.msra.mxu0 %v13383_v59 }
0x2869   :  { %11969 = vmatprep.subr.bf16.mxu0 %v13077_v12 }
0x286c   :  { %11971 = vmatpush3.bf16.msra.mxu0 %v13397_v43  ;;  %11499 = vmatmul.mubr.bf16.gmra.mrb[80].mxu1 %v11958_v38  ;;  %v5654_v47 = vpop.permute.xlu1 %5653 }
0x286d   :  { %11506 = vmatprep.mubr.msk.f32.mxu1 %vm549_vm0, %v14518_v58 }
0x286f   :  { %11476 = vmatmul.mubr.msk.f32.vlgmr.msra.gmra.mrb[54].mxu0 %vm4955_vm7, %v195_v57 }
0x2870   :  { %v5656_v59 = vpop.permute.xlu1 %5655 }
0x2871   :  { %v12370_v9 = vpop.permute.xlu0 %12369 }
0x2872   :  { %v12372_v54 = vunpack.i.h.bf16 %v12370_v9  ;;  %v12371_v19 = vunpack.i.l.bf16 %v12370_v9 }
0x2874   :  { %v11982_v3 = vpack.c.bf16 %v12372_v54, %v12371_v19  ;;  %11507 = vmatmul.mubr.msk.f32.vlgmr.msra.gmra.mrb[34].mxu1 %vm549_vm0, %v14525_v63 }
0x2875   :  { %11520 = vmatprep.mubr.msk.f32.mxu1 %vm549_vm0, %v5654_v47 }
0x2876   :  { %11984 = vmatprep.subr.msk.bf16.mxu1 %vm13430_vm1, %v11982_v3 }
0x2877   :  { %11987 = vmatpush3.bf16.xpose.msk.msra.mxu1 %vm13430_vm1, %v11982_v3 }
0x287e   :  { %11521 = vmatmul.mubr.msk.f32.vlgmr.msra.gmra.mrb[84].mxu1 %vm549_vm0, %v5656_v59 }
0x289f   :  { %v14589_v43 = vpop.f32.mrb[64].mxu1 }
0x28a0   :  { %v5331_v13 = vpop.f32.mrb[65].mxu1 }
0x28a1   :  { %v14591_v49 = vpop.f32.mrb[66].mxu1  ;;  %v5332_v5 = vadd.f32 %v5331_v13, %v14515_v56 }
0x28a2   :  { %v5335_v37 = vpop.f32.mrb[67].mxu1 }
0x28a3   :  { %v5336_v61 = vadd.f32 %v5335_v37, %v14515_v56 }
0x28a5   :  { %v14595_v35 = vpack.i.bf16 %v5336_v61, %v5332_v5  ;;  %v14597_v48 = vpack.c.bf16 %v5336_v61, %v5332_v5 }
0x2927   :  { %v14603_v31 = vpop.f32.mrb[68].mxu1 }
0x2928   :  { %v5341_v28 = vpop.f32.mrb[69].mxu1 }
0x2929   :  { %v14605_v34 = vpop.f32.mrb[70].mxu1  ;;  %v5342_v7 = vadd.f32 %v5341_v28, %v14515_v56 }
0x292a   :  { %v5345_v40 = vpop.f32.mrb[71].mxu1 }
0x292b   :  { %v5346_v10 = vadd.f32 %v5345_v40, %v14515_v56 }
0x292d   :  { %v14609_v14 = vpack.i.bf16 %v5346_v10, %v5342_v7  ;;  %v14611_v50 = vpack.c.bf16 %v5346_v10, %v5342_v7 }
0x292f   :  { %v14613_v27 = vpop.f32.mrb[72].mxu1 }
0x2930   :  { %v5351_v55 = vpop.f32.mrb[73].mxu1 }
0x2931   :  { %v14615_v0 = vpop.f32.mrb[74].mxu1  ;;  %v5352_v8 = vadd.f32 %v5351_v55, %v14515_v56 }
0x2932   :  { %v5355_v41 = vpop.f32.mrb[75].mxu1 }
0x2933   :  { %v5356_v24 = vadd.f32 %v5355_v41, %v14515_v56 }
0x2935   :  { %v14621_v20 = vpack.i.bf16 %v5356_v24, %v5352_v8  ;;  %v14623_v16 = vpack.c.bf16 %v5356_v24, %v5352_v8 }
0x2937   :  { %v11496_v23 = vpop.f32.mrb[76].mxu1 }
0x2938   :  { %v5401_v45 = vadd.f32 %v11496_v23, %v5153_v62  ;;  %v5392_v29 = vpop.f32.mrb[77].mxu1 }
0x2939   :  { %v11497_v11 = vpop.f32.mrb[78].mxu1  ;;  %v5393_v18 = vadd.f32 %v5392_v29, %v5153_v62 }
0x293a   :  { %v5404_v6 = vadd.f32 %v11497_v11, %v5153_v62  ;;  %v5395_v38 = vpop.f32.mrb[79].mxu1 }
0x293b   :  { %v5396_v9 = vadd.f32 %v5395_v38, %v5153_v62 }
0x293c   :  { %v14625_v54 = vpack.c.bf16 %v5404_v6, %v5401_v45  ;;  %v14627_v19 = vpack.i.bf16 %v5404_v6, %v5401_v45 }
0x293d   :  { %v11978_v56 = vpack.c.bf16 %v5396_v9, %v5393_v18  ;;  %v14629_v47 = vpack.i.bf16 %v5396_v9, %v5393_v18 }
0x293f   :  { %v11500_v32 = vpop.f32.mrb[80].mxu1  ;;  %11979 = vmatprep.subr.bf16.mxu0 %v11978_v56 }
0x2940   :  { %v5417_v53 = vadd.f32 %v11500_v32, %v5153_v62  ;;  %v5408_v3 = vpop.f32.mrb[81].mxu1  ;;  %11981 = vmatpush3.bf16.msra.mxu0 %v11978_v56 }
0x2941   :  { %v5409_v59 = vadd.f32 %v5408_v3, %v5153_v62  ;;  %v11501_v13 = vpop.f32.mrb[82].mxu1 }
0x2942   :  { %v5420_v37 = vadd.f32 %v11501_v13, %v5153_v62  ;;  %v5411_v5 = vpop.f32.mrb[83].mxu1 }
0x2943   :  { %v5412_v61 = vadd.f32 %v5411_v5, %v5153_v62 }
0x2944   :  { %v14631_v57 = vpack.c.bf16 %v5420_v37, %v5417_v53  ;;  %v14633_v28 = vpack.i.bf16 %v5420_v37, %v5417_v53 }
0x2945   :  { %v14635_v40 = vpack.c.bf16 %v5412_v61, %v5409_v59  ;;  %v14637_v7 = vpack.i.bf16 %v5412_v61, %v5409_v59 }
0x2947   :  { %v11508_v10 = vpop.f32.mrb[34].mxu1 }
0x2948   :  { %v5537_v55 = vadd.f32 %v11508_v10, %v13480_v15  ;;  %v5531_v41 = vpop.f32.mrb[35].mxu1 }
0x2949   :  { %v5532_v8 = vadd.f32 %v5531_v41, %v13480_v15 }
0x294a   :  { %v5543_v24 = vsel %vm637_vm2, %v5537_v55, -inf }
0x294b   :  { %5544 = vmax.xlane.f32.xlu0 %v5543_v24  ;;  %v5540_v23 = vsel %vm637_vm2, %v5532_v8, -inf }
0x294c   :  { %5541 = vmax.xlane.f32.xlu1 %v5540_v23 }
0x2951   :  { %v11522_v62 = vpop.f32.mrb[84].mxu1 }
0x2952   :  { %v5737_v45 = vpop.f32.mrb[85].mxu1  ;;  %v5743_v11 = vadd.f32 %v11522_v62, %v13480_v15 }
0x2953   :  { %v5738_v29 = vadd.f32 %v5737_v45, %v13480_v15 }
0x2954   :  { %v5749_v38 = vsel %vm637_vm2, %v5743_v11, -inf }
0x2955   :  { %v5746_v6 = vsel %vm637_vm2, %v5738_v29, -inf }
0x2956   :  { %5747 = vmax.xlane.f32.xlu0 %v5746_v6 }
0x295a   :  { %5750 = vmax.xlane.f32.xlu0 %v5749_v38 }
0x295d   :  { %12374 = vrot.lane.b32.xlu1 %v14629_v47, %s13074_s21 }
0x29d8   :  { %v5545_v18 = vpop.xlane.xlu0 %5544 }
0x29d9   :  { %v5547_v9 = vsub.f32 %v5537_v55, %v5545_v18  ;;  %v5542_v56 = vpop.xlane.xlu1 %5541 }
0x29da   :  { %v5546_v32 = vsub.f32 %v5532_v8, %v5542_v56 }
0x29db   :  { %v5550_v53 = vmul.f32 1.442695, %v5547_v9 }
0x29dc   :  { %v5548_v3 = vmul.f32 1.442695, %v5546_v32 }
0x29dd   :  { %12856 = vpow2.f32 %v5550_v53  ;;  %v12375_v59 = vpop.permute.xlu1 %12374 }
0x29de   :  { %12858 = vpow2.f32 %v5548_v3  ;;  %v12377_v13 = vunpack.i.h.bf16 %v12375_v59  ;;  %v12376_v37 = vunpack.i.l.bf16 %v12375_v59 }
0x29e0   :  { %v11988_v5 = vpack.c.bf16 %v12377_v13, %v12376_v37 }
0x29e2   :  { %11989 = vmatprep.subr.bf16.mxu0 %v11988_v5 }
0x29e3   :  { %v5748_v61 = vpop.xlane.xlu0 %5747 }
0x29e4   :  { %v5752_v38 = vsub.f32 %v5738_v29, %v5748_v61 }
0x29e6   :  { %v5754_v18 = vmul.f32 1.442695, %v5752_v38 }
0x29e7   :  { %v12857_v10 = vpop.eup %12856  ;;  %v5751_v41 = vpop.xlane.xlu0 %5750 }
0x29e8   :  { %v12859_v24 = vpop.eup %12858  ;;  %v5753_v23 = vsub.f32 %v5743_v11, %v5751_v41  ;;  %v5555_v62 = vsel %vm637_vm2, %v12857_v10, 0.0 }
0x29e9   :  { %5556 = vadd.xlane.f32.xlu0 %v5555_v62  ;;  %v5552_v55 = vsel %vm637_vm2, %v12859_v24, 0.0 }
0x29ea   :  { %v5756_v8 = vmul.f32 1.442695, %v5753_v23  ;;  %5553 = vadd.xlane.f32.xlu1 %v5552_v55 }
0x29ec   :  { %12860 = vpow2.f32 %v5756_v8 }
0x29ed   :  { %12862 = vpow2.f32 %v5754_v18 }
0x29f6   :  { %v12861_v45 = vpop.eup %12860 }
0x29f7   :  { %v5761_v6 = vsel %vm637_vm2, %v12861_v45, 0.0  ;;  %v12863_v11 = vpop.eup %12862 }
0x29f8   :  { %5762 = vadd.xlane.f32.xlu0 %v5761_v6  ;;  %v5758_v9 = vsel %vm637_vm2, %v12863_v11, 0.0 }
0x29fb   :  { %5875 = vrot.lane.b32.xlu1 %v14518_v58, %s13075_s1 }
0x2a0e   :  { %12379 = vrot.lane.b32.xlu0 %v14527_v1, %s13075_s1 }
0x2a1f   :  { %5759 = vadd.xlane.f32.xlu1 %v5758_v9 }
0x2a30   :  { %5877 = vrot.lane.b32.xlu1 %v14525_v63, %s13075_s1 }
0x2a76   :  { %v5557_v56 = vpop.xlane.xlu0 %5556 }
0x2a77   :  { %12864 = vrcp.f32 %v5557_v56  ;;  %v5554_v32 = vpop.xlane.xlu1 %5553 }
0x2a78   :  { %12866 = vrcp.f32 %v5554_v32 }
0x2a7b   :  { %v5876_v62 = vpop.permute.xlu1 %5875 }
0x2a81   :  { %v12865_v53 = vpop.eup %12864 }
0x2a82   :  { %v12867_v3 = vpop.eup %12866  ;;  %v5561_v29 = vmul.f32 %v12865_v53, %v12857_v10 }
0x2a83   :  { %v5559_v59 = vmul.f32 %v12867_v3, %v12859_v24 }
0x2a85   :  { %v5763_v13 = vpop.xlane.xlu0 %5762  ;;  %11513 = vmatprep.mubr.msk.f32.mxu0 %vm637_vm2, %v5559_v59 }
0x2a86   :  { %11514 = vmatmul.mubr.msk.f32.vlgmr.msra.gmra.mrb[72].mxu0 %vm637_vm2, %v5561_v29  ;;  %12868 = vrcp.f32 %v5763_v13 }
0x2a87   :  { %11991 = vmatpush3.bf16.msra.mxu0 %v11988_v5 }
0x2a89   :  { %v12380_v37 = vpop.permute.xlu0 %12379 }
0x2a8a   :  { %v12382_v61 = vunpack.i.h.bf16 %v12380_v37  ;;  %v12381_v41 = vunpack.i.l.bf16 %v12380_v37 }
0x2a8c   :  { %v11992_v23 = vpack.c.bf16 %v12382_v61, %v12381_v41 }
0x2a8e   :  { %11994 = vmatprep.subr.msk.bf16.mxu0 %vm13430_vm1, %v11992_v23 }
0x2a90   :  { %v12869_v8 = vpop.eup %12868 }
0x2a91   :  { %v5767_v6 = vmul.f32 %v12869_v8, %v12861_v45 }
0x2aac   :  { %v5760_v55 = vpop.xlane.xlu1 %5759 }
0x2aad   :  { %12870 = vrcp.f32 %v5760_v55 }
0x2ab0   :  { %v5878_v5 = vpop.permute.xlu1 %5877 }
0x2ab7   :  { %v12871_v24 = vpop.eup %12870 }
0x2ab8   :  { %v5765_v10 = vmul.f32 %v12871_v24, %v12863_v11 }
0x2aba   :  { %11527 = vmatprep.mubr.msk.f32.mxu0 %vm637_vm2, %v5765_v10 }
0x2abb   :  { %11528 = vmatmul.mubr.msk.f32.vlgmr.msra.gmra.mrb[74].mxu0 %vm637_vm2, %v5767_v6 }
0x2abc   :  { %11997 = vmatpush3.bf16.xpose.msk.msra.mxu0 %vm13430_vm1, %v11992_v23  ;;  %11534 = vmatprep.mubr.msk.f32.mxu0 %vm549_vm0, %v5876_v62 }
0x2ac3   :  { %11535 = vmatmul.mubr.msk.f32.vlgmr.msra.gmra.mrb[76].mxu0 %vm549_vm0, %v5878_v5 }
0x2b59   :  { %v11515_v38 = vpop.f32.mrb[72].mxu0 }
0x2b5a   :  { %5644 = vst.msk [vmem:[#allocation3 + $0x8] sm:$0xff] %vm549_vm0, %v11515_v38  ;;  %v5634_v18 = vpop.f32.mrb[73].mxu0 }
0x2b5b   :  { %5643 = vst.msk [vmem:[#allocation3] sm:$0xff] %vm549_vm0, %v5634_v18 }
0x2b8e   :  { %v14671_v11 = vpop.f32.mrb[74].mxu0 }
0x2b8f   :  { %v14673_v45 = vpop.f32.mrb[75].mxu0 }
0x2b96   :  { %v11536_v9 = vpop.f32.mrb[76].mxu0 }
0x2b97   :  { %v5965_v56 = vadd.f32 %v11536_v9, %v13480_v15  ;;  %v5959_v32 = vpop.f32.mrb[77].mxu0 }
0x2b98   :  { %v5960_v53 = vadd.f32 %v5959_v32, %v13480_v15 }
0x2b99   :  { %v5971_v3 = vsel %vm637_vm2, %v5965_v56, -inf }
0x2b9a   :  { %5972 = vmax.xlane.f32.xlu0 %v5971_v3  ;;  %v5968_v59 = vsel %vm637_vm2, %v5960_v53, -inf }
0x2b9b   :  { %5969 = vmax.xlane.f32.xlu1 %v5968_v59 }
0x2bac   :  { %12384 = vrot.lane.b32.xlu1 %v14629_v47, %s13075_s1 }
0x2bb0   :  { %6097 = vrot.lane.b32.xlu1 %v14518_v58, %s13076_s22 }
0x2bb4   :  { %6099 = vrot.lane.b32.xlu1 %v14525_v63, %s13076_s22 }
0x2c27   :  { %v5973_v29 = vpop.xlane.xlu0 %5972 }
0x2c28   :  { %v5975_v13 = vsub.f32 %v5965_v56, %v5973_v29  ;;  %v5970_v37 = vpop.xlane.xlu1 %5969 }
0x2c29   :  { %v5974_v61 = vsub.f32 %v5960_v53, %v5970_v37 }
0x2c2a   :  { %v5978_v41 = vmul.f32 1.442695, %v5975_v13 }
0x2c2b   :  { %v5976_v23 = vmul.f32 1.442695, %v5974_v61 }
0x2c2c   :  { %12872 = vpow2.f32 %v5978_v41  ;;  %v12385_v62 = vpop.permute.xlu1 %12384 }
0x2c2d   :  { %v12387_v55 = vunpack.i.h.bf16 %v12385_v62  ;;  %v12386_v8 = vunpack.i.l.bf16 %v12385_v62  ;;  %12874 = vpow2.f32 %v5976_v23 }
0x2c2f   :  { %v11998_v24 = vpack.c.bf16 %v12387_v55, %v12386_v8 }
0x2c30   :  { %v6098_v13 = vpop.permute.xlu1 %6097 }
0x2c31   :  { %11999 = vmatprep.subr.bf16.mxu1 %v11998_v24 }
0x2c32   :  { %12001 = vmatpush3.bf16.msra.mxu1 %v11998_v24 }
0x2c36   :  { %v12873_v10 = vpop.eup %12872 }
0x2c37   :  { %v5983_v58 = vsel %vm637_vm2, %v12873_v10, 0.0  ;;  %v12875_v6 = vpop.eup %12874 }
0x2c38   :  { %5984 = vadd.xlane.f32.xlu0 %v5983_v58  ;;  %v5980_v63 = vsel %vm637_vm2, %v12875_v6, 0.0 }
0x2c3c   :  { %5981 = vadd.xlane.f32.xlu0 %v5980_v63 }
0x2c52   :  { %12389 = vrot.lane.b32.xlu0 %v14527_v1, %s13076_s22  ;;  %v6100_v1 = vpop.permute.xlu1 %6099 }
0x2cc5   :  { %v5985_v5 = vpop.xlane.xlu0 %5984 }
0x2cc6   :  { %12876 = vrcp.f32 %v5985_v5 }
0x2cc9   :  { %v5982_v38 = vpop.xlane.xlu0 %5981 }
0x2cca   :  { %12878 = vrcp.f32 %v5982_v38 }
0x2ccd   :  { %v12390_v18 = vpop.permute.xlu0 %12389 }
0x2cce   :  { %v12392_v9 = vunpack.i.h.bf16 %v12390_v18  ;;  %v12391_v56 = vunpack.i.l.bf16 %v12390_v18 }
0x2cd0   :  { %v12002_v32 = vpack.c.bf16 %v12392_v9, %v12391_v56  ;;  %v12877_v53 = vpop.eup %12876 }
0x2cd1   :  { %v5989_v29 = vmul.f32 %v12877_v53, %v12873_v10 }
0x2cd2   :  { %12004 = vmatprep.subr.msk.bf16.mxu1 %vm13430_vm1, %v12002_v32 }
0x2cd4   :  { %v12879_v3 = vpop.eup %12878 }
0x2cd5   :  { %v5987_v59 = vmul.f32 %v12879_v3, %v12875_v6 }
0x2cd7   :  { %11541 = vmatprep.mubr.msk.f32.mxu1 %vm637_vm2, %v5987_v59 }
0x2cd8   :  { %11542 = vmatmul.mubr.msk.f32.vlgmr.msra.gmra.mrb[86].mxu1 %vm637_vm2, %v5989_v29 }
0x2cd9   :  { %12007 = vmatpush3.bf16.xpose.msk.msra.mxu1 %vm13430_vm1, %v12002_v32  ;;  %11548 = vmatprep.mubr.msk.f32.mxu1 %vm549_vm0, %v6098_v13 }
0x2cda   :  { %12019 = vmatprep.subr.bf16.mxu1 %v14625_v54 }
0x2ce0   :  { %11549 = vmatmul.mubr.msk.f32.vlgmr.msra.gmra.mrb[88].mxu1 %vm549_vm0, %v6100_v1 }
0x2ce1   :  { %12021 = vmatpush3.bf16.msra.mxu1 %v14625_v54  ;;  %v14713_v54 = vadd.f32 %v14591_v49, %v14511_v22 }
0x2dab   :  { %v14699_v37 = vpop.f32.mrb[86].mxu1 }
0x2dac   :  { %v14701_v61 = vpop.f32.mrb[87].mxu1 }
0x2db3   :  { %v11550_v41 = vpop.f32.mrb[88].mxu1 }
0x2db4   :  { %v6187_v23 = vadd.f32 %v11550_v41, %v13480_v15  ;;  %v6181_v62 = vpop.f32.mrb[89].mxu1 }
0x2db5   :  { %v6182_v55 = vadd.f32 %v6181_v62, %v13480_v15 }
0x2db6   :  { %v6193_v8 = vsel %vm637_vm2, %v6187_v23, -inf }
0x2db7   :  { %6194 = vmax.xlane.f32.xlu0 %v6193_v8  ;;  %v6190_v24 = vsel %vm637_vm2, %v6182_v55, -inf }
0x2db8   :  { %6191 = vmax.xlane.f32.xlu1 %v6190_v24  ;;  %v14727_v24 = vadd.f32 %v14589_v43, %v14511_v22 }
0x2dc9   :  { %12394 = vrot.lane.b32.xlu1 %v14629_v47, %s13076_s22 }
0x2dcd   :  { %12399 = vrot.lane.b32.xlu1 %v14595_v35, %s13074_s21 }
0x2dd1   :  { %6519 = vrot.lane.b32.xlu1 %v14713_v54, %s13074_s21 }
0x2e44   :  { %v6195_v15 = vpop.xlane.xlu0 %6194 }
0x2e45   :  { %v6197_v10 = vsub.f32 %v6187_v23, %v6195_v15  ;;  %v6192_v58 = vpop.xlane.xlu1 %6191 }
0x2e46   :  { %v6196_v6 = vsub.f32 %v6182_v55, %v6192_v58 }
0x2e47   :  { %v6200_v63 = vmul.f32 1.442695, %v6197_v10 }
0x2e48   :  { %v6198_v5 = vmul.f32 1.442695, %v6196_v6 }
0x2e49   :  { %v12395_v38 = vpop.permute.xlu1 %12394 }
0x2e4a   :  { %12880 = vpow2.f32 %v6198_v5  ;;  %v12397_v18 = vunpack.i.h.bf16 %v12395_v38  ;;  %v12396_v47 = vunpack.i.l.bf16 %v12395_v38 }
0x2e4b   :  { %12882 = vpow2.f32 %v6200_v63 }
0x2e4c   :  { %v12008_v9 = vpack.c.bf16 %v12397_v18, %v12396_v47 }
0x2e4d   :  { %v12400_v56 = vpop.permute.xlu1 %12399 }
0x2e4e   :  { %v12402_v32 = vunpack.i.h.bf16 %v12400_v56  ;;  %v12401_v53 = vunpack.i.l.bf16 %v12400_v56  ;;  %12009 = vmatprep.subr.bf16.mxu0 %v12008_v9 }
0x2e4f   :  { %12011 = vmatpush3.bf16.msra.mxu0 %v12008_v9 }
0x2e50   :  { %v12022_v49 = vpack.c.bf16 %v12402_v32, %v12401_v53  ;;  %12014 = vmatprep.subr.msk.bf16.mxu0 %vm13430_vm1, %v14597_v48 }
0x2e52   :  { %12024 = vmatprep.subr.msk.bf16.mxu1 %vm13430_vm1, %v12022_v49 }
0x2e54   :  { %v12881_v3 = vpop.eup %12880 }
0x2e55   :  { %v6202_v59 = vsel %vm637_vm2, %v12881_v3, 0.0  ;;  %v12883_v29 = vpop.eup %12882 }
0x2e56   :  { %6203 = vadd.xlane.f32.xlu0 %v6202_v59  ;;  %v6205_v13 = vsel %vm637_vm2, %v12883_v29, 0.0 }
0x2e5a   :  { %6206 = vadd.xlane.f32.xlu0 %v6205_v13 }
0x2ee3   :  { %v6204_v1 = vpop.xlane.xlu0 %6203 }
0x2ee4   :  { %12884 = vrcp.f32 %v6204_v1 }
0x2ee7   :  { %v6207_v41 = vpop.xlane.xlu0 %6206 }
0x2ee8   :  { %12886 = vrcp.f32 %v6207_v41 }
0x2eee   :  { %v12885_v23 = vpop.eup %12884 }
0x2eef   :  { %v6209_v62 = vmul.f32 %v12885_v23, %v12881_v3 }
0x2ef1   :  { %11555 = vmatprep.mubr.msk.f32.mxu0 %vm637_vm2, %v6209_v62 }
0x2ef2   :  { %v12887_v55 = vpop.eup %12886 }
0x2ef3   :  { %v6211_v8 = vmul.f32 %v12887_v55, %v12883_v29 }
0x2ef5   :  { %11556 = vmatmul.mubr.msk.f32.vlgmr.msra.gmra.mrb[78].mxu0 %vm637_vm2, %v6211_v8 }
0x2ef6   :  { %12017 = vmatpush3.bf16.xpose.msk.msra.mxu0 %vm13430_vm1, %v14597_v48  ;;  %11562 = vmatprep.mubr.msk.f32.mxu0 %vm549_vm0, %v14727_v24 }
0x2efd   :  { %11563 = vmatmul.mubr.msk.f32.vlgmr.msra.gmra.mrb[80].mxu0 %vm549_vm0, %v14713_v54 }
0x2fc8   :  { %v14737_v15 = vpop.f32.mrb[78].mxu0 }
0x2fc9   :  { %v14739_v10 = vpop.f32.mrb[79].mxu0 }
0x2fd0   :  { %v11564_v58 = vpop.f32.mrb[80].mxu0 }
0x2fd1   :  { %v6395_v6 = vpop.f32.mrb[81].mxu0  ;;  %v6401_v63 = vadd.f32 %v11564_v58, %v13618_v21  ;;  %v6520_v58 = vpop.permute.xlu1 %6519 }
0x2fd2   :  { %v6396_v43 = vadd.f32 %v6395_v6, %v13618_v21 }
0x2fd3   :  { %v6407_v48 = vsel %vm637_vm2, %v6401_v63, -inf }
0x2fd4   :  { %v6404_v5 = vsel %vm637_vm2, %v6396_v43, -inf }
0x2fd5   :  { %6405 = vmax.xlane.f32.xlu0 %v6404_v5 }
0x2fd9   :  { %6408 = vmax.xlane.f32.xlu0 %v6407_v48 }
0x3062   :  { %v6406_v38 = vpop.xlane.xlu0 %6405 }
0x3063   :  { %v6410_v18 = vsub.f32 %v6396_v43, %v6406_v38 }
0x3065   :  { %v6412_v47 = vmul.f32 1.442695, %v6410_v18 }
0x3066   :  { %v6409_v9 = vpop.xlane.xlu0 %6408 }
0x3067   :  { %12888 = vpow2.f32 %v6412_v47  ;;  %v6411_v56 = vsub.f32 %v6401_v63, %v6409_v9 }
0x3069   :  { %v6414_v32 = vmul.f32 1.442695, %v6411_v56 }
0x306b   :  { %12890 = vpow2.f32 %v6414_v32 }
0x3071   :  { %v12889_v53 = vpop.eup %12888 }
0x3072   :  { %v6416_v3 = vsel %vm637_vm2, %v12889_v53, 0.0 }
0x3073   :  { %6417 = vadd.xlane.f32.xlu0 %v6416_v3 }
0x3075   :  { %v12891_v59 = vpop.eup %12890 }
0x3076   :  { %v6419_v29 = vsel %vm637_vm2, %v12891_v59, 0.0 }
0x3077   :  { %6420 = vadd.xlane.f32.xlu0 %v6419_v29 }
0x308d   :  { %6517 = vrot.lane.b32.xlu0 %v14727_v24, %s13074_s21 }
0x3100   :  { %v6418_v13 = vpop.xlane.xlu0 %6417 }
0x3101   :  { %12892 = vrcp.f32 %v6418_v13 }
0x3104   :  { %v6421_v1 = vpop.xlane.xlu0 %6420 }
0x3105   :  { %12894 = vrcp.f32 %v6421_v1 }
0x3108   :  { %v6518_v8 = vpop.permute.xlu0 %6517 }
0x310b   :  { %v12893_v41 = vpop.eup %12892 }
0x310c   :  { %v6423_v23 = vmul.f32 %v12893_v41, %v12889_v53 }
0x310e   :  { %11569 = vmatprep.mubr.msk.f32.mxu1 %vm637_vm2, %v6423_v23 }
0x310f   :  { %v12895_v62 = vpop.eup %12894 }
0x3110   :  { %v6425_v55 = vmul.f32 %v12895_v62, %v12891_v59 }
0x3112   :  { %11570 = vmatmul.mubr.msk.f32.vlgmr.msra.gmra.mrb[90].mxu1 %vm637_vm2, %v6425_v55 }
0x3113   :  { %12027 = vmatpush3.bf16.xpose.msk.msra.mxu1 %vm13430_vm1, %v12022_v49  ;;  %11576 = vmatprep.mubr.msk.f32.mxu1 %vm549_vm0, %v6518_v8 }
0x311a   :  { %11577 = vmatmul.mubr.msk.f32.vlgmr.msra.gmra.mrb[92].mxu1 %vm549_vm0, %v6520_v58 }
0x31e5   :  { %v11571_v6 = vpop.f32.mrb[90].mxu1 }
0x31e6   :  { %6508 = vst.msk [vmem:[#allocation3 + $0x18] sm:$0xff] %vm549_vm0, %v11571_v6  ;;  %v6498_v43 = vpop.f32.mrb[91].mxu1 }
0x31e7   :  { %6507 = vst.msk [vmem:[#allocation3 + $0x10] sm:$0xff] %vm549_vm0, %v6498_v43 }
0x31ed   :  { %v11578_v63 = vpop.f32.mrb[92].mxu1 }
0x31ee   :  { %v6607_v5 = vadd.f32 %v11578_v63, %v13618_v21  ;;  %v6601_v48 = vpop.f32.mrb[93].mxu1 }
0x31ef   :  { %v6602_v38 = vadd.f32 %v6601_v48, %v13618_v21 }
0x31f0   :  { %v6613_v18 = vsel %vm637_vm2, %v6607_v5, -inf }
0x31f1   :  { %6614 = vmax.xlane.f32.xlu0 %v6613_v18  ;;  %v6610_v49 = vsel %vm637_vm2, %v6602_v38, -inf }
0x31f2   :  { %6611 = vmax.xlane.f32.xlu1 %v6610_v49 }
0x3203   :  { %12404 = vrot.lane.b32.xlu1 %v14627_v19, %s13074_s21 }
0x3207   :  { %12409 = vrot.lane.b32.xlu0 %v14595_v35, %s13075_s1  ;;  %6739 = vrot.lane.b32.xlu1 %v14727_v24, %s13075_s1 }
0x327e   :  { %v6615_v47 = vpop.xlane.xlu0 %6614 }
0x327f   :  { %v6617_v9 = vsub.f32 %v6607_v5, %v6615_v47  ;;  %v6612_v56 = vpop.xlane.xlu1 %6611 }
0x3280   :  { %v6616_v32 = vsub.f32 %v6602_v38, %v6612_v56 }
0x3281   :  { %v6620_v53 = vmul.f32 1.442695, %v6617_v9 }
0x3282   :  { %v6618_v3 = vmul.f32 1.442695, %v6616_v32  ;;  %v12410_v59 = vpop.permute.xlu0 %12409 }
0x3283   :  { %12896 = vpow2.f32 %v6620_v53  ;;  %v12405_v29 = vpop.permute.xlu1 %12404  ;;  %v12412_v13 = vunpack.i.h.bf16 %v12410_v59  ;;  %v12411_v1 = vunpack.i.l.bf16 %v12410_v59 }
0x3284   :  { %v12407_v41 = vunpack.i.h.bf16 %v12405_v29  ;;  %v12406_v23 = vunpack.i.l.bf16 %v12405_v29  ;;  %12898 = vpow2.f32 %v6618_v3 }
0x3285   :  { %v12032_v55 = vpack.c.bf16 %v12412_v13, %v12411_v1 }
0x3286   :  { %v12028_v62 = vpack.c.bf16 %v12407_v41, %v12406_v23 }
0x3287   :  { %v6740_v63 = vpop.permute.xlu1 %6739 }
0x3288   :  { %12029 = vmatprep.subr.bf16.mxu0 %v12028_v62 }
0x3289   :  { %12031 = vmatpush3.bf16.msra.mxu0 %v12028_v62 }
0x328a   :  { %12034 = vmatprep.subr.msk.bf16.mxu0 %vm13430_vm1, %v12032_v55 }
0x328d   :  { %v12897_v8 = vpop.eup %12896 }
0x328e   :  { %v6625_v58 = vsel %vm637_vm2, %v12897_v8, 0.0  ;;  %v12899_v6 = vpop.eup %12898 }
0x328f   :  { %6626 = vadd.xlane.f32.xlu1 %v6625_v58  ;;  %v6622_v43 = vsel %vm637_vm2, %v12899_v6, 0.0 }
0x3293   :  { %6623 = vadd.xlane.f32.xlu1 %v6622_v43 }
0x32a4   :  { %6741 = vrot.lane.b32.xlu1 %v14713_v54, %s13075_s1 }
0x331c   :  { %v6627_v5 = vpop.xlane.xlu1 %6626 }
0x331d   :  { %12900 = vrcp.f32 %v6627_v5 }
0x3320   :  { %v6624_v48 = vpop.xlane.xlu1 %6623 }
0x3321   :  { %12902 = vrcp.f32 %v6624_v48 }
0x3324   :  { %v6742_v9 = vpop.permute.xlu1 %6741 }
0x3327   :  { %v12901_v38 = vpop.eup %12900 }
0x3328   :  { %v6631_v47 = vmul.f32 %v12901_v38, %v12897_v8 }
0x332b   :  { %v12903_v18 = vpop.eup %12902 }
0x332c   :  { %v6629_v49 = vmul.f32 %v12903_v18, %v12899_v6 }
0x332e   :  { %11583 = vmatprep.mubr.msk.f32.mxu0 %vm637_vm2, %v6629_v49 }
0x332f   :  { %11584 = vmatmul.mubr.msk.f32.vlgmr.msra.gmra.mrb[82].mxu0 %vm637_vm2, %v6631_v47 }
0x3330   :  { %12037 = vmatpush3.bf16.xpose.msk.msra.mxu0 %vm13430_vm1, %v12032_v55  ;;  %11590 = vmatprep.mubr.msk.f32.mxu0 %vm549_vm0, %v6740_v63 }
0x3337   :  { %11591 = vmatmul.mubr.msk.f32.vlgmr.msra.gmra.mrb[84].mxu0 %vm549_vm0, %v6742_v9 }
0x3402   :  { %v14779_v56 = vpop.f32.mrb[82].mxu0 }
0x3403   :  { %v14781_v32 = vpop.f32.mrb[83].mxu0 }
0x340a   :  { %v11592_v53 = vpop.f32.mrb[84].mxu0 }
0x340b   :  { %v6829_v3 = vadd.f32 %v11592_v53, %v13618_v21  ;;  %v6823_v59 = vpop.f32.mrb[85].mxu0 }
0x340c   :  { %v6824_v29 = vadd.f32 %v6823_v59, %v13618_v21 }
0x340d   :  { %v6835_v13 = vsel %vm637_vm2, %v6829_v3, -inf }
0x340e   :  { %6836 = vmax.xlane.f32.xlu0 %v6835_v13  ;;  %v6832_v1 = vsel %vm637_vm2, %v6824_v29, -inf }
0x340f   :  { %6833 = vmax.xlane.f32.xlu1 %v6832_v1 }
0x3420   :  { %12414 = vrot.lane.b32.xlu1 %v14627_v19, %s13075_s1 }
0x3424   :  { %6961 = vrot.lane.b32.xlu1 %v14727_v24, %s13076_s22 }
0x3428   :  { %6963 = vrot.lane.b32.xlu1 %v14713_v54, %s13076_s22 }
0x349b   :  { %v6837_v41 = vpop.xlane.xlu0 %6836 }
0x349c   :  { %v6839_v23 = vsub.f32 %v6829_v3, %v6837_v41  ;;  %v6834_v62 = vpop.xlane.xlu1 %6833 }
0x349d   :  { %v6838_v55 = vsub.f32 %v6824_v29, %v6834_v62 }
0x349e   :  { %v6842_v8 = vmul.f32 1.442695, %v6839_v23 }
0x349f   :  { %v6840_v58 = vmul.f32 1.442695, %v6838_v55 }
0x34a0   :  { %12904 = vpow2.f32 %v6842_v8  ;;  %v12415_v6 = vpop.permute.xlu1 %12414 }
0x34a1   :  { %v12417_v43 = vunpack.i.h.bf16 %v12415_v6  ;;  %v12416_v63 = vunpack.i.l.bf16 %v12415_v6  ;;  %12906 = vpow2.f32 %v6840_v58 }
0x34a3   :  { %v12038_v5 = vpack.c.bf16 %v12417_v43, %v12416_v63 }
0x34a4   :  { %v6962_v41 = vpop.permute.xlu1 %6961 }
0x34a5   :  { %12039 = vmatprep.subr.bf16.mxu1 %v12038_v5 }
0x34a6   :  { %12041 = vmatpush3.bf16.msra.mxu1 %v12038_v5 }
0x34aa   :  { %v12905_v48 = vpop.eup %12904 }
0x34ab   :  { %v6847_v24 = vsel %vm637_vm2, %v12905_v48, 0.0  ;;  %v12907_v38 = vpop.eup %12906 }
0x34ac   :  { %6848 = vadd.xlane.f32.xlu0 %v6847_v24  ;;  %v6844_v54 = vsel %vm637_vm2, %v12907_v38, 0.0 }
0x34b0   :  { %6845 = vadd.xlane.f32.xlu0 %v6844_v54 }
0x34c6   :  { %12419 = vrot.lane.b32.xlu0 %v14595_v35, %s13076_s22  ;;  %v6964_v35 = vpop.permute.xlu1 %6963 }
0x3539   :  { %v6849_v18 = vpop.xlane.xlu0 %6848 }
0x353a   :  { %12908 = vrcp.f32 %v6849_v18 }
0x353d   :  { %v6846_v49 = vpop.xlane.xlu0 %6845 }
0x353e   :  { %12910 = vrcp.f32 %v6846_v49 }
0x3541   :  { %v12420_v47 = vpop.permute.xlu0 %12419 }
0x3542   :  { %v12422_v9 = vunpack.i.h.bf16 %v12420_v47  ;;  %v12421_v53 = vunpack.i.l.bf16 %v12420_v47 }
0x3544   :  { %v12042_v3 = vpack.c.bf16 %v12422_v9, %v12421_v53  ;;  %v12909_v59 = vpop.eup %12908 }
0x3545   :  { %v6853_v1 = vmul.f32 %v12909_v59, %v12905_v48 }
0x3546   :  { %12044 = vmatprep.subr.msk.bf16.mxu1 %vm13430_vm1, %v12042_v3 }
0x3548   :  { %v12911_v29 = vpop.eup %12910 }
0x3549   :  { %v6851_v13 = vmul.f32 %v12911_v29, %v12907_v38 }
0x354b   :  { %11597 = vmatprep.mubr.msk.f32.mxu1 %vm637_vm2, %v6851_v13 }
0x354c   :  { %11598 = vmatmul.mubr.msk.f32.vlgmr.msra.gmra.mrb[94].mxu1 %vm637_vm2, %v6853_v1 }
0x354d   :  { %12047 = vmatpush3.bf16.xpose.msk.msra.mxu1 %vm13430_vm1, %v12042_v3  ;;  %11604 = vmatprep.mubr.msk.f32.mxu1 %vm549_vm0, %v6962_v41 }
0x354e   :  { %12059 = vmatprep.subr.bf16.mxu1 %v14635_v40 }
0x3554   :  { %11605 = vmatmul.mubr.msk.f32.vlgmr.msra.gmra.mrb[96].mxu1 %vm549_vm0, %v6964_v35 }
0x3555   :  { %12061 = vmatpush3.bf16.msra.mxu1 %v14635_v40  ;;  %v14821_v40 = vadd.f32 %v14605_v34, %v14511_v22 }
0x361f   :  { %v14807_v23 = vpop.f32.mrb[94].mxu1 }
0x3620   :  { %v14809_v62 = vpop.f32.mrb[95].mxu1 }
0x3627   :  { %v11606_v55 = vpop.f32.mrb[96].mxu1 }
0x3628   :  { %v7051_v8 = vadd.f32 %v11606_v55, %v13618_v21  ;;  %v7045_v58 = vpop.f32.mrb[97].mxu1 }
0x3629   :  { %v7046_v6 = vadd.f32 %v7045_v58, %v13618_v21 }
0x362a   :  { %v7057_v43 = vsel %vm637_vm2, %v7051_v8, -inf }
0x362b   :  { %7058 = vmax.xlane.f32.xlu0 %v7057_v43  ;;  %v7054_v63 = vsel %vm637_vm2, %v7046_v6, -inf  ;;  %v14835_v43 = vadd.f32 %v14603_v31, %v14511_v22 }
0x362c   :  { %7055 = vmax.xlane.f32.xlu1 %v7054_v63 }
0x363d   :  { %12424 = vrot.lane.b32.xlu1 %v14627_v19, %s13076_s22 }
0x3641   :  { %12429 = vrot.lane.b32.xlu1 %v14609_v14, %s13074_s21 }
0x3645   :  { %7383 = vrot.lane.b32.xlu1 %v14821_v40, %s13074_s21 }
0x36b8   :  { %v7059_v21 = vpop.xlane.xlu0 %7058 }
0x36b9   :  { %v7061_v5 = vsub.f32 %v7051_v8, %v7059_v21  ;;  %v7056_v48 = vpop.xlane.xlu1 %7055 }
0x36ba   :  { %v7060_v24 = vsub.f32 %v7046_v6, %v7056_v48 }
0x36bb   :  { %v7064_v38 = vmul.f32 1.442695, %v7061_v5 }
0x36bc   :  { %v7062_v54 = vmul.f32 1.442695, %v7060_v24 }
0x36bd   :  { %v12425_v18 = vpop.permute.xlu1 %12424 }
0x36be   :  { %12912 = vpow2.f32 %v7062_v54  ;;  %v12427_v49 = vunpack.i.h.bf16 %v12425_v18  ;;  %v12426_v19 = vunpack.i.l.bf16 %v12425_v18 }
0x36bf   :  { %12914 = vpow2.f32 %v7064_v38 }
0x36c0   :  { %v12048_v47 = vpack.c.bf16 %v12427_v49, %v12426_v19 }
0x36c1   :  { %v12430_v9 = vpop.permute.xlu1 %12429 }
0x36c2   :  { %v12432_v53 = vunpack.i.h.bf16 %v12430_v9  ;;  %v12431_v3 = vunpack.i.l.bf16 %v12430_v9  ;;  %12049 = vmatprep.subr.bf16.mxu0 %v12048_v47 }
0x36c3   :  { %12051 = vmatpush3.bf16.msra.mxu0 %v12048_v47 }
0x36c4   :  { %v12062_v34 = vpack.c.bf16 %v12432_v53, %v12431_v3  ;;  %12054 = vmatprep.subr.msk.bf16.mxu0 %vm13430_vm1, %v14611_v50 }
0x36c6   :  { %12064 = vmatprep.subr.msk.bf16.mxu1 %vm13430_vm1, %v12062_v34 }
0x36c8   :  { %v12913_v59 = vpop.eup %12912 }
0x36c9   :  { %v7066_v29 = vsel %vm637_vm2, %v12913_v59, 0.0  ;;  %v12915_v13 = vpop.eup %12914 }
0x36ca   :  { %7067 = vadd.xlane.f32.xlu0 %v7066_v29  ;;  %v7069_v1 = vsel %vm637_vm2, %v12915_v13, 0.0 }
0x36ce   :  { %7070 = vadd.xlane.f32.xlu0 %v7069_v1 }
0x3757   :  { %v7068_v41 = vpop.xlane.xlu0 %7067 }
0x3758   :  { %12916 = vrcp.f32 %v7068_v41 }
0x375b   :  { %v7071_v35 = vpop.xlane.xlu0 %7070 }
0x375c   :  { %12918 = vrcp.f32 %v7071_v35 }
0x3762   :  { %v12917_v55 = vpop.eup %12916 }
0x3763   :  { %v7073_v8 = vmul.f32 %v12917_v55, %v12913_v59 }
0x3765   :  { %11611 = vmatprep.mubr.msk.f32.mxu0 %vm637_vm2, %v7073_v8 }
0x3766   :  { %v12919_v58 = vpop.eup %12918 }
0x3767   :  { %v7075_v6 = vmul.f32 %v12919_v58, %v12915_v13 }
0x3769   :  { %11612 = vmatmul.mubr.msk.f32.vlgmr.msra.gmra.mrb[86].mxu0 %vm637_vm2, %v7075_v6  ;;  %v7384_v6 = vpop.permute.xlu1 %7383 }
0x376a   :  { %12057 = vmatpush3.bf16.xpose.msk.msra.mxu0 %vm13430_vm1, %v14611_v50  ;;  %11618 = vmatprep.mubr.msk.f32.mxu0 %vm549_vm0, %v14835_v43 }
0x3771   :  { %11619 = vmatmul.mubr.msk.f32.vlgmr.msra.gmra.mrb[88].mxu0 %vm549_vm0, %v14821_v40 }
0x383c   :  { %v14845_v63 = vpop.f32.mrb[86].mxu0 }
0x383d   :  { %v14847_v21 = vpop.f32.mrb[87].mxu0 }
0x3844   :  { %v11620_v5 = vpop.f32.mrb[88].mxu0 }
0x3845   :  { %v7259_v48 = vpop.f32.mrb[89].mxu0  ;;  %v7265_v24 = vadd.f32 %v11620_v5, %v13730_v25 }
0x3846   :  { %v7260_v31 = vadd.f32 %v7259_v48, %v13730_v25 }
0x3847   :  { %v7271_v50 = vsel %vm637_vm2, %v7265_v24, -inf }
0x3848   :  { %v7268_v38 = vsel %vm637_vm2, %v7260_v31, -inf }
0x3849   :  { %7269 = vmax.xlane.f32.xlu0 %v7268_v38 }
0x384d   :  { %7272 = vmax.xlane.f32.xlu0 %v7271_v50 }
0x38d6   :  { %v7270_v54 = vpop.xlane.xlu0 %7269 }
0x38d7   :  { %v7274_v18 = vsub.f32 %v7260_v31, %v7270_v54 }
0x38d9   :  { %v7276_v49 = vmul.f32 1.442695, %v7274_v18 }
0x38da   :  { %v7273_v19 = vpop.xlane.xlu0 %7272 }
0x38db   :  { %12920 = vpow2.f32 %v7276_v49  ;;  %v7275_v47 = vsub.f32 %v7265_v24, %v7273_v19 }
0x38dd   :  { %v7278_v9 = vmul.f32 1.442695, %v7275_v47 }
0x38df   :  { %12922 = vpow2.f32 %v7278_v9 }
0x38e5   :  { %v12921_v53 = vpop.eup %12920 }
0x38e6   :  { %v7280_v3 = vsel %vm637_vm2, %v12921_v53, 0.0 }
0x38e7   :  { %7281 = vadd.xlane.f32.xlu0 %v7280_v3 }
0x38e9   :  { %v12923_v59 = vpop.eup %12922 }
0x38ea   :  { %v7283_v29 = vsel %vm637_vm2, %v12923_v59, 0.0 }
0x38eb   :  { %7284 = vadd.xlane.f32.xlu0 %v7283_v29 }
0x3901   :  { %7381 = vrot.lane.b32.xlu0 %v14835_v43, %s13074_s21 }
0x3974   :  { %v7282_v13 = vpop.xlane.xlu0 %7281 }
0x3975   :  { %12924 = vrcp.f32 %v7282_v13 }
0x3978   :  { %v7285_v1 = vpop.xlane.xlu0 %7284 }
0x3979   :  { %12926 = vrcp.f32 %v7285_v1 }
0x397c   :  { %v7382_v58 = vpop.permute.xlu0 %7381 }
0x397f   :  { %v12925_v41 = vpop.eup %12924 }
0x3980   :  { %v7287_v35 = vmul.f32 %v12925_v41, %v12921_v53 }
0x3982   :  { %11625 = vmatprep.mubr.msk.f32.mxu1 %vm637_vm2, %v7287_v35 }
0x3983   :  { %v12927_v55 = vpop.eup %12926 }
0x3984   :  { %v7289_v8 = vmul.f32 %v12927_v55, %v12923_v59 }
0x3986   :  { %11626 = vmatmul.mubr.msk.f32.vlgmr.msra.gmra.mrb[98].mxu1 %vm637_vm2, %v7289_v8 }
0x3987   :  { %12067 = vmatpush3.bf16.xpose.msk.msra.mxu1 %vm13430_vm1, %v12062_v34  ;;  %11632 = vmatprep.mubr.msk.f32.mxu1 %vm549_vm0, %v7382_v58 }
0x398e   :  { %11633 = vmatmul.mubr.msk.f32.vlgmr.msra.gmra.mrb[100].mxu1 %vm549_vm0, %v7384_v6 }
0x3a59   :  { %v11627_v5 = vpop.f32.mrb[98].mxu1 }
0x3a5a   :  { %7372 = vst.msk [vmem:[#allocation3 + $0x28] sm:$0xff] %vm549_vm0, %v11627_v5  ;;  %v7362_v48 = vpop.f32.mrb[99].mxu1 }
0x3a5b   :  { %7371 = vst.msk [vmem:[#allocation3 + $0x20] sm:$0xff] %vm549_vm0, %v7362_v48 }
0x3a61   :  { %v11634_v31 = vpop.f32.mrb[100].mxu1 }
0x3a62   :  { %v7471_v24 = vadd.f32 %v11634_v31, %v13730_v25  ;;  %v7465_v38 = vpop.f32.mrb[101].mxu1 }
0x3a63   :  { %v7466_v50 = vadd.f32 %v7465_v38, %v13730_v25 }
0x3a64   :  { %v7477_v54 = vsel %vm637_vm2, %v7471_v24, -inf }
0x3a65   :  { %7478 = vmax.xlane.f32.xlu0 %v7477_v54  ;;  %v7474_v34 = vsel %vm637_vm2, %v7466_v50, -inf }
0x3a66   :  { %7475 = vmax.xlane.f32.xlu1 %v7474_v34 }
0x3a77   :  { %12434 = vrot.lane.b32.xlu1 %v14637_v7, %s13074_s21 }
0x3a7b   :  { %12439 = vrot.lane.b32.xlu0 %v14609_v14, %s13075_s1  ;;  %7603 = vrot.lane.b32.xlu1 %v14835_v43, %s13075_s1 }
0x3af2   :  { %v7479_v18 = vpop.xlane.xlu0 %7478 }
0x3af3   :  { %v7481_v49 = vsub.f32 %v7471_v24, %v7479_v18  ;;  %v7476_v19 = vpop.xlane.xlu1 %7475 }
0x3af4   :  { %v7480_v47 = vsub.f32 %v7466_v50, %v7476_v19 }
0x3af5   :  { %v7484_v9 = vmul.f32 1.442695, %v7481_v49 }
0x3af6   :  { %v7482_v53 = vmul.f32 1.442695, %v7480_v47  ;;  %v12440_v3 = vpop.permute.xlu0 %12439 }
0x3af7   :  { %12928 = vpow2.f32 %v7484_v9  ;;  %v12435_v59 = vpop.permute.xlu1 %12434  ;;  %v12442_v29 = vunpack.i.h.bf16 %v12440_v3  ;;  %v12441_v13 = vunpack.i.l.bf16 %v12440_v3 }
0x3af8   :  { %v12437_v1 = vunpack.i.h.bf16 %v12435_v59  ;;  %v12436_v41 = vunpack.i.l.bf16 %v12435_v59  ;;  %12930 = vpow2.f32 %v7482_v53 }
0x3af9   :  { %v12072_v55 = vpack.c.bf16 %v12442_v29, %v12441_v13 }
0x3afa   :  { %v12068_v35 = vpack.c.bf16 %v12437_v1, %v12436_v41 }
0x3afb   :  { %v7604_v48 = vpop.permute.xlu1 %7603 }
0x3afc   :  { %12069 = vmatprep.subr.bf16.mxu0 %v12068_v35 }
0x3afd   :  { %12071 = vmatpush3.bf16.msra.mxu0 %v12068_v35 }
0x3afe   :  { %12074 = vmatprep.subr.msk.bf16.mxu0 %vm13430_vm1, %v12072_v55 }
0x3b01   :  { %v12929_v8 = vpop.eup %12928 }
0x3b02   :  { %v7489_v58 = vsel %vm637_vm2, %v12929_v8, 0.0  ;;  %v12931_v6 = vpop.eup %12930 }
0x3b03   :  { %7490 = vadd.xlane.f32.xlu1 %v7489_v58  ;;  %v7486_v5 = vsel %vm637_vm2, %v12931_v6, 0.0 }
0x3b07   :  { %7487 = vadd.xlane.f32.xlu1 %v7486_v5 }
0x3b18   :  { %7605 = vrot.lane.b32.xlu1 %v14821_v40, %s13075_s1 }
0x3b90   :  { %v7491_v31 = vpop.xlane.xlu1 %7490 }
0x3b91   :  { %12932 = vrcp.f32 %v7491_v31 }
0x3b94   :  { %v7488_v24 = vpop.xlane.xlu1 %7487 }
0x3b95   :  { %12934 = vrcp.f32 %v7488_v24 }
0x3b98   :  { %v7606_v18 = vpop.permute.xlu1 %7605 }
0x3b9b   :  { %v12933_v38 = vpop.eup %12932 }
0x3b9c   :  { %v7495_v34 = vmul.f32 %v12933_v38, %v12929_v8 }
0x3b9f   :  { %v12935_v50 = vpop.eup %12934 }
0x3ba0   :  { %v7493_v54 = vmul.f32 %v12935_v50, %v12931_v6 }
0x3ba2   :  { %11639 = vmatprep.mubr.msk.f32.mxu0 %vm637_vm2, %v7493_v54 }
0x3ba3   :  { %11640 = vmatmul.mubr.msk.f32.vlgmr.msra.gmra.mrb[90].mxu0 %vm637_vm2, %v7495_v34 }
0x3ba4   :  { %12077 = vmatpush3.bf16.xpose.msk.msra.mxu0 %vm13430_vm1, %v12072_v55  ;;  %11646 = vmatprep.mubr.msk.f32.mxu0 %vm549_vm0, %v7604_v48 }
0x3bab   :  { %11647 = vmatmul.mubr.msk.f32.vlgmr.msra.gmra.mrb[92].mxu0 %vm549_vm0, %v7606_v18 }
0x3c76   :  { %v14887_v49 = vpop.f32.mrb[90].mxu0 }
0x3c77   :  { %v14889_v19 = vpop.f32.mrb[91].mxu0 }
0x3c7e   :  { %v11648_v47 = vpop.f32.mrb[92].mxu0 }
0x3c7f   :  { %v7693_v9 = vadd.f32 %v11648_v47, %v13730_v25  ;;  %v7687_v53 = vpop.f32.mrb[93].mxu0 }
0x3c80   :  { %v7688_v3 = vadd.f32 %v7687_v53, %v13730_v25 }
0x3c81   :  { %v7699_v59 = vsel %vm637_vm2, %v7693_v9, -inf }
0x3c82   :  { %7700 = vmax.xlane.f32.xlu0 %v7699_v59  ;;  %v7696_v29 = vsel %vm637_vm2, %v7688_v3, -inf }
0x3c83   :  { %7697 = vmax.xlane.f32.xlu1 %v7696_v29 }
0x3c94   :  { %12444 = vrot.lane.b32.xlu1 %v14637_v7, %s13075_s1 }
0x3c98   :  { %7825 = vrot.lane.b32.xlu1 %v14835_v43, %s13076_s22 }
0x3c9c   :  { %7827 = vrot.lane.b32.xlu1 %v14821_v40, %s13076_s22 }
0x3d0f   :  { %v7701_v13 = vpop.xlane.xlu0 %7700 }
0x3d10   :  { %v7703_v1 = vsub.f32 %v7693_v9, %v7701_v13  ;;  %v7698_v41 = vpop.xlane.xlu1 %7697 }
0x3d11   :  { %v7702_v35 = vsub.f32 %v7688_v3, %v7698_v41 }
0x3d12   :  { %v7706_v55 = vmul.f32 1.442695, %v7703_v1 }
0x3d13   :  { %v7704_v8 = vmul.f32 1.442695, %v7702_v35 }
0x3d14   :  { %12936 = vpow2.f32 %v7706_v55  ;;  %v12445_v58 = vpop.permute.xlu1 %12444 }
0x3d15   :  { %v12447_v6 = vunpack.i.h.bf16 %v12445_v58  ;;  %v12446_v5 = vunpack.i.l.bf16 %v12445_v58  ;;  %12938 = vpow2.f32 %v7704_v8 }
0x3d17   :  { %v12078_v48 = vpack.c.bf16 %v12447_v6, %v12446_v5 }
0x3d18   :  { %v7826_v29 = vpop.permute.xlu1 %7825 }
0x3d19   :  { %12079 = vmatprep.subr.bf16.mxu1 %v12078_v48 }
0x3d1a   :  { %12081 = vmatpush3.bf16.msra.mxu1 %v12078_v48 }
0x3d1e   :  { %v12937_v31 = vpop.eup %12936 }
0x3d1f   :  { %v7711_v43 = vsel %vm637_vm2, %v12937_v31, 0.0  ;;  %v12939_v24 = vpop.eup %12938 }
0x3d20   :  { %7712 = vadd.xlane.f32.xlu0 %v7711_v43  ;;  %v7708_v40 = vsel %vm637_vm2, %v12939_v24, 0.0 }
0x3d24   :  { %7709 = vadd.xlane.f32.xlu0 %v7708_v40 }
0x3d3a   :  { %12449 = vrot.lane.b32.xlu0 %v14609_v14, %s13076_s22  ;;  %v7828_v14 = vpop.permute.xlu1 %7827 }
0x3dad   :  { %v7713_v38 = vpop.xlane.xlu0 %7712 }
0x3dae   :  { %12940 = vrcp.f32 %v7713_v38 }
0x3db1   :  { %v7710_v50 = vpop.xlane.xlu0 %7709 }
0x3db2   :  { %12942 = vrcp.f32 %v7710_v50 }
0x3db5   :  { %v12450_v54 = vpop.permute.xlu0 %12449 }
0x3db6   :  { %v12452_v34 = vunpack.i.h.bf16 %v12450_v54  ;;  %v12451_v18 = vunpack.i.l.bf16 %v12450_v54 }
0x3db8   :  { %v12082_v47 = vpack.c.bf16 %v12452_v34, %v12451_v18  ;;  %v12941_v9 = vpop.eup %12940 }
0x3db9   :  { %v7717_v59 = vmul.f32 %v12941_v9, %v12937_v31 }
0x3dba   :  { %12084 = vmatprep.subr.msk.bf16.mxu1 %vm13430_vm1, %v12082_v47 }
0x3dbc   :  { %v12943_v53 = vpop.eup %12942 }
0x3dbd   :  { %v7715_v3 = vmul.f32 %v12943_v53, %v12939_v24 }
0x3dbf   :  { %11653 = vmatprep.mubr.msk.f32.mxu1 %vm637_vm2, %v7715_v3 }
0x3dc0   :  { %11654 = vmatmul.mubr.msk.f32.vlgmr.msra.gmra.mrb[102].mxu1 %vm637_vm2, %v7717_v59 }
0x3dc1   :  { %12087 = vmatpush3.bf16.xpose.msk.msra.mxu1 %vm13430_vm1, %v12082_v47  ;;  %11660 = vmatprep.mubr.msk.f32.mxu1 %vm549_vm0, %v7826_v29 }
0x3dc2   :  { %12099 = vmatprep.subr.bf16.mxu1 %v14631_v57 }
0x3dc8   :  { %11661 = vmatmul.mubr.msk.f32.vlgmr.msra.gmra.mrb[104].mxu1 %vm549_vm0, %v7828_v14 }
0x3dc9   :  { %12101 = vmatpush3.bf16.msra.mxu1 %v14631_v57  ;;  %v14929_v57 = vadd.f32 %v14615_v0, %v14511_v22 }
0x3e93   :  { %v14915_v13 = vpop.f32.mrb[102].mxu1 }
0x3e94   :  { %v14917_v1 = vpop.f32.mrb[103].mxu1 }
0x3e9b   :  { %v11662_v41 = vpop.f32.mrb[104].mxu1 }
0x3e9c   :  { %v7915_v35 = vadd.f32 %v11662_v41, %v13730_v25  ;;  %v7909_v55 = vpop.f32.mrb[105].mxu1 }
0x3e9d   :  { %v7910_v8 = vadd.f32 %v7909_v55, %v13730_v25 }
0x3e9e   :  { %v7921_v58 = vsel %vm637_vm2, %v7915_v35, -inf }
0x3e9f   :  { %7922 = vmax.xlane.f32.xlu0 %v7921_v58  ;;  %v7918_v6 = vsel %vm637_vm2, %v7910_v8, -inf }
0x3ea0   :  { %7919 = vmax.xlane.f32.xlu1 %v7918_v6 }
0x3eb1   :  { %12454 = vrot.lane.b32.xlu1 %v14637_v7, %s13076_s22 }
0x3eb5   :  { %12459 = vrot.lane.b32.xlu1 %v14621_v20, %s13074_s21 }
0x3eb9   :  { %8247 = vrot.lane.b32.xlu1 %v14929_v57, %s13074_s21 }
0x3f2c   :  { %v7923_v25 = vpop.xlane.xlu0 %7922 }
0x3f2d   :  { %v7925_v5 = vsub.f32 %v7915_v35, %v7923_v25  ;;  %v7920_v48 = vpop.xlane.xlu1 %7919 }
0x3f2e   :  { %v7924_v31 = vsub.f32 %v7910_v8, %v7920_v48  ;;  %v14943_v8 = vadd.f32 %v14613_v27, %v14511_v22 }
0x3f2f   :  { %v7928_v43 = vmul.f32 1.442695, %v7925_v5 }
0x3f30   :  { %v7926_v24 = vmul.f32 1.442695, %v7924_v31 }
0x3f31   :  { %v12455_v40 = vpop.permute.xlu1 %12454 }
0x3f32   :  { %12944 = vpow2.f32 %v7926_v24  ;;  %v12457_v38 = vunpack.i.h.bf16 %v12455_v40  ;;  %v12456_v7 = vunpack.i.l.bf16 %v12455_v40 }
0x3f33   :  { %12946 = vpow2.f32 %v7928_v43 }
0x3f34   :  { %v12088_v50 = vpack.c.bf16 %v12457_v38, %v12456_v7 }
0x3f35   :  { %v12460_v54 = vpop.permute.xlu1 %12459 }
0x3f36   :  { %v12462_v34 = vunpack.i.h.bf16 %v12460_v54  ;;  %v12461_v18 = vunpack.i.l.bf16 %v12460_v54  ;;  %12089 = vmatprep.subr.bf16.mxu0 %v12088_v50 }
0x3f37   :  { %12091 = vmatpush3.bf16.msra.mxu0 %v12088_v50 }
0x3f38   :  { %v12102_v0 = vpack.c.bf16 %v12462_v34, %v12461_v18  ;;  %12094 = vmatprep.subr.msk.bf16.mxu0 %vm13430_vm1, %v14623_v16 }
0x3f3a   :  { %12104 = vmatprep.subr.msk.bf16.mxu1 %vm13430_vm1, %v12102_v0 }
0x3f3c   :  { %v12945_v47 = vpop.eup %12944 }
0x3f3d   :  { %v7930_v9 = vsel %vm637_vm2, %v12945_v47, 0.0  ;;  %v12947_v53 = vpop.eup %12946 }
0x3f3e   :  { %7931 = vadd.xlane.f32.xlu0 %v7930_v9  ;;  %v7933_v3 = vsel %vm637_vm2, %v12947_v53, 0.0 }
0x3f42   :  { %7934 = vadd.xlane.f32.xlu0 %v7933_v3 }
0x3fcb   :  { %v7932_v59 = vpop.xlane.xlu0 %7931 }
0x3fcc   :  { %12948 = vrcp.f32 %v7932_v59 }
0x3fcf   :  { %v7935_v29 = vpop.xlane.xlu0 %7934 }
0x3fd0   :  { %12950 = vrcp.f32 %v7935_v29 }
0x3fd6   :  { %v12949_v14 = vpop.eup %12948 }
0x3fd7   :  { %v7937_v41 = vmul.f32 %v12949_v14, %v12945_v47 }
0x3fd9   :  { %11667 = vmatprep.mubr.msk.f32.mxu0 %vm637_vm2, %v7937_v41  ;;  %v8248_v41 = vpop.permute.xlu1 %8247 }
0x3fda   :  { %v12951_v35 = vpop.eup %12950 }
0x3fdb   :  { %v7939_v55 = vmul.f32 %v12951_v35, %v12947_v53 }
0x3fdd   :  { %11668 = vmatmul.mubr.msk.f32.vlgmr.msra.gmra.mrb[94].mxu0 %vm637_vm2, %v7939_v55 }
0x3fde   :  { %12097 = vmatpush3.bf16.xpose.msk.msra.mxu0 %vm13430_vm1, %v14623_v16  ;;  %11674 = vmatprep.mubr.msk.f32.mxu0 %vm549_vm0, %v14943_v8 }
0x3fe5   :  { %11675 = vmatmul.mubr.msk.f32.vlgmr.msra.gmra.mrb[96].mxu0 %vm549_vm0, %v14929_v57 }
0x40b0   :  { %v14953_v58 = vpop.f32.mrb[94].mxu0 }
0x40b1   :  { %v14955_v6 = vpop.f32.mrb[95].mxu0 }
0x40b8   :  { %v11676_v25 = vpop.f32.mrb[96].mxu0 }
0x40b9   :  { %v8123_v5 = vpop.f32.mrb[97].mxu0  ;;  %v8129_v27 = vadd.f32 %v11676_v25, %v13844_v30 }
0x40ba   :  { %v8124_v22 = vadd.f32 %v8123_v5, %v13844_v30 }
0x40bb   :  { %v8135_v16 = vsel %vm637_vm2, %v8129_v27, -inf }
0x40bc   :  { %v8132_v48 = vsel %vm637_vm2, %v8124_v22, -inf }
0x40bd   :  { %8133 = vmax.xlane.f32.xlu0 %v8132_v48 }
0x40c1   :  { %8136 = vmax.xlane.f32.xlu0 %v8135_v16 }
0x414a   :  { %v8134_v31 = vpop.xlane.xlu0 %8133 }
0x414b   :  { %v8138_v43 = vsub.f32 %v8124_v22, %v8134_v31 }
0x414d   :  { %v8140_v24 = vmul.f32 1.442695, %v8138_v43 }
0x414e   :  { %v8137_v40 = vpop.xlane.xlu0 %8136 }
0x414f   :  { %12952 = vpow2.f32 %v8140_v24  ;;  %v8139_v38 = vsub.f32 %v8129_v27, %v8137_v40 }
0x4151   :  { %v8142_v7 = vmul.f32 1.442695, %v8139_v38 }
0x4153   :  { %12954 = vpow2.f32 %v8142_v7 }
0x4159   :  { %v12953_v50 = vpop.eup %12952 }
0x415a   :  { %v8144_v54 = vsel %vm637_vm2, %v12953_v50, 0.0 }
0x415b   :  { %8145 = vadd.xlane.f32.xlu0 %v8144_v54 }
0x415d   :  { %v12955_v34 = vpop.eup %12954 }
0x415e   :  { %v8147_v18 = vsel %vm637_vm2, %v12955_v34, 0.0 }
0x415f   :  { %8148 = vadd.xlane.f32.xlu0 %v8147_v18 }
0x4175   :  { %8245 = vrot.lane.b32.xlu0 %v14943_v8, %s13074_s21 }
0x41e8   :  { %v8146_v47 = vpop.xlane.xlu0 %8145 }
0x41e9   :  { %12956 = vrcp.f32 %v8146_v47 }
0x41ec   :  { %v8149_v9 = vpop.xlane.xlu0 %8148 }
0x41ed   :  { %12958 = vrcp.f32 %v8149_v9 }
0x41f0   :  { %v8246_v14 = vpop.permute.xlu0 %8245 }
0x41f3   :  { %v12957_v53 = vpop.eup %12956 }
0x41f4   :  { %v8151_v3 = vmul.f32 %v12957_v53, %v12953_v50 }
0x41f6   :  { %11681 = vmatprep.mubr.msk.f32.mxu1 %vm637_vm2, %v8151_v3 }
0x41f7   :  { %v12959_v59 = vpop.eup %12958 }
0x41f8   :  { %v8153_v29 = vmul.f32 %v12959_v59, %v12955_v34 }
0x41fa   :  { %11682 = vmatmul.mubr.msk.f32.vlgmr.msra.gmra.mrb[106].mxu1 %vm637_vm2, %v8153_v29 }
0x41fb   :  { %12107 = vmatpush3.bf16.xpose.msk.msra.mxu1 %vm13430_vm1, %v12102_v0  ;;  %11688 = vmatprep.mubr.msk.f32.mxu1 %vm549_vm0, %v8246_v14 }
0x4202   :  { %11689 = vmatmul.mubr.msk.f32.vlgmr.msra.gmra.mrb[108].mxu1 %vm549_vm0, %v8248_v41 }
0x42cd   :  { %v11683_v35 = vpop.f32.mrb[106].mxu1 }
0x42ce   :  { %8236 = vst.msk [vmem:[#allocation3 + $0x38] sm:$0xff] %vm549_vm0, %v11683_v35  ;;  %v8226_v55 = vpop.f32.mrb[107].mxu1 }
0x42cf   :  { %8235 = vst.msk [vmem:[#allocation3 + $0x30] sm:$0xff] %vm549_vm0, %v8226_v55 }
0x42d5   :  { %v11690_v25 = vpop.f32.mrb[108].mxu1 }
0x42d6   :  { %v8335_v5 = vadd.f32 %v11690_v25, %v13844_v30  ;;  %v8329_v22 = vpop.f32.mrb[109].mxu1 }
0x42d7   :  { %v8330_v27 = vadd.f32 %v8329_v22, %v13844_v30 }
0x42d8   :  { %v8341_v48 = vsel %vm637_vm2, %v8335_v5, -inf }
0x42d9   :  { %8342 = vmax.xlane.f32.xlu0 %v8341_v48  ;;  %v8338_v0 = vsel %vm637_vm2, %v8330_v27, -inf }
0x42da   :  { %8339 = vmax.xlane.f32.xlu1 %v8338_v0 }
0x42eb   :  { %12464 = vrot.lane.b32.xlu1 %v14633_v28, %s13074_s21 }
0x42ef   :  { %12469 = vrot.lane.b32.xlu0 %v14621_v20, %s13075_s1  ;;  %8467 = vrot.lane.b32.xlu1 %v14943_v8, %s13075_s1 }
0x4366   :  { %v8343_v16 = vpop.xlane.xlu0 %8342 }
0x4367   :  { %v8345_v31 = vsub.f32 %v8335_v5, %v8343_v16  ;;  %v8340_v43 = vpop.xlane.xlu1 %8339 }
0x4368   :  { %v8344_v24 = vsub.f32 %v8330_v27, %v8340_v43 }
0x4369   :  { %v8348_v40 = vmul.f32 1.442695, %v8345_v31 }
0x436a   :  { %v8346_v38 = vmul.f32 1.442695, %v8344_v24  ;;  %v12470_v7 = vpop.permute.xlu0 %12469 }
0x436b   :  { %12960 = vpow2.f32 %v8348_v40  ;;  %v12465_v50 = vpop.permute.xlu1 %12464  ;;  %v12472_v54 = vunpack.i.h.bf16 %v12470_v7  ;;  %v12471_v34 = vunpack.i.l.bf16 %v12470_v7 }
0x436c   :  { %v12467_v18 = vunpack.i.h.bf16 %v12465_v50  ;;  %v12466_v47 = vunpack.i.l.bf16 %v12465_v50  ;;  %12962 = vpow2.f32 %v8346_v38 }
0x436d   :  { %v12112_v53 = vpack.c.bf16 %v12472_v54, %v12471_v34 }
0x436e   :  { %v12108_v9 = vpack.c.bf16 %v12467_v18, %v12466_v47 }
0x436f   :  { %v8468_v41 = vpop.permute.xlu1 %8467 }
0x4370   :  { %12109 = vmatprep.subr.bf16.mxu0 %v12108_v9 }
0x4371   :  { %12111 = vmatpush3.bf16.msra.mxu0 %v12108_v9 }
0x4372   :  { %12114 = vmatprep.subr.msk.bf16.mxu0 %vm13430_vm1, %v12112_v53 }
0x4375   :  { %v12961_v3 = vpop.eup %12960 }
0x4376   :  { %v8353_v59 = vsel %vm637_vm2, %v12961_v3, 0.0  ;;  %v12963_v29 = vpop.eup %12962 }
0x4377   :  { %8354 = vadd.xlane.f32.xlu1 %v8353_v59  ;;  %v8350_v14 = vsel %vm637_vm2, %v12963_v29, 0.0 }
0x437b   :  { %8351 = vadd.xlane.f32.xlu1 %v8350_v14 }
0x438c   :  { %8469 = vrot.lane.b32.xlu1 %v14929_v57, %s13075_s1 }
0x4404   :  { %v8355_v35 = vpop.xlane.xlu1 %8354 }
0x4405   :  { %12964 = vrcp.f32 %v8355_v35 }
0x4408   :  { %v8352_v55 = vpop.xlane.xlu1 %8351 }
0x4409   :  { %12966 = vrcp.f32 %v8352_v55 }
0x440c   :  { %v8470_v48 = vpop.permute.xlu1 %8469 }
0x440f   :  { %v12965_v25 = vpop.eup %12964 }
0x4410   :  { %v8359_v27 = vmul.f32 %v12965_v25, %v12961_v3 }
0x4413   :  { %v12967_v5 = vpop.eup %12966 }
0x4414   :  { %v8357_v22 = vmul.f32 %v12967_v5, %v12963_v29 }
0x4416   :  { %11695 = vmatprep.mubr.msk.f32.mxu0 %vm637_vm2, %v8357_v22 }
0x4417   :  { %11696 = vmatmul.mubr.msk.f32.vlgmr.msra.gmra.mrb[98].mxu0 %vm637_vm2, %v8359_v27 }
0x4418   :  { %12117 = vmatpush3.bf16.xpose.msk.msra.mxu0 %vm13430_vm1, %v12112_v53  ;;  %11702 = vmatprep.mubr.msk.f32.mxu0 %vm549_vm0, %v8468_v41 }
0x441f   :  { %11703 = vmatmul.mubr.msk.f32.vlgmr.msra.gmra.mrb[100].mxu0 %vm549_vm0, %v8470_v48 }
0x44ea   :  { %v14995_v0 = vpop.f32.mrb[98].mxu0 }
0x44eb   :  { %v14997_v16 = vpop.f32.mrb[99].mxu0 }
0x44f2   :  { %v11704_v31 = vpop.f32.mrb[100].mxu0 }
0x44f3   :  { %v8557_v43 = vadd.f32 %v11704_v31, %v13844_v30  ;;  %v8551_v24 = vpop.f32.mrb[101].mxu0 }
0x44f4   :  { %v8552_v40 = vadd.f32 %v8551_v24, %v13844_v30 }
0x44f5   :  { %v8563_v38 = vsel %vm637_vm2, %v8557_v43, -inf }
0x44f6   :  { %8564 = vmax.xlane.f32.xlu0 %v8563_v38  ;;  %v8560_v7 = vsel %vm637_vm2, %v8552_v40, -inf }
0x44f7   :  { %8561 = vmax.xlane.f32.xlu1 %v8560_v7 }
0x4508   :  { %12474 = vrot.lane.b32.xlu1 %v14633_v28, %s13075_s1 }
0x450c   :  { %8689 = vrot.lane.b32.xlu1 %v14943_v8, %s13076_s22 }
0x4510   :  { %8691 = vrot.lane.b32.xlu1 %v14929_v57, %s13076_s22 }
0x4583   :  { %v8565_v50 = vpop.xlane.xlu0 %8564 }
0x4584   :  { %v8567_v54 = vsub.f32 %v8557_v43, %v8565_v50  ;;  %v8562_v34 = vpop.xlane.xlu1 %8561 }
0x4585   :  { %v8566_v18 = vsub.f32 %v8552_v40, %v8562_v34 }
0x4586   :  { %v8570_v47 = vmul.f32 1.442695, %v8567_v54 }
0x4587   :  { %v8568_v9 = vmul.f32 1.442695, %v8566_v18 }
0x4588   :  { %12968 = vpow2.f32 %v8570_v47  ;;  %v12475_v53 = vpop.permute.xlu1 %12474 }
0x4589   :  { %v12477_v3 = vunpack.i.h.bf16 %v12475_v53  ;;  %v12476_v59 = vunpack.i.l.bf16 %v12475_v53  ;;  %12970 = vpow2.f32 %v8568_v9 }
0x458b   :  { %v12118_v29 = vpack.c.bf16 %v12477_v3, %v12476_v59 }
0x458c   :  { %v8690_v40 = vpop.permute.xlu1 %8689 }
0x458d   :  { %12119 = vmatprep.subr.bf16.mxu1 %v12118_v29 }
0x458e   :  { %12121 = vmatpush3.bf16.msra.mxu1 %v12118_v29 }
0x4592   :  { %v12969_v14 = vpop.eup %12968 }
0x4593   :  { %v8575_v8 = vsel %vm637_vm2, %v12969_v14, 0.0  ;;  %v12971_v41 = vpop.eup %12970 }
0x4594   :  { %8576 = vadd.xlane.f32.xlu0 %v8575_v8  ;;  %v8572_v57 = vsel %vm637_vm2, %v12971_v41, 0.0 }
0x4598   :  { %8573 = vadd.xlane.f32.xlu0 %v8572_v57 }
0x45ae   :  { %12479 = vrot.lane.b32.xlu0 %v14621_v20, %s13076_s22  ;;  %v8692_v20 = vpop.permute.xlu1 %8691 }
0x4621   :  { %v8577_v35 = vpop.xlane.xlu0 %8576 }
0x4622   :  { %12972 = vrcp.f32 %v8577_v35 }
0x4625   :  { %v8574_v55 = vpop.xlane.xlu0 %8573 }
0x4626   :  { %12974 = vrcp.f32 %v8574_v55 }
0x4629   :  { %v12480_v25 = vpop.permute.xlu0 %12479 }
0x462a   :  { %v12482_v5 = vunpack.i.h.bf16 %v12480_v25  ;;  %v12481_v22 = vunpack.i.l.bf16 %v12480_v25  ;;  %v12600_v25 = vld [vmem:[%s15736_s8 + $0x40] sm:$0xff]  }
0x462c   :  { %v12122_v27 = vpack.c.bf16 %v12482_v5, %v12481_v22  ;;  %v12973_v48 = vpop.eup %12972 }
0x462d   :  { %v8581_v24 = vmul.f32 %v12973_v48, %v12969_v14 }
0x462e   :  { %12124 = vmatprep.subr.msk.bf16.mxu1 %vm13430_vm1, %v12122_v27 }
0x4630   :  { %v12975_v31 = vpop.eup %12974 }
0x4631   :  { %v8579_v43 = vmul.f32 %v12975_v31, %v12971_v41  ;;  %v12602_v31 = vld [vmem:[%s15736_s8 + $0x50] sm:$0xff]  }
0x4633   :  { %11709 = vmatprep.mubr.msk.f32.mxu1 %vm637_vm2, %v8579_v43 }
0x4634   :  { %11710 = vmatmul.mubr.msk.f32.vlgmr.msra.gmra.mrb[110].mxu1 %vm637_vm2, %v8581_v24 }
0x4635   :  { %12127 = vmatpush3.bf16.xpose.msk.msra.mxu1 %vm13430_vm1, %v12122_v27  ;;  %11716 = vmatprep.mubr.msk.f32.mxu1 %vm549_vm0, %v8690_v40  ;;  %v12601_v27 = vld [vmem:[%s15736_s8 + $0x48] sm:$0xff]  }
0x463c   :  { %11717 = vmatmul.mubr.msk.f32.vlgmr.msra.gmra.mrb[112].mxu1 %vm549_vm0, %v8692_v20  ;;  %v12603_v20 = vld [vmem:[%s15736_s8 + $0x58] sm:$0xff]  }
0x463d   :  { %9327 = vmatprep.mubr.bf16.mxu1 %v13073_v39 }
0x4707   :  { %v11711_v38 = vpop.f32.mrb[110].mxu1 }
0x4708   :  { %v15022_v7 = vpop.f32.mrb[111].mxu1 }
0x470f   :  { %v11718_v50 = vpop.f32.mrb[112].mxu1 }
0x4710   :  { %v8779_v54 = vadd.f32 %v11718_v50, %v13844_v30  ;;  %v8773_v34 = vpop.f32.mrb[113].mxu1  ;;  %v12604_v50 = vld [vmem:[%s15736_s8 + $0x60] sm:$0xff]  }
0x4711   :  { %v8774_v18 = vadd.f32 %v8773_v34, %v13844_v30  ;;  %v12605_v34 = vld [vmem:[%s15736_s8 + $0x68] sm:$0xff]  }
0x4712   :  { %v8785_v47 = vsel %vm637_vm2, %v8779_v54, -inf }
0x4713   :  { %8786 = vmax.xlane.f32.xlu0 %v8785_v47  ;;  %v8782_v17 = vsel %vm637_vm2, %v8774_v18, -inf  ;;  %v12606_v47 = vld [vmem:[%s15736_s8 + $0x70] sm:$0xff]  }
0x4714   :  { %8783 = vmax.xlane.f32.xlu1 %v8782_v17 }
0x4725   :  { %12484 = vrot.lane.b32.xlu1 %v14633_v28, %s13076_s22 }
0x4729   :  { %5861 = vrot.lane.b32.xlu1 %v14671_v11, %s13076_s22 }
0x472d   :  { %6081 = vrot.lane.b32.xlu1 %v14701_v61, %s13075_s1 }
0x4731   :  { %6083 = vrot.lane.b32.xlu1 %v14699_v37, %s13075_s1 }
0x4735   :  { %6725 = vrot.lane.b32.xlu1 %v14779_v56, %s13076_s22 }
0x4739   :  { %6305 = vrot.lane.b32.xlu1 %v14737_v15, %s13074_s21 }
0x473d   :  { %6947 = vrot.lane.b32.xlu1 %v14807_v23, %s13075_s1 }
0x4741   :  { %7169 = vrot.lane.b32.xlu1 %v14845_v63, %s13074_s21 }
0x4745   :  { %7589 = vrot.lane.b32.xlu1 %v14887_v49, %s13076_s22 }
0x4749   :  { %7811 = vrot.lane.b32.xlu1 %v14915_v13, %s13075_s1 }
0x474d   :  { %8453 = vrot.lane.b32.xlu1 %v14995_v0, %s13076_s22 }
0x4751   :  { %8033 = vrot.lane.b32.xlu1 %v14953_v58, %s13074_s21 }
0x4755   :  { %8675 = vrot.lane.b32.xlu1 %v11711_v38, %s13075_s1 }
0x47a0   :  { %v8787_v30 = vpop.xlane.xlu0 %8786 }
0x47a1   :  { %v8789_v28 = vsub.f32 %v8779_v54, %v8787_v30  ;;  %v8784_v11 = vpop.xlane.xlu1 %8783  ;;  %v12607_v30 = vld [vmem:[%s15736_s8 + $0x78] sm:$0xff]  }
0x47a2   :  { %v8788_v37 = vsub.f32 %v8774_v18, %v8784_v11 }
0x47a3   :  { %v8792_v61 = vmul.f32 1.442695, %v8789_v28 }
0x47a4   :  { %v8790_v15 = vmul.f32 1.442695, %v8788_v37 }
0x47a5   :  { %v12485_v56 = vpop.permute.xlu1 %12484 }
0x47a6   :  { %12976 = vpow2.f32 %v8790_v15  ;;  %v12487_v23 = vunpack.i.h.bf16 %v12485_v56  ;;  %v12486_v63 = vunpack.i.l.bf16 %v12485_v56 }
0x47a7   :  { %12978 = vpow2.f32 %v8792_v61 }
0x47a8   :  { %v12128_v49 = vpack.c.bf16 %v12487_v23, %v12486_v63 }
0x47a9   :  { %v5862_v13 = vpop.permute.xlu1 %5861 }
0x47aa   :  { %5866 = vst.msk [vmem:[#allocation3 + $0x8] sm:$0xff] %vm963_vm3, %v5862_v13  ;;  %12129 = vmatprep.subr.bf16.mxu0 %v12128_v49  ;;  %v10574_v13 = vld [vmem:[%s15737_s9 + $0x1] ss:$0 sm:$0xff] }
0x47ab   :  { %12131 = vmatpush3.bf16.msra.mxu0 %v12128_v49 }
0x47ac   :  { %11726 = vmatprep.subr.bf16.mxu0 %v12600_v25 }
0x47ad   :  { %v6082_v58 = vpop.permute.xlu1 %6081 }
0x47b0   :  { %v12977_v0 = vpop.eup %12976 }
0x47b1   :  { %v6084_v9 = vpop.permute.xlu1 %6083  ;;  %v8794_v53 = vsel %vm637_vm2, %v12977_v0, 0.0  ;;  %v12979_v3 = vpop.eup %12978 }
0x47b2   :  { %6088 = vst.msk [vmem:[#allocation3 + $0x8] sm:$0xff] %vm1186_vm4, %v6084_v9  ;;  %8795 = vadd.xlane.f32.xlu0 %v8794_v53  ;;  %v8797_v29 = vsel %vm637_vm2, %v12979_v3, 0.0 }
0x47b5   :  { %v6726_v59 = vpop.permute.xlu1 %6725 }
0x47b6   :  { %6730 = vst.msk [vmem:[#allocation3 + $0x18] sm:$0xff] %vm963_vm3, %v6726_v59  ;;  %8798 = vadd.xlane.f32.xlu0 %v8797_v29 }
0x47b9   :  { %v6306_v14 = vpop.permute.xlu1 %6305 }
0x47ba   :  { %6310 = vst.msk [vmem:[#allocation3 + $0x8] sm:$0xff] %vm1409_vm5, %v6306_v14 }
0x47bd   :  { %v6948_v8 = vpop.permute.xlu1 %6947 }
0x47be   :  { %6952 = vst.msk [vmem:[#allocation3 + $0x18] sm:$0xff] %vm1186_vm4, %v6948_v8 }
0x47c1   :  { %v7170_v41 = vpop.permute.xlu1 %7169  ;;  %v8904_v40 = vld [vmem:[#allocation3 + $0x8] sm:$0xff] }
0x47c2   :  { %7174 = vst.msk [vmem:[#allocation3 + $0x18] sm:$0xff] %vm1409_vm5, %v7170_v41 }
0x47c5   :  { %v7590_v57 = vpop.permute.xlu1 %7589 }
0x47c6   :  { %7594 = vst.msk [vmem:[#allocation3 + $0x28] sm:$0xff] %vm963_vm3, %v7590_v57 }
0x47c9   :  { %v7812_v35 = vpop.permute.xlu1 %7811  ;;  %v8906_v37 = vld [vmem:[#allocation3 + $0x18] sm:$0xff] }
0x47ca   :  { %7816 = vst.msk [vmem:[#allocation3 + $0x28] sm:$0xff] %vm1186_vm4, %v7812_v35 }
0x47cc   :  { %5859 = vrot.lane.b32.xlu0 %v14673_v45, %s13076_s22 }
0x47cd   :  { %v8454_v55 = vpop.permute.xlu1 %8453 }
0x47ce   :  { %8458 = vst.msk [vmem:[#allocation3 + $0x38] sm:$0xff] %vm963_vm3, %v8454_v55 }
0x47d0   :  { %6723 = vrot.lane.b32.xlu0 %v14781_v32, %s13076_s22 }
0x47d1   :  { %v8034_v5 = vpop.permute.xlu1 %8033 }
0x47d2   :  { %8038 = vst.msk [vmem:[#allocation3 + $0x28] sm:$0xff] %vm1409_vm5, %v8034_v5 }
0x47d4   :  { %6303 = vrot.lane.b32.xlu0 %v14739_v10, %s13074_s21 }
0x47d5   :  { %v8676_v22 = vpop.permute.xlu1 %8675 }
0x47d6   :  { %8680 = vst.msk [vmem:[#allocation3 + $0x38] sm:$0xff] %vm1186_vm4, %v8676_v22 }
0x47d8   :  { %6945 = vrot.lane.b32.xlu0 %v14809_v62, %s13075_s1 }
0x47d9   :  { %v8908_v56 = vld [vmem:[#allocation3 + $0x28] sm:$0xff] }
0x47dc   :  { %7167 = vrot.lane.b32.xlu0 %v14847_v21, %s13074_s21 }
0x47e0   :  { %7587 = vrot.lane.b32.xlu0 %v14889_v19, %s13076_s22 }
0x47e4   :  { %7809 = vrot.lane.b32.xlu0 %v14917_v1, %s13075_s1 }
0x47e8   :  { %8451 = vrot.lane.b32.xlu0 %v14997_v16, %s13076_s22 }
0x47ec   :  { %8031 = vrot.lane.b32.xlu0 %v14955_v6, %s13074_s21 }
0x47f0   :  { %8673 = vrot.lane.b32.xlu0 %v15022_v7, %s13075_s1 }
0x483f   :  { %v8796_v45 = vpop.xlane.xlu0 %8795 }
0x4840   :  { %12980 = vrcp.f32 %v8796_v45 }
0x4843   :  { %v8799_v10 = vpop.xlane.xlu0 %8798 }
0x4844   :  { %12982 = vrcp.f32 %v8799_v10 }
0x4847   :  { %v5860_v32 = vpop.permute.xlu0 %5859 }
0x4848   :  { %5865 = vst.msk [vmem:[#allocation3] sm:$0xff] %vm963_vm3, %v5860_v32 }
0x4849   :  { %6087 = vst.msk [vmem:[#allocation3] sm:$0xff] %vm1186_vm4, %v6082_v58 }
0x484a   :  { %v12981_v62 = vpop.eup %12980 }
0x484b   :  { %v6724_v21 = vpop.permute.xlu0 %6723  ;;  %v8801_v19 = vmul.f32 %v12981_v62, %v12977_v0 }
0x484c   :  { %6729 = vst.msk [vmem:[#allocation3 + $0x10] sm:$0xff] %vm963_vm3, %v6724_v21 }
0x484d   :  { %11723 = vmatprep.mubr.msk.f32.mxu0 %vm637_vm2, %v8801_v19 }
0x484e   :  { %v12983_v1 = vpop.eup %12982 }
0x484f   :  { %v8803_v6 = vmul.f32 %v12983_v1, %v12979_v3  ;;  %v6304_v16 = vpop.permute.xlu0 %6303 }
0x4850   :  { %6309 = vst.msk [vmem:[#allocation3] sm:$0xff] %vm1409_vm5, %v6304_v16 }
0x4851   :  { %11724 = vmatmul.mubr.msk.f32.vlgmr.msra.gmra.mrb[102].mxu0 %vm637_vm2, %v8803_v6 }
0x4852   :  { %11727 = vmatpush3.bf16.msra.mxu0 %v12600_v25 }
0x4853   :  { %v6946_v48 = vpop.permute.xlu0 %6945  ;;  %11728 = vmatprep.subr.bf16.mxu0 %v12601_v27 }
0x4854   :  { %6951 = vst.msk [vmem:[#allocation3 + $0x10] sm:$0xff] %vm1186_vm4, %v6946_v48 }
0x4856   :  { %11729 = vmatpush3.bf16.msra.mxu0 %v12601_v27 }
0x4857   :  { %v7168_v43 = vpop.permute.xlu0 %7167  ;;  %11730 = vmatprep.subr.bf16.mxu0 %v12602_v31  ;;  %v8903_v24 = vld [vmem:[#allocation3] sm:$0xff] }
0x4858   :  { %7173 = vst.msk [vmem:[#allocation3 + $0x10] sm:$0xff] %vm1409_vm5, %v7168_v43  ;;  %v8928_v38 = vpack.c.bf16 %v8904_v40, %v8903_v24 }
0x485a   :  { %11731 = vmatpush3.bf16.msra.mxu0 %v12602_v31  ;;  %11742 = vmatprep.mubr.bf16.mxu0 %v8928_v38 }
0x485b   :  { %v7588_v7 = vpop.permute.xlu0 %7587  ;;  %11732 = vmatprep.subr.bf16.mxu0 %v12603_v20 }
0x485c   :  { %7593 = vst.msk [vmem:[#allocation3 + $0x20] sm:$0xff] %vm963_vm3, %v7588_v7 }
0x485e   :  { %11733 = vmatpush3.bf16.msra.mxu0 %v12603_v20 }
0x485f   :  { %v7810_v54 = vpop.permute.xlu0 %7809  ;;  %11734 = vmatprep.subr.bf16.mxu0 %v12604_v50  ;;  %v8905_v11 = vld [vmem:[#allocation3 + $0x10] sm:$0xff] }
0x4860   :  { %7815 = vst.msk [vmem:[#allocation3 + $0x20] sm:$0xff] %vm1186_vm4, %v7810_v54  ;;  %v8929_v61 = vpack.c.bf16 %v8906_v37, %v8905_v11  ;;  %v12614_v11 = vld [vmem:[%s15740_s12 + $0xa0] ss:$8 sps:$4 sm:$0xff]   ;;  %v12619_v37 = vld [vmem:[%s15740_s12 + $0xb4] ss:$8 sps:$4 sm:$0xff]  }
0x4862   :  { %11735 = vmatpush3.bf16.msra.mxu0 %v12604_v50 }
0x4863   :  { %v8452_v18 = vpop.permute.xlu0 %8451  ;;  %11736 = vmatprep.subr.bf16.mxu0 %v12605_v34 }
0x4864   :  { %8457 = vst.msk [vmem:[#allocation3 + $0x30] sm:$0xff] %vm963_vm3, %v8452_v18  ;;  %v12610_v18 = vld [vmem:[%s15740_s12 + $0x84] ss:$8 sps:$4 sm:$0xff]  }
0x4865   :  { %9295 = vmatprep.subr.bf16.mxu1 %v12610_v18 }
0x4866   :  { %11737 = vmatpush3.bf16.msra.mxu0 %v12605_v34 }
0x4867   :  { %v8032_v17 = vpop.permute.xlu0 %8031  ;;  %11738 = vmatprep.subr.bf16.mxu0 %v12606_v47 }
0x4868   :  { %8037 = vst.msk [vmem:[#allocation3 + $0x20] sm:$0xff] %vm1409_vm5, %v8032_v17  ;;  %v12613_v17 = vld [vmem:[%s15740_s12 + $0x94] ss:$8 sps:$4 sm:$0xff]  }
0x486a   :  { %11739 = vmatpush3.bf16.msra.mxu0 %v12606_v47  ;;  %v12608_v47 = vld [vmem:[%s15740_s12 + $0x80] ss:$8 sps:$4 sm:$0xff]  }
0x486b   :  { %v8674_v28 = vpop.permute.xlu0 %8673  ;;  %11740 = vmatprep.subr.bf16.mxu0 %v12607_v30  ;;  %9296 = vmatpush1.bf16.msra.mxu1 %v12608_v47 }
0x486c   :  { %8679 = vst.msk [vmem:[#allocation3 + $0x30] sm:$0xff] %vm1186_vm4, %v8674_v28  ;;  %9297 = vmatprep.subr.bf16.mxu1 %v12613_v17  ;;  %v12616_v28 = vld [vmem:[%s15740_s12 + $0xa4] ss:$8 sps:$4 sm:$0xff]  }
0x486e   :  { %11741 = vmatpush3.bf16.msra.mxu0 %v12607_v30  ;;  %v12611_v30 = vld [vmem:[%s15740_s12 + $0x90] ss:$8 sps:$4 sm:$0xff]  }
0x486f   :  { %v8907_v15 = vld [vmem:[#allocation3 + $0x20] sm:$0xff]  ;;  %9298 = vmatpush1.bf16.msra.mxu1 %v12611_v30 }
0x4870   :  { %v8930_v23 = vpack.c.bf16 %v8908_v56, %v8907_v15  ;;  %9299 = vmatprep.subr.bf16.mxu1 %v12616_v28  ;;  %v12622_v15 = vld [vmem:[%s15740_s12 + $0xc4] ss:$8 sps:$4 sm:$0xff]   ;;  %v12620_v56 = vld [vmem:[%s15740_s12 + $0xc0] ss:$8 sps:$4 sm:$0xff]  }
0x4871   :  { %11743 = vmatmul.mubr.bf16.vlgmr.msra.gmra.mrb[104].mxu0 %v8929_v61  ;;  %v12617_v61 = vld [vmem:[%s15740_s12 + $0xb0] ss:$8 sps:$4 sm:$0xff]  }
0x4872   :  { %11746 = vmatprep.mubr.bf16.mxu0 %v8930_v23  ;;  %v12625_v23 = vld [vmem:[%s15740_s12 + $0xd4] ss:$8 sps:$4 sm:$0xff]  }
0x4873   :  { %9300 = vmatpush1.bf16.msra.mxu1 %v12614_v11 }
0x4874   :  { %9301 = vmatprep.subr.bf16.mxu1 %v12619_v37  ;;  %v12633_v37 = vld [vmem:[%s15742_s14 + $0x80] sm:$0xff]  }
0x4877   :  { %9302 = vmatpush1.bf16.msra.mxu1 %v12617_v61  ;;  %v12634_v61 = vld [vmem:[%s15742_s14 + $0xc8] sm:$0xff]  }
0x4878   :  { %9303 = vmatprep.subr.bf16.mxu1 %v12622_v15  ;;  %v12635_v15 = vld [vmem:[%s15742_s14 + $0x88] sm:$0xff]  }
0x487b   :  { %9304 = vmatpush1.bf16.msra.mxu1 %v12620_v56  ;;  %v12636_v56 = vld [vmem:[%s15742_s14 + $0xd0] sm:$0xff]  }
0x487c   :  { %9305 = vmatprep.subr.bf16.mxu1 %v12625_v23  ;;  %v12637_v23 = vld [vmem:[%s15742_s14 + $0x90] sm:$0xff]  }
0x4924   :  { %v11725_v63 = vpop.f32.mrb[102].mxu0 }
0x4925   :  { %8897 = vrot.lane.b32.xlu1 %v11725_v63, %s13074_s21  ;;  %v8884_v49 = vpop.f32.mrb[103].mxu0  ;;  %v12623_v63 = vld [vmem:[%s15740_s12 + $0xd0] ss:$8 sps:$4 sm:$0xff]  }
0x4926   :  { %8895 = vrot.lane.b32.xlu0 %v8884_v49, %s13074_s21  ;;  %9306 = vmatpush1.bf16.msra.mxu1 %v12623_v63  ;;  %v12628_v49 = vld [vmem:[%s15740_s12 + $0xe4] ss:$8 sps:$4 sm:$0xff]   ;;  %v12638_v63 = vld [vmem:[%s15742_s14 + $0xd8] sm:$0xff]  }
0x4927   :  { %9307 = vmatprep.subr.bf16.mxu1 %v12628_v49  ;;  %v12639_v49 = vld [vmem:[%s15742_s14 + $0x98] sm:$0xff]  }
0x4944   :  { %v11744_v58 = vpop.f32.mrb[104].mxu0 }
0x4945   :  { %v9022_v0 = vpop.f32.mrb[105].mxu0  ;;  %v9031_v59 = vadd.f32 %v11744_v58, %v10574_v13  ;;  %v12631_v58 = vld [vmem:[%s15740_s12 + $0xf4] ss:$8 sps:$4 sm:$0xff]  }
0x4946   :  { %v9023_v9 = vadd.f32 %v10574_v13, %v9022_v0  ;;  %v11745_v53 = vpop.f32.mrb[106].mxu0  ;;  %v12629_v0 = vld [vmem:[%s15740_s12 + $0xf0] ss:$8 sps:$4 sm:$0xff]  }
0x4947   :  { %v9025_v3 = vpop.f32.mrb[107].mxu0  ;;  %v9055_v41 = vadd.f32 %v9031_v59, %v14489_v44  ;;  %v9034_v57 = vadd.f32 %v11745_v53, %v10574_v13 }
0x4948   :  { %v9053_v29 = vadd.f32 %v9023_v9, %v14421_v51  ;;  %v9026_v14 = vadd.f32 %v10574_v13, %v9025_v3 }
0x4949   :  { %v9056_v35 = vadd.f32 %v9034_v57, %v14492_v26 }
0x494a   :  { %v9054_v8 = vadd.f32 %v9026_v14, %v14424_v46  ;;  %9065 = vadd.xlane.f32.xlu0 %v9053_v29 }
0x494c   :  { %9067 = vadd.xlane.f32.xlu1 %v9054_v8 }
0x494e   :  { %9069 = vadd.xlane.f32.xlu0 %v9055_v41 }
0x4952   :  { %9071 = vadd.xlane.f32.xlu0 %v9056_v35 }
0x4997   :  { %v8898_v55 = vpop.permute.xlu1 %8897 }
0x4998   :  { %8902 = vst.msk [vmem:[#allocation3 + $0x38] sm:$0xff] %vm1409_vm5, %v8898_v55  ;;  %v8896_v25 = vpop.permute.xlu0 %8895 }
0x4999   :  { %8901 = vst.msk [vmem:[#allocation3 + $0x30] sm:$0xff] %vm1409_vm5, %v8896_v25 }
0x499f   :  { %v8910_v5 = vld [vmem:[#allocation3 + $0x38] sm:$0xff] }
0x49a0   :  { %v8909_v51 = vld [vmem:[#allocation3 + $0x30] sm:$0xff] }
0x49a1   :  { %v8931_v22 = vpack.c.bf16 %v8910_v5, %v8909_v51 }
0x49a3   :  { %11747 = vmatmul.mubr.bf16.gmra.mrb[108].mxu0 %v8931_v22 }
0x49d7   :  { %v9066_v46 = vpop.xlane.xlu0 %9065 }
0x49d8   :  { %v9081_v26 = vmul.f32 0.0078125, %v9066_v46 }
0x49d9   :  { %v9068_v21 = vpop.xlane.xlu1 %9067 }
0x49da   :  { %v9082_v27 = vmul.f32 0.0078125, %v9068_v21  ;;  %v15136_v24 = vsub.f32 %v9053_v29, %v9081_v26 }
0x49db   :  { %v9070_v10 = vpop.xlane.xlu0 %9069 }
0x49dc   :  { %v9083_v40 = vmul.f32 0.0078125, %v9070_v10  ;;  %v15139_v38 = vsub.f32 %v9054_v8, %v9082_v27 }
0x49de   :  { %v9098_v34 = vmul.f32 %v15139_v38, %v15139_v38 }
0x49df   :  { %v9072_v43 = vpop.xlane.xlu0 %9071 }
0x49e0   :  { %v9084_v7 = vmul.f32 0.0078125, %v9072_v43 }
0x49e2   :  { %v15146_v54 = vsub.f32 %v9056_v35, %v9084_v7 }
0x4a76   :  { %v11748_v45 = vpop.f32.mrb[108].mxu0 }
0x4a77   :  { %v9038_v44 = vpop.f32.mrb[109].mxu0  ;;  %v9047_v1 = vadd.f32 %v11748_v45, %v10574_v13 }
0x4a78   :  { %v9039_v32 = vadd.f32 %v10574_v13, %v9038_v44  ;;  %v11749_v62 = vpop.f32.mrb[110].mxu0 }
0x4a79   :  { %v9041_v19 = vpop.f32.mrb[111].mxu0  ;;  %v9050_v48 = vadd.f32 %v11749_v62, %v10574_v13  ;;  %v9059_v20 = vadd.f32 %v9047_v1, %v14554_v33 }
0x4a7a   :  { %v9057_v6 = vadd.f32 %v9039_v32, %v14540_v60  ;;  %v9042_v16 = vadd.f32 %v10574_v13, %v9041_v19  ;;  %v15142_v60 = vsub.f32 %v9055_v41, %v9083_v40  ;;  %v12626_v13 = vld [vmem:[%s15740_s12 + $0xe0] ss:$8 sps:$4 sm:$0xff]  }
0x4a7b   :  { %v9060_v50 = vadd.f32 %v9050_v48, %v14557_v36  ;;  %v9100_v36 = vmul.f32 %v15146_v54, %v15146_v54  ;;  %9308 = vmatpush1.bf16.msra.mxu1 %v12626_v13  ;;  %v12640_v13 = vld [vmem:[%s15742_s14 + $0xe0] sm:$0xff]  }
0x4a7c   :  { %v9058_v31 = vadd.f32 %v9042_v16, %v14543_v52  ;;  %9073 = vadd.xlane.f32.xlu0 %v9057_v6  ;;  %v9097_v52 = vmul.f32 %v15136_v24, %v15136_v24  ;;  %v9099_v33 = vmul.f32 %v15142_v60, %v15142_v60  ;;  %9309 = vmatprep.subr.bf16.mxu1 %v12631_v58  ;;  %v12641_v58 = vld [vmem:[%s15742_s14 + $0xa0] sm:$0xff]  }
0x4a7e   :  { %9075 = vadd.xlane.f32.xlu1 %v9058_v31 }
0x4a7f   :  { %9310 = vmatpush1.bf16.msra.mxu1 %v12629_v0  ;;  %v12642_v0 = vld [vmem:[%s15742_s14 + $0xe8] sm:$0xff]  }
0x4a80   :  { %9077 = vadd.xlane.f32.xlu0 %v9059_v20 }
0x4a82   :  { %9079 = vadd.xlane.f32.xlu1 %v9060_v50 }
0x4a84   :  { %9105 = vadd.xlane.f32.xlu0 %v9097_v52  ;;  %v15229_v52 = vld [vmem:[%s15739_s11 + $0x1] ss:$0 sm:$0xff] }
0x4a86   :  { %9107 = vadd.xlane.f32.xlu1 %v9098_v34 }
0x4a88   :  { %9109 = vadd.xlane.f32.xlu0 %v9099_v33 }
0x4a8a   :  { %9111 = vadd.xlane.f32.xlu1 %v9100_v36 }
0x4b09   :  { %v9074_v9 = vpop.xlane.xlu0 %9073 }
0x4b0a   :  { %v9085_v53 = vmul.f32 0.0078125, %v9074_v9  ;;  %v12643_v9 = vld [vmem:[%s15742_s14 + $0xa8] sm:$0xff]  }
0x4b0b   :  { %v9076_v3 = vpop.xlane.xlu1 %9075 }
0x4b0c   :  { %v15202_v59 = vsub.f32 %v9057_v6, %v9085_v53  ;;  %v9086_v29 = vmul.f32 0.0078125, %v9076_v3  ;;  %v12644_v53 = vld [vmem:[%s15742_s14 + $0xf0] sm:$0xff]  }
0x4b0d   :  { %v9078_v14 = vpop.xlane.xlu0 %9077  ;;  %v12645_v3 = vld [vmem:[%s15742_s14 + $0xb0] sm:$0xff]  }
0x4b0e   :  { %v15204_v8 = vsub.f32 %v9058_v31, %v9086_v29  ;;  %v9087_v41 = vmul.f32 0.0078125, %v9078_v14  ;;  %v9101_v57 = vmul.f32 %v15202_v59, %v15202_v59  ;;  %v15221_v31 = vld [vmem:[%s15738_s10 + $0x1] ss:$0 sm:$0xff]  ;;  %v12646_v14 = vld [vmem:[%s15742_s14 + $0xf8] sm:$0xff]  }
0x4b0f   :  { %v9080_v35 = vpop.xlane.xlu1 %9079 }
0x4b10   :  { %v15208_v55 = vsub.f32 %v9059_v20, %v9087_v41  ;;  %v9088_v25 = vmul.f32 0.0078125, %v9080_v35  ;;  %9113 = vadd.xlane.f32.xlu0 %v9101_v57  ;;  %v9102_v5 = vmul.f32 %v15204_v8, %v15204_v8  ;;  %v12647_v57 = vld [vmem:[%s15742_s14 + $0xb8] sm:$0xff]  }
0x4b11   :  { %v9106_v51 = vpop.xlane.xlu0 %9105 }
0x4b12   :  { %v15212_v22 = vsub.f32 %v9060_v50, %v9088_v25  ;;  %v9121_v46 = vmul.f32 0.0078125, %v9106_v51  ;;  %9115 = vadd.xlane.f32.xlu1 %v9102_v5  ;;  %v9103_v45 = vmul.f32 %v15208_v55, %v15208_v55 }
0x4b13   :  { %v9108_v10 = vpop.xlane.xlu1 %9107 }
0x4b14   :  { %v9129_v44 = vadd.f32 1e-12, %v9121_v46  ;;  %v9122_v32 = vmul.f32 0.0078125, %v9108_v10  ;;  %9117 = vadd.xlane.f32.xlu0 %v9103_v45  ;;  %v9104_v62 = vmul.f32 %v15212_v22, %v15212_v22 }
0x4b15   :  { %v9110_v21 = vpop.xlane.xlu0 %9109 }
0x4b16   :  { %12984 = vrsqrt.f32 %v9129_v44  ;;  %v9130_v19 = vadd.f32 1e-12, %v9122_v32  ;;  %v9123_v26 = vmul.f32 0.0078125, %v9110_v21  ;;  %9119 = vadd.xlane.f32.xlu1 %v9104_v62 }
0x4b17   :  { %v9112_v1 = vpop.xlane.xlu1 %9111 }
0x4b18   :  { %12986 = vrsqrt.f32 %v9130_v19  ;;  %v9131_v6 = vadd.f32 1e-12, %v9123_v26  ;;  %v9124_v16 = vmul.f32 0.0078125, %v9112_v1 }
0x4b1a   :  { %12988 = vrsqrt.f32 %v9131_v6  ;;  %v9132_v27 = vadd.f32 1e-12, %v9124_v16 }
0x4b1c   :  { %12990 = vrsqrt.f32 %v9132_v27 }
0x4b20   :  { %v12985_v48 = vpop.eup %12984 }
0x4b21   :  { %v9145_v43 = vmul.f32 %v12985_v48, %v15136_v24 }
0x4b22   :  { %v12987_v40 = vpop.eup %12986 }
0x4b23   :  { %v9146_v20 = vmul.f32 %v12987_v40, %v15139_v38  ;;  %v9159_v7 = vmul.f32 %v15221_v31, %v9145_v43 }
0x4b24   :  { %v12989_v50 = vpop.eup %12988 }
0x4b25   :  { %v9160_v34 = vmul.f32 %v15221_v31, %v9146_v20  ;;  %v15233_v36 = vadd.f32 %v15229_v52, %v9159_v7  ;;  %v9147_v24 = vmul.f32 %v12989_v50, %v15142_v60 }
0x4b26   :  { %v12991_v33 = vpop.eup %12990 }
0x4b27   :  { %v15236_v18 = vadd.f32 %v15229_v52, %v9160_v34  ;;  %v9148_v38 = vmul.f32 %v12991_v33, %v15146_v54  ;;  %v9161_v30 = vmul.f32 %v15221_v31, %v9147_v24  ;;  %v12632_v54 = vld [vmem:[%s15742_s14 + $0xc0] sm:$0xff]  }
0x4b28   :  { %11040 = vmatprep.subr.bf16.mxu0 %v12632_v54  ;;  %12220 = vmatprep.subr.bf16.mxu1 %v12632_v54 }
0x4b29   :  { %v9198_v47 = vpack.c.bf16 %v15236_v18, %v15233_v36  ;;  %v9162_v17 = vmul.f32 %v15221_v31, %v9148_v38  ;;  %v15249_v11 = vadd.f32 %v15229_v52, %v9161_v30  ;;  %11041 = vmatpush3.bf16.msra.mxu0 %v12633_v37 }
0x4b2a   :  { %11042 = vmatprep.subr.bf16.mxu0 %v12634_v61 }
0x4b2b   :  { %9328 = vmatmul.mubr.bf16.vlgmr.msra.gmra.mrb[116].mxu1 %v9198_v47  ;;  %v15246_v28 = vadd.f32 %v15229_v52, %v9162_v17 }
0x4b2c   :  { %9337 = vmatprep.mubr.bf16.mxu1 %v13073_v39  ;;  %12228 = vmatpush3.bf16.msra.mxu1 %v12633_v37 }
0x4b2d   :  { %v9199_v60 = vpack.c.bf16 %v15246_v28, %v15249_v11  ;;  %12221 = vmatprep.subr.bf16.mxu1 %v12634_v61  ;;  %11043 = vmatpush3.bf16.msra.mxu0 %v12635_v15 }
0x4b2e   :  { %11044 = vmatprep.subr.bf16.mxu0 %v12636_v56 }
0x4b30   :  { %12229 = vmatpush3.bf16.msra.mxu1 %v12635_v15 }
0x4b31   :  { %12222 = vmatprep.subr.bf16.mxu1 %v12636_v56  ;;  %11045 = vmatpush3.bf16.msra.mxu0 %v12637_v23 }
0x4b32   :  { %11046 = vmatprep.subr.bf16.mxu0 %v12638_v63 }
0x4b33   :  { %9338 = vmatmul.mubr.bf16.gmra.mrb[120].mxu1 %v9199_v60 }
0x4b34   :  { %9347 = vmatprep.mubr.bf16.mxu1 %v13073_v39  ;;  %12230 = vmatpush3.bf16.msra.mxu1 %v12637_v23 }
0x4b35   :  { %12223 = vmatprep.subr.bf16.mxu1 %v12638_v63  ;;  %11047 = vmatpush3.bf16.msra.mxu0 %v12639_v49 }
0x4b36   :  { %11048 = vmatprep.subr.bf16.mxu0 %v12640_v13 }
0x4b38   :  { %12231 = vmatpush3.bf16.msra.mxu1 %v12639_v49 }
0x4b39   :  { %12224 = vmatprep.subr.bf16.mxu1 %v12640_v13  ;;  %11049 = vmatpush3.bf16.msra.mxu0 %v12641_v58 }
0x4b3a   :  { %11050 = vmatprep.subr.bf16.mxu0 %v12642_v0 }
0x4b3c   :  { %12232 = vmatpush3.bf16.msra.mxu1 %v12641_v58 }
0x4b3d   :  { %12225 = vmatprep.subr.bf16.mxu1 %v12642_v0  ;;  %11051 = vmatpush3.bf16.msra.mxu0 %v12643_v9 }
0x4b3e   :  { %11052 = vmatprep.subr.bf16.mxu0 %v12644_v53 }
0x4b40   :  { %12233 = vmatpush3.bf16.msra.mxu1 %v12643_v9 }
0x4b41   :  { %12226 = vmatprep.subr.bf16.mxu1 %v12644_v53  ;;  %11053 = vmatpush3.bf16.msra.mxu0 %v12645_v3 }
0x4b42   :  { %11054 = vmatprep.subr.bf16.mxu0 %v12646_v14 }
0x4b44   :  { %12234 = vmatpush3.bf16.msra.mxu1 %v12645_v3 }
0x4b45   :  { %12227 = vmatprep.subr.bf16.mxu1 %v12646_v14  ;;  %11055 = vmatpush3.bf16.msra.mxu0 %v12647_v57 }
0x4b46   :  { %12132 = vmatprep.subr.bf16.mxu0 %v13077_v12 }
0x4b48   :  { %12235 = vmatpush3.bf16.msra.mxu1 %v12647_v57 }
0x4b49   :  { %12144 = vmatprep.subr.bf16.mxu1 %v13077_v12 }
0x4b9d   :  { %v9114_v29 = vpop.xlane.xlu0 %9113 }
0x4b9e   :  { %v9125_v41 = vmul.f32 0.0078125, %v9114_v29 }
0x4b9f   :  { %v9116_v35 = vpop.xlane.xlu1 %9115 }
0x4ba0   :  { %v9133_v25 = vadd.f32 1e-12, %v9125_v41  ;;  %v9126_v5 = vmul.f32 0.0078125, %v9116_v35 }
0x4ba1   :  { %v9118_v51 = vpop.xlane.xlu0 %9117 }
0x4ba2   :  { %12992 = vrsqrt.f32 %v9133_v25  ;;  %v9134_v46 = vadd.f32 1e-12, %v9126_v5  ;;  %v9127_v45 = vmul.f32 0.0078125, %v9118_v51 }
0x4ba3   :  { %v9120_v10 = vpop.xlane.xlu1 %9119 }
0x4ba4   :  { %12994 = vrsqrt.f32 %v9134_v46  ;;  %v9135_v44 = vadd.f32 1e-12, %v9127_v45  ;;  %v9128_v32 = vmul.f32 0.0078125, %v9120_v10 }
0x4ba6   :  { %12996 = vrsqrt.f32 %v9135_v44  ;;  %v9136_v62 = vadd.f32 1e-12, %v9128_v32 }
0x4ba8   :  { %12998 = vrsqrt.f32 %v9136_v62 }
0x4bac   :  { %v12993_v21 = vpop.eup %12992 }
0x4bad   :  { %v9149_v19 = vmul.f32 %v12993_v21, %v15202_v59 }
0x4bae   :  { %v12995_v26 = vpop.eup %12994 }
0x4baf   :  { %v9150_v1 = vmul.f32 %v12995_v26, %v15204_v8  ;;  %v9163_v6 = vmul.f32 %v15221_v31, %v9149_v19 }
0x4bb0   :  { %v12997_v16 = vpop.eup %12996 }
0x4bb1   :  { %v9164_v27 = vmul.f32 %v15221_v31, %v9150_v1  ;;  %v15309_v43 = vadd.f32 %v15229_v52, %v9163_v6  ;;  %v9151_v20 = vmul.f32 %v12997_v16, %v15208_v55 }
0x4bb2   :  { %v12999_v48 = vpop.eup %12998 }
0x4bb3   :  { %v15312_v40 = vadd.f32 %v15229_v52, %v9164_v27  ;;  %v9152_v7 = vmul.f32 %v12999_v48, %v15212_v22  ;;  %v9165_v50 = vmul.f32 %v15221_v31, %v9151_v20  ;;  %v10603_v22 = vld [vmem:[%s15741_s13 + $0x2] sm:$0x3] }
0x4bb4   :  { %v15333_v24 = vrot.slane %v10603_v22, %v13407_v2 }
0x4bb5   :  { %v9200_v59 = vpack.c.bf16 %v15312_v40, %v15309_v43  ;;  %v9166_v8 = vmul.f32 %v15221_v31, %v9152_v7  ;;  %v15325_v33 = vadd.f32 %v15229_v52, %v9165_v50  ;;  %v15336_v31 = vrot.slane %v10603_v22, %v13413_v4 }
0x4bb7   :  { %9348 = vmatmul.mubr.bf16.gmra.mrb[124].mxu1 %v9200_v59  ;;  %v15322_v34 = vadd.f32 %v15229_v52, %v9166_v8 }
0x4bb8   :  { %9357 = vmatprep.mubr.bf16.mxu1 %v13073_v39 }
0x4bb9   :  { %v9201_v55 = vpack.c.bf16 %v15322_v34, %v15325_v33 }
0x4bbf   :  { %9358 = vmatmul.mubr.bf16.gmra.mrb[128].mxu1 %v9201_v55 }
0x4bfe   :  { %v9329_v39 = vpop.f32.mrb[116].mxu1 }
0x4bff   :  { %v15339_v38 = vadd.f32 %v9329_v39, %v15333_v24  ;;  %v9331_v52 = vpop.f32.mrb[117].mxu1 }
0x4c00   :  { %v15342_v47 = vadd.f32 %v9331_v52, %v15336_v31  ;;  %v9333_v17 = vpop.f32.mrb[118].mxu1 }
0x4c01   :  { %v9368_v30 = vmul.f32 %v15339_v38, %v15339_v38  ;;  %v15347_v60 = vadd.f32 %v9333_v17, %v15333_v24  ;;  %v9335_v2 = vpop.f32.mrb[119].mxu1 }
0x4c02   :  { %v9369_v4 = vmul.f32 %v15342_v47, %v15342_v47  ;;  %v15352_v54 = vadd.f32 %v9335_v2, %v15336_v31 }
0x4c03   :  { %v9384_v37 = vmul.f32 %v9368_v30, %v15339_v38  ;;  %v9370_v61 = vmul.f32 %v15347_v60, %v15347_v60 }
0x4c04   :  { %v9385_v15 = vmul.f32 %v9369_v4, %v15342_v47  ;;  %v9371_v56 = vmul.f32 %v15352_v54, %v15352_v54 }
0x4c05   :  { %v9400_v23 = vmul.f32 0.044715, %v9384_v37  ;;  %v9386_v63 = vmul.f32 %v9370_v61, %v15347_v60 }
0x4c06   :  { %v9401_v49 = vmul.f32 0.044715, %v9385_v15  ;;  %v9387_v13 = vmul.f32 %v9371_v56, %v15352_v54  ;;  %v9339_v58 = vpop.f32.mrb[120].mxu1 }
0x4c07   :  { %v9416_v0 = vadd.f32 %v9400_v23, %v15339_v38  ;;  %v9402_v9 = vmul.f32 0.044715, %v9386_v63  ;;  %v15364_v53 = vadd.f32 %v9339_v58, %v15333_v24  ;;  %v9341_v3 = vpop.f32.mrb[121].mxu1 }
0x4c08   :  { %v9417_v29 = vadd.f32 %v9401_v49, %v15342_v47  ;;  %v9403_v14 = vmul.f32 0.044715, %v9387_v13  ;;  %v15368_v41 = vadd.f32 %v9341_v3, %v15336_v31  ;;  %v9343_v57 = vpop.f32.mrb[122].mxu1 }
0x4c09   :  { %v9432_v35 = vmul.f32 0.7978846, %v9416_v0  ;;  %v9418_v25 = vadd.f32 %v9402_v9, %v15347_v60  ;;  %v9372_v5 = vmul.f32 %v15364_v53, %v15364_v53  ;;  %v15374_v51 = vadd.f32 %v9343_v57, %v15333_v24  ;;  %v9345_v46 = vpop.f32.mrb[123].mxu1 }
0x4c0a   :  { %v9433_v45 = vmul.f32 0.7978846, %v9417_v29  ;;  %v9419_v10 = vadd.f32 %v9403_v14, %v15352_v54  ;;  %v9373_v44 = vmul.f32 %v15368_v41, %v15368_v41  ;;  %v15380_v32 = vadd.f32 %v9345_v46, %v15336_v31 }
0x4c0b   :  { %13000 = vtanh.f32 %v9432_v35  ;;  %v9434_v62 = vmul.f32 0.7978846, %v9418_v25  ;;  %v9388_v21 = vmul.f32 %v9372_v5, %v15364_v53  ;;  %v9374_v19 = vmul.f32 %v15374_v51, %v15374_v51 }
0x4c0c   :  { %13002 = vtanh.f32 %v9433_v45  ;;  %v9435_v26 = vmul.f32 0.7978846, %v9419_v10  ;;  %v9389_v1 = vmul.f32 %v9373_v44, %v15368_v41  ;;  %v9375_v6 = vmul.f32 %v15380_v32, %v15380_v32 }
0x4c0d   :  { %13004 = vtanh.f32 %v9434_v62  ;;  %v9404_v16 = vmul.f32 0.044715, %v9388_v21  ;;  %v9390_v27 = vmul.f32 %v9374_v19, %v15374_v51 }
0x4c0e   :  { %13006 = vtanh.f32 %v9435_v26  ;;  %v9405_v48 = vmul.f32 0.044715, %v9389_v1  ;;  %v9391_v20 = vmul.f32 %v9375_v6, %v15380_v32 }
0x4c0f   :  { %v9420_v7 = vadd.f32 %v9404_v16, %v15364_v53  ;;  %v9406_v59 = vmul.f32 0.044715, %v9390_v27 }
0x4c10   :  { %v9421_v8 = vadd.f32 %v9405_v48, %v15368_v41  ;;  %v9407_v50 = vmul.f32 0.044715, %v9391_v20 }
0x4c11   :  { %v9436_v55 = vmul.f32 0.7978846, %v9420_v7  ;;  %v9422_v22 = vadd.f32 %v9406_v59, %v15374_v51 }
0x4c12   :  { %v9437_v39 = vmul.f32 0.7978846, %v9421_v8  ;;  %v9423_v52 = vadd.f32 %v9407_v50, %v15380_v32 }
0x4c13   :  { %13008 = vtanh.f32 %v9436_v55  ;;  %v9438_v17 = vmul.f32 0.7978846, %v9422_v22 }
0x4c14   :  { %13010 = vtanh.f32 %v9437_v39  ;;  %v9439_v30 = vmul.f32 0.7978846, %v9423_v52 }
0x4c15   :  { %v13001_v2 = vpop.eup %13000  ;;  %13012 = vtanh.f32 %v9438_v17 }
0x4c16   :  { %v13003_v4 = vpop.eup %13002  ;;  %v9464_v37 = vadd.f32 1.0, %v13001_v2  ;;  %13014 = vtanh.f32 %v9439_v30 }
0x4c17   :  { %v13005_v61 = vpop.eup %13004  ;;  %v9465_v15 = vadd.f32 1.0, %v13003_v4 }
0x4c18   :  { %v13007_v56 = vpop.eup %13006  ;;  %v9480_v23 = vmul.f32 0.5, %v9464_v37  ;;  %v9466_v63 = vadd.f32 1.0, %v13005_v61 }
0x4c19   :  { %v9467_v49 = vadd.f32 1.0, %v13007_v56  ;;  %v9481_v13 = vmul.f32 0.5, %v9465_v15 }
0x4c1a   :  { %v9482_v58 = vmul.f32 0.5, %v9466_v63  ;;  %v9496_v9 = vmul.f32 %v9480_v23, %v15339_v38 }
0x4c1b   :  { %v9483_v0 = vmul.f32 0.5, %v9467_v49  ;;  %v9497_v14 = vmul.f32 %v9481_v13, %v15342_v47 }
0x4c1c   :  { %v9498_v3 = vmul.f32 %v9482_v58, %v15347_v60 }
0x4c1d   :  { %v13009_v29 = vpop.eup %13008  ;;  %v9499_v57 = vmul.f32 %v9483_v0, %v15352_v54 }
0x4c1e   :  { %v13011_v35 = vpop.eup %13010  ;;  %v9545_v25 = vpack.c.bf16 %v9498_v3, %v9496_v9  ;;  %v9468_v5 = vadd.f32 1.0, %v13009_v29 }
0x4c1f   :  { %v13013_v46 = vpop.eup %13012  ;;  %v9546_v45 = vpack.c.bf16 %v9499_v57, %v9497_v14  ;;  %v9469_v10 = vadd.f32 1.0, %v13011_v35 }
0x4c20   :  { %v13015_v44 = vpop.eup %13014  ;;  %v9470_v62 = vadd.f32 1.0, %v13013_v46  ;;  %v9484_v21 = vmul.f32 0.5, %v9468_v5 }
0x4c21   :  { %9689 = vmatprep.mubr.bf16.mxu0 %v9546_v45  ;;  %v9471_v19 = vadd.f32 1.0, %v13015_v44  ;;  %v9485_v26 = vmul.f32 0.5, %v9469_v10 }
0x4c22   :  { %9690 = vmatmul.mubr.bf16.vlgmr.msra.gmra.mrb[112].mxu0 %v9545_v25  ;;  %v9486_v38 = vmul.f32 0.5, %v9470_v62  ;;  %v9500_v1 = vmul.f32 %v9484_v21, %v15364_v53 }
0x4c23   :  { %v9487_v60 = vmul.f32 0.5, %v9471_v19  ;;  %v9501_v54 = vmul.f32 %v9485_v26, %v15368_v41 }
0x4c24   :  { %v9502_v47 = vmul.f32 %v9486_v38, %v15374_v51 }
0x4c25   :  { %v9503_v6 = vmul.f32 %v9487_v60, %v15380_v32 }
0x4c26   :  { %v9547_v16 = vpack.c.bf16 %v9502_v47, %v9500_v1 }
0x4c27   :  { %v9548_v27 = vpack.c.bf16 %v9503_v6, %v9501_v54 }
0x4c29   :  { %9697 = vmatprep.mubr.bf16.mxu0 %v9548_v27 }
0x4c2a   :  { %9698 = vmatmul.mubr.bf16.gmra.mrb[116].mxu0 %v9547_v16 }
0x4c2b   :  { %11766 = vmatprep.mubr.msk.f32.mxu0 %vm13078_vm6, %v13079_v42 }
0x4c8a   :  { %v9349_v48 = vpop.f32.mrb[124].mxu1 }
0x4c8b   :  { %v15405_v20 = vadd.f32 %v9349_v48, %v15333_v24  ;;  %v9351_v7 = vpop.f32.mrb[125].mxu1 }
0x4c8c   :  { %v15408_v53 = vadd.f32 %v9351_v7, %v15336_v31  ;;  %v9353_v51 = vpop.f32.mrb[126].mxu1 }
0x4c8d   :  { %v9376_v41 = vmul.f32 %v15405_v20, %v15405_v20  ;;  %v15413_v32 = vadd.f32 %v9353_v51, %v15333_v24  ;;  %v9355_v59 = vpop.f32.mrb[127].mxu1 }
0x4c8e   :  { %v9377_v8 = vmul.f32 %v15408_v53, %v15408_v53  ;;  %v15418_v50 = vadd.f32 %v9355_v59, %v15336_v31 }
0x4c8f   :  { %v9392_v55 = vmul.f32 %v9376_v41, %v15405_v20  ;;  %v9378_v22 = vmul.f32 %v15413_v32, %v15413_v32 }
0x4c90   :  { %v9393_v39 = vmul.f32 %v9377_v8, %v15408_v53  ;;  %v9379_v52 = vmul.f32 %v15418_v50, %v15418_v50 }
0x4c91   :  { %v9408_v17 = vmul.f32 0.044715, %v9392_v55  ;;  %v9394_v30 = vmul.f32 %v9378_v22, %v15413_v32 }
0x4c92   :  { %v9409_v2 = vmul.f32 0.044715, %v9393_v39  ;;  %v9395_v4 = vmul.f32 %v9379_v52, %v15418_v50  ;;  %v9359_v37 = vpop.f32.mrb[128].mxu1 }
0x4c93   :  { %v9424_v61 = vadd.f32 %v9408_v17, %v15405_v20  ;;  %v9410_v15 = vmul.f32 0.044715, %v9394_v30  ;;  %v15430_v56 = vadd.f32 %v9359_v37, %v15333_v24  ;;  %v9361_v23 = vpop.f32.mrb[129].mxu1 }
0x4c94   :  { %v9425_v63 = vadd.f32 %v9409_v2, %v15408_v53  ;;  %v9411_v49 = vmul.f32 0.044715, %v9395_v4  ;;  %v15434_v13 = vadd.f32 %v9361_v23, %v15336_v31  ;;  %v9363_v58 = vpop.f32.mrb[130].mxu1 }
0x4c95   :  { %v9440_v0 = vmul.f32 0.7978846, %v9424_v61  ;;  %v9426_v9 = vadd.f32 %v9410_v15, %v15413_v32  ;;  %v9380_v3 = vmul.f32 %v15430_v56, %v15430_v56  ;;  %v15440_v29 = vadd.f32 %v9363_v58, %v15333_v24  ;;  %v9365_v14 = vpop.f32.mrb[131].mxu1 }
0x4c96   :  { %v9441_v57 = vmul.f32 0.7978846, %v9425_v63  ;;  %v9427_v35 = vadd.f32 %v9411_v49, %v15418_v50  ;;  %v9381_v25 = vmul.f32 %v15434_v13, %v15434_v13  ;;  %v15446_v5 = vadd.f32 %v9365_v14, %v15336_v31 }
0x4c97   :  { %13016 = vtanh.f32 %v9440_v0  ;;  %v9442_v46 = vmul.f32 0.7978846, %v9426_v9  ;;  %v9396_v45 = vmul.f32 %v9380_v3, %v15430_v56  ;;  %v9382_v10 = vmul.f32 %v15440_v29, %v15440_v29 }
0x4c98   :  { %13018 = vtanh.f32 %v9441_v57  ;;  %v9443_v24 = vmul.f32 0.7978846, %v9427_v35  ;;  %v9397_v44 = vmul.f32 %v9381_v25, %v15434_v13  ;;  %v9383_v62 = vmul.f32 %v15446_v5, %v15446_v5 }
0x4c99   :  { %13020 = vtanh.f32 %v9442_v46  ;;  %v9412_v21 = vmul.f32 0.044715, %v9396_v45  ;;  %v9398_v19 = vmul.f32 %v9382_v10, %v15440_v29 }
0x4c9a   :  { %13022 = vtanh.f32 %v9443_v24  ;;  %v9413_v31 = vmul.f32 0.044715, %v9397_v44  ;;  %v9399_v26 = vmul.f32 %v9383_v62, %v15446_v5 }
0x4c9b   :  { %v9428_v38 = vadd.f32 %v9412_v21, %v15430_v56  ;;  %v9414_v60 = vmul.f32 0.044715, %v9398_v19  ;;  %v10653_v19 = vld [vmem:[%s15743_s15 + $0x1] ss:$0 sm:$0xff] }
0x4c9c   :  { %v9429_v1 = vadd.f32 %v9413_v31, %v15434_v13  ;;  %v9415_v47 = vmul.f32 0.044715, %v9399_v26 }
0x4c9d   :  { %v9444_v54 = vmul.f32 0.7978846, %v9428_v38  ;;  %v9430_v6 = vadd.f32 %v9414_v60, %v15440_v29 }
0x4c9e   :  { %v9445_v16 = vmul.f32 0.7978846, %v9429_v1  ;;  %v9431_v27 = vadd.f32 %v9415_v47, %v15446_v5 }
0x4c9f   :  { %13024 = vtanh.f32 %v9444_v54  ;;  %v9446_v48 = vmul.f32 0.7978846, %v9430_v6 }
0x4ca0   :  { %13026 = vtanh.f32 %v9445_v16  ;;  %v9447_v7 = vmul.f32 0.7978846, %v9431_v27 }
0x4ca1   :  { %v13017_v51 = vpop.eup %13016  ;;  %13028 = vtanh.f32 %v9446_v48 }
0x4ca2   :  { %v13019_v41 = vpop.eup %13018  ;;  %v9472_v59 = vadd.f32 1.0, %v13017_v51  ;;  %13030 = vtanh.f32 %v9447_v7 }
0x4ca3   :  { %v13021_v8 = vpop.eup %13020  ;;  %v9473_v55 = vadd.f32 1.0, %v13019_v41 }
0x4ca4   :  { %v13023_v22 = vpop.eup %13022  ;;  %v9488_v39 = vmul.f32 0.5, %v9472_v59  ;;  %v9474_v52 = vadd.f32 1.0, %v13021_v8 }
0x4ca5   :  { %v9475_v17 = vadd.f32 1.0, %v13023_v22  ;;  %v9489_v30 = vmul.f32 0.5, %v9473_v55 }
0x4ca6   :  { %v9490_v2 = vmul.f32 0.5, %v9474_v52  ;;  %v9504_v37 = vmul.f32 %v9488_v39, %v15405_v20 }
0x4ca7   :  { %v9491_v4 = vmul.f32 0.5, %v9475_v17  ;;  %v9505_v23 = vmul.f32 %v9489_v30, %v15408_v53 }
0x4ca8   :  { %v9506_v61 = vmul.f32 %v9490_v2, %v15413_v32 }
0x4ca9   :  { %v13025_v15 = vpop.eup %13024  ;;  %v9507_v63 = vmul.f32 %v9491_v4, %v15418_v50 }
0x4caa   :  { %v13027_v49 = vpop.eup %13026  ;;  %v9549_v58 = vpack.c.bf16 %v9506_v61, %v9504_v37  ;;  %v9476_v0 = vadd.f32 1.0, %v13025_v15 }
0x4cab   :  { %v13029_v9 = vpop.eup %13028  ;;  %v9550_v3 = vpack.c.bf16 %v9507_v63, %v9505_v23  ;;  %v9477_v14 = vadd.f32 1.0, %v13027_v49 }
0x4cac   :  { %v13031_v57 = vpop.eup %13030  ;;  %v9478_v35 = vadd.f32 1.0, %v13029_v9  ;;  %v9492_v25 = vmul.f32 0.5, %v9476_v0 }
0x4cad   :  { %9705 = vmatprep.mubr.bf16.mxu1 %v9550_v3  ;;  %v9479_v46 = vadd.f32 1.0, %v13031_v57  ;;  %v9493_v45 = vmul.f32 0.5, %v9477_v14 }
0x4cae   :  { %9706 = vmatmul.mubr.bf16.vlgmr.msra.gmra.mrb[132].mxu1 %v9549_v58  ;;  %v9494_v20 = vmul.f32 0.5, %v9478_v35  ;;  %v9508_v10 = vmul.f32 %v9492_v25, %v15430_v56 }
0x4caf   :  { %v9495_v32 = vmul.f32 0.5, %v9479_v46  ;;  %v9509_v50 = vmul.f32 %v9493_v45, %v15434_v13 }
0x4cb0   :  { %v9510_v53 = vmul.f32 %v9494_v20, %v15440_v29 }
0x4cb1   :  { %v9511_v24 = vmul.f32 %v9495_v32, %v15446_v5 }
0x4cb2   :  { %v9551_v44 = vpack.c.bf16 %v9510_v53, %v9508_v10 }
0x4cb3   :  { %v9552_v62 = vpack.c.bf16 %v9511_v24, %v9509_v50 }
0x4cb5   :  { %9713 = vmatprep.mubr.bf16.mxu1 %v9552_v62 }
0x4cb6   :  { %9714 = vmatmul.mubr.bf16.gmra.mrb[136].mxu1 %v9551_v44 }
0x4cb7   :  { %11785 = vmatprep.mubr.msk.f32.mxu1 %vm13078_vm6, %v13079_v42 }
0x4cf5   :  { %v11056_v21 = vpop.f32.mrb[112].mxu0 }
0x4cf6   :  { %v11057_v31 = vpop.f32.mrb[113].mxu0 }
0x4cf7   :  { %v11058_v56 = vadd.f32 %v11057_v31, %v11056_v21  ;;  %v11059_v26 = vpop.f32.mrb[114].mxu0 }
0x4cf8   :  { %v11060_v29 = vpop.f32.mrb[115].mxu0 }
0x4cf9   :  { %v9692_v38 = vadd.f32 %v11058_v56, %v10653_v19  ;;  %v11061_v13 = vadd.f32 %v11060_v29, %v11059_v26 }
0x4cfb   :  { %v9695_v60 = vadd.f32 %v11061_v13, %v10653_v19  ;;  %v9722_v5 = vadd.f32 %v9692_v38, %v15233_v36 }
0x4cfd   :  { %9734 = vadd.xlane.f32.xlu0 %v9722_v5  ;;  %v11062_v1 = vpop.f32.mrb[116].mxu0  ;;  %v9723_v47 = vadd.f32 %v9695_v60, %v15236_v18 }
0x4cfe   :  { %v11063_v54 = vpop.f32.mrb[117].mxu0 }
0x4cff   :  { %v11064_v42 = vadd.f32 %v11063_v54, %v11062_v1  ;;  %9736 = vadd.xlane.f32.xlu1 %v9723_v47  ;;  %v11065_v6 = vpop.f32.mrb[118].mxu0 }
0x4d00   :  { %v11066_v16 = vpop.f32.mrb[119].mxu0 }
0x4d01   :  { %v9700_v27 = vadd.f32 %v11064_v42, %v10653_v19  ;;  %v11067_v48 = vadd.f32 %v11066_v16, %v11065_v6 }
0x4d03   :  { %v9703_v7 = vadd.f32 %v11067_v48, %v10653_v19  ;;  %v9724_v51 = vadd.f32 %v9700_v27, %v15249_v11 }
0x4d05   :  { %9738 = vadd.xlane.f32.xlu0 %v9724_v51  ;;  %v9725_v41 = vadd.f32 %v9703_v7, %v15246_v28 }
0x4d07   :  { %9740 = vadd.xlane.f32.xlu1 %v9725_v41 }
0x4d81   :  { %v11068_v59 = vpop.f32.mrb[132].mxu1 }
0x4d82   :  { %v11069_v36 = vpop.f32.mrb[133].mxu1 }
0x4d83   :  { %v11070_v8 = vadd.f32 %v11069_v36, %v11068_v59  ;;  %v11071_v55 = vpop.f32.mrb[134].mxu1 }
0x4d84   :  { %v11072_v22 = vpop.f32.mrb[135].mxu1 }
0x4d85   :  { %v9708_v18 = vadd.f32 %v11070_v8, %v10653_v19  ;;  %v11073_v39 = vadd.f32 %v11072_v22, %v11071_v55  ;;  %v10672_v8 = vld [vmem:[%s15744_s16 + $0x1] ss:$0 sm:$0xff] }
0x4d87   :  { %v9711_v52 = vadd.f32 %v11073_v39, %v10653_v19  ;;  %v9726_v17 = vadd.f32 %v9708_v18, %v15309_v43 }
0x4d89   :  { %9742 = vadd.xlane.f32.xlu0 %v9726_v17  ;;  %v11074_v30 = vpop.f32.mrb[136].mxu1  ;;  %v9727_v2 = vadd.f32 %v9711_v52, %v15312_v40 }
0x4d8a   :  { %v11075_v4 = vpop.f32.mrb[137].mxu1  ;;  %v9735_v11 = vpop.xlane.xlu0 %9734 }
0x4d8b   :  { %v11076_v37 = vadd.f32 %v11075_v4, %v11074_v30  ;;  %v9750_v61 = vmul.f32 0.0078125, %v9735_v11  ;;  %9744 = vadd.xlane.f32.xlu1 %v9727_v2  ;;  %v11077_v28 = vpop.f32.mrb[138].mxu1 }
0x4d8c   :  { %v9737_v15 = vpop.xlane.xlu1 %9736  ;;  %v11078_v23 = vpop.f32.mrb[139].mxu1 }
0x4d8d   :  { %v9716_v63 = vadd.f32 %v11076_v37, %v10653_v19  ;;  %v9751_v49 = vmul.f32 0.0078125, %v9737_v15  ;;  %v11079_v58 = vadd.f32 %v11078_v23, %v11077_v28  ;;  %v9758_v0 = vsub.f32 %v9722_v5, %v9750_v61 }
0x4d8f   :  { %v9719_v9 = vadd.f32 %v11079_v58, %v10653_v19  ;;  %v9728_v3 = vadd.f32 %v9716_v63, %v15325_v33  ;;  %v9759_v43 = vsub.f32 %v9723_v47, %v9751_v49  ;;  %v9766_v35 = vmul.f32 %v9758_v0, %v9758_v0 }
0x4d91   :  { %9746 = vadd.xlane.f32.xlu0 %v9728_v3  ;;  %v9729_v14 = vadd.f32 %v9719_v9, %v15322_v34  ;;  %v9767_v20 = vmul.f32 %v9759_v43, %v9759_v43 }
0x4d92   :  { %v9739_v40 = vpop.xlane.xlu0 %9738 }
0x4d93   :  { %v9752_v57 = vmul.f32 0.0078125, %v9739_v40  ;;  %9748 = vadd.xlane.f32.xlu1 %v9729_v14 }
0x4d94   :  { %v9741_v25 = vpop.xlane.xlu1 %9740 }
0x4d95   :  { %v9760_v46 = vsub.f32 %v9724_v51, %v9752_v57  ;;  %v9753_v45 = vmul.f32 0.0078125, %v9741_v25  ;;  %9774 = vadd.xlane.f32.xlu0 %v9766_v35 }
0x4d97   :  { %v9761_v32 = vsub.f32 %v9725_v41, %v9753_v45  ;;  %9776 = vadd.xlane.f32.xlu1 %v9767_v20  ;;  %v9768_v10 = vmul.f32 %v9760_v46, %v9760_v46 }
0x4d99   :  { %9778 = vadd.xlane.f32.xlu0 %v9768_v10  ;;  %v9769_v53 = vmul.f32 %v9761_v32, %v9761_v32 }
0x4d9b   :  { %9780 = vadd.xlane.f32.xlu1 %v9769_v53 }
0x4e16   :  { %v9743_v33 = vpop.xlane.xlu0 %9742 }
0x4e17   :  { %v9754_v50 = vmul.f32 0.0078125, %v9743_v33 }
0x4e18   :  { %v9745_v24 = vpop.xlane.xlu1 %9744 }
0x4e19   :  { %v15481_v44 = vsub.f32 %v9726_v17, %v9754_v50  ;;  %v9755_v34 = vmul.f32 0.0078125, %v9745_v24  ;;  %v10673_v17 = vld [vmem:[%s15745_s17 + $0x1] ss:$0 sm:$0xff]  ;;  %s15763_s17 = sld [smem:[#allocation10_spill]] }
0x4e1b   :  { %v15483_v62 = vsub.f32 %v9727_v2, %v9755_v34  ;;  %v9770_v21 = vmul.f32 %v15481_v44, %v15481_v44 }
0x4e1d   :  { %9782 = vadd.xlane.f32.xlu0 %v9770_v21  ;;  %v9771_v19 = vmul.f32 %v15483_v62, %v15483_v62 }
0x4e1e   :  { %v9747_v31 = vpop.xlane.xlu0 %9746 }
0x4e1f   :  { %v9756_v56 = vmul.f32 0.0078125, %v9747_v31  ;;  %9784 = vadd.xlane.f32.xlu1 %v9771_v19 }
0x4e20   :  { %v9749_v26 = vpop.xlane.xlu1 %9748 }
0x4e21   :  { %v15489_v29 = vsub.f32 %v9728_v3, %v9756_v56  ;;  %v9757_v38 = vmul.f32 0.0078125, %v9749_v26 }
0x4e22   :  { %v9775_v13 = vpop.xlane.xlu0 %9774 }
0x4e23   :  { %v15491_v60 = vsub.f32 %v9729_v14, %v9757_v38  ;;  %v9790_v5 = vmul.f32 0.0078125, %v9775_v13  ;;  %v9772_v1 = vmul.f32 %v15489_v29, %v15489_v29 }
0x4e24   :  { %v9777_v47 = vpop.xlane.xlu1 %9776 }
0x4e25   :  { %v9798_v54 = vadd.f32 1e-12, %v9790_v5  ;;  %v9791_v42 = vmul.f32 0.0078125, %v9777_v47  ;;  %9786 = vadd.xlane.f32.xlu0 %v9772_v1  ;;  %v9773_v6 = vmul.f32 %v15491_v60, %v15491_v60  ;;  %v10055_v5 = vld [vmem:[%s15746_s18 + $0x188] sm:$0xff] }
0x4e26   :  { %v9779_v16 = vpop.xlane.xlu0 %9778 }
0x4e27   :  { %13032 = vrsqrt.f32 %v9798_v54  ;;  %v9799_v27 = vadd.f32 1e-12, %v9791_v42  ;;  %v9792_v48 = vmul.f32 0.0078125, %v9779_v16  ;;  %9788 = vadd.xlane.f32.xlu1 %v9773_v6  ;;  %v10007_v54 = vld [vmem:[%s15746_s18 + $0x8] sm:$0xff]  ;;  %v10038_v16 = vld [vmem:[%s15746_s18 + $0x100] sm:$0xff] }
0x4e28   :  { %v9781_v7 = vpop.xlane.xlu1 %9780 }
0x4e29   :  { %13034 = vrsqrt.f32 %v9799_v27  ;;  %v9800_v51 = vadd.f32 1e-12, %v9792_v48  ;;  %v9793_v41 = vmul.f32 0.0078125, %v9781_v7  ;;  %v10039_v27 = vld [vmem:[%s15746_s18 + $0x108] sm:$0xff]  ;;  %v10024_v48 = vld [vmem:[%s15746_s18 + $0x90] sm:$0xff] }
0x4e2b   :  { %13036 = vrsqrt.f32 %v9800_v51  ;;  %v9801_v59 = vadd.f32 1e-12, %v9793_v41  ;;  %v10025_v51 = vld [vmem:[%s15746_s18 + $0x98] sm:$0xff]  ;;  %v10056_v41 = vld [vmem:[%s15746_s18 + $0x190] sm:$0xff] }
0x4e2d   :  { %13038 = vrsqrt.f32 %v9801_v59  ;;  %v10057_v59 = vld [vmem:[%s15746_s18 + $0x198] sm:$0xff] }
0x4e31   :  { %v13033_v36 = vpop.eup %13032 }
0x4e32   :  { %v9814_v55 = vmul.f32 %v13033_v36, %v9758_v0  ;;  %v10674_v36 = vld [vmem:[%s15762_s25 + $0x8] sm:$0xf] }
0x4e33   :  { %v13035_v22 = vpop.eup %13034 }
0x4e34   :  { %v9815_v18 = vmul.f32 %v13035_v22, %v9759_v43  ;;  %v9828_v39 = vmul.f32 %v10672_v8, %v9814_v55  ;;  %v12190_v22 = vpack.c.bf16 %v10039_v27, %v10038_v16  ;;  %v10049_v16 = vld [vmem:[%s15746_s18 + $0x158] sm:$0xff]  ;;  %v10034_v27 = vld [vmem:[%s15746_s18 + $0xe0] sm:$0xff] }
0x4e35   :  { %v13037_v52 = vpop.eup %13036 }
0x4e36   :  { %v9816_v30 = vmul.f32 %v13037_v52, %v9760_v46  ;;  %v9829_v2 = vmul.f32 %v10672_v8, %v9815_v18  ;;  %v9842_v37 = vadd.f32 %v10673_v17, %v9828_v39  ;;  %v10008_v18 = vld [vmem:[%s15746_s18 + $0x10] sm:$0xff]  ;;  %v10009_v39 = vld [vmem:[%s15746_s18 + $0x18] sm:$0xff]  ;;  %v12160_v52 = vpack.c.bf16 %v10025_v51, %v10024_v48  ;;  %v10035_v48 = vld [vmem:[%s15746_s18 + $0xe8] sm:$0xff] }
0x4e37   :  { %v13039_v4 = vpop.eup %13038  ;;  %v10067_v51 = vld [vmem:[%s15746_s18 + $0x1e8] sm:$0xff] }
0x4e38   :  { %v9817_v11 = vmul.f32 %v13039_v4, %v9761_v32  ;;  %v9843_v61 = vadd.f32 %v10673_v17, %v9829_v2  ;;  %v9830_v28 = vmul.f32 %v10672_v8, %v9816_v30  ;;  %v10040_v30 = vld [vmem:[%s15746_s18 + $0x110] sm:$0xff]  ;;  %v10041_v2 = vld [vmem:[%s15746_s18 + $0x118] sm:$0xff]  ;;  %v10026_v4 = vld [vmem:[%s15746_s18 + $0xa0] sm:$0xff] }
0x4e3a   :  { %v12133_v15 = vpack.c.bf16 %v9843_v61, %v9842_v37  ;;  %v9831_v23 = vmul.f32 %v10672_v8, %v9817_v11  ;;  %v9844_v63 = vadd.f32 %v10673_v17, %v9830_v28  ;;  %v10027_v11 = vld [vmem:[%s15746_s18 + $0xa8] sm:$0xff]  ;;  %v10058_v37 = vld [vmem:[%s15746_s18 + $0x1a0] sm:$0xff]  ;;  %v12162_v28 = vpack.c.bf16 %v10009_v39, %v10008_v18 }
0x4e3b   :  { %v10059_v61 = vld [vmem:[%s15746_s18 + $0x1a8] sm:$0xff]  ;;  %v10050_v18 = vld [vmem:[%s15746_s18 + $0x160] sm:$0xff] }
0x4e3c   :  { %12134 = vmatpush3.bf16.msra.mxu0 %v12133_v15  ;;  %12146 = vmatpush3.bf16.msra.mxu1 %v12133_v15  ;;  %v9845_v49 = vadd.f32 %v10673_v17, %v9831_v23  ;;  %v12194_v15 = vpack.c.bf16 %v10041_v2, %v10040_v30  ;;  %v10010_v23 = vld [vmem:[%s15746_s18 + $0x20] sm:$0xff]  ;;  %v10051_v39 = vld [vmem:[%s15746_s18 + $0x168] sm:$0xff] }
0x4e3d   :  { %12135 = vmatprep.subr.bf16.mxu0 %v13077_v12  ;;  %12147 = vmatprep.subr.bf16.mxu1 %v13077_v12  ;;  %v12214_v2 = vpack.c.bf16 %v10051_v39, %v10050_v18 }
0x4e3e   :  { %v12136_v58 = vpack.c.bf16 %v9845_v49, %v9844_v63  ;;  %v10011_v63 = vld [vmem:[%s15746_s18 + $0x28] sm:$0xff]  ;;  %v12164_v49 = vpack.c.bf16 %v10027_v11, %v10026_v4  ;;  %v10020_v11 = vld [vmem:[%s15746_s18 + $0x70] sm:$0xff] }
0x4e40   :  { %12137 = vmatpush3.bf16.msra.mxu0 %v12136_v58  ;;  %12149 = vmatpush3.bf16.msra.mxu1 %v12136_v58  ;;  %v12196_v58 = vpack.c.bf16 %v10059_v61, %v10058_v37  ;;  %v10021_v37 = vld [vmem:[%s15746_s18 + $0x78] sm:$0xff] }
0x4e41   :  { %12138 = vmatprep.subr.bf16.mxu0 %v13077_v12  ;;  %12150 = vmatprep.subr.bf16.mxu1 %v13077_v12  ;;  %v12186_v61 = vpack.c.bf16 %v10021_v37, %v10020_v11 }
0x4eaa   :  { %v9783_v0 = vpop.xlane.xlu0 %9782 }
0x4eab   :  { %v9794_v9 = vmul.f32 0.0078125, %v9783_v0  ;;  %v10042_v0 = vld [vmem:[%s15746_s18 + $0x120] sm:$0xff] }
0x4eac   :  { %v9785_v3 = vpop.xlane.xlu1 %9784 }
0x4ead   :  { %v9802_v43 = vadd.f32 1e-12, %v9794_v9  ;;  %v9795_v14 = vmul.f32 0.0078125, %v9785_v3  ;;  %v10043_v9 = vld [vmem:[%s15746_s18 + $0x128] sm:$0xff]  ;;  %v10028_v3 = vld [vmem:[%s15746_s18 + $0xb0] sm:$0xff] }
0x4eaf   :  { %13040 = vrsqrt.f32 %v9802_v43  ;;  %v9803_v40 = vadd.f32 1e-12, %v9795_v14  ;;  %v10029_v43 = vld [vmem:[%s15746_s18 + $0xb8] sm:$0xff]  ;;  %v10060_v14 = vld [vmem:[%s15746_s18 + $0x1b0] sm:$0xff] }
0x4eb1   :  { %13042 = vrsqrt.f32 %v9803_v40  ;;  %v10061_v40 = vld [vmem:[%s15746_s18 + $0x1b8] sm:$0xff] }
0x4eb2   :  { %v9787_v57 = vpop.xlane.xlu0 %9786 }
0x4eb3   :  { %v9796_v35 = vmul.f32 0.0078125, %v9787_v57  ;;  %v12166_v57 = vpack.c.bf16 %v10011_v63, %v10010_v23  ;;  %v10052_v63 = vld [vmem:[%s15746_s18 + $0x170] sm:$0xff] }
0x4eb4   :  { %v9789_v25 = vpop.xlane.xlu1 %9788 }
0x4eb5   :  { %v9804_v46 = vadd.f32 1e-12, %v9796_v35  ;;  %v9797_v45 = vmul.f32 0.0078125, %v9789_v25  ;;  %v12198_v35 = vpack.c.bf16 %v10043_v9, %v10042_v0  ;;  %v10012_v25 = vld [vmem:[%s15746_s18 + $0x30] sm:$0xff] }
0x4eb7   :  { %13044 = vrsqrt.f32 %v9804_v46  ;;  %v9805_v20 = vadd.f32 1e-12, %v9797_v45  ;;  %v10013_v46 = vld [vmem:[%s15746_s18 + $0x38] sm:$0xff]  ;;  %v12168_v45 = vpack.c.bf16 %v10029_v43, %v10028_v3 }
0x4eb9   :  { %v13041_v32 = vpop.eup %13040  ;;  %13046 = vrsqrt.f32 %v9805_v20  ;;  %v12200_v20 = vpack.c.bf16 %v10061_v40, %v10060_v14 }
0x4eba   :  { %v9818_v10 = vmul.f32 %v13041_v32, %v15481_v44  ;;  %v10022_v44 = vld [vmem:[%s15746_s18 + $0x80] sm:$0xff]  ;;  %v10044_v32 = vld [vmem:[%s15746_s18 + $0x130] sm:$0xff] }
0x4ebb   :  { %v13043_v53 = vpop.eup %13042 }
0x4ebc   :  { %v9819_v33 = vmul.f32 %v13043_v53, %v15483_v62  ;;  %v9832_v50 = vmul.f32 %v10672_v8, %v9818_v10  ;;  %v10045_v10 = vld [vmem:[%s15746_s18 + $0x138] sm:$0xff]  ;;  %v10030_v53 = vld [vmem:[%s15746_s18 + $0xc0] sm:$0xff] }
0x4ebe   :  { %v9833_v24 = vmul.f32 %v10672_v8, %v9819_v33  ;;  %v9846_v34 = vadd.f32 %v10673_v17, %v9832_v50  ;;  %v10031_v33 = vld [vmem:[%s15746_s18 + $0xc8] sm:$0xff]  ;;  %v10062_v50 = vld [vmem:[%s15746_s18 + $0x1c0] sm:$0xff] }
0x4ec0   :  { %v9847_v21 = vadd.f32 %v10673_v17, %v9833_v24  ;;  %v10063_v24 = vld [vmem:[%s15746_s18 + $0x1c8] sm:$0xff] }
0x4ec1   :  { %v13045_v19 = vpop.eup %13044 }
0x4ec2   :  { %v9820_v31 = vmul.f32 %v13045_v19, %v15489_v29  ;;  %v12139_v56 = vpack.c.bf16 %v9847_v21, %v9846_v34  ;;  %v10023_v29 = vld [vmem:[%s15746_s18 + $0x88] sm:$0xff]  ;;  %v12170_v34 = vpack.c.bf16 %v10013_v46, %v10012_v25  ;;  %v12202_v21 = vpack.c.bf16 %v10045_v10, %v10044_v32  ;;  %v10014_v19 = vld [vmem:[%s15746_s18 + $0x40] sm:$0xff] }
0x4ec3   :  { %v13047_v26 = vpop.eup %13046  ;;  %v12156_v42 = vpack.c.bf16 %v10023_v29, %v10022_v44  ;;  %v10032_v44 = vld [vmem:[%s15746_s18 + $0xd0] sm:$0xff] }
0x4ec4   :  { %v9821_v38 = vmul.f32 %v13047_v26, %v15491_v60  ;;  %12140 = vmatpush3.bf16.msra.mxu0 %v12139_v56  ;;  %12152 = vmatpush3.bf16.msra.mxu1 %v12139_v56  ;;  %v9834_v13 = vmul.f32 %v10672_v8, %v9820_v31  ;;  %v10054_v60 = vld [vmem:[%s15746_s18 + $0x180] sm:$0xff]  ;;  %v10015_v31 = vld [vmem:[%s15746_s18 + $0x48] sm:$0xff]  ;;  %v12172_v56 = vpack.c.bf16 %v10031_v33, %v10030_v53  ;;  %v10064_v29 = vld [vmem:[%s15746_s18 + $0x1d0] sm:$0xff] }
0x4ec5   :  { %12141 = vmatprep.subr.bf16.mxu0 %v13077_v12  ;;  %12153 = vmatprep.subr.bf16.mxu1 %v13077_v12  ;;  %v10006_v12 = vld [vmem:[%s15746_s18] sm:$0xff]  ;;  %v12188_v6 = vpack.c.bf16 %v10055_v5, %v10054_v60  ;;  %v12204_v26 = vpack.c.bf16 %v10063_v24, %v10062_v50  ;;  %v10065_v60 = vld [vmem:[%s15746_s18 + $0x1d8] sm:$0xff]  ;;  %v12174_v5 = vpack.c.bf16 %v10015_v31, %v10014_v19 }
0x4ec6   :  { %v9835_v62 = vmul.f32 %v10672_v8, %v9821_v38  ;;  %v9848_v1 = vadd.f32 %v10673_v17, %v9834_v13  ;;  %v9926_v8 = vld [vmem:[%s15763_s17] sm:$0xf]  ;;  %v12158_v55 = vpack.c.bf16 %v10007_v54, %v10006_v12  ;;  %v10047_v13 = vld [vmem:[%s15746_s18 + $0x148] sm:$0xff]  ;;  %v10017_v12 = vld [vmem:[%s15746_s18 + $0x58] sm:$0xff] }
0x4ec7   :  { %v10046_v38 = vld [vmem:[%s15746_s18 + $0x140] sm:$0xff] }
0x4ec8   :  { %v9849_v47 = vadd.f32 %v10673_v17, %v9835_v62  ;;  %v12192_v17 = vpack.c.bf16 %v10057_v59, %v10056_v41  ;;  %v10033_v62 = vld [vmem:[%s15746_s18 + $0xd8] sm:$0xff] }
0x4ec9   :  { %v12176_v54 = vpack.c.bf16 %v10033_v62, %v10032_v44 }
0x4eca   :  { %v12142_v7 = vpack.c.bf16 %v9849_v47, %v9848_v1  ;;  %v12206_v1 = vpack.c.bf16 %v10047_v13, %v10046_v38  ;;  %v10016_v47 = vld [vmem:[%s15746_s18 + $0x50] sm:$0xff] }
0x4ecb   :  { %v12178_v41 = vpack.c.bf16 %v10017_v12, %v10016_v47 }
0x4ecc   :  { %12143 = vmatpush3.bf16.msra.mxu0 %v12142_v7  ;;  %12155 = vmatpush3.bf16.msra.mxu1 %v12142_v7  ;;  %v10066_v7 = vld [vmem:[%s15746_s18 + $0x1e0] sm:$0xff] }
0x4ecd   :  { %12157 = vmatprep.subr.bf16.mxu1 %v12156_v42  ;;  %12189 = vmatprep.subr.bf16.mxu0 %v12188_v6  ;;  %v12208_v42 = vpack.c.bf16 %v10065_v60, %v10064_v29  ;;  %v10048_v6 = vld [vmem:[%s15746_s18 + $0x150] sm:$0xff] }
0x4ece   :  { %v12210_v59 = vpack.c.bf16 %v10049_v16, %v10048_v6 }
0x4ecf   :  { %11767 = vmatmul.mubr.msk.f32.vlgmr.msra.gmra.mrb[54].mxu0 %vm4955_vm7, %v10674_v36  ;;  %11786 = vmatmul.mubr.msk.f32.vlgmr.msra.gmra.mrb[114].mxu1 %vm4955_vm7, %v9926_v8  ;;  %v10018_v36 = vld [vmem:[%s15746_s18 + $0x60] sm:$0xff]  ;;  %v12180_v8 = vpack.c.bf16 %v10035_v48, %v10034_v27 }
0x4ed0   :  { %12159 = vmatpush3.bf16.msra.mxu1 %v12158_v55  ;;  %12191 = vmatpush3.bf16.msra.mxu0 %v12190_v22  ;;  %v10019_v55 = vld [vmem:[%s15746_s18 + $0x68] sm:$0xff]  ;;  %v12212_v22 = vpack.c.bf16 %v10067_v51, %v10066_v7 }
0x4ed1   :  { %12161 = vmatprep.subr.bf16.mxu1 %v12160_v52  ;;  %12193 = vmatprep.subr.bf16.mxu0 %v12192_v17  ;;  %v10036_v52 = vld [vmem:[%s15746_s18 + $0xf0] sm:$0xff]  ;;  %v10037_v17 = vld [vmem:[%s15746_s18 + $0xf8] sm:$0xff]  ;;  %v12182_v30 = vpack.c.bf16 %v10019_v55, %v10018_v36 }
0x4ed2   :  { %v12184_v4 = vpack.c.bf16 %v10037_v17, %v10036_v52 }
0x4ed4   :  { %12163 = vmatpush3.bf16.msra.mxu1 %v12162_v28  ;;  %12195 = vmatpush3.bf16.msra.mxu0 %v12194_v15  ;;  %v10068_v28 = vld [vmem:[%s15746_s18 + $0x1f0] sm:$0xff]  ;;  %v10069_v15 = vld [vmem:[%s15746_s18 + $0x1f8] sm:$0xff] }
0x4ed5   :  { %12165 = vmatprep.subr.bf16.mxu1 %v12164_v49  ;;  %12197 = vmatprep.subr.bf16.mxu0 %v12196_v58  ;;  %v12216_v23 = vpack.c.bf16 %v10069_v15, %v10068_v28  ;;  %v10053_v49 = vld [vmem:[%s15746_s18 + $0x178] sm:$0xff]  ;;  %s13080_s18 = smov [#allocation4]  }
0x4ed6   :  { %v12218_v58 = vpack.c.bf16 %v10053_v49, %v10052_v63  ;;  %s10225_s15 = sshll.u32 %s13080_s18, 4  ;;  %s10226_s15 = int_to_ptr.vmem [resolvable:$true] %s10225_s15 }
0x4ed7   :  { %s13049_s29 = scalar_lea.vmem %s10226_s15, 32  ;;  %p13054_p1 = scmp.lt.s32.totalorder %s10226_s15, %s10226_s15 }
0x4ed8   :  { %12167 = vmatpush3.bf16.msra.mxu1 %v12166_v57  ;;  %12199 = vmatpush3.bf16.msra.mxu0 %v12198_v35  ;;  %v10677_v35 = vld [vmem:[%s15747_s19] ss:$0 sm:$0xff]  ;;  %p13050_p0 = scmp.ne.s32.totalorder %s10226_s15, %s13049_s29  ;;  %p13055_p2 = scmp.lt.s32.totalorder %s13049_s29, %s13049_s29 }
0x4ed9   :  { %12169 = vmatprep.subr.bf16.mxu1 %v12168_v45  ;;  %12201 = vmatprep.subr.bf16.mxu0 %v12200_v20 }
0x4eda   :  { %p13056_p3 = por %p13055_p2, %p13054_p1 }
0x4edc   :  { %12171 = vmatpush3.bf16.msra.mxu1 %v12170_v34  ;;  %12203 = vmatpush3.bf16.msra.mxu0 %v12202_v21  ;;  %p13057_p4 = pnand %p13056_p3, %p13050_p0 }
0x4edd   :  { %12173 = vmatprep.subr.bf16.mxu1 %v12172_v56  ;;  %12205 = vmatprep.subr.bf16.mxu0 %v12204_v26 }
0x4ee0   :  { %12175 = vmatpush3.bf16.msra.mxu1 %v12174_v5  ;;  %12207 = vmatpush3.bf16.msra.mxu0 %v12206_v1 }
0x4ee1   :  { %12177 = vmatprep.subr.bf16.mxu1 %v12176_v54  ;;  %12209 = vmatprep.subr.bf16.mxu0 %v12208_v42 }
0x4ee4   :  { %12179 = vmatpush3.bf16.msra.mxu1 %v12178_v41  ;;  %12211 = vmatpush3.bf16.msra.mxu0 %v12210_v59 }
0x4ee5   :  { %12181 = vmatprep.subr.bf16.mxu1 %v12180_v8  ;;  %12213 = vmatprep.subr.bf16.mxu0 %v12212_v22 }
0x4ee8   :  { %12183 = vmatpush3.bf16.msra.mxu1 %v12182_v30  ;;  %12215 = vmatpush3.bf16.msra.mxu0 %v12214_v2 }
0x4ee9   :  { %12185 = vmatprep.subr.bf16.mxu1 %v12184_v4  ;;  %12217 = vmatprep.subr.bf16.mxu0 %v12216_v23 }
0x4eec   :  { %12187 = vmatpush3.bf16.msra.mxu1 %v12186_v61  ;;  %12219 = vmatpush3.bf16.msra.mxu0 %v12218_v58 }
0x4fa2   :  { %v9921_v0 = vpop.f32.mrb[54].mxu0  ;;  %v9996_v9 = vpop.f32.mrb[114].mxu1 }
0x4fa3   :  { %v10001_v3 = vrot.slane %v9921_v0, 2  ;;  %v10004_v43 = vrot.slane %v9996_v9, 2  ;;  %v11768_v14 = vpop.f32.mrb[55].mxu0  ;;  %10141 = vmatprep.mubr.f32.mxu1 %v9996_v9  ;;  %v11787_v40 = vpop.f32.mrb[115].mxu1 }
0x4fa4   :  { %10142 = vmatmul.mubr.f32.vlgmr.msra.gmra.mrb[140].mxu1 %v9921_v0 }
0x4fa5   :  { %10211 = vmatprep.mubr.f32.mxu0 %v10004_v43 }
0x4fa6   :  { %10212 = vmatmul.mubr.f32.vlgmr.msra.gmra.mrb[120].mxu0 %v10001_v3 }
0x5077   :  { %v11130_v57 = vpop.f32.mrb[140].mxu1 }
0x5078   :  { %v11131_v25 = vpop.f32.mrb[141].mxu1 }
0x5079   :  { %v11132_v46 = vadd.f32 %v11131_v25, %v11130_v57  ;;  %v11165_v45 = vpop.f32.mrb[120].mxu0 }
0x507a   :  { %v11166_v20 = vpop.f32.mrb[121].mxu0 }
0x507b   :  { %v10144_v32 = vadd.f32 %v11132_v46, %v10677_v35  ;;  %v11167_v10 = vadd.f32 %v11166_v20, %v11165_v45 }
0x507d   :  { %v10214_v53 = vadd.f32 %v11167_v10, %v10144_v32 }
0x507f   :  { %10218 = vst.msk [vmem:[#allocation4] sm:$0x3] %vm10217_vm8, %v10214_v53 }
0x5080   :  { %13060 = shalt.err (!%p13057_p4)
}
0x5081   :  { %s13061_s0 = scalar_lea.hbm %s15748_s20, 32 }
0x5082   :  { %p13062_p5 = scmp.ne.s32.totalorder %s15748_s20, %s13061_s0  ;;  %p13065_p6 = scmp.lt.u32.totalorder %s13061_s0, %s15748_s20 }
0x5084   :  { %p13067_p7 = pnand %p13065_p6, %p13062_p5 }
0x5086   :  { %13070 = shalt.err (!%p13067_p7)
}
0x5087   :  { %10228 = dma.vmem_to_hbm [thread:$0]  %s10226_s15, 32, %s15748_s20, [#allocation5]  }
0x5088   :  { %13071 = dma.done.wait [#allocation5], 32  }
0x5089   :  { %13072 = vsyncadd [#allocation5], 4294967264 }
0x508a   :  { %10232 = vsyncpa [#allocation5], 1 }

</bundles_post_ra>
